<compile_context>
chip_gen: v5e
topology: v5e:2x2
jax: 0.10.0
libtpu: 0.0.40
codegen_flags: <defaults>
</compile_context>

<pallas_src>
import jax
import jax.numpy as jnp
from jax.experimental import pallas as pl
from jax.experimental.pallas import tpu as pltpu


def _round_up(x, m):
    return (x + m - 1) // m * m


def _make_basic_block_kernel(H, W, Cin, Cout, has_downsample, lead, Lmid):
    Wp = W + 2                          # padded width
    Lw = H * Wp                         # "wide" output rows (row-major over (h, padded w))
    offsets = [dh * Wp + dw for dh in range(3) for dw in range(3)]
    id_off = Wp + 1                     # flat offset of x[h, w] inside the padded image
    base = lead - id_off                # read origin inside the mid scratch

    def kernel(*refs):
        if has_downsample:
            (x_ref, mask_ref, w1_ref, s1_ref, b1_ref,
             w2_ref, s2_ref, b2_ref,
             wd_ref, sd_ref, bd_ref,
             out_ref, mid_ref) = refs
        else:
            (x_ref, mask_ref, w1_ref, s1_ref, b1_ref,
             w2_ref, s2_ref, b2_ref,
             out_ref, mid_ref) = refs

        xflat = x_ref[0]                # (Lp_in, Cin) f32: zero-padded image, rows = i*(W+2)+j
        mask = mask_ref[...]            # (Lw, 1) f32: 1.0 on real pixels, 0.0 on the 2 wrap columns

        # ---- conv1: single im2col matmul, K = 9*Cin, bf16 operands / f32 accum ----
        p1 = jnp.concatenate([xflat[off:off + Lw, :] for off in offsets], axis=-1)
        q1 = jnp.dot(p1.astype(jnp.bfloat16), w1_ref[...],
                     preferred_element_type=jnp.float32)            # (Lw, Cout) f32
        # bn1 (folded) + relu; zero the 2 wrap columns so they land as padding in mid
        y1 = jnp.maximum(q1 * s1_ref[...] + b1_ref[...], 0.0) * mask

        # ---- padded flat scratch for conv2: zero only the halo, overwrite interior ----
        mid_ref[0:lead, :] = jnp.zeros((lead, Cout), jnp.float32)
        mid_ref[lead + Lw:Lmid, :] = jnp.zeros((Lmid - lead - Lw, Cout), jnp.float32)
        mid_ref[lead:lead + Lw, :] = y1          # aligned interior store (lead % 8 == 0)
        mid = mid_ref[...]

        # ---- conv2: same single im2col matmul, K = 9*Cout ----
        p2 = jnp.concatenate([mid[base + off:base + off + Lw, :] for off in offsets],
                             axis=-1)
        q2 = jnp.dot(p2.astype(jnp.bfloat16), w2_ref[...],
                     preferred_element_type=jnp.float32)
        y2 = q2 * s2_ref[...] + b2_ref[...]      # bn2 (folded)

        # ---- identity / 1x1 downsample branch (contiguous slice of the padded input) ----
        x_id = xflat[id_off:id_off + Lw, :]
        if has_downsample:
            ident = jnp.dot(x_id.astype(jnp.bfloat16), wd_ref[...],
                            preferred_element_type=jnp.float32)
            ident = ident * sd_ref[...] + bd_ref[...]
        else:
            ident = x_id

        # wide output: the wrap columns hold garbage and are sliced off in the wrapper
        out_ref[0] = jnp.maximum(y2 + ident, 0.0).astype(out_ref.dtype)

    return kernel


def _fold_bn(gamma, beta, mean, var, eps=1e-5):
    # TODO(synk): training-mode BatchNorm (batch statistics + running-stat updates)
    # not implemented; eval-mode BN is folded into per-channel scale/bias.
    scale = gamma / jnp.sqrt(var + eps)
    bias = beta - mean * scale
    return (scale.reshape(1, -1).astype(jnp.float32),
            bias.reshape(1, -1).astype(jnp.float32))


def basic_block_forward(x_nchw, params, stride=1):
    """Pallas implementation of BasicBlock.forward. Takes / returns NCHW."""
    # TODO(synk): stride != 1 (strided conv + strided 1x1 downsample) not implemented.
    assert stride == 1
    x = jnp.transpose(x_nchw, (0, 2, 3, 1)).astype(jnp.float32)     # NCHW -> NHWC
    N, H, W, Cin = x.shape
    Cout = params["w1"].shape[-1]
    has_ds = (Cin != Cout)

    Wp, Hp = W + 2, H + 2
    Lw = H * Wp
    Lp_in = _round_up(Hp * Wp + 2, 8)          # flat padded-input rows (+2 overrun for max shift)
    lead = _round_up(W + 3, 8)                 # aligned start of the interior write in mid scratch
    Lmid = _round_up(lead + Lw + W + 3, 8)     # mid scratch rows (covers all shifted reads)

    # Zero-pad + flatten once in the wrapper: xflat[n, i*(W+2)+j, c] == xpad[n, i, j, c].
    xpad = jnp.pad(x, ((0, 0), (1, 1), (1, 1), (0, 0)))
    xflat = jnp.pad(xpad.reshape(N, Hp * Wp, Cin),
                    ((0, 0), (0, Lp_in - Hp * Wp), (0, 0)))

    # Validity mask over wide rows: row p is a real pixel iff (p mod (W+2)) < W.
    col = jnp.arange(Lw, dtype=jnp.int32) % Wp
    mask = (col < W).astype(jnp.float32).reshape(Lw, 1)

    s1, b1 = _fold_bn(*params["bn1"])
    s2, b2 = _fold_bn(*params["bn2"])
    # K-packed bf16 weights: row order (dh, dw, cin) matches the patch concatenation.
    w1p = params["w1"].reshape(9 * Cin, Cout).astype(jnp.bfloat16)
    w2p = params["w2"].reshape(9 * Cout, Cout).astype(jnp.bfloat16)

    inputs = [xflat, mask, w1p, s1, b1, w2p, s2, b2]
    in_specs = [
        pl.BlockSpec((1, Lp_in, Cin), lambda b: (b, 0, 0)),
        pl.BlockSpec((Lw, 1), lambda b: (0, 0)),
        pl.BlockSpec((9 * Cin, Cout), lambda b: (0, 0)),
        pl.BlockSpec((1, Cout), lambda b: (0, 0)),
        pl.BlockSpec((1, Cout), lambda b: (0, 0)),
        pl.BlockSpec((9 * Cout, Cout), lambda b: (0, 0)),
        pl.BlockSpec((1, Cout), lambda b: (0, 0)),
        pl.BlockSpec((1, Cout), lambda b: (0, 0)),
    ]
    if has_ds:
        sd, bd = _fold_bn(*params["bnd"])
        wd = params["wd"].reshape(Cin, Cout).astype(jnp.bfloat16)   # 1x1 conv == channel matmul
        inputs += [wd, sd, bd]
        in_specs += [
            pl.BlockSpec((Cin, Cout), lambda b: (0, 0)),
            pl.BlockSpec((1, Cout), lambda b: (0, 0)),
            pl.BlockSpec((1, Cout), lambda b: (0, 0)),
        ]

    kernel = _make_basic_block_kernel(H, W, Cin, Cout, has_ds, lead, Lmid)
    out_wide = pl.pallas_call(
        kernel,
        out_shape=jax.ShapeDtypeStruct((N, Lw, Cout), jnp.float32),
        grid_spec=pltpu.PrefetchScalarGridSpec(
            num_scalar_prefetch=0,
            grid=(N,),
            in_specs=in_specs,
            out_specs=pl.BlockSpec((1, Lw, Cout), lambda b: (b, 0, 0)),
            scratch_shapes=[pltpu.VMEM((Lmid, Cout), jnp.float32)],
        ),
        compiler_params=pltpu.CompilerParams(dimension_semantics=("parallel",)),
    )(*inputs)

    # Drop the 2 wrap columns of the wide layout, back to NHWC then NCHW.
    out_nhwc = out_wide.reshape(N, H, Wp, Cout)[:, :, :W, :]
    return jnp.transpose(out_nhwc, (0, 3, 1, 2))


def reference_forward(x_nchw, params):
    """Plain-JAX reference (mirrors the PyTorch forward, eval-mode BN, f32)."""
    x = jnp.transpose(x_nchw, (0, 2, 3, 1)).astype(jnp.float32)

    def conv(a, w, pad):
        return jax.lax.conv_general_dilated(
            a, w, window_strides=(1, 1), padding=pad,
            dimension_numbers=("NHWC", "HWIO", "NHWC"))

    def bn(a, p):
        gamma, beta, mean, var = p
        return (a - mean) / jnp.sqrt(var + 1e-5) * gamma + beta

    out = jax.nn.relu(bn(conv(x, params["w1"], ((1, 1), (1, 1))), params["bn1"]))
    out = bn(conv(out, params["w2"], ((1, 1), (1, 1))), params["bn2"])
    Cin, Cout = x.shape[-1], params["w1"].shape[-1]
    if Cin != Cout:
        ident = bn(conv(x, params["wd"], ((0, 0), (0, 0))), params["bnd"])
    else:
        ident = x
    out = jax.nn.relu(out + ident)
    return jnp.transpose(out, (0, 3, 1, 2))


if __name__ == "__main__":
    N, Cin, H, W = 2, 4, 16, 16
    Cout = 8                       # Cin != Cout -> downsample branch is active

    keys = jax.random.split(jax.random.PRNGKey(0), 20)

    def bn_params(k0, k1, k2, k3):
        return (1.0 + 0.1 * jax.random.normal(k0, (Cout,), jnp.float32),   # gamma
                0.1 * jax.random.normal(k1, (Cout,), jnp.float32),         # beta
                0.1 * jax.random.normal(k2, (Cout,), jnp.float32),         # running_mean
                1.0 + 0.1 * jnp.abs(jax.random.normal(k3, (Cout,), jnp.float32)))  # running_var

    params = {
        "w1": 0.1 * jax.random.normal(keys[0], (3, 3, Cin, Cout), jnp.float32),
        "bn1": bn_params(keys[1], keys[2], keys[3], keys[4]),
        "w2": 0.1 * jax.random.normal(keys[5], (3, 3, Cout, Cout), jnp.float32),
        "bn2": bn_params(keys[6], keys[7], keys[8], keys[9]),
        "wd": 0.1 * jax.random.normal(keys[10], (1, 1, Cin, Cout), jnp.float32),
        "bnd": bn_params(keys[11], keys[12], keys[13], keys[14]),
    }

    x = jax.random.normal(keys[15], (N, Cin, H, W), jnp.float32)   # PyTorch NCHW

    out = jax.block_until_ready(basic_block_forward(x, params))
    ref = reference_forward(x, params)

    assert out.shape == (N, Cout, H, W), out.shape
    max_err = float(jnp.max(jnp.abs(out - ref)))
    # bf16 MXU operands (f32 accumulation) vs. a pure-f32 reference -> loosened tolerance.
    if not jnp.allclose(out, ref, atol=5e-2, rtol=5e-2):
        raise AssertionError(f"Pallas kernel mismatch vs reference, max_err={max_err}")
    print("KERNEL_OK")
</pallas_src>

<mosaic_0001>
module attributes {stable_mosaic.version = 11 : i64} {
  func.func @kernel(%arg0: i32, %arg1: memref<1x328x4xf32, #tpu.memory_space<vmem>>, %arg2: memref<288x1xf32, #tpu.memory_space<vmem>>, %arg3: memref<36x8xbf16, #tpu.memory_space<vmem>>, %arg4: memref<1x8xf32, #tpu.memory_space<vmem>>, %arg5: memref<1x8xf32, #tpu.memory_space<vmem>>, %arg6: memref<72x8xbf16, #tpu.memory_space<vmem>>, %arg7: memref<1x8xf32, #tpu.memory_space<vmem>>, %arg8: memref<1x8xf32, #tpu.memory_space<vmem>>, %arg9: memref<4x8xbf16, #tpu.memory_space<vmem>>, %arg10: memref<1x8xf32, #tpu.memory_space<vmem>>, %arg11: memref<1x8xf32, #tpu.memory_space<vmem>>, %arg12: memref<1x288x8xf32, #tpu.memory_space<vmem>>, %arg13: memref<336x8xf32, #tpu.memory_space<vmem>>) attributes {dimension_semantics = [#tpu.dimension_semantics<parallel>], iteration_bounds = array<i64: 2>, scalar_prefetch = 0 : i64, scratch_operands = 1 : i64, tpu.core_type = #tpu.core_type<tc>, window_params = [{transform_indices = @transform_0, window_bounds = array<i64: 1, 328, 4>}, {pipeline_mode = #tpu.pipeline_mode<synchronous>, transform_indices = @transform_1, window_bounds = array<i64: 288, 1>}, {pipeline_mode = #tpu.pipeline_mode<synchronous>, transform_indices = @transform_2, window_bounds = array<i64: 36, 8>}, {pipeline_mode = #tpu.pipeline_mode<synchronous>, transform_indices = @transform_3, window_bounds = array<i64: 1, 8>}, {pipeline_mode = #tpu.pipeline_mode<synchronous>, transform_indices = @transform_4, window_bounds = array<i64: 1, 8>}, {pipeline_mode = #tpu.pipeline_mode<synchronous>, transform_indices = @transform_5, window_bounds = array<i64: 72, 8>}, {pipeline_mode = #tpu.pipeline_mode<synchronous>, transform_indices = @transform_6, window_bounds = array<i64: 1, 8>}, {pipeline_mode = #tpu.pipeline_mode<synchronous>, transform_indices = @transform_7, window_bounds = array<i64: 1, 8>}, {pipeline_mode = #tpu.pipeline_mode<synchronous>, transform_indices = @transform_8, window_bounds = array<i64: 4, 8>}, {pipeline_mode = #tpu.pipeline_mode<synchronous>, transform_indices = @transform_9, window_bounds = array<i64: 1, 8>}, {pipeline_mode = #tpu.pipeline_mode<synchronous>, transform_indices = @transform_10, window_bounds = array<i64: 1, 8>}, {transform_indices = @transform_11, window_bounds = array<i64: 1, 288, 8>}]} {
    %c0 = arith.constant 0 : index
    %c0_0 = arith.constant 0 : index
    %c0_1 = arith.constant 0 : index
    %0 = vector.load %arg1[%c0, %c0_0, %c0_1] : memref<1x328x4xf32, #tpu.memory_space<vmem>>, vector<1x328x4xf32>
    %1 = vector.shape_cast %0 : vector<1x328x4xf32> to vector<328x4xf32>
    %c0_2 = arith.constant 0 : index
    %c0_3 = arith.constant 0 : index
    %2 = vector.load %arg2[%c0_2, %c0_3] : memref<288x1xf32, #tpu.memory_space<vmem>>, vector<288x1xf32>
    %3 = vector.extract_strided_slice %1 {offsets = [0, 0], sizes = [288, 4], strides = [1, 1]} : vector<328x4xf32> to vector<288x4xf32>
    %4 = vector.extract_strided_slice %1 {offsets = [1, 0], sizes = [288, 4], strides = [1, 1]} : vector<328x4xf32> to vector<288x4xf32>
    %5 = vector.extract_strided_slice %1 {offsets = [2, 0], sizes = [288, 4], strides = [1, 1]} : vector<328x4xf32> to vector<288x4xf32>
    %6 = vector.extract_strided_slice %1 {offsets = [18, 0], sizes = [288, 4], strides = [1, 1]} : vector<328x4xf32> to vector<288x4xf32>
    %7 = vector.extract_strided_slice %1 {offsets = [19, 0], sizes = [288, 4], strides = [1, 1]} : vector<328x4xf32> to vector<288x4xf32>
    %8 = vector.extract_strided_slice %1 {offsets = [20, 0], sizes = [288, 4], strides = [1, 1]} : vector<328x4xf32> to vector<288x4xf32>
    %9 = vector.extract_strided_slice %1 {offsets = [36, 0], sizes = [288, 4], strides = [1, 1]} : vector<328x4xf32> to vector<288x4xf32>
    %10 = vector.extract_strided_slice %1 {offsets = [37, 0], sizes = [288, 4], strides = [1, 1]} : vector<328x4xf32> to vector<288x4xf32>
    %11 = vector.extract_strided_slice %1 {offsets = [38, 0], sizes = [288, 4], strides = [1, 1]} : vector<328x4xf32> to vector<288x4xf32>
    %12 = tpu.concatenate %3, %4, %5, %6, %7, %8, %9, %10, %11 in 1 : vector<288x4xf32>, vector<288x4xf32>, vector<288x4xf32>, vector<288x4xf32>, vector<288x4xf32>, vector<288x4xf32>, vector<288x4xf32>, vector<288x4xf32>, vector<288x4xf32> -> vector<288x36xf32>
    %13 = arith.truncf %12 : vector<288x36xf32> to vector<288x36xbf16>
    %c0_4 = arith.constant 0 : index
    %c0_5 = arith.constant 0 : index
    %14 = vector.load %arg3[%c0_4, %c0_5] : memref<36x8xbf16, #tpu.memory_space<vmem>>, vector<36x8xbf16>
    %cst = arith.constant dense<0.000000e+00> : vector<288x8xf32>
    %15 = tpu.matmul %13, %14, %cst {dimension_numbers = #tpu.dot_dimension_numbers<[1], [0], [0], [1], [0, 0, 1, 1], [], []>} : vector<288x36xbf16>, vector<36x8xbf16>, vector<288x8xf32> -> vector<288x8xf32>
    %c0_6 = arith.constant 0 : index
    %c0_7 = arith.constant 0 : index
    %16 = vector.load %arg4[%c0_6, %c0_7] : memref<1x8xf32, #tpu.memory_space<vmem>>, vector<1x8xf32>
    %17 = vector.broadcast %16 : vector<1x8xf32> to vector<288x8xf32>
    %18 = arith.mulf %15, %17 : vector<288x8xf32>
    %c0_8 = arith.constant 0 : index
    %c0_9 = arith.constant 0 : index
    %19 = vector.load %arg5[%c0_8, %c0_9] : memref<1x8xf32, #tpu.memory_space<vmem>>, vector<1x8xf32>
    %20 = vector.broadcast %19 : vector<1x8xf32> to vector<288x8xf32>
    %21 = arith.addf %18, %20 : vector<288x8xf32>
    %cst_10 = arith.constant 0.000000e+00 : f32
    %22 = vector.broadcast %cst_10 : f32 to vector<288x8xf32>
    %23 = arith.maximumf %21, %22 : vector<288x8xf32>
    %24 = vector.broadcast %2 : vector<288x1xf32> to vector<288x8xf32>
    %25 = arith.mulf %23, %24 : vector<288x8xf32>
    %cst_11 = arith.constant 0.000000e+00 : f32
    %26 = vector.broadcast %cst_11 : f32 to vector<24x8xf32>
    %c0_12 = arith.constant 0 : index
    %c0_13 = arith.constant 0 : index
    %27 = vector.load %arg13[%c0_12, %c0_13] : memref<336x8xf32, #tpu.memory_space<vmem>>, vector<24x8xf32>
    tpu.vector_store %arg13[%c0_12, %c0_13], %26 {strides = array<i32>} : memref<336x8xf32, #tpu.memory_space<vmem>>, vector<24x8xf32>,
    %cst_14 = arith.constant 0.000000e+00 : f32
    %28 = vector.broadcast %cst_14 : f32 to vector<24x8xf32>
    %c312 = arith.constant 312 : index
    %c0_15 = arith.constant 0 : index
    %29 = vector.load %arg13[%c312, %c0_15] : memref<336x8xf32, #tpu.memory_space<vmem>>, vector<24x8xf32>
    tpu.vector_store %arg13[%c312, %c0_15], %28 {strides = array<i32>} : memref<336x8xf32, #tpu.memory_space<vmem>>, vector<24x8xf32>,
    %c24 = arith.constant 24 : index
    %c0_16 = arith.constant 0 : index
    %30 = vector.load %arg13[%c24, %c0_16] : memref<336x8xf32, #tpu.memory_space<vmem>>, vector<288x8xf32>
    tpu.vector_store %arg13[%c24, %c0_16], %25 {strides = array<i32>} : memref<336x8xf32, #tpu.memory_space<vmem>>, vector<288x8xf32>,
    %c0_17 = arith.constant 0 : index
    %c0_18 = arith.constant 0 : index
    %31 = vector.load %arg13[%c0_17, %c0_18] : memref<336x8xf32, #tpu.memory_space<vmem>>, vector<336x8xf32>
    %32 = vector.extract_strided_slice %31 {offsets = [5, 0], sizes = [288, 8], strides = [1, 1]} : vector<336x8xf32> to vector<288x8xf32>
    %33 = vector.extract_strided_slice %31 {offsets = [6, 0], sizes = [288, 8], strides = [1, 1]} : vector<336x8xf32> to vector<288x8xf32>
    %34 = vector.extract_strided_slice %31 {offsets = [7, 0], sizes = [288, 8], strides = [1, 1]} : vector<336x8xf32> to vector<288x8xf32>
    %35 = vector.extract_strided_slice %31 {offsets = [23, 0], sizes = [288, 8], strides = [1, 1]} : vector<336x8xf32> to vector<288x8xf32>
    %36 = vector.extract_strided_slice %31 {offsets = [24, 0], sizes = [288, 8], strides = [1, 1]} : vector<336x8xf32> to vector<288x8xf32>
    %37 = vector.extract_strided_slice %31 {offsets = [25, 0], sizes = [288, 8], strides = [1, 1]} : vector<336x8xf32> to vector<288x8xf32>
    %38 = vector.extract_strided_slice %31 {offsets = [41, 0], sizes = [288, 8], strides = [1, 1]} : vector<336x8xf32> to vector<288x8xf32>
    %39 = vector.extract_strided_slice %31 {offsets = [42, 0], sizes = [288, 8], strides = [1, 1]} : vector<336x8xf32> to vector<288x8xf32>
    %40 = vector.extract_strided_slice %31 {offsets = [43, 0], sizes = [288, 8], strides = [1, 1]} : vector<336x8xf32> to vector<288x8xf32>
    %41 = tpu.concatenate %32, %33, %34, %35, %36, %37, %38, %39, %40 in 1 : vector<288x8xf32>, vector<288x8xf32>, vector<288x8xf32>, vector<288x8xf32>, vector<288x8xf32>, vector<288x8xf32>, vector<288x8xf32>, vector<288x8xf32>, vector<288x8xf32> -> vector<288x72xf32>
    %42 = arith.truncf %41 : vector<288x72xf32> to vector<288x72xbf16>
    %c0_19 = arith.constant 0 : index
    %c0_20 = arith.constant 0 : index
    %43 = vector.load %arg6[%c0_19, %c0_20] : memref<72x8xbf16, #tpu.memory_space<vmem>>, vector<72x8xbf16>
    %cst_21 = arith.constant dense<0.000000e+00> : vector<288x8xf32>
    %44 = tpu.matmul %42, %43, %cst_21 {dimension_numbers = #tpu.dot_dimension_numbers<[1], [0], [0], [1], [0, 0, 1, 1], [], []>} : vector<288x72xbf16>, vector<72x8xbf16>, vector<288x8xf32> -> vector<288x8xf32>
    %c0_22 = arith.constant 0 : index
    %c0_23 = arith.constant 0 : index
    %45 = vector.load %arg7[%c0_22, %c0_23] : memref<1x8xf32, #tpu.memory_space<vmem>>, vector<1x8xf32>
    %46 = vector.broadcast %45 : vector<1x8xf32> to vector<288x8xf32>
    %47 = arith.mulf %44, %46 : vector<288x8xf32>
    %c0_24 = arith.constant 0 : index
    %c0_25 = arith.constant 0 : index
    %48 = vector.load %arg8[%c0_24, %c0_25] : memref<1x8xf32, #tpu.memory_space<vmem>>, vector<1x8xf32>
    %49 = vector.broadcast %48 : vector<1x8xf32> to vector<288x8xf32>
    %50 = arith.addf %47, %49 : vector<288x8xf32>
    %51 = vector.extract_strided_slice %1 {offsets = [19, 0], sizes = [288, 4], strides = [1, 1]} : vector<328x4xf32> to vector<288x4xf32>
    %52 = arith.truncf %51 : vector<288x4xf32> to vector<288x4xbf16>
    %c0_26 = arith.constant 0 : index
    %c0_27 = arith.constant 0 : index
    %53 = vector.load %arg9[%c0_26, %c0_27] : memref<4x8xbf16, #tpu.memory_space<vmem>>, vector<4x8xbf16>
    %cst_28 = arith.constant dense<0.000000e+00> : vector<288x8xf32>
    %54 = tpu.matmul %52, %53, %cst_28 {dimension_numbers = #tpu.dot_dimension_numbers<[1], [0], [0], [1], [0, 0, 1, 1], [], []>} : vector<288x4xbf16>, vector<4x8xbf16>, vector<288x8xf32> -> vector<288x8xf32>
    %c0_29 = arith.constant 0 : index
    %c0_30 = arith.constant 0 : index
    %55 = vector.load %arg10[%c0_29, %c0_30] : memref<1x8xf32, #tpu.memory_space<vmem>>, vector<1x8xf32>
    %56 = vector.broadcast %55 : vector<1x8xf32> to vector<288x8xf32>
    %57 = arith.mulf %54, %56 : vector<288x8xf32>
    %c0_31 = arith.constant 0 : index
    %c0_32 = arith.constant 0 : index
    %58 = vector.load %arg11[%c0_31, %c0_32] : memref<1x8xf32, #tpu.memory_space<vmem>>, vector<1x8xf32>
    %59 = vector.broadcast %58 : vector<1x8xf32> to vector<288x8xf32>
    %60 = arith.addf %57, %59 : vector<288x8xf32>
    %61 = arith.addf %50, %60 : vector<288x8xf32>
    %cst_33 = arith.constant 0.000000e+00 : f32
    %62 = vector.broadcast %cst_33 : f32 to vector<288x8xf32>
    %63 = arith.maximumf %61, %62 : vector<288x8xf32>
    %c0_34 = arith.constant 0 : index
    %c0_35 = arith.constant 0 : index
    %c0_36 = arith.constant 0 : index
    %64 = vector.load %arg12[%c0_34, %c0_35, %c0_36] : memref<1x288x8xf32, #tpu.memory_space<vmem>>, vector<1x288x8xf32>
    %65 = vector.shape_cast %64 : vector<1x288x8xf32> to vector<288x8xf32>
    %66 = vector.shape_cast %63 : vector<288x8xf32> to vector<1x288x8xf32>
    tpu.vector_store %arg12[%c0_34, %c0_35, %c0_36], %66 {strides = array<i32>} : memref<1x288x8xf32, #tpu.memory_space<vmem>>, vector<1x288x8xf32>,
    return
  }
  func.func @transform_0(%arg0: i32) -> (i32, i32, i32) {
    %c0_i32 = arith.constant 0 : i32
    %c0_i32_0 = arith.constant 0 : i32
    %c0_i32_1 = arith.constant 0 : i32
    return %arg0, %c0_i32, %c0_i32_0 : i32, i32, i32
  }
  func.func @transform_1(%arg0: i32) -> (i32, i32) {
    %c0_i32 = arith.constant 0 : i32
    %c0_i32_0 = arith.constant 0 : i32
    %c0_i32_1 = arith.constant 0 : i32
    return %c0_i32, %c0_i32_0 : i32, i32
  }
  func.func @transform_2(%arg0: i32) -> (i32, i32) {
    %c0_i32 = arith.constant 0 : i32
    %c0_i32_0 = arith.constant 0 : i32
    %c0_i32_1 = arith.constant 0 : i32
    return %c0_i32, %c0_i32_0 : i32, i32
  }
  func.func @transform_3(%arg0: i32) -> (i32, i32) {
    %c0_i32 = arith.constant 0 : i32
    %c0_i32_0 = arith.constant 0 : i32
    %c0_i32_1 = arith.constant 0 : i32
    return %c0_i32, %c0_i32_0 : i32, i32
  }
  func.func @transform_4(%arg0: i32) -> (i32, i32) {
    %c0_i32 = arith.constant 0 : i32
    %c0_i32_0 = arith.constant 0 : i32
    %c0_i32_1 = arith.constant 0 : i32
    return %c0_i32, %c0_i32_0 : i32, i32
  }
  func.func @transform_5(%arg0: i32) -> (i32, i32) {
    %c0_i32 = arith.constant 0 : i32
    %c0_i32_0 = arith.constant 0 : i32
    %c0_i32_1 = arith.constant 0 : i32
    return %c0_i32, %c0_i32_0 : i32, i32
  }
  func.func @transform_6(%arg0: i32) -> (i32, i32) {
    %c0_i32 = arith.constant 0 : i32
    %c0_i32_0 = arith.constant 0 : i32
    %c0_i32_1 = arith.constant 0 : i32
    return %c0_i32, %c0_i32_0 : i32, i32
  }
  func.func @transform_7(%arg0: i32) -> (i32, i32) {
    %c0_i32 = arith.constant 0 : i32
    %c0_i32_0 = arith.constant 0 : i32
    %c0_i32_1 = arith.constant 0 : i32
    return %c0_i32, %c0_i32_0 : i32, i32
  }
  func.func @transform_8(%arg0: i32) -> (i32, i32) {
    %c0_i32 = arith.constant 0 : i32
    %c0_i32_0 = arith.constant 0 : i32
    %c0_i32_1 = arith.constant 0 : i32
    return %c0_i32, %c0_i32_0 : i32, i32
  }
  func.func @transform_9(%arg0: i32) -> (i32, i32) {
    %c0_i32 = arith.constant 0 : i32
    %c0_i32_0 = arith.constant 0 : i32
    %c0_i32_1 = arith.constant 0 : i32
    return %c0_i32, %c0_i32_0 : i32, i32
  }
  func.func @transform_10(%arg0: i32) -> (i32, i32) {
    %c0_i32 = arith.constant 0 : i32
    %c0_i32_0 = arith.constant 0 : i32
    %c0_i32_1 = arith.constant 0 : i32
    return %c0_i32, %c0_i32_0 : i32, i32
  }
  func.func @transform_11(%arg0: i32) -> (i32, i32, i32) {
    %c0_i32 = arith.constant 0 : i32
    %c0_i32_0 = arith.constant 0 : i32
    %c0_i32_1 = arith.constant 0 : i32
    return %arg0, %c0_i32, %c0_i32_0 : i32, i32, i32
  }
}

</mosaic_0001>

<bundles_post_ra>
// kernel: tpu_custom_call.1
= control target key start
LH: loop header
LB: loop body
LE: loop exit
PB: predicated region body
PF: predicated region fallthrough
CT: control target
= control target key end

     0   :  { %s7260_s17 = smov 0   ;;  %s11982_s0 = inlined_call_operand.vmem [shape: f32[2,328,4], index: 0, kind: input, shape index: {}]   ;;  %s11983_s1 = inlined_call_operand.vmem [shape: f32[288,1], index: 1, kind: input, shape index: {}]   ;;  %s11984_s2 = inlined_call_operand.vmem [shape: bf16[36,8], index: 2, kind: input, shape index: {}]   ;;  %s11985_s3 = inlined_call_operand.vmem [shape: f32[1,8], index: 3, kind: input, shape index: {}]   ;;  %s11986_s4 = inlined_call_operand.vmem [shape: f32[1,8], index: 4, kind: input, shape index: {}]   ;;  %s11987_s5 = inlined_call_operand.vmem [shape: bf16[72,8], index: 5, kind: input, shape index: {}]   ;;  %s11988_s6 = inlined_call_operand.vmem [shape: f32[1,8], index: 6, kind: input, shape index: {}]   ;;  %s11989_s7 = inlined_call_operand.vmem [shape: f32[1,8], index: 7, kind: input, shape index: {}]   ;;  %s11990_s8 = inlined_call_operand.vmem [shape: bf16[4,8], index: 8, kind: input, shape index: {}]   ;;  %s11991_s9 = inlined_call_operand.vmem [shape: f32[1,8], index: 9, kind: input, shape index: {}]   ;;  %s11992_s10 = inlined_call_operand.vmem [shape: f32[1,8], index: 10, kind: input, shape index: {}]   ;;  %s11993_s11 = inlined_call_operand.vmem [shape: f32[2,288,8], index: 11, kind: output, shape index: {}]  }
   0x1 LB: > { %s5456_s18 = sadd.s32 4294967295, %s7184_s17   ;;  %p5460_p0 = scmp.ge.s32.totalorder %s7184_s17, 1  ;;  %s7184_s17 = sphi %s7260_s17, %s21_s17  }
   0x2   : > { %p337_p1 = scmp.lt.s32.totalorder %s7184_s17, 3 }
   0x4   : > { %p338_p2 = pnand %p5460_p0, %p337_p1 }
   0x6   : > { %341 = sbr.rel (%p338_p2) target bundleno = 1515 (0x5eb), region = 64 }
   0xb   : > { %p377_p3 = scmp.lt.s32.totalorder %s5456_s18, 1  ;;  %vm502_vm0 = vcmask 1046528   ;;  %s7186_s23 = smov 4   ;;  %vm684_vm1 = vcmask 1045504   ;;  %vm980_vm2 = vcmask 1044480   ;;  %vm1162_vm3 = vcmask 1043456  }
   0xc   : > { %s7187_s24 = smov 8   ;;  %s7188_s25 = smov 12   ;;  %vm1458_vm4 = vcmask 1042432   ;;  %vm1640_vm5 = vcmask 1041408   ;;  %vm1822_vm6 = vcmask 31744   ;;  %vm1859_vm7 = vcmask 64512  }
   0xd   : > { %s12595_s18 = smov (!%p377_p3, %s5456_s18), 1  ;;  %s7189_s26 = smov 16   ;;  %vm1896_vm8 = vcmask 97280   ;;  %vm1933_vm9 = vcmask 130048   ;;  %vm1970_vm10 = vcmask 162816   ;;  %vm2007_vm11 = vcmask 195584  }
   0xe   : > { %s5558_s19 = smul.u32 328, %s12595_s18  ;;  %s7190_s27 = smov 20   ;;  %vm2044_vm12 = vcmask 228352   ;;  %vm2081_vm13 = vcmask 261120   ;;  %vm2156_vm14 = vcmask 293888  }
   0xf   : > { %s7191_s28 = smov 24   ;;  %s7192_s29 = smov 28   ;;  %vm4886_vm15 = vsmask.f32 6400 }
  0x10   : > { %s7274_s22 = scalar_lea.vmem %s11982_s0, %s5558_s19  ;;  %s7193_s30 = smov 32  }
  0x11   : > { %v7277_v0 = vld [vmem:[%s7274_s22 + $0x40] sm:$0xff]  ;;  %v7280_v1 = vld [vmem:[%s7274_s22 + $0x48] sm:$0xff]  ;;  %v7283_v2 = vld [vmem:[%s7274_s22 + $0x50] sm:$0xff]  ;;  %s7198_s14 = smov 64   ;;  %s7199_s15 = smov 48  }
  0x12   : > { %v518_v3 = vrot.slane %v7277_v0, 1  ;;  %v520_v4 = vrot.slane %v7280_v1, 1  ;;  %v522_v5 = vrot.slane %v7283_v2, 1  ;;  %v7289_v6 = vld [vmem:[%s7274_s22 + $0x20] sm:$0xff]  ;;  %v7292_v7 = vld [vmem:[%s7274_s22 + $0x28] sm:$0xff]  ;;  %v7295_v8 = vld [vmem:[%s7274_s22 + $0x30] sm:$0xff] }
  0x13   : > { %v510_v9 = vrot.slane %v7289_v6, 1  ;;  %v512_v10 = vrot.slane %v7292_v7, 1  ;;  %v514_v11 = vrot.slane %v7295_v8, 1  ;;  %v7301_v12 = vld [vmem:[%s7274_s22] sm:$0xff]  ;;  %v7304_v13 = vld [vmem:[%s7274_s22 + $0x8] sm:$0xff]  ;;  %v7307_v14 = vld [vmem:[%s7274_s22 + $0x10] sm:$0xff] }
  0x14   : > { %v521_v15 = vsel %vm502_vm0, %v518_v3, %v520_v4  ;;  %v523_v16 = vsel %vm502_vm0, %v520_v4, %v522_v5  ;;  %v503_v17 = vrot.slane %v7301_v12, 1  ;;  %v504_v18 = vrot.slane %v7304_v13, 1  ;;  %v7314_v19 = vld [vmem:[%s7274_s22 + $0x58] sm:$0xff]  ;;  %v7317_v20 = vld [vmem:[%s7274_s22 + $0x60] sm:$0xff]  ;;  %v7344_v40 = vld [vmem:[%s7274_s22 + $0x88] sm:$0xff]  ;;  %s5559_s20 = smul.u32 288, %s12595_s18 }
  0x15   : > { %v7320_v21 = vld [vmem:[%s7274_s22 + $0x38] sm:$0xff]  ;;  %v5602_v22 = vpack.i.bf16 %v523_v16, %v521_v15  ;;  %v513_v23 = vsel %vm502_vm0, %v510_v9, %v512_v10  ;;  %v515_v24 = vsel %vm502_vm0, %v512_v10, %v514_v11  ;;  %v506_v25 = vrot.slane %v7307_v14, 1  ;;  %v7341_v39 = vld [vmem:[%s7274_s22 + $0x80] sm:$0xff]  ;;  %v7347_v41 = vld [vmem:[%s7274_s22 + $0x90] sm:$0xff] }
  0x16   : > { %v7326_v26 = vld [vmem:[%s7274_s22 + $0x18] sm:$0xff]  ;;  %v5592_v27 = vpack.i.bf16 %v515_v24, %v513_v23  ;;  %v505_v28 = vsel %vm502_vm0, %v503_v17, %v504_v18  ;;  %v524_v29 = vrot.slane %v7314_v19, 1  ;;  %v526_v30 = vrot.slane %v7317_v20, 1  ;;  %v7351_v42 = vld [vmem:[%s7274_s22 + $0x70] sm:$0xff]  ;;  %v7362_v51 = vld [vmem:[%s7274_s22 + $0x68] sm:$0xff] }
  0x17   : > { %5603 = vrot.lane.b32.xlu2 %v5602_v22, %s7186_s23  ;;  %v507_v31 = vsel %vm502_vm0, %v504_v18, %v506_v25  ;;  %v516_v32 = vrot.slane %v7320_v21, 1  ;;  %v508_v33 = vrot.slane %v7326_v26, 1  ;;  %v7354_v43 = vld [vmem:[%s7274_s22 + $0x78] sm:$0xff]  ;;  %v534_v48 = vrot.slane %v7341_v39, 1  ;;  %v7374_v60 = vld [vmem:[%s7274_s22 + $0xb0] sm:$0xff]  ;;  %v7380_v62 = vld [vmem:[%s7274_s22 + $0xc0] sm:$0xff] }
  0x18   : > { %5593 = vrot.lane.b32.xlu1 %v5592_v27, %s7186_s23  ;;  %v5582_v34 = vpack.i.bf16 %v507_v31, %v505_v28  ;;  %v525_v35 = vsel %vm502_vm0, %v522_v5, %v524_v29  ;;  %v527_v36 = vsel %vm502_vm0, %v524_v29, %v526_v30  ;;  %v536_v49 = vrot.slane %v7344_v40, 1  ;;  %v7377_v61 = vld [vmem:[%s7274_s22 + $0xb8] sm:$0xff]  ;;  %v7384_v63 = vld [vmem:[%s7274_s22 + $0xa0] sm:$0xff]  ;;  %v7410_v31 = vld [vmem:[%s7274_s22 + $0xe8] sm:$0xff] }
  0x19   : > { %v517_v37 = vsel %vm502_vm0, %v514_v11, %v516_v32  ;;  %v519_v38 = vsel %vm502_vm0, %v516_v32, %v518_v3  ;;  %v5607_v44 = vpack.i.bf16 %v527_v36, %v525_v35  ;;  %v509_v45 = vsel %vm502_vm0, %v506_v25, %v508_v33  ;;  %v7387_v3 = vld [vmem:[%s7274_s22 + $0xa8] sm:$0xff]  ;;  %v7395_v17 = vld [vmem:[%s7274_s22 + $0x98] sm:$0xff]  ;;  %12165 = vst [vmem:[#allocation3_spill] sm:$0xff] %v7410_v31  ;;  %v7413_v32 = vld [vmem:[%s7274_s22 + $0xf0] sm:$0xff] }
  0x1a   : > { %5583 = vrot.lane.b32.xlu0 %v5582_v34, %s7186_s23  ;;  %v511_v46 = vsel %vm502_vm0, %v508_v33, %v510_v9  ;;  %v5597_v47 = vpack.i.bf16 %v519_v38, %v517_v37  ;;  %v538_v50 = vrot.slane %v7347_v41, 1  ;;  %v530_v52 = vrot.slane %v7351_v42, 1  ;;  %v7417_v33 = vld [vmem:[%s7274_s22 + $0xd0] sm:$0xff]  ;;  %v7420_v34 = vld [vmem:[%s7274_s22 + $0xd8] sm:$0xff] }
  0x1b   : > { %v532_v53 = vrot.slane %v7354_v43, 1  ;;  %v5587_v54 = vpack.i.bf16 %v511_v46, %v509_v45  ;;  %v528_v55 = vrot.slane %v7362_v51, 1  ;;  %v537_v56 = vsel %vm502_vm0, %v534_v48, %v536_v49  ;;  %12166 = vst [vmem:[#allocation4_spill] sm:$0xff] %v7420_v34 }
  0x1c   : > { %v539_v57 = vsel %vm502_vm0, %v536_v49, %v538_v50  ;;  %v546_v11 = vrot.slane %v7374_v60, 1  ;;  %v548_v15 = vrot.slane %v7377_v61, 1  ;;  %v550_v16 = vrot.slane %v7380_v62, 1 }
  0x1d   : > { %v533_v58 = vsel %vm502_vm0, %v530_v52, %v532_v53  ;;  %v535_v59 = vsel %vm502_vm0, %v532_v53, %v534_v48  ;;  %v5622_v4 = vpack.i.bf16 %v539_v57, %v537_v56  ;;  %v529_v5 = vsel %vm502_vm0, %v526_v30, %v528_v55  ;;  %v7407_v30 = vld [vmem:[%s7274_s22 + $0xe0] sm:$0xff]  ;;  %v7440_v57 = vld [vmem:[%s7274_s22 + $0x110] sm:$0xff] }
  0x1e   : > { %v531_v9 = vsel %vm502_vm0, %v528_v55, %v530_v52  ;;  %v5617_v10 = vpack.i.bf16 %v535_v59, %v533_v58  ;;  %v542_v18 = vrot.slane %v7384_v63, 1  ;;  %v544_v22 = vrot.slane %v7387_v3, 1  ;;  %v7443_v58 = vld [vmem:[%s7274_s22 + $0x118] sm:$0xff]  ;;  %v7446_v59 = vld [vmem:[%s7274_s22 + $0x120] sm:$0xff] }
  0x1f   : > { %5608 = vrot.lane.b32.xlu2 %v5607_v44, %s7186_s23  ;;  %v5612_v23 = vpack.i.bf16 %v531_v9, %v529_v5  ;;  %v540_v24 = vrot.slane %v7395_v17, 1  ;;  %v549_v25 = vsel %vm502_vm0, %v546_v11, %v548_v15  ;;  %v551_v27 = vsel %vm502_vm0, %v548_v15, %v550_v16  ;;  %v7453_v5 = vld [vmem:[%s7274_s22 + $0x108] sm:$0xff] }
  0x20   : > { %5598 = vrot.lane.b32.xlu1 %v5597_v47, %s7186_s23  ;;  %v545_v28 = vsel %vm502_vm0, %v542_v18, %v544_v22  ;;  %v547_v29 = vsel %vm502_vm0, %v544_v22, %v546_v11  ;;  %v5637_v35 = vpack.i.bf16 %v551_v27, %v549_v25  ;;  %v558_v44 = vrot.slane %v7407_v30, 1  ;;  %v7428_v47 = vld [vmem:[%s7274_s22 + $0xc8] sm:$0xff] }
  0x21   : > { %v541_v36 = vsel %vm502_vm0, %v538_v50, %v540_v24  ;;  %v543_v37 = vsel %vm502_vm0, %v540_v24, %v542_v18  ;;  %v5632_v38 = vpack.i.bf16 %v547_v29, %v545_v28  ;;  %v560_v45 = vrot.slane %v7410_v31, 1  ;;  %v7461_v24 = vld [vmem:[%s7274_s22 + $0xf8] sm:$0xff] }
  0x22   : > { %5588 = vrot.lane.b32.xlu0 %v5587_v54, %s7186_s23  ;;  %v562_v46 = vrot.slane %v7413_v32, 1  ;;  %v554_v48 = vrot.slane %v7417_v33, 1  ;;  %v556_v49 = vrot.slane %v7420_v34, 1  ;;  %v5627_v50 = vpack.i.bf16 %v543_v37, %v541_v36 }
  0x23   : > { %v552_v52 = vrot.slane %v7428_v47, 1  ;;  %v561_v53 = vsel %vm502_vm0, %v558_v44, %v560_v45  ;;  %v570_v18 = vrot.slane %v7440_v57, 1  ;;  %v572_v22 = vrot.slane %v7443_v58, 1 }
  0x24   : > { %v563_v54 = vsel %vm502_vm0, %v560_v45, %v562_v46  ;;  %v557_v55 = vsel %vm502_vm0, %v554_v48, %v556_v49  ;;  %v559_v56 = vsel %vm502_vm0, %v556_v49, %v558_v44  ;;  %v568_v27 = vrot.slane %v7453_v5, 1 }
  0x25   : > { %v5652_v9 = vpack.i.bf16 %v563_v54, %v561_v53  ;;  %v555_v11 = vsel %vm502_vm0, %v552_v52, %v554_v48  ;;  %v5647_v15 = vpack.i.bf16 %v559_v56, %v557_v55  ;;  %v573_v29 = vsel %vm502_vm0, %v570_v18, %v572_v22 }
  0x26   : > { %v571_v37 = vsel %vm502_vm0, %v568_v27, %v570_v18  ;;  %v692_v49 = vrot.slane %v7289_v6, 2  ;;  %v688_v53 = vrot.slane %v7307_v14, 2  ;;  %v690_v54 = vrot.slane %v7326_v26, 2 }
  0x27   : > { %5623 = vrot.lane.b32.xlu2 %v5622_v4, %s7186_s23  ;;  %v7450_v4 = vld [vmem:[%s7274_s22 + $0x100] sm:$0xff]  ;;  %v685_v56 = vrot.slane %v7301_v12, 2 }
  0x28   : > { %5618 = vrot.lane.b32.xlu1 %v5617_v10, %s7186_s23  ;;  %v553_v10 = vsel %vm502_vm0, %v550_v16, %v552_v52  ;;  %v566_v25 = vrot.slane %v7450_v4, 1  ;;  %v564_v16 = vrot.slane %v7461_v24, 1  ;;  %v696_v52 = vrot.slane %v7295_v8, 2 }
  0x29   : > { %v5642_v28 = vpack.i.bf16 %v555_v11, %v553_v10  ;;  %v691_v11 = vsel %vm684_vm1, %v688_v53, %v690_v54 }
  0x2a   : > { %5613 = vrot.lane.b32.xlu0 %v5612_v23, %s7186_s23  ;;  %v574_v23 = vrot.slane %v7446_v59, 1  ;;  %v569_v36 = vsel %vm502_vm0, %v566_v25, %v568_v27  ;;  %v565_v44 = vsel %vm502_vm0, %v562_v46, %v564_v16  ;;  %v567_v45 = vsel %vm502_vm0, %v564_v16, %v566_v25 }
  0x2b   : > { %v5662_v48 = vpack.i.bf16 %v571_v37, %v569_v36  ;;  %v5657_v55 = vpack.i.bf16 %v567_v45, %v565_v44  ;;  %v686_v46 = vrot.slane %v7304_v13, 2  ;;  %v704_v13 = vrot.slane %v7283_v2, 2 }
  0x2c   : > { %v706_v25 = vrot.slane %v7314_v19, 2  ;;  %v708_v27 = vrot.slane %v7317_v20, 2  ;;  %v702_v16 = vrot.slane %v7280_v1, 2 }
  0x2d   : > { %v689_v12 = vsel %vm684_vm1, %v686_v46, %v688_v53  ;;  %v716_v53 = vrot.slane %v7341_v39, 2 }
  0x2e   : > { %v707_v36 = vsel %vm684_vm1, %v704_v13, %v706_v25  ;;  %v709_v37 = vsel %vm684_vm1, %v706_v25, %v708_v27  ;;  %v705_v44 = vsel %vm684_vm1, %v702_v16, %v704_v13 }
  0x2f   : > { %5638 = vrot.lane.b32.xlu2 %v5637_v35, %s7186_s23  ;;  %v575_v35 = vsel %vm502_vm0, %v572_v22, %v574_v23  ;;  %v687_v22 = vsel %vm684_vm1, %v685_v56, %v686_v46  ;;  %v7510_v45 = vpack.i.bf16 %v709_v37, %v707_v36  ;;  %v712_v56 = vrot.slane %v7351_v42, 2 }
  0x30   : > { %5633 = vrot.lane.b32.xlu1 %v5632_v38, %s7186_s23  ;;  %v5667_v38 = vpack.i.bf16 %v575_v35, %v573_v29  ;;  %v5672_v29 = vpack.i.bf16 %v689_v12, %v687_v22  ;;  %v698_v35 = vrot.slane %v7320_v21, 2  ;;  %v714_v46 = vrot.slane %v7354_v43, 2 }
  0x31   : > { %v724_v36 = vrot.slane %v7384_v63, 2  ;;  %v726_v37 = vrot.slane %v7387_v3, 2 }
  0x32   : > { %5628 = vrot.lane.b32.xlu0 %v5627_v50, %s7186_s23  ;;  %v694_v50 = vrot.slane %v7292_v7, 2  ;;  %v717_v22 = vsel %vm684_vm1, %v714_v46, %v716_v53 }
  0x34   : > { %v697_v10 = vsel %vm684_vm1, %v694_v50, %v696_v52 }
  0x37   : > { %5653 = vrot.lane.b32.xlu2 %v5652_v9, %s7186_s23  ;;  %v695_v9 = vsel %vm684_vm1, %v692_v49, %v694_v50 }
  0x38   : > { %5648 = vrot.lane.b32.xlu1 %v5647_v15, %s7186_s23  ;;  %v693_v15 = vsel %vm684_vm1, %v690_v54, %v692_v49  ;;  %v7489_v18 = vpack.i.bf16 %v697_v10, %v695_v9  ;;  %v718_v54 = vrot.slane %v7344_v40, 2 }
  0x39   : > { %v7493_v23 = vpack.i.bf16 %v693_v15, %v691_v11  ;;  %v715_v15 = vsel %vm684_vm1, %v712_v56, %v714_v46 }
  0x3a   : > { %5643 = vrot.lane.b32.xlu0 %v5642_v28, %s7186_s23  ;;  %v700_v28 = vrot.slane %v7277_v0, 2  ;;  %v719_v10 = vsel %vm684_vm1, %v716_v53, %v718_v54 }
  0x3c   : > { %v701_v49 = vsel %vm684_vm1, %v698_v35, %v700_v28 }
  0x3f   : > { %5668 = vrot.lane.b32.xlu2 %v5667_v38, %s7186_s23  ;;  %v703_v38 = vsel %vm684_vm1, %v700_v28, %v702_v16  ;;  %v7538_v28 = vpack.i.bf16 %v717_v22, %v715_v15  ;;  %v728_v16 = vrot.slane %v7374_v60, 2  ;;  %v744_v15 = vrot.slane %v7413_v32, 2 }
  0x40   : > { %5663 = vrot.lane.b32.xlu1 %v5662_v48, %s7186_s23  ;;  %v699_v48 = vsel %vm684_vm1, %v696_v52, %v698_v35  ;;  %v7514_v50 = vpack.i.bf16 %v705_v44, %v703_v38  ;;  %v710_v52 = vrot.slane %v7362_v51, 2  ;;  %v732_v35 = vrot.slane %v7380_v62, 2 }
  0x41   : > { %v7521_v9 = vpack.i.bf16 %v701_v49, %v699_v48  ;;  %v727_v49 = vsel %vm684_vm1, %v724_v36, %v726_v37  ;;  %v729_v53 = vsel %vm684_vm1, %v726_v37, %v728_v16  ;;  %v736_v22 = vrot.slane %v7417_v33, 2 }
  0x42   : > { %5658 = vrot.lane.b32.xlu0 %v5657_v55, %s7186_s23  ;;  %v720_v55 = vrot.slane %v7347_v41, 2  ;;  %v711_v13 = vsel %vm684_vm1, %v708_v27, %v710_v52  ;;  %v713_v25 = vsel %vm684_vm1, %v710_v52, %v712_v56  ;;  %v722_v27 = vrot.slane %v7395_v17, 2  ;;  %s11661_s23 = scalar_lea.vmem %s11993_s11, %s5559_s20 }
  0x43   : > { %v5702_v38 = vpack.i.bf16 %v713_v25, %v711_v13  ;;  %v5722_v52 = vpack.i.bf16 %v729_v53, %v727_v49  ;;  %v738_v13 = vrot.slane %v7420_v34, 2  ;;  %v752_v53 = vrot.slane %v7440_v57, 2 }
  0x44   : > { %v721_v11 = vsel %vm684_vm1, %v718_v54, %v720_v55  ;;  %v723_v56 = vsel %vm684_vm1, %v720_v55, %v722_v27  ;;  %v725_v46 = vsel %vm684_vm1, %v722_v27, %v724_v36  ;;  %v750_v34 = vrot.slane %v7453_v5, 2 }
  0x45   : > { %v7534_v12 = vpack.i.bf16 %v721_v11, %v719_v10  ;;  %v740_v10 = vrot.slane %v7407_v30, 2  ;;  %v742_v11 = vrot.slane %v7410_v31, 2  ;;  %v5717_v25 = vpack.i.bf16 %v725_v46, %v723_v56 }
  0x46   : > { %v739_v36 = vsel %vm684_vm1, %v736_v22, %v738_v13  ;;  %v754_v56 = vrot.slane %v7443_v58, 2  ;;  %v756_v46 = vrot.slane %v7446_v59, 2 }
  0x47   : > { %5683 = vrot.lane.b32.xlu2 %v7489_v18, %s7187_s24  ;;  %v743_v55 = vsel %vm684_vm1, %v740_v10, %v742_v11  ;;  %v741_v37 = vsel %vm684_vm1, %v738_v13, %v740_v10  ;;  %v746_v10 = vrot.slane %v7461_v24, 2 }
  0x48   : > { %5678 = vrot.lane.b32.xlu1 %v7493_v23, %s7187_s24  ;;  %v5737_v49 = vpack.i.bf16 %v741_v37, %v739_v36 }
  0x4a   : > { %5673 = vrot.lane.b32.xlu0 %v5672_v29, %s7187_s24  ;;  %v730_v29 = vrot.slane %v7377_v61, 2 }
  0x4c   : > { %v731_v44 = vsel %vm684_vm1, %v728_v16, %v730_v29  ;;  %v733_v48 = vsel %vm684_vm1, %v730_v29, %v732_v35  ;;  %v734_v16 = vrot.slane %v7428_v47, 2  ;;  %v745_v29 = vsel %vm684_vm1, %v742_v11, %v744_v15 }
  0x4d   : > { %v5727_v54 = vpack.i.bf16 %v733_v48, %v731_v44  ;;  %v5742_v27 = vpack.i.bf16 %v745_v29, %v743_v55  ;;  %v748_v11 = vrot.slane %v7450_v4, 2  ;;  %v747_v29 = vsel %vm684_vm1, %v744_v15, %v746_v10 }
  0x4e   : > { %v735_v44 = vsel %vm684_vm1, %v732_v35, %v734_v16  ;;  %v737_v48 = vsel %vm684_vm1, %v734_v16, %v736_v22  ;;  %v755_v35 = vsel %vm684_vm1, %v752_v53, %v754_v56  ;;  %v757_v22 = vsel %vm684_vm1, %v754_v56, %v756_v46 }
  0x4f   : > { %5698 = vrot.lane.b32.xlu2 %v7510_v45, %s7187_s24  ;;  %v5732_v31 = vpack.i.bf16 %v737_v48, %v735_v44  ;;  %v751_v13 = vsel %vm684_vm1, %v748_v11, %v750_v34  ;;  %v753_v16 = vsel %vm684_vm1, %v750_v34, %v752_v53  ;;  %v5757_v55 = vpack.i.bf16 %v757_v22, %v755_v35 }
  0x50   : > { %5693 = vrot.lane.b32.xlu1 %v7514_v50, %s7187_s24  ;;  %v749_v36 = vsel %vm684_vm1, %v746_v10, %v748_v11  ;;  %v5752_v37 = vpack.i.bf16 %v753_v16, %v751_v13  ;;  %v988_v35 = vrot.slane %v7295_v8, 3  ;;  %v990_v22 = vrot.slane %v7320_v21, 3 }
  0x51   : > { %v5747_v44 = vpack.i.bf16 %v749_v36, %v747_v29  ;;  %v992_v13 = vrot.slane %v7277_v0, 3  ;;  %v982_v16 = vrot.slane %v7326_v26, 3 }
  0x52   : > { %5688 = vrot.lane.b32.xlu0 %v7521_v9, %s7187_s24  ;;  %v991_v29 = vsel %vm980_vm2, %v988_v35, %v990_v22 }
  0x53   : > { %v993_v36 = vsel %vm980_vm2, %v990_v22, %v992_v13  ;;  %v1000_v22 = vrot.slane %v7317_v20, 3 }
  0x57   : > { %5713 = vrot.lane.b32.xlu2 %v7534_v12, %s7187_s24 }
  0x58   : > { %5708 = vrot.lane.b32.xlu1 %v7538_v28, %s7187_s24 }
  0x5a   : > { %5703 = vrot.lane.b32.xlu0 %v5702_v38, %s7187_s24 }
  0x5f   : > { %5728 = vrot.lane.b32.xlu2 %v5727_v54, %s7187_s24 }
  0x60   : > { %5723 = vrot.lane.b32.xlu1 %v5722_v52, %s7187_s24 }
  0x62   : > { %5718 = vrot.lane.b32.xlu0 %v5717_v25, %s7187_s24 }
  0x67   : > { %5743 = vrot.lane.b32.xlu2 %v5742_v27, %s7187_s24 }
  0x68   : > { %5738 = vrot.lane.b32.xlu1 %v5737_v49, %s7187_s24 }
  0x6a   : > { %5733 = vrot.lane.b32.xlu0 %v5732_v31, %s7187_s24 }
  0x6f   : > { %5758 = vrot.lane.b32.xlu2 %v5757_v55, %s7187_s24 }
  0x70   : > { %5753 = vrot.lane.b32.xlu1 %v5752_v37, %s7187_s24 }
  0x71   : > { %v7589_v48 = vpop.permute.xlu2 %5603 }
  0x72   : > { %12167 = vst [vmem:[#allocation5_spill] sm:$0xff] %v7589_v48  ;;  %5748 = vrot.lane.b32.xlu0 %v5747_v44, %s7187_s24 }
  0x77   : > { %5773 = vrot.lane.b32.xlu2 %v7521_v9, %s7188_s25 }
  0x78   : > { %5768 = vrot.lane.b32.xlu1 %v7489_v18, %s7188_s25 }
  0x79   : > { %v7596_v34 = vpop.permute.xlu2 %5608 }
  0x7a   : > { %12168 = vst [vmem:[#allocation6_spill] sm:$0xff] %v7596_v34  ;;  %5763 = vrot.lane.b32.xlu0 %v7493_v23, %s7188_s25  ;;  %v1040_v34 = vrot.slane %v7450_v4, 3 }
  0x7f   : > { %5788 = vrot.lane.b32.xlu2 %v5702_v38, %s7188_s25  ;;  %v7626_v38 = vld [vmem:[%s7274_s22 + $0x130] sm:$0xff] }
  0x80   : > { %5783 = vrot.lane.b32.xlu1 %v7510_v45, %s7188_s25  ;;  %v870_v53 = vrot.slane %v7626_v38, 2 }
  0x81   : > { %v7603_v15 = vpop.permute.xlu2 %5623 }
  0x82   : > { %12169 = vst [vmem:[#allocation7_spill] sm:$0xff] %v7603_v15  ;;  %5778 = vrot.lane.b32.xlu0 %v7514_v50, %s7188_s25  ;;  %v7623_v50 = vld [vmem:[%s7274_s22 + $0x128] sm:$0xff] }
  0x87   : > { %5803 = vrot.lane.b32.xlu2 %v5717_v25, %s7188_s25 }
  0x88   : > { %5798 = vrot.lane.b32.xlu1 %v7534_v12, %s7188_s25 }
  0x89   : > { %v7610_v18 = vpop.permute.xlu2 %5638 }
  0x8a   : > { %12170 = vst [vmem:[#allocation8_spill] sm:$0xff] %v7610_v18  ;;  %5793 = vrot.lane.b32.xlu0 %v7538_v28, %s7188_s25  ;;  %v7614_v23 = vpop.permute.xlu1 %5593  ;;  %v868_v28 = vrot.slane %v7623_v50, 2 }
  0x8b   : > { %12171 = vst [vmem:[#allocation9_spill] sm:$0xff] %v7614_v23  ;;  %v1052_v23 = vrot.slane %v7626_v38, 3 }
  0x8c   : > { %v7616_v9 = vpop.permute.xlu0 %5583 }
  0x8f   : > { %5818 = vrot.lane.b32.xlu2 %v5732_v31, %s7188_s25  ;;  %v869_v31 = vsel %vm684_vm1, %v756_v46, %v868_v28  ;;  %v986_v46 = vrot.slane %v7292_v7, 3 }
  0x90   : > { %5813 = vrot.lane.b32.xlu1 %v5727_v54, %s7188_s25  ;;  %v871_v54 = vsel %vm684_vm1, %v868_v28, %v870_v53 }
  0x91   : > { %v7620_v45 = vpop.permute.xlu2 %5653  ;;  %v5847_v11 = vpack.i.bf16 %v871_v54, %v869_v31  ;;  %v989_v53 = vsel %vm980_vm2, %v986_v46, %v988_v35  ;;  %v5862_v54 = vpack.i.bf16 %v993_v36, %v991_v29  ;;  %v996_v35 = vrot.slane %v7283_v2, 3 }
  0x92   : > { %5808 = vrot.lane.b32.xlu0 %v5722_v52, %s7188_s25  ;;  %v7629_v12 = vpop.permute.xlu1 %5598 }
  0x93   : > { %12172 = vst [vmem:[#allocation10_spill] sm:$0xff] %v7629_v12  ;;  %v1050_v12 = vrot.slane %v7623_v50, 3 }
  0x94   : > { %v7631_v25 = vpop.permute.xlu0 %5588 }
  0x95   : > { %12173 = vst [vmem:[#allocation11_spill] sm:$0xff] %v7631_v25 }
  0x97   : > { %5833 = vrot.lane.b32.xlu2 %v5747_v44, %s7188_s25 }
  0x98   : > { %5828 = vrot.lane.b32.xlu1 %v5742_v27, %s7188_s25  ;;  %v984_v27 = vrot.slane %v7289_v6, 3 }
  0x99   : > { %v7639_v56 = vpop.permute.xlu2 %5668 }
  0x9a   : > { %12174 = vst [vmem:[#allocation12_spill] sm:$0xff] %v7639_v56  ;;  %5823 = vrot.lane.b32.xlu0 %v5737_v49, %s7188_s25  ;;  %v7642_v52 = vpop.permute.xlu1 %5618  ;;  %v981_v49 = vrot.slane %v7307_v14, 3  ;;  %v987_v28 = vsel %vm980_vm2, %v984_v27, %v986_v46  ;;  %v985_v18 = vsel %vm980_vm2, %v982_v16, %v984_v27 }
  0x9b   : > { %12175 = vst [vmem:[#allocation13_spill] sm:$0xff] %v7642_v52  ;;  %v5857_v15 = vpack.i.bf16 %v989_v53, %v987_v28  ;;  %v1002_v52 = vrot.slane %v7362_v51, 3 }
  0x9c   : > { %v7644_v10 = vpop.permute.xlu0 %5613 }
  0x9d   : > { %12176 = vst [vmem:[#allocation14_spill] sm:$0xff] %v7644_v10  ;;  %v1004_v10 = vrot.slane %v7351_v42, 3  ;;  %v1003_v27 = vsel %vm980_vm2, %v1000_v22, %v1002_v52 }
  0x9f   : > { %5848 = vrot.lane.b32.xlu2 %v5847_v11, %s7188_s25  ;;  %v983_v11 = vsel %vm980_vm2, %v981_v49, %v982_v16  ;;  %v994_v49 = vrot.slane %v7280_v1, 3  ;;  %v1005_v16 = vsel %vm980_vm2, %v1002_v52, %v1004_v10  ;;  %v1012_v52 = vrot.slane %v7347_v41, 3 }
  0xa0   : > { %5843 = vrot.lane.b32.xlu1 %v5757_v55, %s7188_s25  ;;  %v5852_v46 = vpack.i.bf16 %v985_v18, %v983_v11  ;;  %v5877_v53 = vpack.i.bf16 %v1005_v16, %v1003_v27 }
  0xa1   : > { %v7657_v44 = vpop.permute.xlu2 %5683  ;;  %v997_v11 = vsel %vm980_vm2, %v994_v49, %v996_v35 }
  0xa2   : > { %12177 = vst [vmem:[#allocation15_spill] sm:$0xff] %v7657_v44  ;;  %5838 = vrot.lane.b32.xlu0 %v5752_v37, %s7188_s25  ;;  %v7662_v31 = vpop.permute.xlu1 %5633  ;;  %v998_v37 = vrot.slane %v7314_v19, 3 }
  0xa3   : > { %12178 = vst [vmem:[#allocation16_spill] sm:$0xff] %v7662_v31 }
  0xa4   : > { %v7666_v55 = vpop.permute.xlu0 %5628  ;;  %v999_v36 = vsel %vm980_vm2, %v996_v35, %v998_v37  ;;  %v1001_v28 = vsel %vm980_vm2, %v998_v37, %v1000_v22  ;;  %v1008_v22 = vrot.slane %v7341_v39, 3  ;;  %v1010_v37 = vrot.slane %v7344_v40, 3 }
  0xa5   : > { %12179 = vst [vmem:[#allocation17_spill] sm:$0xff] %v7666_v55  ;;  %v5872_v31 = vpack.i.bf16 %v1001_v28, %v999_v36  ;;  %v1014_v55 = vrot.slane %v7395_v17, 3 }
  0xa6   : > { %v1011_v16 = vsel %vm980_vm2, %v1008_v22, %v1010_v37  ;;  %v1013_v36 = vsel %vm980_vm2, %v1010_v37, %v1012_v52  ;;  %v1022_v37 = vrot.slane %v7377_v61, 3 }
  0xa7   : > { %5863 = vrot.lane.b32.xlu2 %v5862_v54, %s7189_s26  ;;  %v995_v54 = vsel %vm980_vm2, %v992_v13, %v994_v49  ;;  %v1006_v13 = vrot.slane %v7354_v43, 3  ;;  %v1015_v35 = vsel %vm980_vm2, %v1012_v52, %v1014_v55  ;;  %v1020_v52 = vrot.slane %v7374_v60, 3 }
  0xa8   : > { %5858 = vrot.lane.b32.xlu1 %v5857_v15, %s7189_s26 }
  0xa9   : > { %v7678_v29 = vpop.permute.xlu2 %5698 }
  0xaa   : > { %12180 = vst [vmem:[#allocation18_spill] sm:$0xff] %v7678_v29  ;;  %5853 = vrot.lane.b32.xlu0 %v5852_v46, %s7189_s26  ;;  %v7683_v18 = vpop.permute.xlu1 %5648  ;;  %v1016_v29 = vrot.slane %v7384_v63, 3  ;;  %v5867_v46 = vpack.i.bf16 %v997_v11, %v995_v54  ;;  %v1009_v11 = vsel %vm980_vm2, %v1006_v13, %v1008_v22 }
  0xab   : > { %12181 = vst [vmem:[#allocation19_spill] sm:$0xff] %v7683_v18  ;;  %v5887_v18 = vpack.i.bf16 %v1013_v36, %v1011_v16 }
  0xac   : > { %v7687_v15 = vpop.permute.xlu0 %5643  ;;  %v1017_v49 = vsel %vm980_vm2, %v1014_v55, %v1016_v29  ;;  %v1024_v55 = vrot.slane %v7380_v62, 3 }
  0xad   : > { %12182 = vst [vmem:[#allocation20_spill] sm:$0xff] %v7687_v15  ;;  %v5892_v54 = vpack.i.bf16 %v1017_v49, %v1015_v35  ;;  %v1026_v15 = vrot.slane %v7428_v47, 3  ;;  %v1023_v49 = vsel %vm980_vm2, %v1020_v52, %v1022_v37 }
  0xae   : > { %v1025_v16 = vsel %vm980_vm2, %v1022_v37, %v1024_v55  ;;  %v12188_v37 = vld [vmem:[#allocation3_spill] sm:$0xff] }
  0xaf   : > { %5878 = vrot.lane.b32.xlu2 %v5877_v53, %s7189_s26  ;;  %v1007_v53 = vsel %vm980_vm2, %v1004_v10, %v1006_v13  ;;  %v1018_v10 = vrot.slane %v7387_v3, 3  ;;  %v1027_v22 = vsel %vm980_vm2, %v1024_v55, %v1026_v15  ;;  %v5902_v56 = vpack.i.bf16 %v1025_v16, %v1023_v49 }
  0xb0   : > { %5873 = vrot.lane.b32.xlu1 %v5872_v31, %s7189_s26  ;;  %v1032_v55 = vrot.slane %v7407_v30, 3 }
  0xb1   : > { %v7699_v27 = vpop.permute.xlu2 %5713 }
  0xb2   : > { %12183 = vst [vmem:[#allocation21_spill] sm:$0xff] %v7699_v27  ;;  %5868 = vrot.lane.b32.xlu0 %v5867_v46, %s7189_s26  ;;  %v7704_v28 = vpop.permute.xlu1 %5663  ;;  %v1028_v27 = vrot.slane %v7417_v33, 3  ;;  %v5882_v46 = vpack.i.bf16 %v1009_v11, %v1007_v53  ;;  %v1021_v11 = vsel %vm980_vm2, %v1018_v10, %v1020_v52 }
  0xb3   : > { %12184 = vst [vmem:[#allocation22_spill] sm:$0xff] %v7704_v28 }
  0xb4   : > { %v7708_v31 = vpop.permute.xlu0 %5658  ;;  %v1029_v13 = vsel %vm980_vm2, %v1026_v15, %v1028_v27  ;;  %v1036_v15 = vrot.slane %v7413_v32, 3 }
  0xb5   : > { %12185 = vst [vmem:[#allocation23_spill] sm:$0xff] %v7708_v31  ;;  %v5907_v53 = vpack.i.bf16 %v1029_v13, %v1027_v22  ;;  %v12189_v22 = vld [vmem:[#allocation4_spill] sm:$0xff] }
  0xb7   : > { %5893 = vrot.lane.b32.xlu2 %v5892_v54, %s7189_s26  ;;  %v1019_v54 = vsel %vm980_vm2, %v1016_v29, %v1018_v10  ;;  %v1030_v29 = vrot.slane %v12189_v22, 3 }
  0xb8   : > { %5888 = vrot.lane.b32.xlu1 %v5887_v18, %s7189_s26  ;;  %v5897_v28 = vpack.i.bf16 %v1021_v11, %v1019_v54 }
  0xb9   : > { %v7720_v35 = vpop.permute.xlu2 %5728  ;;  %v1033_v11 = vsel %vm980_vm2, %v1030_v29, %v1032_v55 }
  0xba   : > { %12186 = vst [vmem:[#allocation24_spill] sm:$0xff] %v7720_v35  ;;  %5883 = vrot.lane.b32.xlu0 %v5882_v46, %s7189_s26  ;;  %v7725_v36 = vpop.permute.xlu1 %5678  ;;  %v1038_v35 = vrot.slane %v7461_v24, 3  ;;  %v1034_v46 = vrot.slane %v12188_v37, 3 }
  0xbb   : > { %12187 = vst [vmem:[#allocation25_spill] sm:$0xff] %v7725_v36 }
  0xbc   : > { %v7729_v18 = vpop.permute.xlu0 %5673  ;;  %v1039_v52 = vsel %vm980_vm2, %v1036_v15, %v1038_v35  ;;  %v1041_v10 = vsel %vm980_vm2, %v1038_v35, %v1040_v34  ;;  %v1035_v49 = vsel %vm980_vm2, %v1032_v55, %v1034_v46  ;;  %v1037_v16 = vsel %vm980_vm2, %v1034_v46, %v1036_v15 }
  0xbd   : > { %v5922_v54 = vpack.i.bf16 %v1041_v10, %v1039_v52  ;;  %v5917_v44 = vpack.i.bf16 %v1037_v16, %v1035_v49  ;;  %v1048_v35 = vrot.slane %v7446_v59, 3  ;;  %v1044_v15 = vrot.slane %v7440_v57, 3 }
  0xbf   : > { %5908 = vrot.lane.b32.xlu2 %v5907_v53, %s7189_s26  ;;  %v1031_v53 = vsel %vm980_vm2, %v1028_v27, %v1030_v29  ;;  %v1042_v27 = vrot.slane %v7453_v5, 3  ;;  %v1051_v55 = vsel %vm980_vm2, %v1048_v35, %v1050_v12  ;;  %v1053_v29 = vsel %vm980_vm2, %v1050_v12, %v1052_v23 }
  0xc0   : > { %5903 = vrot.lane.b32.xlu1 %v5902_v56, %s7189_s26  ;;  %v5912_v46 = vpack.i.bf16 %v1033_v11, %v1031_v53  ;;  %v5937_v53 = vpack.i.bf16 %v1053_v29, %v1051_v55  ;;  %v1170_v23 = vrot.slane %v7295_v8, 4  ;;  %v1172_v12 = vrot.slane %v7320_v21, 4 }
  0xc1   : > { %v7741_v13 = vpop.permute.xlu2 %5743  ;;  %v1045_v11 = vsel %vm980_vm2, %v1042_v27, %v1044_v15 }
  0xc2   : > { %5898 = vrot.lane.b32.xlu0 %v5897_v28, %s7189_s26  ;;  %v7746_v31 = vpop.permute.xlu1 %5693  ;;  %v1046_v28 = vrot.slane %v7443_v58, 3  ;;  %v1173_v8 = vsel %vm1162_vm3, %v1170_v23, %v1172_v12 }
  0xc3   : > { %12190 = vst [vmem:[#allocation3_spill] sm:$0xff] %v7746_v31 }
  0xc4   : > { %v7750_v56 = vpop.permute.xlu0 %5688  ;;  %v1047_v10 = vsel %vm980_vm2, %v1044_v15, %v1046_v28  ;;  %v1049_v49 = vsel %vm980_vm2, %v1046_v28, %v1048_v35  ;;  %v1166_v35 = vrot.slane %v7289_v6, 4  ;;  %v1168_v28 = vrot.slane %v7292_v7, 4 }
  0xc5   : > { %12191 = vst [vmem:[#allocation4_spill] sm:$0xff] %v7750_v56  ;;  %v5932_v31 = vpack.i.bf16 %v1049_v49, %v1047_v10  ;;  %v1164_v15 = vrot.slane %v7326_v26, 4  ;;  %v1182_v10 = vrot.slane %v7317_v20, 4  ;;  %v1184_v49 = vrot.slane %v7362_v51, 4 }
  0xc6   : > { %v1171_v6 = vsel %vm1162_vm3, %v1168_v28, %v1170_v23 }
  0xc7   : > { %5923 = vrot.lane.b32.xlu2 %v5922_v54, %s7189_s26  ;;  %v1043_v54 = vsel %vm980_vm2, %v1040_v34, %v1042_v27  ;;  %v1163_v34 = vrot.slane %v7307_v14, 4  ;;  %v1167_v26 = vsel %vm1162_vm3, %v1164_v15, %v1166_v35  ;;  %v1185_v20 = vsel %vm1162_vm3, %v1182_v10, %v1184_v49 }
  0xc8   : > { %5918 = vrot.lane.b32.xlu1 %v5917_v44, %s7189_s26 }
  0xc9   : > { %v7762_v52 = vpop.permute.xlu2 %5758  ;;  %v1165_v14 = vsel %vm1162_vm3, %v1163_v34, %v1164_v15 }
  0xca   : > { %12192 = vst [vmem:[#allocation26_spill] sm:$0xff] %v7762_v52  ;;  %5913 = vrot.lane.b32.xlu0 %v5912_v46, %s7189_s26  ;;  %v7767_v16 = vpop.permute.xlu1 %5708  ;;  %v1174_v52 = vrot.slane %v7277_v0, 4  ;;  %v5927_v46 = vpack.i.bf16 %v1045_v11, %v1043_v54  ;;  %v1169_v0 = vsel %vm1162_vm3, %v1166_v35, %v1168_v28  ;;  %v1178_v54 = vrot.slane %v7283_v2, 4 }
  0xcb   : > { %12193 = vst [vmem:[#allocation27_spill] sm:$0xff] %v7767_v16  ;;  %v7797_v29 = vpack.i.bf16 %v1171_v6, %v1169_v0  ;;  %v1180_v11 = vrot.slane %v7314_v19, 4  ;;  %v5942_v23 = vpack.i.bf16 %v1167_v26, %v1165_v14  ;;  %v1198_v0 = vrot.slane %v7384_v63, 4 }
  0xcc   : > { %v7771_v44 = vpop.permute.xlu0 %5703  ;;  %v1175_v21 = vsel %vm1162_vm3, %v1172_v12, %v1174_v52  ;;  %v1176_v12 = vrot.slane %v7280_v1, 4  ;;  %v1190_v6 = vrot.slane %v7341_v39, 4  ;;  %v1192_v14 = vrot.slane %v7344_v40, 4 }
  0xcd   : > { %12194 = vst [vmem:[#allocation28_spill] sm:$0xff] %v7771_v44  ;;  %v7791_v55 = vpack.i.bf16 %v1175_v21, %v1173_v8  ;;  %v1181_v2 = vsel %vm1162_vm3, %v1178_v54, %v1180_v11  ;;  %v1183_v19 = vsel %vm1162_vm3, %v1180_v11, %v1182_v10  ;;  %v1194_v8 = vrot.slane %v7347_v41, 4 }
  0xce   : > { %v1177_v1 = vsel %vm1162_vm3, %v1174_v52, %v1176_v12  ;;  %v7824_v15 = vpack.i.bf16 %v1183_v19, %v1181_v2  ;;  %v1196_v21 = vrot.slane %v7395_v17, 4  ;;  %v1188_v52 = vrot.slane %v7354_v43, 4 }
  0xcf   : > { %5938 = vrot.lane.b32.xlu2 %v5937_v53, %s7189_s26  ;;  %v1186_v53 = vrot.slane %v7351_v42, 4  ;;  %v1193_v39 = vsel %vm1162_vm3, %v1190_v6, %v1192_v14  ;;  %v1195_v40 = vsel %vm1162_vm3, %v1192_v14, %v1194_v8  ;;  %v1202_v2 = vrot.slane %v7374_v60, 4 }
  0xd0   : > { %5933 = vrot.lane.b32.xlu1 %v5932_v31, %s7189_s26  ;;  %v1197_v41 = vsel %vm1162_vm3, %v1194_v8, %v1196_v21  ;;  %v1199_v17 = vsel %vm1162_vm3, %v1196_v21, %v1198_v0  ;;  %v1204_v19 = vrot.slane %v7377_v61, 4 }
  0xd1   : > { %v7784_v27 = vpop.permute.xlu2 %5773  ;;  %v1187_v51 = vsel %vm1162_vm3, %v1184_v49, %v1186_v53  ;;  %v7848_v49 = vpack.i.bf16 %v1199_v17, %v1197_v41  ;;  %v1189_v43 = vsel %vm1162_vm3, %v1186_v53, %v1188_v52  ;;  %v1200_v53 = vrot.slane %v7387_v3, 4 }
  0xd2   : > { %12195 = vst [vmem:[#allocation29_spill] sm:$0xff] %v7784_v27  ;;  %5928 = vrot.lane.b32.xlu0 %v5927_v46, %s7189_s26  ;;  %v7789_v7 = vpop.permute.xlu1 %5723  ;;  %v7818_v28 = vpack.i.bf16 %v1187_v51, %v1185_v20  ;;  %v1179_v46 = vsel %vm1162_vm3, %v1176_v12, %v1178_v54  ;;  %v1191_v54 = vsel %vm1162_vm3, %v1188_v52, %v1190_v6  ;;  %v1206_v12 = vrot.slane %v7380_v62, 4 }
  0xd3   : > { %12196 = vst [vmem:[#allocation30_spill] sm:$0xff] %v7789_v7  ;;  %v7831_v26 = vpack.i.bf16 %v1179_v46, %v1177_v1  ;;  %v1208_v20 = vrot.slane %v7428_v47, 4  ;;  %v1210_v51 = vrot.slane %v7417_v33, 4  ;;  %v7861_v1 = vpack.i.bf16 %v1191_v54, %v1189_v43 }
  0xd4   : > { %v7795_v31 = vpop.permute.xlu0 %5718  ;;  %v1205_v60 = vsel %vm1162_vm3, %v1202_v2, %v1204_v19  ;;  %v1207_v61 = vsel %vm1162_vm3, %v1204_v19, %v1206_v12  ;;  %v1201_v3 = vsel %vm1162_vm3, %v1198_v0, %v1200_v53  ;;  %v1203_v21 = vsel %vm1162_vm3, %v1200_v53, %v1202_v2 }
  0xd5   : > { %12197 = vst [vmem:[#allocation31_spill] sm:$0xff] %v7795_v31  ;;  %v1209_v62 = vsel %vm1162_vm3, %v1206_v12, %v1208_v20  ;;  %v1211_v47 = vsel %vm1162_vm3, %v1208_v20, %v1210_v51  ;;  %v7884_v14 = vpack.i.bf16 %v1207_v61, %v1205_v60  ;;  %v1218_v52 = vrot.slane %v7413_v32, 4 }
  0xd6   : > { %v7878_v8 = vpack.i.bf16 %v1211_v47, %v1209_v62  ;;  %v1220_v41 = vrot.slane %v7461_v24, 4  ;;  %v1222_v17 = vrot.slane %v7450_v4, 4  ;;  %v5987_v43 = vpack.i.bf16 %v1203_v21, %v1201_v3 }
  0xd7   : > { %5953 = vrot.lane.b32.xlu2 %v7791_v55, %s7190_s27  ;;  %v1212_v0 = vrot.slane %v12189_v22, 4  ;;  %v1230_v53 = vrot.slane %v7446_v59, 4  ;;  %v1232_v62 = vrot.slane %v7623_v50, 4  ;;  %v1234_v47 = vrot.slane %v7626_v38, 4 }
  0xd8   : > { %5948 = vrot.lane.b32.xlu1 %v7797_v29, %s7190_s27  ;;  %v1221_v54 = vsel %vm1162_vm3, %v1218_v52, %v1220_v41  ;;  %v1223_v32 = vsel %vm1162_vm3, %v1220_v41, %v1222_v17  ;;  %v1226_v60 = vrot.slane %v7440_v57, 4  ;;  %v1228_v61 = vrot.slane %v7443_v58, 4 }
  0xd9   : > { %v7811_v35 = vpop.permute.xlu2 %5788  ;;  %v6012_v12 = vpack.i.bf16 %v1223_v32, %v1221_v54  ;;  %v1213_v22 = vsel %vm1162_vm3, %v1210_v51, %v1212_v0  ;;  %v1224_v51 = vrot.slane %v7453_v5, 4  ;;  %v1233_v21 = vsel %vm1162_vm3, %v1230_v53, %v1232_v62 }
  0xda   : > { %12198 = vst [vmem:[#allocation32_spill] sm:$0xff] %v7811_v35  ;;  %5943 = vrot.lane.b32.xlu0 %v5942_v23, %s7190_s27  ;;  %v7816_v42 = vpop.permute.xlu1 %5738  ;;  %v7854_v23 = vpack.i.bf16 %v1195_v40, %v1193_v39  ;;  %v1214_v39 = vrot.slane %v7407_v30, 4  ;;  %v1216_v40 = vrot.slane %v12188_v37, 4  ;;  %v1235_v59 = vsel %vm1162_vm3, %v1232_v62, %v1234_v47  ;;  %v8103_v35 = vld [vmem:[%s7274_s22 + $0xa8] sm:$0xff] }
  0xdb   : > { %12199 = vst [vmem:[#allocation33_spill] sm:$0xff] %v7816_v42  ;;  %v1229_v41 = vsel %vm1162_vm3, %v1226_v60, %v1228_v61  ;;  %v1231_v57 = vsel %vm1162_vm3, %v1228_v61, %v1230_v53  ;;  %v1225_v5 = vsel %vm1162_vm3, %v1222_v17, %v1224_v51  ;;  %v8040_v42 = vld [vmem:[%s7274_s22 + $0x28] sm:$0xff] }
  0xdc   : > { %v7822_v34 = vpop.permute.xlu0 %5733  ;;  %v1217_v4 = vsel %vm1162_vm3, %v1214_v39, %v1216_v40  ;;  %v1219_v30 = vsel %vm1162_vm3, %v1216_v40, %v1218_v52  ;;  %v1215_v20 = vsel %vm1162_vm3, %v1212_v0, %v1214_v39  ;;  %v7929_v39 = vpack.i.bf16 %v1235_v59, %v1233_v21 }
  0xdd   : > { %12200 = vst [vmem:[#allocation34_spill] sm:$0xff] %v7822_v34  ;;  %v7909_v19 = vpack.i.bf16 %v1219_v30, %v1217_v4  ;;  %v6002_v3 = vpack.i.bf16 %v1215_v20, %v1213_v22  ;;  %v1227_v40 = vsel %vm1162_vm3, %v1224_v51, %v1226_v60  ;;  %v7935_v54 = vpack.i.bf16 %v1231_v57, %v1229_v41  ;;  %v8015_v57 = vld [vmem:[%s7274_s22 + $0x40] sm:$0xff] }
  0xde   : > { %v6017_v32 = vpack.i.bf16 %v1227_v40, %v1225_v5  ;;  %v8023_v40 = vld [vmem:[%s7274_s22 + $0x50] sm:$0xff] }
  0xdf   : > { %5968 = vrot.lane.b32.xlu2 %v7818_v28, %s7190_s27 }
  0xe0   : > { %5963 = vrot.lane.b32.xlu1 %v7824_v15, %s7190_s27 }
  0xe1   : > { %v7840_v10 = vpop.permute.xlu2 %5803 }
  0xe2   : > { %12201 = vst [vmem:[#allocation35_spill] sm:$0xff] %v7840_v10  ;;  %5958 = vrot.lane.b32.xlu0 %v7831_v26, %s7190_s27  ;;  %v7846_v63 = vpop.permute.xlu1 %5753  ;;  %v8060_v10 = vld [vmem:[%s7274_s22 + $0x70] sm:$0xff] }
  0xe3   : > { %12202 = vst [vmem:[#allocation36_spill] sm:$0xff] %v7846_v63  ;;  %v8142_v63 = vld [vmem:[%s7274_s22 + $0xd8] sm:$0xff] }
  0xe4   : > { %v7852_v11 = vpop.permute.xlu0 %5748 }
  0xe5   : > { %12203 = vst [vmem:[#allocation37_spill] sm:$0xff] %v7852_v11 }
  0xe7   : > { %5983 = vrot.lane.b32.xlu2 %v7848_v49, %s7190_s27 }
  0xe8   : > { %5978 = vrot.lane.b32.xlu1 %v7854_v23, %s7190_s27 }
  0xe9   : > { %v7870_v46 = vpop.permute.xlu2 %5818 }
  0xea   : > { %12204 = vst [vmem:[#allocation38_spill] sm:$0xff] %v7870_v46  ;;  %5973 = vrot.lane.b32.xlu0 %v7861_v1, %s7190_s27  ;;  %v7876_v33 = vpop.permute.xlu1 %5768 }
  0xeb   : > { %12205 = vst [vmem:[#allocation39_spill] sm:$0xff] %v7876_v33 }
  0xec   : > { %v7882_v6 = vpop.permute.xlu0 %5763 }
  0xef   : > { %5998 = vrot.lane.b32.xlu2 %v7878_v8, %s7190_s27 }
  0xf0   : > { %5993 = vrot.lane.b32.xlu1 %v7884_v14, %s7190_s27 }
  0xf1   : > { %v7898_v24 = vpop.permute.xlu2 %5833 }
  0xf2   : > { %5988 = vrot.lane.b32.xlu0 %v5987_v43, %s7190_s27  ;;  %v7903_v37 = vpop.permute.xlu1 %5783 }
  0xf3   : > { %12206 = vst [vmem:[#allocation40_spill] sm:$0xff] %v7903_v37 }
  0xf4   : > { %v7907_v2 = vpop.permute.xlu0 %5778 }
  0xf5   : > { %12207 = vst [vmem:[#allocation41_spill] sm:$0xff] %v7907_v2 }
  0xf7   : > { %6013 = vrot.lane.b32.xlu2 %v6012_v12, %s7190_s27 }
  0xf8   : > { %6008 = vrot.lane.b32.xlu1 %v7909_v19, %s7190_s27 }
  0xf9   : > { %v7922_v52 = vpop.permute.xlu2 %5848 }
  0xfa   : > { %12208 = vst [vmem:[#allocation42_spill] sm:$0xff] %v7922_v52  ;;  %6003 = vrot.lane.b32.xlu0 %v6002_v3, %s7190_s27  ;;  %v7927_v58 = vpop.permute.xlu1 %5798 }
  0xfb   : > { %12209 = vst [vmem:[#allocation43_spill] sm:$0xff] %v7927_v58 }
  0xfc   : > { %v7933_v0 = vpop.permute.xlu0 %5793 }
  0xfd   : > { %12210 = vst [vmem:[#allocation44_spill] sm:$0xff] %v7933_v0 }
  0xff   : > { %6028 = vrot.lane.b32.xlu2 %v7929_v39, %s7190_s27 }
 0x100   : > { %6023 = vrot.lane.b32.xlu1 %v7935_v54, %s7190_s27 }
 0x101   : > { %v7941_v4 = vpop.permute.xlu2 %5863 }
 0x102   : > { %12211 = vst [vmem:[#allocation45_spill] sm:$0xff] %v7941_v4  ;;  %6018 = vrot.lane.b32.xlu0 %v6017_v32, %s7190_s27  ;;  %v7944_v30 = vpop.permute.xlu1 %5813 }
 0x103   : > { %12212 = vst [vmem:[#allocation46_spill] sm:$0xff] %v7944_v30 }
 0x104   : > { %v7946_v17 = vpop.permute.xlu0 %5808 }
 0x105   : > { %12213 = vst [vmem:[#allocation47_spill] sm:$0xff] %v7946_v17 }
 0x107   : > { %6043 = vrot.lane.b32.xlu2 %v7831_v26, %s7191_s28 }
 0x108   : > { %6038 = vrot.lane.b32.xlu1 %v7791_v55, %s7191_s28 }
 0x109   : > { %v7952_v22 = vpop.permute.xlu2 %5878 }
 0x10a   : > { %12214 = vst [vmem:[#allocation48_spill] sm:$0xff] %v7952_v22  ;;  %6033 = vrot.lane.b32.xlu0 %v7797_v29, %s7191_s28  ;;  %v7956_v20 = vpop.permute.xlu1 %5828 }
 0x10b   : > { %12215 = vst [vmem:[#allocation49_spill] sm:$0xff] %v7956_v20 }
 0x10c   : > { %v7958_v53 = vpop.permute.xlu0 %5823 }
 0x10d   : > { %12216 = vst [vmem:[#allocation50_spill] sm:$0xff] %v7958_v53  ;;  %v1460_v53 = vrot.slane %v8040_v42, 5 }
 0x10f   : > { %6058 = vrot.lane.b32.xlu2 %v7861_v1, %s7191_s28 }
 0x110   : > { %6053 = vrot.lane.b32.xlu1 %v7818_v28, %s7191_s28 }
 0x111   : > { %v7964_v26 = vpop.permute.xlu2 %5893 }
 0x112   : > { %12217 = vst [vmem:[#allocation51_spill] sm:$0xff] %v7964_v26  ;;  %6048 = vrot.lane.b32.xlu0 %v7824_v15, %s7191_s28  ;;  %v7968_v55 = vpop.permute.xlu1 %5843 }
 0x113   : > { %12218 = vst [vmem:[#allocation52_spill] sm:$0xff] %v7968_v55 }
 0x114   : > { %v7970_v29 = vpop.permute.xlu0 %5838 }
 0x115   : > { %12219 = vst [vmem:[#allocation53_spill] sm:$0xff] %v7970_v29 }
 0x117   : > { %6073 = vrot.lane.b32.xlu2 %v5987_v43, %s7191_s28  ;;  %v7989_v43 = vld [vmem:[%s7274_s22 + $0x138] sm:$0xff] }
 0x118   : > { %6068 = vrot.lane.b32.xlu1 %v7848_v49, %s7191_s28  ;;  %v7992_v49 = vld [vmem:[%s7274_s22 + $0x140] sm:$0xff]  ;;  %v1346_v61 = vrot.slane %v7989_v43, 4  ;;  %v1528_v25 = vrot.slane %v7989_v43, 5 }
 0x119   : > { %v7975_v62 = vpop.permute.xlu2 %5908 }
 0x11a   : > { %12220 = vst [vmem:[#allocation54_spill] sm:$0xff] %v7975_v62  ;;  %6063 = vrot.lane.b32.xlu0 %v7854_v23, %s7191_s28  ;;  %v7979_v28 = vpop.permute.xlu1 %5858 }
 0x11b   : > { %12221 = vst [vmem:[#allocation55_spill] sm:$0xff] %v7979_v28 }
 0x11c   : > { %v7981_v1 = vpop.permute.xlu0 %5853 }
 0x11f   : > { %6088 = vrot.lane.b32.xlu2 %v6002_v3, %s7191_s28  ;;  %v1347_v3 = vsel %vm1162_vm3, %v1234_v47, %v1346_v61  ;;  %v8019_v47 = vld [vmem:[%s7274_s22 + $0x48] sm:$0xff] }
 0x120   : > { %6083 = vrot.lane.b32.xlu1 %v7878_v8, %s7191_s28  ;;  %v1348_v8 = vrot.slane %v7992_v49, 4  ;;  %v1468_v5 = vrot.slane %v8019_v47, 5 }
 0x121   : > { %v7986_v15 = vpop.permute.xlu2 %5923 }
 0x122   : > { %6078 = vrot.lane.b32.xlu0 %v7884_v14, %s7191_s28  ;;  %v7996_v23 = vpop.permute.xlu1 %5873  ;;  %v1349_v14 = vsel %vm1162_vm3, %v1346_v61, %v1348_v8  ;;  %v8031_v8 = vld [vmem:[%s7274_s22 + $0x38] sm:$0xff] }
 0x123   : > { %12222 = vst [vmem:[#allocation56_spill] sm:$0xff] %v7996_v23  ;;  %v6117_v59 = vpack.i.bf16 %v1349_v14, %v1347_v3  ;;  %v1464_v3 = vrot.slane %v8031_v8, 5  ;;  %v8036_v14 = vld [vmem:[%s7274_s22 + $0x20] sm:$0xff] }
 0x124   : > { %v7998_v60 = vpop.permute.xlu0 %5868  ;;  %v1459_v20 = vrot.slane %v8036_v14, 5 }
 0x125   : > { %12223 = vst [vmem:[#allocation57_spill] sm:$0xff] %v7998_v60 }
 0x127   : > { %6103 = vrot.lane.b32.xlu2 %v6017_v32, %s7191_s28  ;;  %v1470_v32 = vrot.slane %v8023_v40, 5 }
 0x128   : > { %6098 = vrot.lane.b32.xlu1 %v6012_v12, %s7191_s28  ;;  %v1466_v12 = vrot.slane %v8015_v57, 5 }
 0x129   : > { %v8006_v51 = vpop.permute.xlu2 %5938  ;;  %v1471_v62 = vsel %vm1458_vm4, %v1468_v5, %v1470_v32 }
 0x12a   : > { %12224 = vst [vmem:[#allocation58_spill] sm:$0xff] %v8006_v51  ;;  %6093 = vrot.lane.b32.xlu0 %v7909_v19, %s7191_s28  ;;  %v8010_v21 = vpop.permute.xlu1 %5888  ;;  %v8027_v19 = vld [vmem:[%s7274_s22 + $0x30] sm:$0xff]  ;;  %v1469_v34 = vsel %vm1458_vm4, %v1466_v12, %v1468_v5  ;;  %v1467_v30 = vsel %vm1458_vm4, %v1464_v3, %v1466_v12  ;;  %v8064_v12 = vld [vmem:[%s7274_s22 + $0x78] sm:$0xff] }
 0x12b   : > { %12225 = vst [vmem:[#allocation59_spill] sm:$0xff] %v8010_v21  ;;  %v1462_v61 = vrot.slane %v8027_v19, 5  ;;  %v6132_v17 = vpack.i.bf16 %v1471_v62, %v1469_v34  ;;  %v1478_v21 = vrot.slane %v8060_v10, 5  ;;  %v8072_v62 = vld [vmem:[%s7274_s22 + $0x60] sm:$0xff] }
 0x12c   : > { %v8012_v41 = vpop.permute.xlu0 %5883 }
 0x12d   : > { %12226 = vst [vmem:[#allocation60_spill] sm:$0xff] %v8012_v41  ;;  %v1463_v31 = vsel %vm1458_vm4, %v1460_v53, %v1462_v61 }
 0x12f   : > { %6118 = vrot.lane.b32.xlu2 %v6117_v59, %s7191_s28  ;;  %v1465_v59 = vsel %vm1458_vm4, %v1462_v61, %v1464_v3  ;;  %v1480_v3 = vrot.slane %v8064_v12, 5 }
 0x130   : > { %6113 = vrot.lane.b32.xlu1 %v7929_v39, %s7191_s28  ;;  %v1461_v39 = vsel %vm1458_vm4, %v1459_v20, %v1460_v53  ;;  %v6127_v26 = vpack.i.bf16 %v1467_v30, %v1465_v59  ;;  %v1474_v20 = vrot.slane %v8072_v62, 5  ;;  %v8076_v53 = vld [vmem:[%s7274_s22 + $0x68] sm:$0xff]  ;;  %v8081_v59 = vld [vmem:[%s7274_s22 + $0x58] sm:$0xff] }
 0x131   : > { %v8047_v46 = vpop.permute.xlu2 %5953  ;;  %v1476_v30 = vrot.slane %v8076_v53, 5  ;;  %v6122_v61 = vpack.i.bf16 %v1463_v31, %v1461_v39 }
 0x132   : > { %12227 = vst [vmem:[#allocation61_spill] sm:$0xff] %v8047_v46  ;;  %6108 = vrot.lane.b32.xlu0 %v7935_v54, %s7191_s28  ;;  %v8053_v7 = vpop.permute.xlu1 %5903  ;;  %v8068_v54 = vld [vmem:[%s7274_s22 + $0x80] sm:$0xff]  ;;  %v8181_v46 = vld [vmem:[%s7274_s22 + $0x108] sm:$0xff] }
 0x133   : > { %12228 = vst [vmem:[#allocation62_spill] sm:$0xff] %v8053_v7  ;;  %v1482_v34 = vrot.slane %v8068_v54, 5  ;;  %v1472_v7 = vrot.slane %v8081_v59, 5  ;;  %v1477_v31 = vsel %vm1458_vm4, %v1474_v20, %v1476_v30 }
 0x134   : > { %v8057_v5 = vpop.permute.xlu0 %5898 }
 0x135   : > { %12229 = vst [vmem:[#allocation63_spill] sm:$0xff] %v8057_v5  ;;  %v1481_v5 = vsel %vm1458_vm4, %v1478_v21, %v1480_v3  ;;  %v1483_v58 = vsel %vm1458_vm4, %v1480_v3, %v1482_v34  ;;  %v1475_v0 = vsel %vm1458_vm4, %v1472_v7, %v1474_v20 }
 0x136   : > { %v6147_v41 = vpack.i.bf16 %v1483_v58, %v1481_v5  ;;  %v8111_v5 = vld [vmem:[%s7274_s22 + $0x90] sm:$0xff] }
 0x137   : > { %6133 = vrot.lane.b32.xlu2 %v6132_v17, %s7192_s29  ;;  %v1479_v17 = vsel %vm1458_vm4, %v1476_v30, %v1478_v21  ;;  %v1492_v21 = vrot.slane %v8103_v35, 5  ;;  %v8107_v30 = vld [vmem:[%s7274_s22 + $0xb0] sm:$0xff] }
 0x138   : > { %6128 = vrot.lane.b32.xlu1 %v6127_v26, %s7192_s29  ;;  %v1473_v26 = vsel %vm1458_vm4, %v1470_v32, %v1472_v7  ;;  %v6142_v3 = vpack.i.bf16 %v1479_v17, %v1477_v31  ;;  %v1494_v58 = vrot.slane %v8107_v30, 5  ;;  %v1486_v32 = vrot.slane %v8111_v5, 5  ;;  %v8115_v7 = vld [vmem:[%s7274_s22 + $0x98] sm:$0xff]  ;;  %v8120_v31 = vld [vmem:[%s7274_s22 + $0x88] sm:$0xff] }
 0x139   : > { %v8087_v16 = vpop.permute.xlu2 %5968  ;;  %v1488_v20 = vrot.slane %v8115_v7, 5  ;;  %v1484_v17 = vrot.slane %v8120_v31, 5 }
 0x13a   : > { %12230 = vst [vmem:[#allocation64_spill] sm:$0xff] %v8087_v16  ;;  %6123 = vrot.lane.b32.xlu0 %v6122_v61, %s7192_s29  ;;  %v8092_v39 = vpop.permute.xlu1 %5918  ;;  %v8099_v16 = vld [vmem:[%s7274_s22 + $0xa0] sm:$0xff]  ;;  %v6137_v61 = vpack.i.bf16 %v1475_v0, %v1473_v26 }
 0x13b   : > { %12231 = vst [vmem:[#allocation65_spill] sm:$0xff] %v8092_v39  ;;  %v1490_v22 = vrot.slane %v8099_v16, 5  ;;  %v1489_v0 = vsel %vm1458_vm4, %v1486_v32, %v1488_v20  ;;  %v1487_v23 = vsel %vm1458_vm4, %v1484_v17, %v1486_v32  ;;  %v8154_v32 = vld [vmem:[%s7274_s22 + $0xc8] sm:$0xff] }
 0x13c   : > { %v8096_v44 = vpop.permute.xlu0 %5913 }
 0x13d   : > { %12232 = vst [vmem:[#allocation66_spill] sm:$0xff] %v8096_v44  ;;  %v1493_v39 = vsel %vm1458_vm4, %v1490_v22, %v1492_v21  ;;  %v1495_v44 = vsel %vm1458_vm4, %v1492_v21, %v1494_v58 }
 0x13e   : > { %v6162_v52 = vpack.i.bf16 %v1495_v44, %v1493_v39  ;;  %v8150_v39 = vld [vmem:[%s7274_s22 + $0xc0] sm:$0xff] }
 0x13f   : > { %6148 = vrot.lane.b32.xlu2 %v6147_v41, %s7192_s29  ;;  %v1491_v41 = vsel %vm1458_vm4, %v1488_v20, %v1490_v22  ;;  %v1504_v22 = vrot.slane %v8142_v63, 5  ;;  %v8146_v20 = vld [vmem:[%s7274_s22 + $0xe0] sm:$0xff] }
 0x140   : > { %6143 = vrot.lane.b32.xlu1 %v6142_v3, %s7192_s29  ;;  %v1485_v3 = vsel %vm1458_vm4, %v1482_v34, %v1484_v17  ;;  %v6157_v21 = vpack.i.bf16 %v1491_v41, %v1489_v0  ;;  %v1506_v44 = vrot.slane %v8146_v20, 5  ;;  %v1498_v34 = vrot.slane %v8150_v39, 5  ;;  %v8159_v0 = vld [vmem:[%s7274_s22 + $0xb8] sm:$0xff] }
 0x141   : > { %v8126_v51 = vpop.permute.xlu2 %5983  ;;  %v6152_v17 = vpack.i.bf16 %v1487_v23, %v1485_v3  ;;  %v1496_v41 = vrot.slane %v8159_v0, 5 }
 0x142   : > { %12233 = vst [vmem:[#allocation67_spill] sm:$0xff] %v8126_v51  ;;  %6138 = vrot.lane.b32.xlu0 %v6137_v61, %s7192_s29  ;;  %v8131_v26 = vpop.permute.xlu1 %5933  ;;  %v8138_v51 = vld [vmem:[%s7274_s22 + $0xd0] sm:$0xff]  ;;  %v1500_v61 = vrot.slane %v8154_v32, 5  ;;  %v1507_v60 = vsel %vm1458_vm4, %v1504_v22, %v1506_v44 }
 0x143   : > { %12234 = vst [vmem:[#allocation68_spill] sm:$0xff] %v8131_v26  ;;  %v1502_v55 = vrot.slane %v8138_v51, 5  ;;  %v1499_v29 = vsel %vm1458_vm4, %v1496_v41, %v1498_v34 }
 0x144   : > { %v8135_v37 = vpop.permute.xlu0 %5928  ;;  %v1501_v23 = vsel %vm1458_vm4, %v1498_v34, %v1500_v61  ;;  %v8193_v34 = vld [vmem:[%s7274_s22 + $0xf8] sm:$0xff] }
 0x145   : > { %12235 = vst [vmem:[#allocation69_spill] sm:$0xff] %v8135_v37  ;;  %v1505_v26 = vsel %vm1458_vm4, %v1502_v55, %v1504_v22 }
 0x146   : > { %v6177_v2 = vpack.i.bf16 %v1507_v60, %v1505_v26  ;;  %v8189_v26 = vld [vmem:[%s7274_s22 + $0xf0] sm:$0xff] }
 0x147   : > { %6163 = vrot.lane.b32.xlu2 %v6162_v52, %s7192_s29  ;;  %v1503_v52 = vsel %vm1458_vm4, %v1500_v61, %v1502_v55  ;;  %v1516_v55 = vrot.slane %v8181_v46, 5  ;;  %v8185_v61 = vld [vmem:[%s7274_s22 + $0x110] sm:$0xff] }
 0x148   : > { %6158 = vrot.lane.b32.xlu1 %v6157_v21, %s7192_s29  ;;  %v1497_v21 = vsel %vm1458_vm4, %v1494_v58, %v1496_v41  ;;  %v6172_v22 = vpack.i.bf16 %v1503_v52, %v1501_v23  ;;  %v1518_v60 = vrot.slane %v8185_v61, 5  ;;  %v1510_v58 = vrot.slane %v8189_v26, 5  ;;  %v8198_v23 = vld [vmem:[%s7274_s22 + $0xe8] sm:$0xff] }
 0x149   : > { %v8165_v37 = vpop.permute.xlu2 %5998  ;;  %v6167_v41 = vpack.i.bf16 %v1499_v29, %v1497_v21  ;;  %v1508_v52 = vrot.slane %v8198_v23, 5 }
 0x14a   : > { %12236 = vst [vmem:[#allocation70_spill] sm:$0xff] %v8165_v37  ;;  %6153 = vrot.lane.b32.xlu0 %v6152_v17, %s7192_s29  ;;  %v8170_v3 = vpop.permute.xlu1 %5948  ;;  %v8177_v37 = vld [vmem:[%s7274_s22 + $0x100] sm:$0xff]  ;;  %v1512_v17 = vrot.slane %v8193_v34, 5  ;;  %v1519_v27 = vsel %vm1458_vm4, %v1516_v55, %v1518_v60 }
 0x14b   : > { %12237 = vst [vmem:[#allocation71_spill] sm:$0xff] %v8170_v3  ;;  %v1514_v56 = vrot.slane %v8177_v37, 5  ;;  %v1509_v21 = vsel %vm1458_vm4, %v1506_v44, %v1508_v52 }
 0x14c   : > { %v8174_v11 = vpop.permute.xlu0 %5943  ;;  %v1513_v3 = vsel %vm1458_vm4, %v1510_v58, %v1512_v17 }
 0x14d   : > { %v1517_v4 = vsel %vm1458_vm4, %v1514_v56, %v1516_v55  ;;  %v1515_v28 = vsel %vm1458_vm4, %v1512_v17, %v1514_v56  ;;  %v1526_v55 = vrot.slane %v7626_v38, 5  ;;  %v8219_v56 = vld [vmem:[%s7274_s22 + $0x120] sm:$0xff] }
 0x14e   : > { %v6192_v29 = vpack.i.bf16 %v1519_v27, %v1517_v4  ;;  %v6187_v36 = vpack.i.bf16 %v1515_v28, %v1513_v3  ;;  %v1522_v17 = vrot.slane %v8219_v56, 5  ;;  %v8225_v4 = vld [vmem:[%s7274_s22 + $0x118] sm:$0xff] }
 0x14f   : > { %6178 = vrot.lane.b32.xlu2 %v6177_v2, %s7192_s29  ;;  %v1520_v44 = vrot.slane %v8225_v4, 5  ;;  %v1529_v38 = vsel %vm1458_vm4, %v1526_v55, %v1528_v25 }
 0x150   : > { %6173 = vrot.lane.b32.xlu1 %v6172_v22, %s7192_s29  ;;  %v1511_v22 = vsel %vm1458_vm4, %v1508_v52, %v1510_v58 }
 0x151   : > { %v8204_v48 = vpop.permute.xlu2 %6013  ;;  %v6182_v27 = vpack.i.bf16 %v1511_v22, %v1509_v21  ;;  %v1521_v21 = vsel %vm1458_vm4, %v1518_v60, %v1520_v44  ;;  %v1523_v22 = vsel %vm1458_vm4, %v1520_v44, %v1522_v17  ;;  %v1641_v60 = vrot.slane %v8036_v14, 6 }
 0x152   : > { %12238 = vst [vmem:[#allocation72_spill] sm:$0xff] %v8204_v48  ;;  %6168 = vrot.lane.b32.xlu0 %v6167_v41, %s7192_s29  ;;  %v8209_v2 = vpop.permute.xlu1 %5963  ;;  %v1530_v48 = vrot.slane %v7992_v49, 5  ;;  %v1524_v41 = vrot.slane %v7623_v50, 5 }
 0x153   : > { %12239 = vst [vmem:[#allocation73_spill] sm:$0xff] %v8209_v2 }
 0x154   : > { %v8213_v33 = vpop.permute.xlu0 %5958  ;;  %v1531_v28 = vsel %vm1458_vm4, %v1528_v25, %v1530_v48  ;;  %v1525_v58 = vsel %vm1458_vm4, %v1522_v17, %v1524_v41  ;;  %v1527_v52 = vsel %vm1458_vm4, %v1524_v41, %v1526_v55  ;;  %v1648_v48 = vrot.slane %v8015_v57, 6 }
 0x155   : > { %v6202_v2 = vpack.i.bf16 %v1527_v52, %v1525_v58  ;;  %v1650_v25 = vrot.slane %v8019_v47, 6  ;;  %v1644_v55 = vrot.slane %v8027_v19, 6  ;;  %v1646_v41 = vrot.slane %v8031_v8, 6 }
 0x156   : > { %v1642_v17 = vrot.slane %v8040_v42, 6 }
 0x157   : > { %6193 = vrot.lane.b32.xlu2 %v6192_v29, %s7192_s29  ;;  %v6207_v29 = vpack.i.bf16 %v1531_v28, %v1529_v38  ;;  %v1651_v44 = vsel %vm1640_vm5, %v1648_v48, %v1650_v25  ;;  %v1649_v19 = vsel %vm1640_vm5, %v1646_v41, %v1648_v48  ;;  %v1656_v48 = vrot.slane %v8072_v62, 6 }
 0x158   : > { %6188 = vrot.lane.b32.xlu1 %v6187_v36, %s7192_s29 }
 0x159   : > { %v8231_v3 = vpop.permute.xlu2 %6028 }
 0x15a   : > { %12240 = vst [vmem:[#allocation74_spill] sm:$0xff] %v8231_v3  ;;  %6183 = vrot.lane.b32.xlu0 %v6182_v27, %s7192_s29  ;;  %v8236_v50 = vpop.permute.xlu1 %5978  ;;  %v1652_v3 = vrot.slane %v8023_v40, 6  ;;  %v6197_v27 = vpack.i.bf16 %v1523_v22, %v1521_v21  ;;  %v1647_v40 = vsel %vm1640_vm5, %v1644_v55, %v1646_v41  ;;  %v1645_v21 = vsel %vm1640_vm5, %v1642_v17, %v1644_v55 }
 0x15b   : > { %12241 = vst [vmem:[#allocation75_spill] sm:$0xff] %v8236_v50  ;;  %v6217_v22 = vpack.i.bf16 %v1649_v19, %v1647_v40  ;;  %v1662_v50 = vrot.slane %v8064_v12, 6  ;;  %v1658_v41 = vrot.slane %v8076_v53, 6  ;;  %v1674_v19 = vrot.slane %v8103_v35, 6 }
 0x15c   : > { %v8240_v36 = vpop.permute.xlu0 %5973  ;;  %v1653_v38 = vsel %vm1640_vm5, %v1650_v25, %v1652_v3  ;;  %v1660_v25 = vrot.slane %v8060_v10, 6 }
 0x15d   : > { %12242 = vst [vmem:[#allocation76_spill] sm:$0xff] %v8240_v36  ;;  %v6222_v52 = vpack.i.bf16 %v1653_v38, %v1651_v44  ;;  %v1664_v36 = vrot.slane %v8068_v54, 6  ;;  %v1659_v12 = vsel %vm1640_vm5, %v1656_v48, %v1658_v41 }
 0x15e   : > { %v1663_v55 = vsel %vm1640_vm5, %v1660_v25, %v1662_v50  ;;  %v1661_v54 = vsel %vm1640_vm5, %v1658_v41, %v1660_v25 }
 0x15f   : > { %6208 = vrot.lane.b32.xlu2 %v6207_v29, %s7192_s29  ;;  %v1643_v29 = vsel %vm1640_vm5, %v1641_v60, %v1642_v17  ;;  %v1654_v60 = vrot.slane %v8081_v59, 6  ;;  %v1665_v10 = vsel %vm1640_vm5, %v1662_v50, %v1664_v36  ;;  %v6232_v40 = vpack.i.bf16 %v1661_v54, %v1659_v12 }
 0x160   : > { %6203 = vrot.lane.b32.xlu1 %v6202_v2, %s7192_s29  ;;  %v6237_v53 = vpack.i.bf16 %v1665_v10, %v1663_v55  ;;  %v1672_v50 = vrot.slane %v8099_v16, 6  ;;  %v1684_v55 = vrot.slane %v8138_v51, 6  ;;  %v1686_v10 = vrot.slane %v8142_v63, 6 }
 0x161   : > { %v8253_v28 = vpop.permute.xlu2 %6043  ;;  %v1655_v44 = vsel %vm1640_vm5, %v1652_v3, %v1654_v60  ;;  %v1657_v59 = vsel %vm1640_vm5, %v1654_v60, %v1656_v48  ;;  %v1666_v3 = vrot.slane %v8120_v31, 6  ;;  %v1688_v12 = vrot.slane %v8146_v20, 6 }
 0x162   : > { %6198 = vrot.lane.b32.xlu0 %v6197_v27, %s7192_s29  ;;  %v8258_v58 = vpop.permute.xlu1 %5993  ;;  %v6212_v27 = vpack.i.bf16 %v1645_v21, %v1643_v29  ;;  %v1668_v29 = vrot.slane %v8111_v5, 6  ;;  %v1670_v21 = vrot.slane %v8115_v7, 6  ;;  %v1675_v25 = vsel %vm1640_vm5, %v1672_v50, %v1674_v19 }
 0x163   : > { %12243 = vst [vmem:[#allocation77_spill] sm:$0xff] %v8258_v58  ;;  %v1667_v41 = vsel %vm1640_vm5, %v1664_v36, %v1666_v3  ;;  %v1680_v54 = vrot.slane %v8150_v39, 6  ;;  %v1678_v36 = vrot.slane %v8159_v0, 6 }
 0x164   : > { %v8262_v2 = vpop.permute.xlu0 %5988  ;;  %v1671_v35 = vsel %vm1640_vm5, %v1668_v29, %v1670_v21  ;;  %v1669_v31 = vsel %vm1640_vm5, %v1666_v3, %v1668_v29  ;;  %v1698_v3 = vrot.slane %v8181_v46, 6 }
 0x165   : > { %12244 = vst [vmem:[#allocation78_spill] sm:$0xff] %v8262_v2  ;;  %v1681_v0 = vsel %vm1640_vm5, %v1678_v36, %v1680_v54 }
 0x167   : > { %6223 = vrot.lane.b32.xlu2 %v6222_v52, %s7193_s30  ;;  %v1676_v52 = vrot.slane %v8107_v30, 6  ;;  %v1673_v30 = vsel %vm1640_vm5, %v1670_v21, %v1672_v50 }
 0x168   : > { %6218 = vrot.lane.b32.xlu1 %v6217_v22, %s7193_s30  ;;  %v6227_v22 = vpack.i.bf16 %v1657_v59, %v1655_v44  ;;  %v6247_v60 = vpack.i.bf16 %v1673_v30, %v1671_v35  ;;  %v6242_v44 = vpack.i.bf16 %v1669_v31, %v1667_v41  ;;  %v1687_v59 = vsel %vm1640_vm5, %v1684_v55, %v1686_v10 }
 0x169   : > { %v8274_v17 = vpop.permute.xlu2 %6058  ;;  %v1677_v48 = vsel %vm1640_vm5, %v1674_v19, %v1676_v52  ;;  %v1679_v19 = vsel %vm1640_vm5, %v1676_v52, %v1678_v36  ;;  %v1694_v35 = vrot.slane %v8193_v34, 6  ;;  %v1690_v52 = vrot.slane %v8198_v23, 6  ;;  %v7064_v36 = vld [vmem:[%s7274_s22 + $0x130] sm:$0xff] }
 0x16a   : > { %6213 = vrot.lane.b32.xlu0 %v6212_v27, %s7193_s30  ;;  %v8279_v62 = vpop.permute.xlu1 %6008  ;;  %v6252_v7 = vpack.i.bf16 %v1677_v48, %v1675_v25  ;;  %v1700_v25 = vrot.slane %v8185_v61, 6  ;;  %v1692_v48 = vrot.slane %v8189_v26, 6  ;;  %v6257_v30 = vpack.i.bf16 %v1681_v0, %v1679_v19 }
 0x16b   : > { %12245 = vst [vmem:[#allocation79_spill] sm:$0xff] %v8279_v62  ;;  %v442_v62 = vld [vmem:[%s11983_s1 + $0x68] sm:$0xff] }
 0x16c   : > { %v8283_v38 = vpop.permute.xlu0 %6003  ;;  %v1701_v41 = vsel %vm1640_vm5, %v1698_v3, %v1700_v25  ;;  %v1695_v61 = vsel %vm1640_vm5, %v1692_v48, %v1694_v35 }
 0x16d   : > { %12246 = vst [vmem:[#allocation80_spill] sm:$0xff] %v8283_v38 }
 0x16f   : > { %6238 = vrot.lane.b32.xlu2 %v6237_v53, %s7193_s30  ;;  %v1682_v53 = vrot.slane %v8154_v32, 6 }
 0x170   : > { %6233 = vrot.lane.b32.xlu1 %v6232_v40, %s7193_s30  ;;  %v1689_v40 = vsel %vm1640_vm5, %v1686_v10, %v1688_v12  ;;  %v1691_v10 = vsel %vm1640_vm5, %v1688_v12, %v1690_v52  ;;  %v1702_v12 = vrot.slane %v8225_v4, 6 }
 0x171   : > { %v8295_v16 = vpop.permute.xlu2 %6073  ;;  %v1683_v63 = vsel %vm1640_vm5, %v1680_v54, %v1682_v53  ;;  %v1685_v50 = vsel %vm1640_vm5, %v1682_v53, %v1684_v55  ;;  %v6267_v32 = vpack.i.bf16 %v1689_v40, %v1687_v59  ;;  %v1693_v54 = vsel %vm1640_vm5, %v1690_v52, %v1692_v48 }
 0x172   : > { %12247 = vst [vmem:[#allocation81_spill] sm:$0xff] %v8295_v16  ;;  %6228 = vrot.lane.b32.xlu0 %v6227_v22, %s7193_s30  ;;  %v8300_v5 = vpop.permute.xlu1 %6023  ;;  %v6262_v21 = vpack.i.bf16 %v1685_v50, %v1683_v63  ;;  %v1696_v22 = vrot.slane %v8177_v37, 6  ;;  %v1708_v59 = vrot.slane %v7064_v36, 6  ;;  %v1710_v40 = vrot.slane %v7989_v43, 6 }
 0x173   : > { %v1712_v63 = vrot.slane %v7992_v49, 6  ;;  %v1704_v50 = vrot.slane %v8219_v56, 6  ;;  %v6272_v0 = vpack.i.bf16 %v1693_v54, %v1691_v10  ;;  %v429_v54 = vld [vmem:[%s11983_s1] sm:$0xff] }
 0x174   : > { %v8304_v27 = vpop.permute.xlu0 %6018  ;;  %v1697_v31 = vsel %vm1640_vm5, %v1694_v35, %v1696_v22  ;;  %v1703_v35 = vsel %vm1640_vm5, %v1700_v25, %v1702_v12 }
 0x175   : > { %v1705_v4 = vsel %vm1640_vm5, %v1702_v12, %v1704_v50  ;;  %v430_v12 = vld [vmem:[%s11983_s1 + $0x8] sm:$0xff] }
 0x177   : > { %6253 = vrot.lane.b32.xlu2 %v6252_v7, %s7193_s30  ;;  %v1699_v7 = vsel %vm1640_vm5, %v1696_v22, %v1698_v3  ;;  %v1713_v22 = vsel %vm1640_vm5, %v1710_v40, %v1712_v63  ;;  %v434_v63 = vld [vmem:[%s11983_s1 + $0x28] sm:$0xff] }
 0x178   : > { %6248 = vrot.lane.b32.xlu1 %v6247_v60, %s7193_s30  ;;  %v6282_v55 = vpack.i.bf16 %v1701_v41, %v1699_v7  ;;  %v6287_v7 = vpack.i.bf16 %v1705_v4, %v1703_v35 }
 0x179   : > { %v8316_v51 = vpop.permute.xlu2 %6088 }
 0x17a   : > { %12248 = vst [vmem:[#allocation82_spill] sm:$0xff] %v8316_v51  ;;  %6243 = vrot.lane.b32.xlu0 %v6242_v44, %s7193_s30  ;;  %v8321_v39 = vpop.permute.xlu1 %6038  ;;  %v6277_v44 = vpack.i.bf16 %v1697_v31, %v1695_v61  ;;  %v5675_v51 = vunpack.i.l.bf16 %v7729_v18 }
 0x17c   : > { %v8325_v29 = vpop.permute.xlu0 %6033 }
 0x17f   : > { %6268 = vrot.lane.b32.xlu2 %v6267_v32, %s7193_s30  ;;  %v7065_v32 = vld [vmem:[%s7274_s22 + $0x128] sm:$0xff] }
 0x180   : > { %6263 = vrot.lane.b32.xlu1 %v6262_v21, %s7193_s30  ;;  %v1706_v19 = vrot.slane %v7065_v32, 6  ;;  %v1711_v21 = vsel %vm1640_vm5, %v1708_v59, %v1710_v40 }
 0x181   : > { %v8337_v46 = vpop.permute.xlu2 %6103  ;;  %v6297_v48 = vpack.i.bf16 %v1713_v22, %v1711_v21  ;;  %v437_v21 = vld [vmem:[%s11983_s1 + $0x40] sm:$0xff] }
 0x182   : > { %6258 = vrot.lane.b32.xlu0 %v6257_v30, %s7193_s30  ;;  %v8342_v60 = vpop.permute.xlu1 %6053  ;;  %v1707_v43 = vsel %vm1640_vm5, %v1704_v50, %v1706_v19  ;;  %v1709_v49 = vsel %vm1640_vm5, %v1706_v19, %v1708_v59 }
 0x183   : > { %v6292_v52 = vpack.i.bf16 %v1709_v49, %v1707_v43  ;;  %v2140_v43 = vld [vmem:[%s11984_s2 + $0x10] sm:$0x3] }
 0x184   : > { %v8346_v53 = vpop.permute.xlu0 %6048 }
 0x187   : > { %6283 = vrot.lane.b32.xlu2 %v6282_v55, %s7193_s30 }
 0x188   : > { %6278 = vrot.lane.b32.xlu1 %v6277_v44, %s7193_s30  ;;  %v7194_v44 = vmov 0  }
 0x189   : > { %v8358_v3 = vpop.permute.xlu2 %6118  ;;  %6302 = vset.pattern.permute.xlu0 %v7194_v44  ;;  %6304 = vset.pattern.permute.xlu2 %v7194_v44 }
 0x18a   : > { %6273 = vrot.lane.b32.xlu0 %v6272_v0, %s7193_s30  ;;  %v8363_v56 = vpop.permute.xlu1 %6068  ;;  %6303 = vset.pattern.permute.xlu1 %v7194_v44  ;;  %v431_v0 = vld [vmem:[%s11983_s1 + $0x10] sm:$0xff]  ;;  %v440_v44 = vld [vmem:[%s11983_s1 + $0x58] sm:$0xff] }
 0x18c   : > { %v8367_v30 = vpop.permute.xlu0 %6063 }
 0x18f   : > { %6298 = vrot.lane.b32.xlu2 %v6297_v48, %s7193_s30  ;;  %v2150_v48 = vunpack.c.l.b16 %v2140_v43  ;;  %v5543_v43 = vld [vmem:[%s11984_s2] sm:$0xff] }
 0x190   : > { %6293 = vrot.lane.b32.xlu1 %v6292_v52, %s7193_s30  ;;  %v433_v52 = vld [vmem:[%s11983_s1 + $0x20] sm:$0xff] }
 0x191   : > { %v8371_v41 = vpop.permute.xlu2 %6133  ;;  %v2153_v4 = vpack.c.b16 %v2150_v48, %v2150_v48  ;;  %v436_v48 = vld [vmem:[%s11983_s1 + $0x38] sm:$0xff] }
 0x192   : > { %6288 = vrot.lane.b32.xlu0 %v6287_v7, %s7193_s30  ;;  %v8374_v61 = vpop.permute.xlu1 %6083  ;;  %v432_v7 = vld [vmem:[%s11983_s1 + $0x18] sm:$0xff] }
 0x193   : > { %12249 = vst [vmem:[#allocation83_spill] sm:$0xff] %v8374_v61 }
 0x194   : > { %v8376_v31 = vpop.permute.xlu0 %6078 }
 0x195   : > { %12250 = vst [vmem:[#allocation84_spill] sm:$0xff] %v8376_v31  ;;  %v5766_v31 = vunpack.i.h.bf16 %v7882_v6 }
 0x197   : > { %2441 = vperm.xlu2 %6304, %v431_v0  }
 0x198   : > { %2436 = vperm.xlu1 %6303, %v430_v12  }
 0x199   : > { %v8378_v55 = vpop.permute.xlu2 %6148 }
 0x19a   : > { %v8380_v25 = vpop.permute.xlu1 %6098  ;;  %2431 = vperm.xlu0 %6302, %v429_v54   ;;  %v2212_v54 = vsel %vm1640_vm5, %v2153_v4, 0  ;;  %v435_v4 = vld [vmem:[%s11983_s1 + $0x30] sm:$0xff] }
 0x19b   : > { %12251 = vst [vmem:[#allocation85_spill] sm:$0xff] %v8380_v25  ;;  %2219 = vmatpush.bf16.msra.mxu0 %v2212_v54  ;;  %5549 = vmatpush.bf16.msra.mxu3 %v2212_v54  ;;  %v438_v25 = vld [vmem:[%s11983_s1 + $0x48] sm:$0xff] }
 0x19c   : > { %v8382_v10 = vpop.permute.xlu0 %6093 }
 0x19d   : > { %12252 = vst [vmem:[#allocation86_spill] sm:$0xff] %v8382_v10  ;;  %v441_v10 = vld [vmem:[%s11983_s1 + $0x60] sm:$0xff] }
 0x19f   : > { %2451 = vperm.xlu2 %6304, %v433_v52   ;;  %v443_v52 = vld [vmem:[%s11983_s1 + $0x70] sm:$0xff] }
 0x1a0   : > { %2446 = vperm.xlu1 %6303, %v432_v7  }
 0x1a1   : > { %v8387_v36 = vpop.permute.xlu2 %6163 }
 0x1a2   : > { %12253 = vst [vmem:[#allocation87_spill] sm:$0xff] %v8387_v36  ;;  %v8389_v59 = vpop.permute.xlu1 %6113  ;;  %2456 = vperm.xlu0 %6302, %v434_v63   ;;  %v5544_v63 = vld [vmem:[%s11984_s2 + $0x8] sm:$0xff]  ;;  %v5945_v36 = vunpack.i.l.bf16 %v8174_v11 }
 0x1a3   : > { %2220 = vmatpush.bf16.msra.mxu0 %v5544_v63  ;;  %5550 = vmatpush.bf16.msra.mxu3 %v5544_v63  ;;  %v439_v63 = vld [vmem:[%s11983_s1 + $0x50] sm:$0xff] }
 0x1a4   : > { %v8391_v40 = vpop.permute.xlu0 %6108 }
 0x1a7   : > { %2221 = vmatpush.bf16.msra.mxu0 %v5543_v43  ;;  %5551 = vmatpush.bf16.msra.mxu3 %v5543_v43  ;;  %v446_v43 = vld [vmem:[%s11983_s1 + $0x88] sm:$0xff] }
 0x1a8   : > { %2466 = vperm.xlu2 %6304, %v436_v48   ;;  %2461 = vperm.xlu1 %6303, %v435_v4  }
 0x1a9   : > { %v8396_v50 = vpop.permute.xlu2 %6178 }
 0x1aa   : > { %12254 = vst [vmem:[#allocation88_spill] sm:$0xff] %v8396_v50  ;;  %v8398_v32 = vpop.permute.xlu1 %6128  ;;  %2471 = vperm.xlu0 %6302, %v437_v21   ;;  %v5676_v50 = vunpack.i.h.bf16 %v7729_v18 }
 0x1ac   : > { %v8400_v19 = vpop.permute.xlu0 %6123 }
 0x1b0   : > { %2481 = vperm.xlu2 %6304, %v439_v63   ;;  %2476 = vperm.xlu1 %6303, %v438_v25   ;;  %v449_v63 = vld [vmem:[%s11983_s1 + $0xa0] sm:$0xff]  ;;  %v5656_v25 = vunpack.i.h.bf16 %v7620_v45 }
 0x1b1   : > { %v8411_v22 = vpop.permute.xlu2 %6193 }
 0x1b2   : > { %v8416_v49 = vpop.permute.xlu1 %6143  ;;  %2486 = vperm.xlu0 %6302, %v440_v44  }
 0x1b4   : > { %v8418_v35 = vpop.permute.xlu0 %6138 }
 0x1b8   : > { %2496 = vperm.xlu2 %6304, %v442_v62   ;;  %2491 = vperm.xlu1 %6303, %v441_v10   ;;  %v5765_v10 = vunpack.i.l.bf16 %v7882_v6 }
 0x1b9   : > { %v8433_v0 = vpop.permute.xlu2 %6208 }
 0x1ba   : > { %v8435_v12 = vpop.permute.xlu1 %6158  ;;  %2501 = vperm.xlu0 %6302, %v443_v52  }
 0x1bc   : > { %v8437_v21 = vpop.permute.xlu0 %6153 }
 0x1c1   : > { %v8451_v7 = vpop.permute.xlu2 %6223 }
 0x1c2   : > { %v8453_v54 = vpop.permute.xlu1 %6173  ;;  %2516 = vperm.xlu0 %6302, %v446_v43   ;;  %v5655_v43 = vunpack.i.l.bf16 %v7620_v45  ;;  %v5745_v45 = vunpack.i.l.bf16 %v7741_v13 }
 0x1c3   : > { %12255 = vst [vmem:[#allocation89_spill] sm:$0xff] %v8453_v54  ;;  %v5746_v54 = vunpack.i.h.bf16 %v7741_v13  ;;  %v5835_v13 = vunpack.i.l.bf16 %v7898_v24 }
 0x1c4   : > { %v8455_v44 = vpop.permute.xlu0 %6168  ;;  %v1851_v62 = vsel %vm1822_vm6, %v8146_v20, %v5655_v43  ;;  %v5856_v20 = vunpack.i.h.bf16 %v7981_v1 }
 0x1c5   : > { %12256 = vst [vmem:[#allocation90_spill] sm:$0xff] %v8455_v44  ;;  %v7067_v44 = vld [vmem:[%s7274_s22] sm:$0xff] }
 0x1c9   : > { %v8466_v48 = vpop.permute.xlu2 %6238 }
 0x1ca   : > { %v8468_v4 = vpop.permute.xlu1 %6188  ;;  %2531 = vperm.xlu0 %6302, %v449_v63   ;;  %v7066_v63 = vld [vmem:[%s7274_s22 + $0x8] sm:$0xff] }
 0x1cb   : > { %12257 = vst [vmem:[#allocation91_spill] sm:$0xff] %v8468_v4  ;;  %v5586_v4 = vunpack.i.h.bf16 %v7616_v9 }
 0x1cc   : > { %v8470_v52 = vpop.permute.xlu0 %6183 }
 0x1cd   : > { %12258 = vst [vmem:[#allocation92_spill] sm:$0xff] %v8470_v52  ;;  %v5585_v52 = vunpack.i.l.bf16 %v7616_v9  ;;  %v1852_v9 = vsel %vm1822_vm6, %v8198_v23, %v5656_v25  ;;  %v1824_v58 = vsel %vm1822_vm6, %v7066_v63, %v5586_v4  ;;  %v5836_v23 = vunpack.i.h.bf16 %v7898_v24  ;;  %v445_v4 = vld [vmem:[%s11983_s1 + $0x80] sm:$0xff] }
 0x1ce   : > { %v5855_v25 = vunpack.i.l.bf16 %v7981_v1  ;;  %v1889_v43 = vsel %vm1859_vm7, %v1852_v9, %v5746_v54  ;;  %v1888_v24 = vsel %vm1859_vm7, %v1851_v62, %v5745_v45  ;;  %v452_v1 = vld [vmem:[%s11983_s1 + $0xb8] sm:$0xff]  ;;  %2511 = vperm.xlu2 %6304, %v445_v4  }
 0x1cf   : > { %v1823_v18 = vsel %vm1822_vm6, %v7067_v44, %v5585_v52  ;;  %v444_v44 = vld [vmem:[%s11983_s1 + $0x78] sm:$0xff]  ;;  %v1861_v52 = vsel %vm1859_vm7, %v1824_v58, %v5676_v50  ;;  %v6036_v58 = vunpack.i.h.bf16 %v8325_v29  ;;  %v6035_v50 = vunpack.i.l.bf16 %v8325_v29 }
 0x1d0   : > { %v1860_v6 = vsel %vm1859_vm7, %v1823_v18, %v5675_v51  ;;  %v1898_v16 = vsel %vm1896_vm8, %v1861_v52, %v5766_v31  ;;  %v1925_v51 = vsel %vm1896_vm8, %v1888_v24, %v5835_v13  ;;  %2506 = vperm.xlu1 %6303, %v444_v44   ;;  %v1926_v54 = vsel %vm1896_vm8, %v1889_v43, %v5836_v23  ;;  %v12260_v23 = vld [vmem:[#allocation72_spill] sm:$0xff] }
 0x1d1   : > { %v8485_v38 = vpop.permute.xlu2 %6253  ;;  %v1897_v63 = vsel %vm1896_vm8, %v1860_v6, %v5765_v10  ;;  %v1935_v9 = vsel %vm1933_vm9, %v1898_v16, %v5856_v20  ;;  %v5925_v31 = vunpack.i.l.bf16 %v7986_v15  ;;  %v6126_v10 = vunpack.i.h.bf16 %v8400_v19 }
 0x1d2   : > { %12259 = vst [vmem:[#allocation93_spill] sm:$0xff] %v8485_v38  ;;  %v8491_v61 = vpop.permute.xlu1 %6203  ;;  %v5946_v38 = vunpack.i.h.bf16 %v8174_v11  ;;  %v1934_v45 = vsel %vm1933_vm9, %v1897_v63, %v5855_v25  ;;  %2546 = vperm.xlu0 %6302, %v452_v1   ;;  %v5926_v11 = vunpack.i.h.bf16 %v7986_v15  ;;  %v6125_v29 = vunpack.i.l.bf16 %v8400_v19 }
 0x1d3   : > { %v1971_v18 = vsel %vm1970_vm10, %v1934_v45, %v5945_v36  ;;  %v6016_v25 = vunpack.i.h.bf16 %v12260_v23  ;;  %v6015_v16 = vunpack.i.l.bf16 %v12260_v23  ;;  %v6106_v6 = vunpack.i.h.bf16 %v8337_v46  ;;  %v455_v45 = vld [vmem:[%s11983_s1 + $0xd0] sm:$0xff] }
 0x1d4   : > { %v8504_v2 = vpop.permute.xlu0 %6198  ;;  %v1972_v13 = vsel %vm1970_vm10, %v1935_v9, %v5946_v38  ;;  %v2008_v20 = vsel %vm2007_vm11, %v1971_v18, %v6035_v50  ;;  %v6105_v19 = vunpack.i.l.bf16 %v8337_v46  ;;  %v6196_v38 = vunpack.i.h.bf16 %v8411_v22  ;;  %v448_v46 = vld [vmem:[%s11983_s1 + $0x98] sm:$0xff]  ;;  %v447_v50 = vld [vmem:[%s11983_s1 + $0x90] sm:$0xff] }
 0x1d5   : > { %v2009_v4 = vsel %vm2007_vm11, %v1972_v13, %v6036_v58  ;;  %v2045_v43 = vsel %vm2044_vm12, %v2008_v20, %v6125_v29  ;;  %v6195_v1 = vunpack.i.l.bf16 %v8411_v22  ;;  %v1962_v9 = vsel %vm1933_vm9, %v1925_v51, %v5925_v31  ;;  %v12261_v29 = vld [vmem:[#allocation11_spill] sm:$0xff] }
 0x1d6   : > { %v2046_v24 = vsel %vm2044_vm12, %v2009_v4, %v6126_v10  ;;  %v1963_v22 = vsel %vm1933_vm9, %v1926_v54, %v5926_v11  ;;  %2526 = vperm.xlu2 %6304, %v448_v46   ;;  %v5591_v18 = vunpack.i.h.bf16 %v12261_v29  ;;  %v5590_v13 = vunpack.i.l.bf16 %v12261_v29  ;;  %v12262_v11 = vld [vmem:[#allocation25_spill] sm:$0xff]  ;;  %v12264_v46 = vld [vmem:[#allocation55_spill] sm:$0xff] }
 0x1d7   : > { %v1999_v23 = vsel %vm1970_vm10, %v1962_v9, %v6015_v16  ;;  %v2000_v20 = vsel %vm1970_vm10, %v1963_v22, %v6016_v25  ;;  %v5681_v31 = vunpack.i.h.bf16 %v12262_v11  ;;  %v7068_v22 = vld [vmem:[%s7274_s22 + $0x18] sm:$0xff]  ;;  %v7069_v29 = vld [vmem:[%s7274_s22 + $0x10] sm:$0xff] }
 0x1d8   : > { %2521 = vperm.xlu1 %6303, %v447_v50   ;;  %v5861_v50 = vunpack.i.h.bf16 %v12264_v46 }
 0x1d9   : > { %v8532_v62 = vpop.permute.xlu2 %6268 }
 0x1da   : > { %v8544_v44 = vpop.permute.xlu1 %6218  ;;  %2561 = vperm.xlu0 %6302, %v455_v45   ;;  %v5860_v45 = vunpack.i.l.bf16 %v12264_v46 }
 0x1dc   : > { %v6214_v15 = vpop.permute.xlu0 %6213 }
 0x1dd   : > { %v6216_v36 = vunpack.i.h.bf16 %v6214_v15  ;;  %v6215_v52 = vunpack.i.l.bf16 %v6214_v15  ;;  %v2036_v15 = vsel %vm2007_vm11, %v1999_v23, %v6105_v19  ;;  %v1825_v23 = vsel %vm1822_vm6, %v7069_v29, %v5590_v13 }
 0x1de   : > { %v2073_v16 = vsel %vm2044_vm12, %v2036_v15, %v6195_v1  ;;  %v451_v1 = vld [vmem:[%s11983_s1 + $0xb0] sm:$0xff] }
 0x1df   : > { %v2082_v63 = vsel %vm2081_vm13, %v2045_v43, %v6215_v52  ;;  %v2083_v58 = vsel %vm2081_vm13, %v2046_v24, %v6216_v36  ;;  %v2037_v36 = vsel %vm2007_vm11, %v2000_v20, %v6106_v6  ;;  %v5680_v52 = vunpack.i.l.bf16 %v12262_v11  ;;  %v12263_v43 = vld [vmem:[#allocation39_spill] sm:$0xff]  ;;  %2541 = vperm.xlu2 %6304, %v451_v1  }
 0x1e0   : > { %v2118_v10 = vpack.c.bf16 %v2083_v58, %v2082_v63  ;;  %v2074_v25 = vsel %vm2044_vm12, %v2037_v36, %v6196_v38  ;;  %v5771_v24 = vunpack.i.h.bf16 %v12263_v43  ;;  %v5770_v19 = vunpack.i.l.bf16 %v12263_v43  ;;  %v450_v38 = vld [vmem:[%s11983_s1 + $0xa8] sm:$0xff]  ;;  %v12265_v20 = vld [vmem:[#allocation71_spill] sm:$0xff] }
 0x1e1   : > { %v6284_v4 = vpop.permute.xlu2 %6283  ;;  %v5950_v15 = vunpack.i.l.bf16 %v12265_v20  ;;  %v6131_v43 = vunpack.i.h.bf16 %v8398_v32  ;;  %2536 = vperm.xlu1 %6303, %v450_v38  }
 0x1e2   : > { %5471 = vmatmul.msk.bf16.vlgmr.msra.gmra.mxu0 %vm2156_vm14, %v2118_v10  ;;  %v6286_v51 = vunpack.i.h.bf16 %v6284_v4  ;;  %v6285_v54 = vunpack.i.l.bf16 %v6284_v4  ;;  %v1826_v10 = vsel %vm1822_vm6, %v7068_v22, %v5591_v18  ;;  %v5951_v4 = vunpack.i.h.bf16 %v12265_v20  ;;  %v8596_v36 = vpop.permute.xlu1 %6233  ;;  %v453_v22 = vld [vmem:[%s11983_s1 + $0xc0] sm:$0xff] }
 0x1e3   : > { %v1863_v11 = vsel %vm1859_vm7, %v1826_v10, %v5681_v31  ;;  %v6040_v18 = vunpack.i.l.bf16 %v8321_v39  ;;  %v12266_v10 = vld [vmem:[#allocation5_spill] sm:$0xff] }
 0x1e4   : > { %v8578_v63 = vpop.permute.xlu0 %6228  ;;  %v2110_v6 = vsel %vm2081_vm13, %v2073_v16, %v6285_v54  ;;  %v2111_v58 = vsel %vm2081_vm13, %v2074_v25, %v6286_v51  ;;  %v458_v51 = vld [vmem:[%s11983_s1 + $0xe8] sm:$0xff]  ;;  %v1862_v54 = vsel %vm1859_vm7, %v1825_v23, %v5680_v52  ;;  %v6041_v16 = vunpack.i.h.bf16 %v8321_v39 }
 0x1e5   : > { %v2132_v9 = vpack.c.bf16 %v2111_v58, %v2110_v6  ;;  %v1899_v13 = vsel %vm1896_vm8, %v1862_v54, %v5770_v19  ;;  %v1900_v25 = vsel %vm1896_vm8, %v1863_v11, %v5771_v24  ;;  %v6130_v6 = vunpack.i.l.bf16 %v8398_v32  ;;  %2576 = vperm.xlu0 %6302, %v458_v51   ;;  %v12268_v11 = vld [vmem:[#allocation10_spill] sm:$0xff] }
 0x1e6   : > { %v1936_v52 = vsel %vm1933_vm9, %v1899_v13, %v5860_v45  ;;  %v1937_v31 = vsel %vm1933_vm9, %v1900_v25, %v5861_v50  ;;  %v6221_v58 = vunpack.i.h.bf16 %v8544_v44  ;;  %v6220_v39 = vunpack.i.l.bf16 %v8544_v44  ;;  %v454_v44 = vld [vmem:[%s11983_s1 + $0xc8] sm:$0xff] }
 0x1e7   : > { %5485 = vmatmul.msk.bf16.vlgmr.msra.gmra.mxu3 %vm2156_vm14, %v2132_v9  ;;  %v1973_v46 = vsel %vm1970_vm10, %v1936_v52, %v5950_v15  ;;  %v1974_v19 = vsel %vm1970_vm10, %v1937_v31, %v5951_v4  ;;  %v5606_v29 = vunpack.i.h.bf16 %v12266_v10  ;;  %v5605_v23 = vunpack.i.l.bf16 %v12266_v10  ;;  %2556 = vperm.xlu2 %6304, %v454_v44   ;;  %v12267_v15 = vld [vmem:[#allocation9_spill] sm:$0xff] }
 0x1e8   : > { %v2010_v24 = vsel %vm2007_vm11, %v1973_v46, %v6040_v18  ;;  %v2011_v9 = vsel %vm2007_vm11, %v1974_v19, %v6041_v16  ;;  %v5596_v51 = vunpack.i.h.bf16 %v12267_v15  ;;  %v5595_v54 = vunpack.i.l.bf16 %v12267_v15  ;;  %v12269_v18 = vld [vmem:[#allocation15_spill] sm:$0xff]  ;;  %v12270_v52 = vld [vmem:[#allocation29_spill] sm:$0xff] }
 0x1e9   : > { %v2047_v1 = vsel %vm2044_vm12, %v2010_v24, %v6130_v6  ;;  %v2048_v45 = vsel %vm2044_vm12, %v2011_v9, %v6131_v43  ;;  %2551 = vperm.xlu1 %6303, %v453_v22   ;;  %v5601_v16 = vunpack.i.h.bf16 %v12268_v11  ;;  %v5686_v13 = vunpack.i.h.bf16 %v12269_v18  ;;  %v12271_v24 = vld [vmem:[#allocation45_spill] sm:$0xff] }
 0x1ea   : > { %v2084_v50 = vsel %vm2081_vm13, %v2047_v1, %v6220_v39  ;;  %v2085_v38 = vsel %vm2081_vm13, %v2048_v45, %v6221_v58  ;;  %v8632_v20 = vpop.permute.xlu1 %6248  ;;  %v5685_v25 = vunpack.i.l.bf16 %v12269_v18  ;;  %v8642_v43 = vsel %vm1822_vm6, %v8019_v47, %v5606_v29  ;;  %v456_v1 = vld [vmem:[%s11983_s1 + $0xd8] sm:$0xff] }
 0x1eb   : > { %v2119_v4 = vpack.c.bf16 %v2085_v38, %v2084_v50  ;;  %v8646_v6 = vsel %vm1822_vm6, %v8015_v57, %v5605_v23  ;;  %v5776_v31 = vunpack.i.h.bf16 %v12270_v52  ;;  %v5775_v58 = vunpack.i.l.bf16 %v12270_v52  ;;  %v457_v57 = vld [vmem:[%s11983_s1 + $0xe0] sm:$0xff] }
 0x1ec   : > { %v8618_v32 = vpop.permute.xlu0 %6243  ;;  %v1828_v46 = vsel %vm1822_vm6, %v8040_v42, %v5596_v51  ;;  %v1827_v19 = vsel %vm1822_vm6, %v8036_v14, %v5595_v54  ;;  %v5866_v9 = vunpack.i.h.bf16 %v12271_v24  ;;  %v5865_v47 = vunpack.i.l.bf16 %v12271_v24  ;;  %v12272_v50 = vld [vmem:[#allocation61_spill] sm:$0xff] }
 0x1ed   : > { %v1830_v45 = vsel %vm1822_vm6, %v8031_v8, %v5601_v16  ;;  %v5600_v42 = vunpack.i.l.bf16 %v12268_v11  ;;  %v5956_v38 = vunpack.i.h.bf16 %v12272_v50  ;;  %v5955_v14 = vunpack.i.l.bf16 %v12272_v50 }
 0x1ee   : > { %v1864_v44 = vsel %vm1859_vm7, %v1827_v19, %v5685_v25  ;;  %v1865_v22 = vsel %vm1859_vm7, %v1828_v46, %v5686_v13  ;;  %v6046_v10 = vunpack.i.h.bf16 %v8253_v28  ;;  %v6045_v29 = vunpack.i.l.bf16 %v8253_v28  ;;  %v12273_v28 = vld [vmem:[#allocation23_spill] sm:$0xff]  ;;  %v12274_v46 = vld [vmem:[#allocation4_spill] sm:$0xff] }
 0x1ef   : > { %v1901_v23 = vsel %vm1896_vm8, %v1864_v44, %v5775_v58  ;;  %v6136_v8 = vunpack.i.h.bf16 %v8371_v41  ;;  %v6135_v15 = vunpack.i.l.bf16 %v8371_v41  ;;  %2571 = vperm.xlu2 %6304, %v457_v57   ;;  %v6226_v11 = vunpack.i.h.bf16 %v8451_v7  ;;  %v7070_v41 = vld [vmem:[%s7274_s22 + $0x30] sm:$0xff] }
 0x1f0   : > { %v1938_v51 = vsel %vm1933_vm9, %v1901_v23, %v5865_v47  ;;  %v6225_v16 = vunpack.i.l.bf16 %v8451_v7  ;;  %v5661_v18 = vunpack.i.h.bf16 %v12273_v28  ;;  %v5660_v13 = vunpack.i.l.bf16 %v12273_v28  ;;  %v12275_v7 = vld [vmem:[#allocation22_spill] sm:$0xff]  ;;  %v12278_v28 = vld [vmem:[#allocation41_spill] sm:$0xff] }
 0x1f1   : > { %2566 = vperm.xlu1 %6303, %v456_v1   ;;  %v1975_v25 = vsel %vm1970_vm10, %v1938_v51, %v5955_v14  ;;  %v1829_v58 = vsel %vm1822_vm6, %v7070_v41, %v5600_v42  ;;  %v5691_v19 = vunpack.i.h.bf16 %v12274_v46  ;;  %v5665_v47 = vunpack.i.l.bf16 %v12275_v7  ;;  %v12276_v14 = vld [vmem:[#allocation37_spill] sm:$0xff] }
 0x1f2   : > { %5472 = vmatmul.msk.bf16.gmra.mxu0 %vm2156_vm14, %v2119_v4  ;;  %v1902_v4 = vsel %vm1896_vm8, %v1865_v22, %v5776_v31  ;;  %v8685_v31 = vpop.permute.xlu1 %6263  ;;  %v2012_v24 = vsel %vm2007_vm11, %v1975_v25, %v6045_v29  ;;  %v5690_v57 = vunpack.i.l.bf16 %v12274_v46  ;;  %v5751_v44 = vunpack.i.h.bf16 %v12276_v14  ;;  %v12279_v25 = vld [vmem:[#allocation69_spill] sm:$0xff] }
 0x1f3   : > { %v1939_v54 = vsel %vm1933_vm9, %v1902_v4, %v5866_v9  ;;  %v2049_v50 = vsel %vm2044_vm12, %v2012_v24, %v6135_v15  ;;  %v5750_v42 = vunpack.i.l.bf16 %v12276_v14  ;;  %v1854_v23 = vsel %vm1822_vm6, %v8193_v34, %v5661_v18  ;;  %v12277_v15 = vld [vmem:[#allocation53_spill] sm:$0xff] }
 0x1f4   : > { %v8650_v39 = vpop.permute.xlu0 %6258  ;;  %v1976_v52 = vsel %vm1970_vm10, %v1939_v54, %v5956_v38  ;;  %v2086_v22 = vsel %vm2081_vm13, %v2049_v50, %v6225_v16  ;;  %v1853_v4 = vsel %vm1822_vm6, %v8189_v26, %v5660_v13  ;;  %v5840_v51 = vunpack.i.l.bf16 %v12277_v15 }
 0x1f5   : > { %v2013_v9 = vsel %vm2007_vm11, %v1976_v52, %v6046_v10  ;;  %v459_v10 = vld [vmem:[%s11983_s1 + $0xf0] sm:$0xff]  ;;  %v1867_v54 = vsel %vm1859_vm7, %v1830_v45, %v5691_v19  ;;  %v5780_v16 = vunpack.i.l.bf16 %v12278_v28  ;;  %v5930_v52 = vunpack.i.l.bf16 %v12279_v25 }
 0x1f6   : > { %v2050_v38 = vsel %vm2044_vm12, %v2013_v9, %v6136_v8  ;;  %v5841_v8 = vunpack.i.h.bf16 %v12277_v15  ;;  %v1866_v41 = vsel %vm1859_vm7, %v1829_v58, %v5690_v57  ;;  %v6021_v46 = vunpack.i.h.bf16 %v8304_v27 }
 0x1f7   : > { %v2087_v29 = vsel %vm2081_vm13, %v2050_v38, %v6226_v11  ;;  %v5931_v11 = vunpack.i.h.bf16 %v12279_v25  ;;  %v6020_v34 = vunpack.i.l.bf16 %v8304_v27  ;;  %v1890_v26 = vsel %vm1859_vm7, %v1853_v4, %v5750_v42 }
 0x1f8   : > { %v2120_v18 = vpack.c.bf16 %v2087_v29, %v2086_v22  ;;  %v1891_v13 = vsel %vm1859_vm7, %v1854_v23, %v5751_v44  ;;  %v6111_v45 = vunpack.i.h.bf16 %v8391_v40  ;;  %v6110_v19 = vunpack.i.l.bf16 %v8391_v40  ;;  %v12280_v44 = vld [vmem:[#allocation57_spill] sm:$0xff] }
 0x1f9   : > { %2581 = vperm.xlu1 %6303, %v459_v10   ;;  %v1927_v24 = vsel %vm1896_vm8, %v1890_v26, %v5840_v51  ;;  %v1928_v9 = vsel %vm1896_vm8, %v1891_v13, %v5841_v8  ;;  %v6201_v58 = vunpack.i.h.bf16 %v8504_v2  ;;  %v6200_v57 = vunpack.i.l.bf16 %v8504_v2 }
 0x1fa   : > { %v5781_v27 = vunpack.i.h.bf16 %v12278_v28  ;;  %v1903_v50 = vsel %vm1896_vm8, %v1866_v41, %v5780_v16  ;;  %v1964_v38 = vsel %vm1933_vm9, %v1927_v24, %v5930_v52  ;;  %v1965_v14 = vsel %vm1933_vm9, %v1928_v9, %v5931_v11  ;;  %v8735_v10 = vpop.permute.xlu1 %6278  ;;  %v12281_v9 = vld [vmem:[#allocation36_spill] sm:$0xff] }
 0x1fb   : > { %v5871_v40 = vunpack.i.h.bf16 %v12280_v44  ;;  %v5870_v42 = vunpack.i.l.bf16 %v12280_v44  ;;  %v2001_v22 = vsel %vm1970_vm10, %v1964_v38, %v6020_v34  ;;  %v2002_v29 = vsel %vm1970_vm10, %v1965_v14, %v6021_v46 }
 0x1fc   : > { %v8694_v1 = vpop.permute.xlu0 %6273  ;;  %v2038_v23 = vsel %vm2007_vm11, %v2001_v22, %v6110_v19  ;;  %v2039_v4 = vsel %vm2007_vm11, %v2002_v29, %v6111_v45  ;;  %v5961_v51 = vunpack.i.h.bf16 %v8213_v33  ;;  %v5960_v28 = vunpack.i.l.bf16 %v8213_v33 }
 0x1fd   : > { %v2075_v16 = vsel %vm2044_vm12, %v2038_v23, %v6200_v57  ;;  %v2076_v25 = vsel %vm2044_vm12, %v2039_v4, %v6201_v58  ;;  %v6051_v11 = vunpack.i.h.bf16 %v8346_v53  ;;  %v6050_v52 = vunpack.i.l.bf16 %v8346_v53 }
 0x1fe   : > { %v1904_v34 = vsel %vm1896_vm8, %v1867_v54, %v5781_v27  ;;  %v6140_v26 = vunpack.i.l.bf16 %v8418_v35  ;;  %v1940_v33 = vsel %vm1933_vm9, %v1903_v50, %v5870_v42  ;;  %v6231_v19 = vunpack.i.h.bf16 %v8578_v63  ;;  %v12282_v50 = vld [vmem:[#allocation52_spill] sm:$0xff]  ;;  %v8771_v42 = vpop.permute.xlu2 %6298 }
 0x1ff   : > { %v1941_v45 = vsel %vm1933_vm9, %v1904_v34, %v5871_v40  ;;  %v6230_v24 = vunpack.i.l.bf16 %v8578_v63  ;;  %v5666_v53 = vunpack.i.h.bf16 %v12275_v7  ;;  %v5755_v58 = vunpack.i.l.bf16 %v12281_v9  ;;  %v7071_v7 = vld [vmem:[%s7274_s22 + $0x108] sm:$0xff] }
 0x200   : > { %v1977_v57 = vsel %vm1970_vm10, %v1940_v33, %v5960_v28  ;;  %v1978_v54 = vsel %vm1970_vm10, %v1941_v45, %v5961_v51  ;;  %v5756_v27 = vunpack.i.h.bf16 %v12281_v9  ;;  %v5845_v38 = vunpack.i.l.bf16 %v12282_v50 }
 0x201   : > { %v2014_v63 = vsel %vm2007_vm11, %v1977_v57, %v6050_v52  ;;  %v2015_v14 = vsel %vm2007_vm11, %v1978_v54, %v6051_v11  ;;  %v1855_v44 = vsel %vm1822_vm6, %v8177_v37, %v5665_v47  ;;  %v5846_v40 = vunpack.i.h.bf16 %v12282_v50  ;;  %v460_v57 = vld [vmem:[%s11983_s1 + $0xf8] sm:$0xff] }
 0x202   : > { %5473 = vmatmul.msk.bf16.gmra.mxu0 %vm2156_vm14, %v2120_v18  ;;  %v6141_v18 = vunpack.i.h.bf16 %v8418_v35  ;;  %v461_v35 = vld [vmem:[%s11983_s1 + $0x100] sm:$0xff]  ;;  %v2051_v22 = vsel %vm2044_vm12, %v2014_v63, %v6140_v26  ;;  %v1856_v51 = vsel %vm1822_vm6, %v7071_v7, %v5666_v53  ;;  %v1892_v37 = vsel %vm1859_vm7, %v1855_v44, %v5755_v58  ;;  %v12285_v53 = vld [vmem:[#allocation3_spill] sm:$0xff]  ;;  %2586 = vperm.xlu2 %6304, %v460_v57   ;;  %v12287_v63 = vld [vmem:[#allocation12_spill] sm:$0xff] }
 0x203   : > { %2591 = vperm.xlu0 %6302, %v461_v35   ;;  %v6026_v47 = vunpack.i.h.bf16 %v8300_v5  ;;  %v6025_v28 = vunpack.i.l.bf16 %v8300_v5  ;;  %v1929_v11 = vsel %vm1896_vm8, %v1892_v37, %v5845_v38  ;;  %v6116_v52 = vunpack.i.h.bf16 %v8389_v59  ;;  %v12286_v35 = vld [vmem:[#allocation40_spill] sm:$0xff]  ;;  %v12289_v37 = vld [vmem:[#allocation73_spill] sm:$0xff] }
 0x204   : > { %v6289_v2 = vpop.permute.xlu0 %6288  ;;  %v2052_v29 = vsel %vm2044_vm12, %v2015_v14, %v6141_v18  ;;  %v6206_v34 = vunpack.i.h.bf16 %v8491_v61  ;;  %v6205_v18 = vunpack.i.l.bf16 %v8491_v61  ;;  %v5695_v9 = vunpack.i.l.bf16 %v12285_v53  ;;  %v462_v61 = vld [vmem:[%s11983_s1 + $0x108] sm:$0xff] }
 0x205   : > { %v6291_v15 = vunpack.i.h.bf16 %v6289_v2  ;;  %v6290_v8 = vunpack.i.l.bf16 %v6289_v2  ;;  %v12283_v2 = vld [vmem:[#allocation68_spill] sm:$0xff]  ;;  %v5696_v54 = vunpack.i.h.bf16 %v12285_v53  ;;  %2596 = vperm.xlu1 %6303, %v462_v61   ;;  %v5671_v14 = vunpack.i.h.bf16 %v12287_v63 }
 0x206   : > { %v5936_v23 = vunpack.i.h.bf16 %v12283_v2  ;;  %v5935_v4 = vunpack.i.l.bf16 %v12283_v2  ;;  %v5786_v44 = vunpack.i.h.bf16 %v12286_v35  ;;  %v12288_v2 = vld [vmem:[#allocation56_spill] sm:$0xff]  ;;  %v5670_v7 = vunpack.i.l.bf16 %v12287_v63  ;;  %v12292_v63 = vld [vmem:[#allocation58_spill] sm:$0xff] }
 0x207   : > { %v2112_v41 = vsel %vm2081_vm13, %v2075_v16, %v6290_v8  ;;  %v2113_v46 = vsel %vm2081_vm13, %v2076_v25, %v6291_v15  ;;  %v2088_v15 = vsel %vm2081_vm13, %v2051_v22, %v6230_v24  ;;  %v2089_v8 = vsel %vm2081_vm13, %v2052_v29, %v6231_v19  ;;  %v6294_v16 = vpop.permute.xlu1 %6293  ;;  %v12284_v19 = vld [vmem:[#allocation6_spill] sm:$0xff]  ;;  %v8812_v29 = vpop.permute.xlu2 %2441 }
 0x208   : > { %v2133_v13 = vpack.c.bf16 %v2113_v46, %v2112_v41  ;;  %v1893_v25 = vsel %vm1859_vm7, %v1856_v51, %v5756_v27  ;;  %v6115_v41 = vunpack.i.l.bf16 %v8389_v59  ;;  %v2121_v26 = vpack.c.bf16 %v2089_v8, %v2088_v15 }
 0x209   : > { %v1930_v46 = vsel %vm1896_vm8, %v1893_v25, %v5846_v40  ;;  %v6296_v33 = vunpack.i.h.bf16 %v6294_v16  ;;  %v6295_v45 = vunpack.i.l.bf16 %v6294_v16  ;;  %v5611_v24 = vunpack.i.h.bf16 %v12284_v19 }
 0x20a   : > { %5486 = vmatmul.msk.bf16.gmra.mxu3 %vm2156_vm14, %v2133_v13  ;;  %v1966_v13 = vsel %vm1933_vm9, %v1929_v11, %v5935_v4  ;;  %v1967_v5 = vsel %vm1933_vm9, %v1930_v46, %v5936_v23  ;;  %v5785_v27 = vunpack.i.l.bf16 %v12286_v35  ;;  %v5876_v23 = vunpack.i.h.bf16 %v12288_v2 }
 0x20b   : > { %v2003_v58 = vsel %vm1970_vm10, %v1966_v13, %v6025_v28  ;;  %v2004_v59 = vsel %vm1970_vm10, %v1967_v5, %v6026_v47  ;;  %v5875_v4 = vunpack.i.l.bf16 %v12288_v2  ;;  %v1868_v51 = vsel %vm1859_vm7, %v8646_v6, %v5695_v9  ;;  %v7072_v5 = vld [vmem:[%s7274_s22 + $0x110] sm:$0xff] }
 0x20c   : > { %v2040_v50 = vsel %vm2007_vm11, %v2003_v58, %v6115_v41  ;;  %v2041_v38 = vsel %vm2007_vm11, %v2004_v59, %v6116_v52  ;;  %v5966_v47 = vunpack.i.h.bf16 %v12289_v37  ;;  %v5965_v28 = vunpack.i.l.bf16 %v12289_v37  ;;  %v12291_v58 = vld [vmem:[#allocation42_spill] sm:$0xff] }
 0x20d   : > { %v2077_v40 = vsel %vm2044_vm12, %v2040_v50, %v6205_v18  ;;  %v2078_v22 = vsel %vm2044_vm12, %v2041_v38, %v6206_v34  ;;  %v1869_v16 = vsel %vm1859_vm7, %v8642_v43, %v5696_v54  ;;  %v1905_v25 = vsel %vm1896_vm8, %v1868_v51, %v5785_v27  ;;  %v8850_v38 = vpop.permute.xlu0 %2431 }
 0x20e   : > { %v2114_v15 = vsel %vm2081_vm13, %v2077_v40, %v6295_v45  ;;  %v2115_v8 = vsel %vm2081_vm13, %v2078_v22, %v6296_v33  ;;  %v6056_v11 = vunpack.i.h.bf16 %v8342_v60  ;;  %v6055_v52 = vunpack.i.l.bf16 %v8342_v60  ;;  %v12290_v60 = vld [vmem:[#allocation26_spill] sm:$0xff] }
 0x20f   : > { %v1906_v41 = vsel %vm1896_vm8, %v1869_v16, %v5786_v44  ;;  %v6146_v46 = vunpack.i.h.bf16 %v8416_v49  ;;  %v6145_v34 = vunpack.i.l.bf16 %v8416_v49  ;;  %v2134_v6 = vpack.c.bf16 %v2115_v8, %v2114_v15 }
 0x210   : > { %v1942_v18 = vsel %vm1933_vm9, %v1905_v25, %v5875_v4  ;;  %v6236_v43 = vunpack.i.h.bf16 %v8596_v36  ;;  %v6235_v13 = vunpack.i.l.bf16 %v8596_v36  ;;  %v1857_v33 = vsel %vm1822_vm6, %v7072_v5, %v5670_v7  ;;  %v7073_v36 = vld [vmem:[%s7274_s22 + $0x118] sm:$0xff]  ;;  %v12293_v4 = vld [vmem:[#allocation74_spill] sm:$0xff]  ;;  %v8860_v7 = vpop.permute.xlu2 %2451 }
 0x211   : > { %v5760_v45 = vunpack.i.l.bf16 %v12290_v60  ;;  %v1979_v53 = vsel %vm1970_vm10, %v1942_v18, %v5965_v28  ;;  %v5761_v49 = vunpack.i.h.bf16 %v12290_v60  ;;  %v5850_v59 = vunpack.i.l.bf16 %v12291_v58  ;;  %v7074_v18 = vld [vmem:[%s7274_s22 + $0x50] sm:$0xff]  ;;  %v12295_v60 = vld [vmem:[#allocation32_spill] sm:$0xff] }
 0x212   : > { %5474 = vmatmul.msk.bf16.gmra.mxu0 %vm2156_vm14, %v2121_v26  ;;  %v1943_v26 = vsel %vm1933_vm9, %v1906_v41, %v5876_v23  ;;  %v2016_v61 = vsel %vm2007_vm11, %v1979_v53, %v6055_v52  ;;  %v1858_v54 = vsel %vm1822_vm6, %v7073_v36, %v5671_v14  ;;  %v5851_v35 = vunpack.i.h.bf16 %v12291_v58 }
 0x213   : > { %v1980_v9 = vsel %vm1970_vm10, %v1943_v26, %v5966_v47  ;;  %v2053_v27 = vsel %vm2044_vm12, %v2016_v61, %v6145_v34  ;;  %v5941_v44 = vunpack.i.h.bf16 %v12292_v63  ;;  %v5940_v40 = vunpack.i.l.bf16 %v12292_v63  ;;  %v12297_v63 = vld [vmem:[#allocation64_spill] sm:$0xff] }
 0x214   : > { %v2017_v57 = vsel %vm2007_vm11, %v1980_v9, %v6056_v11  ;;  %v2090_v22 = vsel %vm2081_vm13, %v2053_v27, %v6235_v13  ;;  %v5610_v23 = vunpack.i.l.bf16 %v12284_v19  ;;  %v1894_v14 = vsel %vm1859_vm7, %v1857_v33, %v5760_v45  ;;  %v7075_v9 = vld [vmem:[%s7274_s22 + $0x58] sm:$0xff] }
 0x215   : > { %v2054_v50 = vsel %vm2044_vm12, %v2017_v57, %v6146_v46  ;;  %v6031_v15 = vunpack.i.h.bf16 %v12293_v4  ;;  %v6030_v8 = vunpack.i.l.bf16 %v12293_v4  ;;  %v1895_v51 = vsel %vm1859_vm7, %v1858_v54, %v5761_v49  ;;  %v12296_v57 = vld [vmem:[#allocation48_spill] sm:$0xff] }
 0x216   : > { %v2091_v2 = vsel %vm2081_vm13, %v2054_v50, %v6236_v43  ;;  %v1931_v37 = vsel %vm1896_vm8, %v1894_v14, %v5850_v59  ;;  %v6121_v47 = vunpack.i.h.bf16 %v8358_v3  ;;  %v6120_v28 = vunpack.i.l.bf16 %v8358_v3  ;;  %v12294_v3 = vld [vmem:[#allocation18_spill] sm:$0xff] }
 0x217   : > { %v1932_v16 = vsel %vm1896_vm8, %v1895_v51, %v5851_v35  ;;  %v6211_v25 = vunpack.i.h.bf16 %v8433_v0  ;;  %v6210_v11 = vunpack.i.l.bf16 %v8433_v0  ;;  %v2122_v52 = vpack.c.bf16 %v2091_v2, %v2090_v22  ;;  %v464_v0 = vld [vmem:[%s11983_s1 + $0x118] sm:$0xff] }
 0x218   : > { %v1968_v41 = vsel %vm1933_vm9, %v1931_v37, %v5940_v40  ;;  %v1969_v46 = vsel %vm1933_vm9, %v1932_v16, %v5941_v44  ;;  %v6301_v34 = vunpack.i.h.bf16 %v8771_v42  ;;  %v1833_v26 = vsel %vm1822_vm6, %v7074_v18, %v5610_v23  ;;  %2606 = vperm.xlu0 %6302, %v464_v0   ;;  %v8900_v44 = vpop.permute.xlu0 %2456  ;;  %v8909_v51 = vpop.permute.xlu2 %2466  ;;  %v12299_v0 = vld [vmem:[#allocation28_spill] sm:$0xff] }
 0x219   : > { %v5700_v43 = vunpack.i.l.bf16 %v12294_v3  ;;  %v2005_v13 = vsel %vm1970_vm10, %v1968_v41, %v6030_v8  ;;  %v2006_v5 = vsel %vm1970_vm10, %v1969_v46, %v6031_v15  ;;  %v5701_v33 = vunpack.i.h.bf16 %v12294_v3 }
 0x21a   : > { %5487 = vmatmul.msk.bf16.gmra.mxu3 %vm2156_vm14, %v2134_v6  ;;  %v6300_v6 = vunpack.i.l.bf16 %v8771_v42  ;;  %v5790_v45 = vunpack.i.l.bf16 %v12295_v60  ;;  %v2042_v42 = vsel %vm2007_vm11, %v2005_v13, %v6120_v28  ;;  %v2043_v53 = vsel %vm2007_vm11, %v2006_v5, %v6121_v47  ;;  %v463_v5 = vld [vmem:[%s11983_s1 + $0x110] sm:$0xff] }
 0x21b   : > { %v1834_v49 = vsel %vm1822_vm6, %v7075_v9, %v5611_v24  ;;  %v5791_v58 = vunpack.i.h.bf16 %v12295_v60  ;;  %v2079_v59 = vsel %vm2044_vm12, %v2042_v42, %v6210_v11  ;;  %v2080_v61 = vsel %vm2044_vm12, %v2043_v53, %v6211_v25  ;;  %2601 = vperm.xlu2 %6304, %v463_v5   ;;  %v12301_v9 = vld [vmem:[#allocation60_spill] sm:$0xff]  ;;  %v12305_v5 = vld [vmem:[#allocation43_spill] sm:$0xff] }
 0x21c   : > { %v5881_v36 = vunpack.i.h.bf16 %v12296_v57  ;;  %v5880_v54 = vunpack.i.l.bf16 %v12296_v57  ;;  %v2116_v35 = vsel %vm2081_vm13, %v2079_v59, %v6300_v6  ;;  %v2117_v27 = vsel %vm2081_vm13, %v2080_v61, %v6301_v34  ;;  %v7076_v59 = vld [vmem:[%s7274_s22 + $0x68] sm:$0xff]  ;;  %v7077_v57 = vld [vmem:[%s7274_s22 + $0x60] sm:$0xff] }
 0x21d   : > { %v1870_v50 = vsel %vm1859_vm7, %v1833_v26, %v5700_v43  ;;  %v5971_v19 = vunpack.i.h.bf16 %v12297_v63  ;;  %v5970_v24 = vunpack.i.l.bf16 %v12297_v63  ;;  %v1871_v40 = vsel %vm1859_vm7, %v1834_v49, %v5701_v33  ;;  %v12298_v26 = vld [vmem:[#allocation14_spill] sm:$0xff] }
 0x21e   : > { %v1907_v22 = vsel %vm1896_vm8, %v1870_v50, %v5790_v45  ;;  %v6061_v2 = vunpack.i.h.bf16 %v8274_v17  ;;  %v6060_v23 = vunpack.i.l.bf16 %v8274_v17  ;;  %v1908_v14 = vsel %vm1896_vm8, %v1871_v40, %v5791_v58  ;;  %v12300_v45 = vld [vmem:[#allocation44_spill] sm:$0xff] }
 0x21f   : > { %v6151_v4 = vunpack.i.h.bf16 %v8378_v55  ;;  %v6150_v15 = vunpack.i.l.bf16 %v8378_v55  ;;  %v2135_v8 = vpack.c.bf16 %v2117_v27, %v2116_v35  ;;  %v1944_v37 = vsel %vm1933_vm9, %v1907_v22, %v5880_v54  ;;  %v12302_v54 = vld [vmem:[#allocation76_spill] sm:$0xff] }
 0x220   : > { %v1945_v47 = vsel %vm1933_vm9, %v1908_v14, %v5881_v36  ;;  %v6241_v28 = vunpack.i.h.bf16 %v8466_v48  ;;  %v6240_v16 = vunpack.i.l.bf16 %v8466_v48  ;;  %v1981_v25 = vsel %vm1970_vm10, %v1944_v37, %v5970_v24  ;;  %v8924_v48 = vpop.permute.xlu1 %2436  ;;  %v8926_v18 = vpop.permute.xlu0 %2471 }
 0x221   : > { %v1982_v17 = vsel %vm1970_vm10, %v1945_v47, %v5971_v19  ;;  %v2018_v11 = vsel %vm2007_vm11, %v1981_v25, %v6060_v23  ;;  %v5616_v3 = vunpack.i.h.bf16 %v12298_v26  ;;  %v5615_v43 = vunpack.i.l.bf16 %v12298_v26  ;;  %v8931_v13 = vpop.permute.xlu2 %2481  ;;  %v12304_v26 = vld [vmem:[#allocation27_spill] sm:$0xff] }
 0x222   : > { %5475 = vmatmul.msk.bf16.gmra.mxu0 %vm2156_vm14, %v2122_v52  ;;  %v2019_v55 = vsel %vm2007_vm11, %v1982_v17, %v6061_v2  ;;  %v2055_v52 = vsel %vm2044_vm12, %v2018_v11, %v6150_v15  ;;  %v5706_v33 = vunpack.i.h.bf16 %v12299_v0  ;;  %v5705_v60 = vunpack.i.l.bf16 %v12299_v0 }
 0x223   : > { %v2056_v41 = vsel %vm2044_vm12, %v2019_v55, %v6151_v4  ;;  %v2092_v46 = vsel %vm2081_vm13, %v2055_v52, %v6240_v16  ;;  %v5796_v42 = vunpack.i.h.bf16 %v12300_v45  ;;  %v5795_v53 = vunpack.i.l.bf16 %v12300_v45  ;;  %v7078_v45 = vld [vmem:[%s7274_s22 + $0x78] sm:$0xff] }
 0x224   : > { %v2093_v34 = vsel %vm2081_vm13, %v2056_v41, %v6241_v28  ;;  %v5886_v49 = vunpack.i.h.bf16 %v12301_v9  ;;  %v5885_v58 = vunpack.i.l.bf16 %v12301_v9  ;;  %v1836_v61 = vsel %vm1822_vm6, %v7076_v59, %v5616_v3  ;;  %v12303_v41 = vld [vmem:[#allocation13_spill] sm:$0xff] }
 0x225   : > { %v2123_v6 = vpack.c.bf16 %v2093_v34, %v2092_v46  ;;  %v1835_v36 = vsel %vm1822_vm6, %v7077_v57, %v5615_v43  ;;  %v5976_v35 = vunpack.i.h.bf16 %v12302_v54  ;;  %v5975_v27 = vunpack.i.l.bf16 %v12302_v54  ;;  %v12307_v57 = vld [vmem:[#allocation75_spill] sm:$0xff] }
 0x226   : > { %v1872_v50 = vsel %vm1859_vm7, %v1835_v36, %v5705_v60  ;;  %v1873_v63 = vsel %vm1859_vm7, %v1836_v61, %v5706_v33  ;;  %v6066_v19 = vunpack.i.h.bf16 %v8367_v30  ;;  %v6065_v24 = vunpack.i.l.bf16 %v8367_v30 }
 0x227   : > { %v1909_v22 = vsel %vm1896_vm8, %v1872_v50, %v5795_v53  ;;  %v1910_v2 = vsel %vm1896_vm8, %v1873_v63, %v5796_v42  ;;  %v6156_v23 = vunpack.i.h.bf16 %v8437_v21  ;;  %v6155_v14 = vunpack.i.l.bf16 %v8437_v21  ;;  %v12306_v53 = vld [vmem:[#allocation59_spill] sm:$0xff] }
 0x228   : > { %v8952_v40 = vpop.permute.xlu1 %2446  ;;  %v1946_v4 = vsel %vm1933_vm9, %v1909_v22, %v5885_v58  ;;  %v1947_v15 = vsel %vm1933_vm9, %v1910_v2, %v5886_v49  ;;  %v6245_v37 = vunpack.i.l.bf16 %v8618_v32  ;;  %v8964_v28 = vpop.permute.xlu0 %2486  ;;  %v5621_v46 = vunpack.i.h.bf16 %v12303_v41  ;;  %v7079_v58 = vld [vmem:[%s7274_s22 + $0x70] sm:$0xff] }
 0x229   : > { %v1983_v30 = vsel %vm1970_vm10, %v1946_v4, %v5975_v27  ;;  %v1984_v47 = vsel %vm1970_vm10, %v1947_v15, %v5976_v35  ;;  %v8970_v11 = vpop.permute.xlu2 %2496  ;;  %v5711_v3 = vunpack.i.h.bf16 %v12304_v26  ;;  %v5710_v43 = vunpack.i.l.bf16 %v12304_v26 }
 0x22a   : > { %5488 = vmatmul.msk.bf16.gmra.mxu3 %vm2156_vm14, %v2135_v8  ;;  %v6246_v8 = vunpack.i.h.bf16 %v8618_v32  ;;  %v2020_v16 = vsel %vm2007_vm11, %v1983_v30, %v6065_v24  ;;  %v2021_v25 = vsel %vm2007_vm11, %v1984_v47, %v6066_v19  ;;  %v5801_v0 = vunpack.i.h.bf16 %v12305_v5 }
 0x22b   : > { %v2057_v21 = vsel %vm2044_vm12, %v2020_v16, %v6155_v14  ;;  %v2058_v17 = vsel %vm2044_vm12, %v2021_v25, %v6156_v23  ;;  %v5800_v33 = vunpack.i.l.bf16 %v12305_v5  ;;  %v1838_v42 = vsel %vm1822_vm6, %v7078_v45, %v5621_v46  ;;  %v12310_v45 = vld [vmem:[#allocation35_spill] sm:$0xff] }
 0x22c   : > { %v2094_v55 = vsel %vm2081_vm13, %v2057_v21, %v6245_v37  ;;  %v2095_v32 = vsel %vm2081_vm13, %v2058_v17, %v6246_v8  ;;  %v5891_v9 = vunpack.i.h.bf16 %v12306_v53  ;;  %v5890_v49 = vunpack.i.l.bf16 %v12306_v53 }
 0x22d   : > { %v2124_v52 = vpack.c.bf16 %v2095_v32, %v2094_v55  ;;  %v1875_v61 = vsel %vm1859_vm7, %v1838_v42, %v5711_v3  ;;  %v5981_v36 = vunpack.i.h.bf16 %v12307_v57  ;;  %v5980_v54 = vunpack.i.l.bf16 %v12307_v57  ;;  %v12308_v55 = vld [vmem:[#allocation7_spill] sm:$0xff] }
 0x22e   : > { %v6071_v50 = vunpack.i.h.bf16 %v8363_v56  ;;  %v6070_v63 = vunpack.i.l.bf16 %v8363_v56  ;;  %v1912_v24 = vsel %vm1896_vm8, %v1875_v61, %v5801_v0  ;;  %v6161_v22 = vunpack.i.h.bf16 %v8435_v12  ;;  %v7081_v0 = vld [vmem:[%s7274_s22 + $0x80] sm:$0xff]  ;;  %v12312_v61 = vld [vmem:[#allocation67_spill] sm:$0xff] }
 0x22f   : > { %v6160_v2 = vunpack.i.l.bf16 %v8435_v12  ;;  %v7195_v23 = vmov 0.0   ;;  %v1949_v4 = vsel %vm1933_vm9, %v1912_v24, %v5891_v9  ;;  %v6251_v15 = vunpack.i.h.bf16 %v8632_v20  ;;  %v12311_v9 = vld [vmem:[#allocation51_spill] sm:$0xff] }
 0x230   : > { %v8975_v34 = vpop.permute.xlu1 %2461  ;;  %v8983_v60 = vpop.permute.xlu0 %2501  ;;  %2647 = vst.msk [vmem:[#allocation2 + $0x10] sm:$0xff] %vm1859_vm7, %v7195_v23  ;;  %v6250_v8 = vunpack.i.l.bf16 %v8632_v20  ;;  %v1986_v37 = vsel %vm1970_vm10, %v1949_v4, %v5981_v36  ;;  %v5626_v32 = vunpack.i.h.bf16 %v12308_v55  ;;  %v5806_v42 = vunpack.i.h.bf16 %v12310_v45 }
 0x231   : > { %v8994_v35 = vpop.permute.xlu2 %2511  ;;  %2645 = vst.msk [vmem:[#allocation2] sm:$0xff] %vm1859_vm7, %v7195_v23  ;;  %v2023_v30 = vsel %vm2007_vm11, %v1986_v37, %v6071_v50  ;;  %v5805_v53 = vunpack.i.l.bf16 %v12310_v45  ;;  %v5986_v57 = vunpack.i.h.bf16 %v12312_v61  ;;  %v5985_v36 = vunpack.i.l.bf16 %v12312_v61  ;;  %v12313_v50 = vld [vmem:[#allocation81_spill] sm:$0xff] }
 0x232   : > { %5476 = vmatmul.msk.bf16.gmra.mxu0 %vm2156_vm14, %v2123_v6  ;;  %v5620_v6 = vunpack.i.l.bf16 %v12303_v41  ;;  %2646 = vst.msk [vmem:[#allocation2 + $0x8] sm:$0xff] %vm1859_vm7, %v7195_v23  ;;  %v2060_v20 = vsel %vm2044_vm12, %v2023_v30, %v6161_v22 }
 0x233   : > { %2648 = vst.msk [vmem:[#allocation2 + $0x138] sm:$0xff] %vm1859_vm7, %v7195_v23  ;;  %v2097_v21 = vsel %vm2081_vm13, %v2060_v20, %v6251_v15 }
 0x234   : > { %v1837_v59 = vsel %vm1822_vm6, %v7079_v58, %v5620_v6  ;;  %2649 = vst.msk [vmem:[#allocation2 + $0x140] sm:$0xff] %vm1859_vm7, %v7195_v23  ;;  %v12309_v6 = vld [vmem:[#allocation21_spill] sm:$0xff]  ;;  %v5895_v58 = vunpack.i.l.bf16 %v12311_v9 }
 0x235   : > { %v1874_v27 = vsel %vm1859_vm7, %v1837_v59, %v5710_v43  ;;  %2650 = vst.msk [vmem:[#allocation2 + $0x148] sm:$0xff] %vm1859_vm7, %v7195_v23  ;;  %v5716_v26 = vunpack.i.h.bf16 %v12309_v6  ;;  %v5715_v3 = vunpack.i.l.bf16 %v12309_v6  ;;  %v7080_v43 = vld [vmem:[%s7274_s22 + $0x88] sm:$0xff] }
 0x236   : > { %v1911_v19 = vsel %vm1896_vm8, %v1874_v27, %v5800_v33  ;;  %v1840_v5 = vsel %vm1822_vm6, %v7080_v43, %v5626_v32 }
 0x237   : > { %v1948_v14 = vsel %vm1933_vm9, %v1911_v19, %v5890_v49  ;;  %v5896_v49 = vunpack.i.h.bf16 %v12311_v9  ;;  %v6075_v19 = vunpack.i.l.bf16 %v12313_v50 }
 0x238   : > { %v1985_v56 = vsel %vm1970_vm10, %v1948_v14, %v5980_v54  ;;  %v9014_v47 = vpop.permute.xlu1 %2476  ;;  %v9023_v17 = vpop.permute.xlu0 %2516  ;;  %v1877_v54 = vsel %vm1859_vm7, %v1840_v5, %v5716_v26  ;;  %v9076_v26 = vld [vmem:[%s11986_s4] ss:$0 sm:$0xff] }
 0x239   : > { %v2022_v12 = vsel %vm2007_vm11, %v1985_v56, %v6070_v63  ;;  %v9027_v46 = vpop.permute.xlu2 %2526  ;;  %v6076_v63 = vunpack.i.h.bf16 %v12313_v50  ;;  %v1914_v22 = vsel %vm1896_vm8, %v1877_v54, %v5806_v42  ;;  %v12315_v56 = vld [vmem:[#allocation93_spill] sm:$0xff] }
 0x23a   : > { %v2059_v16 = vsel %vm2044_vm12, %v2022_v12, %v6160_v2  ;;  %v12314_v2 = vld [vmem:[#allocation87_spill] sm:$0xff]  ;;  %v6256_v37 = vunpack.i.h.bf16 %v12315_v56  ;;  %v6255_v12 = vunpack.i.l.bf16 %v12315_v56  ;;  %v12316_v5 = vld [vmem:[#allocation17_spill] sm:$0xff]  ;;  %v12320_v56 = vld [vmem:[#allocation78_spill] sm:$0xff] }
 0x23b   : > { %v2096_v25 = vsel %vm2081_vm13, %v2059_v16, %v6250_v8  ;;  %v6166_v23 = vunpack.i.h.bf16 %v12314_v2  ;;  %v6165_v14 = vunpack.i.l.bf16 %v12314_v2  ;;  %v1951_v8 = vsel %vm1933_vm9, %v1914_v22, %v5896_v49 }
 0x23c   : > { %v2125_v41 = vpack.c.bf16 %v2097_v21, %v2096_v25  ;;  %v1988_v16 = vsel %vm1970_vm10, %v1951_v8, %v5986_v57 }
 0x23d   : > { %v2025_v21 = vsel %vm2007_vm11, %v1988_v16, %v6076_v63  ;;  %v7082_v63 = vld [vmem:[%s7274_s22 + $0x98] sm:$0xff] }
 0x23e   : > { %v12321_v16 = vld [vmem:[#allocation84_spill] sm:$0xff] }
 0x240   : > { %v9040_v59 = vpop.permute.xlu1 %2491  ;;  %v9052_v4 = vpop.permute.xlu0 %2531 }
 0x241   : > { %v9060_v20 = vpop.permute.xlu2 %2541 }
 0x242   : > { %5477 = vmatmul.msk.bf16.gmra.mxu0 %vm2156_vm14, %v2124_v52  ;;  %v5625_v52 = vunpack.i.l.bf16 %v12308_v55  ;;  %v9067_v55 = vld [vmem:[%s11985_s3] ss:$0 sm:$0xff] }
 0x244   : > { %v1839_v33 = vsel %vm1822_vm6, %v7081_v0, %v5625_v52  ;;  %v2062_v52 = vsel %vm2044_vm12, %v2025_v21, %v6166_v23  ;;  %v5631_v0 = vunpack.i.h.bf16 %v12316_v5  ;;  %v6080_v21 = vunpack.i.l.bf16 %v12321_v16 }
 0x245   : > { %v1876_v27 = vsel %vm1859_vm7, %v1839_v33, %v5715_v3  ;;  %v2099_v6 = vsel %vm2081_vm13, %v2062_v52, %v6256_v37  ;;  %v5630_v33 = vunpack.i.l.bf16 %v12316_v5  ;;  %v5991_v37 = vunpack.i.h.bf16 %v12320_v56 }
 0x246   : > { %v1913_v24 = vsel %vm1896_vm8, %v1876_v27, %v5805_v53  ;;  %v12317_v53 = vld [vmem:[#allocation31_spill] sm:$0xff] }
 0x247   : > { %v1950_v15 = vsel %vm1933_vm9, %v1913_v24, %v5895_v58  ;;  %v5721_v9 = vunpack.i.h.bf16 %v12317_v53  ;;  %v5720_v49 = vunpack.i.l.bf16 %v12317_v53  ;;  %v12318_v58 = vld [vmem:[#allocation47_spill] sm:$0xff] }
 0x248   : > { %v1987_v30 = vsel %vm1970_vm10, %v1950_v15, %v5985_v36  ;;  %v9078_v43 = vpop.permute.xlu1 %2506  ;;  %v5810_v61 = vunpack.i.l.bf16 %v12318_v58  ;;  %v9088_v36 = vpop.permute.xlu0 %2546  ;;  %v5811_v54 = vunpack.i.h.bf16 %v12318_v58  ;;  %v12319_v27 = vld [vmem:[#allocation63_spill] sm:$0xff] }
 0x249   : > { %v2024_v25 = vsel %vm2007_vm11, %v1987_v30, %v6075_v19  ;;  %v5900_v50 = vunpack.i.l.bf16 %v12319_v27  ;;  %v1842_v19 = vsel %vm1822_vm6, %v7082_v63, %v5631_v0  ;;  %v7083_v24 = vld [vmem:[%s7274_s22 + $0x90] sm:$0xff]  ;;  %v5901_v2 = vunpack.i.h.bf16 %v12319_v27 }
 0x24a   : > { %v2061_v32 = vsel %vm2044_vm12, %v2024_v25, %v6165_v14  ;;  %v1841_v22 = vsel %vm1822_vm6, %v7083_v24, %v5630_v33  ;;  %v9097_v14 = vpop.permute.xlu2 %2556  ;;  %v1879_v8 = vsel %vm1859_vm7, %v1842_v19, %v5721_v9  ;;  %v6081_v25 = vunpack.i.h.bf16 %v12321_v16 }
 0x24b   : > { %v1878_v15 = vsel %vm1859_vm7, %v1841_v22, %v5720_v49  ;;  %v1916_v52 = vsel %vm1896_vm8, %v1879_v8, %v5811_v54  ;;  %v9132_v8 = vld [vmem:[#allocation2 + $0x10] sm:$0xff] }
 0x24c   : > { %v1915_v30 = vsel %vm1896_vm8, %v1878_v15, %v5810_v61  ;;  %v1953_v33 = vsel %vm1933_vm9, %v1916_v52, %v5901_v2  ;;  %v12323_v2 = vld [vmem:[#allocation16_spill] sm:$0xff] }
 0x24d   : > { %v1990_v9 = vsel %vm1970_vm10, %v1953_v33, %v5991_v37 }
 0x24e   : > { %v2027_v61 = vsel %vm2007_vm11, %v1990_v9, %v6081_v25 }
 0x250   : > { %v9118_v49 = vpop.permute.xlu1 %2521  ;;  %v9128_v22 = vpop.permute.xlu0 %2561 }
 0x252   : > { %5478 = vmatmul.msk.bf16.gmra.mxu0 %vm2156_vm14, %v2125_v41  ;;  %v2098_v41 = vsel %vm2081_vm13, %v2061_v32, %v6255_v12  ;;  %v5990_v12 = vunpack.i.l.bf16 %v12320_v56  ;;  %v5635_v56 = vunpack.i.l.bf16 %v12323_v2 }
 0x253   : > { %v2126_v42 = vpack.c.bf16 %v2099_v6, %v2098_v41  ;;  %v1952_v41 = vsel %vm1933_vm9, %v1915_v30, %v5900_v50  ;;  %v12322_v6 = vld [vmem:[#allocation90_spill] sm:$0xff] }
 0x254   : > { %v6170_v5 = vunpack.i.l.bf16 %v12322_v6  ;;  %v12324_v30 = vld [vmem:[#allocation30_spill] sm:$0xff] }
 0x255   : > { %v5726_v16 = vunpack.i.h.bf16 %v12324_v30  ;;  %v5725_v25 = vunpack.i.l.bf16 %v12324_v30 }
 0x25f   : > { %v2223_v3 = vpop.f32.mrf.mxu0 }
 0x260   : > { %v2317_v45 = vmul.f32 %v9067_v55, %v2223_v3  ;;  %v6171_v3 = vunpack.i.h.bf16 %v12322_v6  ;;  %v2688_v6 = vld [vmem:[#allocation2 + $0x8] sm:$0xff] }
 0x261   : > { %v2767_v33 = vrot.slane %v2688_v6, 1 }
 0x262   : > { %v2357_v57 = vadd.f32 %v9076_v26, %v2317_v45  ;;  %5479 = vmatmul.msk.bf16.gmra.mxu0 %vm2156_vm14, %v2126_v42  ;;  %v6261_v45 = vunpack.i.h.bf16 %v8650_v39  ;;  %v6260_v42 = vunpack.i.l.bf16 %v8650_v39  ;;  %v2064_v50 = vsel %vm2044_vm12, %v2027_v61, %v6171_v3 }
 0x264   : > { %v2393_v23 = vmax.f32 %v2357_v57, 0.0  ;;  %v2101_v24 = vsel %vm2081_vm13, %v2064_v50, %v6261_v45  ;;  %v7085_v50 = vld [vmem:[%s7274_s22 + $0xa0] sm:$0xff] }
 0x266   : > { %v2609_v32 = vmul.f32 %v8850_v38, %v2393_v23  ;;  %v1989_v38 = vsel %vm1970_vm10, %v1952_v41, %v5990_v12  ;;  %v5636_v23 = vunpack.i.h.bf16 %v12323_v2  ;;  %v2572_v12 = vpop.permute.xlu2 %2571  ;;  %v2687_v41 = vld [vmem:[#allocation2] sm:$0xff]  ;;  %v9155_v2 = vpop.permute.xlu1 %2536 }
 0x267   : > { %v2225_v0 = vpop.f32.mrf.mxu0  ;;  %v2026_v58 = vsel %vm2007_vm11, %v1989_v38, %v6080_v21 }
 0x268   : > { %2651 = vst.msk [vmem:[#allocation2 + $0x18] sm:$0xff] %vm1859_vm7, %v2609_v32  ;;  %v2318_v53 = vmul.f32 %v9067_v55, %v2225_v0  ;;  %v2063_v39 = vsel %vm2044_vm12, %v2026_v58, %v6170_v5  ;;  %v2769_v5 = vrot.slane %v9132_v8, 1  ;;  %v2766_v0 = vrot.slane %v2687_v41, 1  ;;  %v12326_v58 = vld [vmem:[#allocation62_spill] sm:$0xff] }
 0x269   : > { %v2100_v19 = vsel %vm2081_vm13, %v2063_v39, %v6260_v42  ;;  %v12325_v42 = vld [vmem:[#allocation46_spill] sm:$0xff]  ;;  %v5905_v61 = vunpack.i.l.bf16 %v12326_v58 }
 0x26a   : > { %v2358_v57 = vadd.f32 %v9076_v26, %v2318_v53  ;;  %v2293_v54 = vpop.f32.mrf.mxu3  ;;  %v2127_v52 = vpack.c.bf16 %v2101_v24, %v2100_v19  ;;  %v5816_v53 = vunpack.i.h.bf16 %v12325_v42  ;;  %v5815_v38 = vunpack.i.l.bf16 %v12325_v42 }
 0x26b   : > { %v2345_v27 = vmul.f32 %v9067_v55, %v2293_v54  ;;  %v2770_v39 = vsel %vm502_vm0, %v2767_v33, %v2769_v5  ;;  %v5906_v19 = vunpack.i.h.bf16 %v12326_v58 }
 0x26c   : > { %v2394_v63 = vmax.f32 %v2358_v57, 0.0 }
 0x26d   : > { %v2385_v15 = vadd.f32 %v9076_v26, %v2345_v27  ;;  %v2768_v27 = vsel %vm502_vm0, %v2766_v0, %v2767_v33  ;;  %v12328_v33 = vld [vmem:[#allocation83_spill] sm:$0xff] }
 0x26e   : > { %v2610_v37 = vmul.f32 %v8924_v48, %v2394_v63  ;;  %v7084_v48 = vld [vmem:[%s7274_s22 + $0xa8] sm:$0xff]  ;;  %v1843_v63 = vsel %vm1822_vm6, %v7085_v50, %v5635_v56  ;;  %v12327_v56 = vld [vmem:[#allocation77_spill] sm:$0xff] }
 0x26f   : > { %v2421_v21 = vmax.f32 %v2385_v15, 0.0  ;;  %v2228_v32 = vpop.f32.mrf.mxu0  ;;  %v1844_v45 = vsel %vm1822_vm6, %v7084_v48, %v5636_v23  ;;  %v2690_v23 = vld [vmem:[#allocation2 + $0x18] sm:$0xff]  ;;  %v6305_v15 = vpack.i.bf16 %v2770_v39, %v2768_v27  ;;  %v5996_v6 = vunpack.i.h.bf16 %v12327_v56 }
 0x270   : > { %2652 = vst.msk [vmem:[#allocation2 + $0x20] sm:$0xff] %vm1859_vm7, %v2610_v37  ;;  %v2319_v3 = vmul.f32 %v9067_v55, %v2228_v32  ;;  %v1881_v8 = vsel %vm1859_vm7, %v1844_v45, %v5726_v16  ;;  %v1880_v37 = vsel %vm1859_vm7, %v1843_v63, %v5725_v25  ;;  %v5995_v32 = vunpack.i.l.bf16 %v12327_v56  ;;  %v2577_v16 = vpop.permute.xlu0 %2576  ;;  %v9194_v56 = vpop.permute.xlu1 %2551 }
 0x271   : > { %v2637_v9 = vmul.f32 %v2572_v12, %v2421_v21  ;;  %v1917_v30 = vsel %vm1896_vm8, %v1880_v37, %v5815_v38  ;;  %v1918_v21 = vsel %vm1896_vm8, %v1881_v8, %v5816_v53  ;;  %6306 = vrot.lane.b32.xlu1 %v6305_v15, %s7187_s24  ;;  %v2771_v0 = vrot.slane %v2690_v23, 1 }
 0x272   : > { %v2359_v57 = vadd.f32 %v9076_v26, %v2319_v3  ;;  %5480 = vmatmul.msk.bf16.gmra.mxu0 %vm2156_vm14, %v2127_v52  ;;  %v2295_v54 = vpop.f32.mrf.mxu3  ;;  %v1954_v41 = vsel %vm1933_vm9, %v1917_v30, %v5905_v61  ;;  %v1955_v25 = vsel %vm1933_vm9, %v1918_v21, %v5906_v19  ;;  %v6086_v48 = vunpack.i.h.bf16 %v12328_v33 }
 0x273   : > { %2679 = vst.msk [vmem:[#allocation2 + $0xf8] sm:$0xff] %vm1859_vm7, %v2637_v9  ;;  %v2346_v24 = vmul.f32 %v9067_v55, %v2295_v54  ;;  %v6085_v45 = vunpack.i.l.bf16 %v12328_v33  ;;  %v12329_v9 = vld [vmem:[#allocation89_spill] sm:$0xff]  ;;  %v1991_v54 = vsel %vm1970_vm10, %v1954_v41, %v5995_v32  ;;  %v6266_v27 = vunpack.i.h.bf16 %v8685_v31  ;;  %v12330_v32 = vld [vmem:[#allocation8_spill] sm:$0xff] }
 0x274   : > { %v2395_v12 = vmax.f32 %v2359_v57, 0.0  ;;  %v6176_v58 = vunpack.i.h.bf16 %v12329_v9  ;;  %v6175_v61 = vunpack.i.l.bf16 %v12329_v9  ;;  %v6265_v39 = vunpack.i.l.bf16 %v8685_v31 }
 0x275   : > { %v2386_v52 = vadd.f32 %v9076_v26, %v2346_v24  ;;  %v1992_v63 = vsel %vm1970_vm10, %v1955_v25, %v5996_v6  ;;  %v2772_v24 = vsel %vm502_vm0, %v2769_v5, %v2771_v0  ;;  %v2028_v15 = vsel %vm2007_vm11, %v1991_v54, %v6085_v45  ;;  %v12331_v25 = vld [vmem:[#allocation24_spill] sm:$0xff]  ;;  %v12333_v54 = vld [vmem:[#allocation54_spill] sm:$0xff] }
 0x276   : > { %v2611_v3 = vmul.f32 %v8812_v29, %v2395_v12  ;;  %v2029_v8 = vsel %vm2007_vm11, %v1992_v63, %v6086_v48  ;;  %v2065_v31 = vsel %vm2044_vm12, %v2028_v15, %v6175_v61  ;;  %v5640_v41 = vunpack.i.l.bf16 %v12330_v32  ;;  %v7086_v45 = vld [vmem:[%s7274_s22 + $0xb8] sm:$0xff] }
 0x277   : > { %v2230_v42 = vpop.f32.mrf.mxu0  ;;  %v2422_v53 = vmax.f32 %v2386_v52, 0.0  ;;  %v9170_v38 = vld [vmem:[#allocation2 + $0x20] sm:$0xff]  ;;  %v2066_v30 = vsel %vm2044_vm12, %v2029_v8, %v6176_v58  ;;  %v2102_v5 = vsel %vm2081_vm13, %v2065_v31, %v6265_v39  ;;  %v5641_v52 = vunpack.i.h.bf16 %v12330_v32  ;;  %v12332_v58 = vld [vmem:[#allocation38_spill] sm:$0xff] }
 0x278   : > { %2653 = vst.msk [vmem:[#allocation2 + $0x28] sm:$0xff] %vm1859_vm7, %v2611_v3  ;;  %v2320_v29 = vmul.f32 %v9067_v55, %v2230_v42  ;;  %v2773_v57 = vrot.slane %v9170_v38, 1  ;;  %v2103_v21 = vsel %vm2081_vm13, %v2066_v30, %v6266_v27  ;;  %v5731_v33 = vunpack.i.h.bf16 %v12331_v25 }
 0x279   : > { %v2638_v50 = vmul.f32 %v2577_v16, %v2422_v53  ;;  %v5730_v48 = vunpack.i.l.bf16 %v12331_v25  ;;  %v1846_v42 = vsel %vm1822_vm6, %v7086_v45, %v5641_v52  ;;  %v7087_v53 = vld [vmem:[%s7274_s22 + $0xb0] sm:$0xff]  ;;  %v5820_v61 = vunpack.i.l.bf16 %v12332_v58 }
 0x27a   : > { %v2360_v19 = vadd.f32 %v9076_v26, %v2320_v29  ;;  %v2774_v23 = vsel %vm502_vm0, %v2771_v0, %v2773_v57  ;;  %v2128_v0 = vpack.c.bf16 %v2103_v21, %v2102_v5  ;;  %v1845_v9 = vsel %vm1822_vm6, %v7087_v53, %v5640_v41  ;;  %v12335_v21 = vld [vmem:[#allocation82_spill] sm:$0xff] }
 0x27b   : > { %2680 = vst.msk [vmem:[#allocation2 + $0x100] sm:$0xff] %vm1859_vm7, %v2638_v50  ;;  %v6310_v37 = vpack.i.bf16 %v2774_v23, %v2772_v24  ;;  %v5821_v29 = vunpack.i.h.bf16 %v12332_v58  ;;  %v5910_v27 = vunpack.i.l.bf16 %v12333_v54  ;;  %v1883_v63 = vsel %vm1859_vm7, %v1846_v42, %v5731_v33  ;;  %v12334_v23 = vld [vmem:[#allocation70_spill] sm:$0xff] }
 0x27c   : > { %v2396_v12 = vmax.f32 %v2360_v19, 0.0  ;;  %v1882_v19 = vsel %vm1859_vm7, %v1845_v9, %v5730_v48  ;;  %v5911_v24 = vunpack.i.h.bf16 %v12333_v54  ;;  %v6000_v15 = vunpack.i.l.bf16 %v12334_v23 }
 0x27d   : > { %6311 = vrot.lane.b32.xlu2 %v6310_v37, %s7187_s24  ;;  %v1919_v8 = vsel %vm1896_vm8, %v1882_v19, %v5820_v61  ;;  %v6001_v37 = vunpack.i.h.bf16 %v12334_v23  ;;  %v1920_v30 = vsel %vm1896_vm8, %v1883_v63, %v5821_v29  ;;  %v6091_v32 = vunpack.i.h.bf16 %v12335_v21 }
 0x27e   : > { %v2612_v6 = vmul.f32 %v8952_v40, %v2396_v12  ;;  %v1956_v5 = vsel %vm1933_vm9, %v1919_v8, %v5910_v27  ;;  %v6090_v52 = vunpack.i.l.bf16 %v12335_v21  ;;  %v1957_v48 = vsel %vm1933_vm9, %v1920_v30, %v5911_v24 }
 0x27f   : > { %v2233_v3 = vpop.f32.mrf.mxu0  ;;  %v9212_v39 = vld [vmem:[#allocation2 + $0x28] sm:$0xff]  ;;  %v1993_v45 = vsel %vm1970_vm10, %v1956_v5, %v6000_v15  ;;  %v6271_v42 = vunpack.i.h.bf16 %v8532_v62  ;;  %v6270_v53 = vunpack.i.l.bf16 %v8532_v62  ;;  %v1994_v9 = vsel %vm1970_vm10, %v1957_v48, %v6001_v37  ;;  %v12337_v15 = vld [vmem:[#allocation20_spill] sm:$0xff] }
 0x280   : > { %2654 = vst.msk [vmem:[#allocation2 + $0x30] sm:$0xff] %vm1859_vm7, %v2612_v6  ;;  %v2321_v16 = vmul.f32 %v9067_v55, %v2233_v3  ;;  %v2775_v31 = vrot.slane %v9212_v39, 1  ;;  %v9226_v6 = vpop.permute.xlu1 %2566  ;;  %v2030_v29 = vsel %vm2007_vm11, %v1993_v45, %v6090_v52  ;;  %v2031_v54 = vsel %vm2007_vm11, %v1994_v9, %v6091_v32  ;;  %v12339_v52 = vld [vmem:[#allocation50_spill] sm:$0xff]  ;;  %v7089_v9 = vld [vmem:[%s7274_s22 + $0xc0] sm:$0xff] }
 0x281   : > { %v5646_v8 = vunpack.i.h.bf16 %v12337_v15  ;;  %v5645_v37 = vunpack.i.l.bf16 %v12337_v15 }
 0x282   : > { %v2361_v40 = vadd.f32 %v9076_v26, %v2321_v16  ;;  %5481 = vmatmul.msk.bf16.gmra.mxu0 %vm2156_vm14, %v2128_v0  ;;  %v12336_v16 = vld [vmem:[#allocation88_spill] sm:$0xff]  ;;  %v2776_v61 = vsel %vm502_vm0, %v2773_v57, %v2775_v31 }
 0x283   : > { %v6181_v0 = vunpack.i.h.bf16 %v12336_v16  ;;  %v6180_v25 = vunpack.i.l.bf16 %v12336_v16  ;;  %v5825_v16 = vunpack.i.l.bf16 %v12339_v52 }
 0x284   : > { %v2397_v50 = vmax.f32 %v2361_v40, 0.0 }
 0x285   : > { %v2067_v62 = vsel %vm2044_vm12, %v2030_v29, %v6180_v25  ;;  %v2068_v63 = vsel %vm2044_vm12, %v2031_v54, %v6181_v0  ;;  %v12340_v25 = vld [vmem:[#allocation66_spill] sm:$0xff] }
 0x286   : > { %v2613_v12 = vmul.f32 %v8860_v7, %v2397_v50  ;;  %v2104_v38 = vsel %vm2081_vm13, %v2067_v62, %v6270_v53  ;;  %v2105_v57 = vsel %vm2081_vm13, %v2068_v63, %v6271_v42  ;;  %v7088_v42 = vld [vmem:[%s7274_s22 + $0xc8] sm:$0xff] }
 0x287   : > { %v2235_v41 = vpop.f32.mrf.mxu0  ;;  %v9228_v3 = vld [vmem:[#allocation2 + $0x30] sm:$0xff]  ;;  %v1848_v53 = vsel %vm1822_vm6, %v7088_v42, %v5646_v8  ;;  %v2587_v42 = vpop.permute.xlu2 %2586 }
 0x288   : > { %2655 = vst.msk [vmem:[#allocation2 + $0x38] sm:$0xff] %vm1859_vm7, %v2613_v12  ;;  %v2322_v7 = vmul.f32 %v9067_v55, %v2235_v41  ;;  %v2777_v33 = vrot.slane %v9228_v3, 1  ;;  %v12338_v12 = vld [vmem:[#allocation34_spill] sm:$0xff]  ;;  %v5826_v41 = vunpack.i.h.bf16 %v12339_v52  ;;  %v2582_v0 = vpop.permute.xlu1 %2581 }
 0x289   : > { %v5735_v5 = vunpack.i.l.bf16 %v12338_v12 }
 0x28a   : > { %v2362_v58 = vadd.f32 %v9076_v26, %v2322_v7  ;;  %v2778_v40 = vsel %vm502_vm0, %v2775_v31, %v2777_v33  ;;  %v5736_v31 = vunpack.i.h.bf16 %v12338_v12  ;;  %v5915_v7 = vunpack.i.l.bf16 %v12340_v25 }
 0x28b   : > { %v6315_v27 = vpack.i.bf16 %v2778_v40, %v2776_v61  ;;  %v5916_v61 = vunpack.i.h.bf16 %v12340_v25 }
 0x28c   : > { %v2398_v50 = vmax.f32 %v2362_v58, 0.0  ;;  %v1847_v58 = vsel %vm1822_vm6, %v7089_v9, %v5645_v37  ;;  %v1885_v54 = vsel %vm1859_vm7, %v1848_v53, %v5736_v31  ;;  %v12342_v31 = vld [vmem:[#allocation86_spill] sm:$0xff] }
 0x28d   : > { %v2298_v19 = vpop.f32.mrf.mxu3  ;;  %6316 = vrot.lane.b32.xlu0 %v6315_v27, %s7187_s24  ;;  %v1884_v29 = vsel %vm1859_vm7, %v1847_v58, %v5735_v5  ;;  %v1922_v63 = vsel %vm1896_vm8, %v1885_v54, %v5826_v41  ;;  %v6095_v5 = vunpack.i.l.bf16 %v12342_v31 }
 0x28e   : > { %v2614_v24 = vmul.f32 %v8900_v44, %v2398_v50  ;;  %v2347_v23 = vmul.f32 %v9067_v55, %v2298_v19  ;;  %v2129_v44 = vpack.c.bf16 %v2105_v57, %v2104_v38  ;;  %v1921_v62 = vsel %vm1896_vm8, %v1884_v29, %v5825_v16  ;;  %v12341_v19 = vld [vmem:[#allocation80_spill] sm:$0xff] }
 0x28f   : > { %v2238_v30 = vpop.f32.mrf.mxu0  ;;  %v9273_v40 = vld [vmem:[#allocation2 + $0x38] sm:$0xff]  ;;  %v6006_v38 = vunpack.i.h.bf16 %v12341_v19  ;;  %v6005_v57 = vunpack.i.l.bf16 %v12341_v19  ;;  %v1959_v12 = vsel %vm1933_vm9, %v1922_v63, %v5916_v61 }
 0x290   : > { %2656 = vst.msk [vmem:[#allocation2 + $0x40] sm:$0xff] %vm1859_vm7, %v2614_v24  ;;  %v2387_v21 = vadd.f32 %v9076_v26, %v2347_v23  ;;  %v2323_v32 = vmul.f32 %v9067_v55, %v2238_v30  ;;  %v1958_v23 = vsel %vm1933_vm9, %v1921_v62, %v5915_v7  ;;  %v2779_v37 = vrot.slane %v9273_v40, 1 }
 0x291   : > { %v6096_v30 = vunpack.i.h.bf16 %v12342_v31  ;;  %v1995_v25 = vsel %vm1970_vm10, %v1958_v23, %v6005_v57  ;;  %v1996_v7 = vsel %vm1970_vm10, %v1959_v12, %v6006_v38  ;;  %v12344_v23 = vld [vmem:[#allocation19_spill] sm:$0xff] }
 0x292   : > { %v2423_v48 = vmax.f32 %v2387_v21, 0.0  ;;  %v2363_v45 = vadd.f32 %v9076_v26, %v2323_v32  ;;  %5482 = vmatmul.msk.bf16.gmra.mxu0 %vm2156_vm14, %v2129_v44  ;;  %v12343_v21 = vld [vmem:[#allocation92_spill] sm:$0xff]  ;;  %v2780_v58 = vsel %vm502_vm0, %v2777_v33, %v2779_v37  ;;  %v2032_v29 = vsel %vm2007_vm11, %v1995_v25, %v6095_v5 }
 0x293   : > { %v6186_v32 = vunpack.i.h.bf16 %v12343_v21  ;;  %v6185_v41 = vunpack.i.l.bf16 %v12343_v21  ;;  %v2033_v54 = vsel %vm2007_vm11, %v1996_v7, %v6096_v30 }
 0x294   : > { %v2399_v27 = vmax.f32 %v2363_v45, 0.0  ;;  %v2639_v50 = vmul.f32 %v2582_v0, %v2423_v48  ;;  %v6276_v48 = vunpack.i.h.bf16 %v8694_v1  ;;  %v6275_v45 = vunpack.i.l.bf16 %v8694_v1 }
 0x295   : > { %v2300_v24 = vpop.f32.mrf.mxu3  ;;  %v2070_v1 = vsel %vm2044_vm12, %v2033_v54, %v6186_v32  ;;  %v12346_v32 = vld [vmem:[#allocation49_spill] sm:$0xff] }
 0x296   : > { %v2615_v15 = vmul.f32 %v8975_v34, %v2399_v27  ;;  %2681 = vst.msk [vmem:[#allocation2 + $0x108] sm:$0xff] %vm1859_vm7, %v2639_v50  ;;  %v2348_v8 = vmul.f32 %v9067_v55, %v2300_v24  ;;  %v2069_v50 = vsel %vm2044_vm12, %v2032_v29, %v6185_v41  ;;  %v2107_v38 = vsel %vm2081_vm13, %v2070_v1, %v6276_v48 }
 0x297   : > { %v2240_v44 = vpop.f32.mrf.mxu0  ;;  %v9290_v52 = vld [vmem:[#allocation2 + $0x40] sm:$0xff]  ;;  %v2106_v19 = vsel %vm2081_vm13, %v2069_v50, %v6275_v45  ;;  %v5830_v41 = vunpack.i.l.bf16 %v12346_v32  ;;  %v7090_v45 = vld [vmem:[%s7274_s22 + $0xd8] sm:$0xff] }
 0x298   : > { %2657 = vst.msk [vmem:[#allocation2 + $0x48] sm:$0xff] %vm1859_vm7, %v2615_v15  ;;  %v2388_v34 = vadd.f32 %v9076_v26, %v2348_v8  ;;  %v2324_v16 = vmul.f32 %v9067_v55, %v2240_v44  ;;  %v2781_v0 = vrot.slane %v9290_v52, 1  ;;  %v5651_v15 = vunpack.i.h.bf16 %v12344_v23 }
 0x299   : > { %v5650_v8 = vunpack.i.l.bf16 %v12344_v23  ;;  %v2130_v21 = vpack.c.bf16 %v2107_v38, %v2106_v19  ;;  %v5831_v44 = vunpack.i.h.bf16 %v12346_v32 }
 0x29a   : > { %v2424_v53 = vmax.f32 %v2388_v34, 0.0  ;;  %v2364_v9 = vadd.f32 %v9076_v26, %v2324_v16  ;;  %v2782_v61 = vsel %vm502_vm0, %v2779_v37, %v2781_v0  ;;  %v12345_v37 = vld [vmem:[#allocation33_spill] sm:$0xff]  ;;  %v2592_v34 = vpop.permute.xlu0 %2591 }
 0x29b   : > { %v6320_v27 = vpack.i.bf16 %v2782_v61, %v2780_v58  ;;  %v5741_v12 = vunpack.i.h.bf16 %v12345_v37  ;;  %v5740_v30 = vunpack.i.l.bf16 %v12345_v37  ;;  %v12347_v16 = vld [vmem:[#allocation65_spill] sm:$0xff] }
 0x29c   : > { %v2400_v62 = vmax.f32 %v2364_v9, 0.0  ;;  %v2640_v63 = vmul.f32 %v2587_v42, %v2424_v53  ;;  %v5920_v25 = vunpack.i.l.bf16 %v12347_v16  ;;  %v1850_v42 = vsel %vm1822_vm6, %v7090_v45, %v5651_v15  ;;  %v7091_v53 = vld [vmem:[%s7274_s22 + $0xd0] sm:$0xff]  ;;  %v12349_v37 = vld [vmem:[#allocation85_spill] sm:$0xff] }
 0x29d   : > { %v2303_v33 = vpop.f32.mrf.mxu3  ;;  %6321 = vrot.lane.b32.xlu1 %v6320_v27, %s7187_s24  ;;  %v1849_v9 = vsel %vm1822_vm6, %v7091_v53, %v5650_v8  ;;  %v5921_v58 = vunpack.i.h.bf16 %v12347_v16  ;;  %v1887_v29 = vsel %vm1859_vm7, %v1850_v42, %v5741_v12  ;;  %v6101_v12 = vunpack.i.h.bf16 %v12349_v37 }
 0x29e   : > { %v2616_v57 = vmul.f32 %v8909_v51, %v2400_v62  ;;  %2682 = vst.msk [vmem:[#allocation2 + $0x110] sm:$0xff] %vm1859_vm7, %v2640_v63  ;;  %v2349_v24 = vmul.f32 %v9067_v55, %v2303_v33  ;;  %v1886_v54 = vsel %vm1859_vm7, %v1849_v9, %v5740_v30  ;;  %v1924_v62 = vsel %vm1896_vm8, %v1887_v29, %v5831_v44  ;;  %v12348_v63 = vld [vmem:[#allocation79_spill] sm:$0xff] }
 0x29f   : > { %v2243_v31 = vpop.f32.mrf.mxu0  ;;  %v9335_v61 = vld [vmem:[#allocation2 + $0x48] sm:$0xff]  ;;  %v1923_v1 = vsel %vm1896_vm8, %v1886_v54, %v5830_v41  ;;  %v6011_v19 = vunpack.i.h.bf16 %v12348_v63  ;;  %v6010_v38 = vunpack.i.l.bf16 %v12348_v63  ;;  %v1961_v8 = vsel %vm1933_vm9, %v1924_v62, %v5921_v58  ;;  %v12350_v30 = vld [vmem:[#allocation91_spill] sm:$0xff] }
 0x2a0   : > { %2658 = vst.msk [vmem:[#allocation2 + $0x50] sm:$0xff] %vm1859_vm7, %v2616_v57  ;;  %v2389_v5 = vadd.f32 %v9076_v26, %v2349_v24  ;;  %v2325_v51 = vmul.f32 %v9067_v55, %v2243_v31  ;;  %v1960_v57 = vsel %vm1933_vm9, %v1923_v1, %v5920_v25  ;;  %v2783_v15 = vrot.slane %v9335_v61, 1 }
 0x2a1   : > { %v6100_v31 = vunpack.i.l.bf16 %v12349_v37  ;;  %v6190_v32 = vunpack.i.l.bf16 %v12350_v30  ;;  %v1998_v16 = vsel %vm1970_vm10, %v1961_v8, %v6011_v19  ;;  %v6281_v25 = vunpack.i.h.bf16 %v8735_v10 }
 0x2a2   : > { %v2425_v7 = vmax.f32 %v2389_v5, 0.0  ;;  %v2365_v48 = vadd.f32 %v9076_v26, %v2325_v51  ;;  %5483 = vmatmul.msk.bf16.gmra.mxu0 %vm2156_vm14, %v2130_v21  ;;  %v6191_v5 = vunpack.i.h.bf16 %v12350_v30  ;;  %v2784_v53 = vsel %vm502_vm0, %v2781_v0, %v2783_v15 }
 0x2a3   : > { %v2035_v29 = vsel %vm2007_vm11, %v1998_v16, %v6101_v12  ;;  %vm4365_vm8 = vcmask 523264  }
 0x2a4   : > { %v2401_v27 = vmax.f32 %v2365_v48, 0.0  ;;  %v2641_v50 = vmul.f32 %v2592_v34, %v2425_v7  ;;  %v1997_v34 = vsel %vm1970_vm10, %v1960_v57, %v6010_v38  ;;  %v6280_v7 = vunpack.i.l.bf16 %v8735_v10  ;;  %v2597_v48 = vpop.permute.xlu1 %2596 }
 0x2a5   : > { %v2305_v33 = vpop.f32.mrf.mxu3  ;;  %v2034_v58 = vsel %vm2007_vm11, %v1997_v34, %v6100_v31  ;;  %vm4629_vm10 = vcmask 588800  }
 0x2a6   : > { %v2617_v24 = vmul.f32 %v8926_v18, %v2401_v27  ;;  %2683 = vst.msk [vmem:[#allocation2 + $0x118] sm:$0xff] %vm1859_vm7, %v2641_v50  ;;  %v2350_v23 = vmul.f32 %v9067_v55, %v2305_v33  ;;  %v2071_v27 = vsel %vm2044_vm12, %v2034_v58, %v6190_v32  ;;  %v2072_v50 = vsel %vm2044_vm12, %v2035_v29, %v6191_v5 }
 0x2a7   : > { %v2245_v51 = vpop.f32.mrf.mxu0  ;;  %v9352_v21 = vld [vmem:[#allocation2 + $0x50] sm:$0xff]  ;;  %v2108_v62 = vsel %vm2081_vm13, %v2071_v27, %v6280_v7  ;;  %v2109_v63 = vsel %vm2081_vm13, %v2072_v50, %v6281_v25  ;;  %v2607_v7 = vpop.permute.xlu0 %2606 }
 0x2a8   : > { %2659 = vst.msk [vmem:[#allocation2 + $0x58] sm:$0xff] %vm1859_vm7, %v2617_v24  ;;  %v2390_v18 = vadd.f32 %v9076_v26, %v2350_v23  ;;  %v2326_v44 = vmul.f32 %v9067_v55, %v2245_v51  ;;  %v2785_v41 = vrot.slane %v9352_v21, 1  ;;  %v2131_v23 = vpack.c.bf16 %v2109_v63, %v2108_v62 }
 0x2aa   : > { %v2426_v45 = vmax.f32 %v2390_v18, 0.0  ;;  %v2366_v42 = vadd.f32 %v9076_v26, %v2326_v44  ;;  %v2786_v9 = vsel %vm502_vm0, %v2783_v15, %v2785_v41  ;;  %v2602_v15 = vpop.permute.xlu2 %2601 }
 0x2ab   : > { %v6325_v54 = vpack.i.bf16 %v2786_v9, %v2784_v53 }
 0x2ac   : > { %v2402_v10 = vmax.f32 %v2366_v42, 0.0  ;;  %v2642_v1 = vmul.f32 %v2597_v48, %v2426_v45 }
 0x2ad   : > { %v2308_v19 = vpop.f32.mrf.mxu3  ;;  %6326 = vrot.lane.b32.xlu2 %v6325_v54, %s7187_s24 }
 0x2ae   : > { %v2618_v0 = vmul.f32 %v9014_v47, %v2402_v10  ;;  %2684 = vst.msk [vmem:[#allocation2 + $0x120] sm:$0xff] %vm1859_vm7, %v2642_v1  ;;  %v2351_v38 = vmul.f32 %v9067_v55, %v2308_v19 }
 0x2af   : > { %v2248_v33 = vpop.f32.mrf.mxu0  ;;  %v9383_v12 = vld [vmem:[#allocation2 + $0x58] sm:$0xff] }
 0x2b0   : > { %2660 = vst.msk [vmem:[#allocation2 + $0x60] sm:$0xff] %vm1859_vm7, %v2618_v0  ;;  %v2391_v57 = vadd.f32 %v9076_v26, %v2351_v38  ;;  %v2327_v24 = vmul.f32 %v9067_v55, %v2248_v33  ;;  %v2787_v32 = vrot.slane %v9383_v12, 1 }
 0x2b2   : > { %v2427_v8 = vmax.f32 %v2391_v57, 0.0  ;;  %v2367_v37 = vadd.f32 %v9076_v26, %v2327_v24  ;;  %5484 = vmatmul.msk.bf16.gmra.mxu0 %vm2156_vm14, %v2131_v23  ;;  %v2788_v45 = vsel %vm502_vm0, %v2785_v41, %v2787_v32 }
 0x2b4   : > { %v2403_v47 = vmax.f32 %v2367_v37, 0.0  ;;  %v2643_v31 = vmul.f32 %v2602_v15, %v2427_v8 }
 0x2b5   : > { %v2310_v30 = vpop.f32.mrf.mxu3  ;;  %v9408_v62 = vld [vmem:[#allocation2 + $0x120] sm:$0xff] }
 0x2b6   : > { %v2619_v5 = vmul.f32 %v8931_v13, %v2403_v47  ;;  %2685 = vst.msk [vmem:[#allocation2 + $0x128] sm:$0xff] %vm1859_vm7, %v2643_v31  ;;  %v2352_v51 = vmul.f32 %v9067_v55, %v2310_v30  ;;  %v12098_v24 = vrot.slane %v9408_v62, 3 }
 0x2b7   : > { %v2250_v18 = vpop.f32.mrf.mxu0  ;;  %v9389_v44 = vld [vmem:[#allocation2 + $0x60] sm:$0xff]  ;;  %12351 = vst [vmem:[#allocation72_spill] sm:$0xff] %v9408_v62 }
 0x2b8   : > { %2661 = vst.msk [vmem:[#allocation2 + $0x68] sm:$0xff] %vm1859_vm7, %v2619_v5  ;;  %v2392_v34 = vadd.f32 %v9076_v26, %v2352_v51  ;;  %v2328_v16 = vmul.f32 %v9067_v55, %v2250_v18  ;;  %v2789_v25 = vrot.slane %v9389_v44, 1 }
 0x2ba   : > { %v2428_v48 = vmax.f32 %v2392_v34, 0.0  ;;  %v2368_v13 = vadd.f32 %v9076_v26, %v2328_v16  ;;  %v2790_v42 = vsel %vm502_vm0, %v2787_v32, %v2789_v25 }
 0x2bb   : > { %v6330_v53 = vpack.i.bf16 %v2790_v42, %v2788_v45 }
 0x2bc   : > { %v2404_v9 = vmax.f32 %v2368_v13, 0.0  ;;  %v2644_v58 = vmul.f32 %v2607_v7, %v2428_v48 }
 0x2bd   : > { %6331 = vrot.lane.b32.xlu0 %v6330_v53, %s7187_s24  ;;  %v9404_v10 = vld [vmem:[#allocation2 + $0x128] sm:$0xff] }
 0x2be   : > { %v2620_v29 = vmul.f32 %v8964_v28, %v2404_v9  ;;  %2686 = vst.msk [vmem:[#allocation2 + $0x130] sm:$0xff] %vm1859_vm7, %v2644_v58  ;;  %v3318_v28 = vrot.slane %v9404_v10, 3  ;;  %v3798_v48 = vrot.slane %v9404_v10, 5 }
 0x2bf   : > { %v2253_v54 = vpop.f32.mrf.mxu0  ;;  %v9406_v41 = vld [vmem:[#allocation2 + $0x68] sm:$0xff] }
 0x2c0   : > { %2662 = vst.msk [vmem:[#allocation2 + $0x70] sm:$0xff] %vm1859_vm7, %v2620_v29  ;;  %v2329_v27 = vmul.f32 %v9067_v55, %v2253_v54  ;;  %v2791_v0 = vrot.slane %v9406_v41, 1  ;;  %v9425_v8 = vsel %vm980_vm2, %v12098_v24, %v3318_v28 }
 0x2c1   : > { %12353 = vst [vmem:[#allocation25_spill] sm:$0xff] %v9425_v8 }
 0x2c2   : > { %v2369_v50 = vadd.f32 %v9076_v26, %v2329_v27  ;;  %v2792_v47 = vsel %vm502_vm0, %v2789_v25, %v2791_v0 }
 0x2c4   : > { %v2405_v1 = vmax.f32 %v2369_v50, 0.0 }
 0x2c5   : > { %v9410_v63 = vld [vmem:[#allocation2 + $0x130] sm:$0xff] }
 0x2c6   : > { %12352 = vst [vmem:[#allocation11_spill] sm:$0xff] %v9410_v63  ;;  %v2621_v19 = vmul.f32 %v9040_v59, %v2405_v1  ;;  %v12097_v38 = vrot.slane %v9410_v63, 3  ;;  %v12089_v13 = vrot.slane %v9410_v63, 5 }
 0x2c7   : > { %v2255_v33 = vpop.f32.mrf.mxu0  ;;  %v9416_v57 = vld [vmem:[#allocation2 + $0x70] sm:$0xff] }
 0x2c8   : > { %2663 = vst.msk [vmem:[#allocation2 + $0x78] sm:$0xff] %vm1859_vm7, %v2621_v19  ;;  %v2330_v23 = vmul.f32 %v9067_v55, %v2255_v33  ;;  %v2793_v15 = vrot.slane %v9416_v57, 1  ;;  %v9430_v59 = vsel %vm980_vm2, %v3318_v28, %v12097_v38  ;;  %v9454_v58 = vsel %vm1458_vm4, %v3798_v48, %v12089_v13 }
 0x2c9   : > { %12354 = vst [vmem:[#allocation39_spill] sm:$0xff] %v9430_v59  ;;  %v12096_v33 = vrot.slane %v9416_v57, 4 }
 0x2ca   : > { %v2370_v37 = vadd.f32 %v9076_v26, %v2330_v23  ;;  %v2794_v31 = vsel %vm502_vm0, %v2791_v0, %v2793_v15  ;;  %12355 = vst [vmem:[#allocation55_spill] sm:$0xff] %v9454_v58 }
 0x2cb   : > { %v6335_v5 = vpack.i.bf16 %v2794_v31, %v2792_v47 }
 0x2cc   : > { %v2406_v51 = vmax.f32 %v2370_v37, 0.0 }
 0x2cd   : > { %6336 = vrot.lane.b32.xlu1 %v6335_v5, %s7187_s24 }
 0x2ce   : > { %v2622_v32 = vmul.f32 %v8970_v11, %v2406_v51  ;;  %v12094_v11 = vrot.slane %v9408_v62, 5 }
 0x2cf   : > { %v2258_v18 = vpop.f32.mrf.mxu0  ;;  %v9442_v7 = vld [vmem:[#allocation2 + $0x78] sm:$0xff] }
 0x2d0   : > { %2664 = vst.msk [vmem:[#allocation2 + $0x80] sm:$0xff] %vm1859_vm7, %v2622_v32  ;;  %v2331_v34 = vmul.f32 %v9067_v55, %v2258_v18  ;;  %v2795_v42 = vrot.slane %v9442_v7, 1  ;;  %v9463_v27 = vsel %vm1458_vm4, %v12094_v11, %v3798_v48  ;;  %v3503_v18 = vrot.slane %v9410_v63, 4 }
 0x2d1   : > { %12356 = vst [vmem:[#allocation71_spill] sm:$0xff] %v9463_v27 }
 0x2d2   : > { %v2371_v16 = vadd.f32 %v9076_v26, %v2331_v34  ;;  %v2796_v19 = vsel %vm502_vm0, %v2793_v15, %v2795_v42  ;;  %v3501_v15 = vrot.slane %v9404_v10, 4 }
 0x2d4   : > { %v2407_v25 = vmax.f32 %v2371_v16, 0.0  ;;  %v12091_v16 = vrot.slane %v9408_v62, 4 }
 0x2d6   : > { %v2623_v45 = vmul.f32 %v8983_v60, %v2407_v25  ;;  %v3457_v60 = vrot.slane %v9442_v7, 4 }
 0x2d7   : > { %v2260_v53 = vpop.f32.mrf.mxu0  ;;  %v9449_v9 = vld [vmem:[#allocation2 + $0x80] sm:$0xff] }
 0x2d8   : > { %2665 = vst.msk [vmem:[#allocation2 + $0x88] sm:$0xff] %vm1859_vm7, %v2623_v45  ;;  %v2332_v29 = vmul.f32 %v9067_v55, %v2260_v53  ;;  %v2797_v54 = vrot.slane %v9449_v9, 1  ;;  %v3459_v50 = vrot.slane %v9449_v9, 4  ;;  %v3458_v31 = vsel %vm1162_vm3, %v12096_v33, %v3457_v60 }
 0x2d9   : > { %v3502_v45 = vsel %vm1162_vm3, %v12091_v16, %v3501_v15 }
 0x2da   : > { %v2372_v28 = vadd.f32 %v9076_v26, %v2332_v29  ;;  %v2798_v0 = vsel %vm502_vm0, %v2795_v42, %v2797_v54  ;;  %v3460_v37 = vsel %vm1162_vm3, %v3457_v60, %v3459_v50  ;;  %v3982_v29 = vrot.slane %v9404_v10, 6 }
 0x2db   : > { %v6340_v23 = vpack.i.bf16 %v2798_v0, %v2796_v19  ;;  %v9477_v5 = vpack.i.bf16 %v3460_v37, %v3458_v31  ;;  %v12090_v60 = vrot.slane %v9410_v63, 6  ;;  %v12095_v0 = vrot.slane %v9408_v62, 6 }
 0x2dc   : > { %v2408_v47 = vmax.f32 %v2372_v28, 0.0 }
 0x2dd   : > { %6341 = vrot.lane.b32.xlu2 %v6340_v23, %s7187_s24  ;;  %12357 = vst [vmem:[#allocation5_spill] sm:$0xff] %v9477_v5 }
 0x2de   : > { %v2624_v51 = vmul.f32 %v9078_v43, %v2408_v47  ;;  %v3504_v43 = vsel %vm1162_vm3, %v3501_v15, %v3503_v18  ;;  %v9506_v47 = vsel %vm1640_vm5, %v3982_v29, %v12090_v60 }
 0x2df   : > { %v2263_v32 = vpop.f32.mrf.mxu0  ;;  %v9486_v48 = vld [vmem:[#allocation2 + $0x88] sm:$0xff]  ;;  %v9494_v53 = vpack.i.bf16 %v3504_v43, %v3502_v45  ;;  %12359 = vst [vmem:[#allocation10_spill] sm:$0xff] %v9506_v47 }
 0x2e0   : > { %2666 = vst.msk [vmem:[#allocation2 + $0x90] sm:$0xff] %vm1859_vm7, %v2624_v51  ;;  %v2333_v34 = vmul.f32 %v9067_v55, %v2263_v32  ;;  %v2799_v19 = vrot.slane %v9486_v48, 1 }
 0x2e1   : > { %12358 = vst [vmem:[#allocation9_spill] sm:$0xff] %v9494_v53 }
 0x2e2   : > { %v2373_v25 = vadd.f32 %v9076_v26, %v2333_v34  ;;  %v2800_v34 = vsel %vm502_vm0, %v2797_v54, %v2799_v19 }
 0x2e4   : > { %v2409_v42 = vmax.f32 %v2373_v25, 0.0 }
 0x2e6   : > { %v2625_v28 = vmul.f32 %v8994_v35, %v2409_v42  ;;  %v9514_v35 = vsel %vm1640_vm5, %v12095_v0, %v3982_v29 }
 0x2e7   : > { %v2265_v23 = vpop.f32.mrf.mxu0  ;;  %v9501_v37 = vld [vmem:[#allocation2 + $0x90] sm:$0xff]  ;;  %12360 = vst [vmem:[#allocation15_spill] sm:$0xff] %v9514_v35 }
 0x2e8   : > { %2667 = vst.msk [vmem:[#allocation2 + $0x98] sm:$0xff] %vm1859_vm7, %v2625_v28  ;;  %v2334_v31 = vmul.f32 %v9067_v55, %v2265_v23  ;;  %v2801_v51 = vrot.slane %v9501_v37, 1  ;;  %v3463_v45 = vrot.slane %v9501_v37, 4  ;;  %v3461_v28 = vrot.slane %v9486_v48, 4 }
 0x2ea   : > { %v2374_v15 = vadd.f32 %v9076_v26, %v2334_v31  ;;  %v2802_v25 = vsel %vm502_vm0, %v2799_v19, %v2801_v51  ;;  %v3464_v23 = vsel %vm1162_vm3, %v3461_v28, %v3463_v45  ;;  %v3462_v54 = vsel %vm1162_vm3, %v3459_v50, %v3461_v28 }
 0x2eb   : > { %v6345_v43 = vpack.i.bf16 %v2802_v25, %v2800_v34  ;;  %v9529_v19 = vpack.i.bf16 %v3464_v23, %v3462_v54 }
 0x2ec   : > { %v2410_v42 = vmax.f32 %v2374_v15, 0.0 }
 0x2ed   : > { %6346 = vrot.lane.b32.xlu0 %v6345_v43, %s7187_s24  ;;  %12361 = vst [vmem:[#allocation29_spill] sm:$0xff] %v9529_v19 }
 0x2ee   : > { %v2626_v29 = vmul.f32 %v9023_v17, %v2410_v42 }
 0x2ef   : > { %v2268_v13 = vpop.f32.mrf.mxu0  ;;  %v9532_v15 = vld [vmem:[#allocation2 + $0x98] sm:$0xff] }
 0x2f0   : > { %2668 = vst.msk [vmem:[#allocation2 + $0xa0] sm:$0xff] %vm1859_vm7, %v2626_v29  ;;  %v2335_v31 = vmul.f32 %v9067_v55, %v2268_v13  ;;  %v2803_v17 = vrot.slane %v9532_v15, 1 }
 0x2f2   : > { %v2375_v34 = vadd.f32 %v9076_v26, %v2335_v31  ;;  %v2804_v29 = vsel %vm502_vm0, %v2801_v51, %v2803_v17 }
 0x2f4   : > { %v2411_v25 = vmax.f32 %v2375_v34, 0.0 }
 0x2f6   : > { %v2627_v43 = vmul.f32 %v9118_v49, %v2411_v25  ;;  %v3465_v25 = vrot.slane %v9532_v15, 4 }
 0x2f7   : > { %v2270_v42 = vpop.f32.mrf.mxu0  ;;  %v9536_v60 = vld [vmem:[#allocation2 + $0xa0] sm:$0xff] }
 0x2f8   : > { %2669 = vst.msk [vmem:[#allocation2 + $0xa8] sm:$0xff] %vm1859_vm7, %v2627_v43  ;;  %v2336_v13 = vmul.f32 %v9067_v55, %v2270_v42  ;;  %v2805_v50 = vrot.slane %v9536_v60, 1  ;;  %v3467_v49 = vrot.slane %v9536_v60, 4  ;;  %v2989_v47 = vrot.slane %v9536_v60, 2 }
 0x2fa   : > { %v2376_v28 = vadd.f32 %v9076_v26, %v2336_v13  ;;  %v2806_v23 = vsel %vm502_vm0, %v2803_v17, %v2805_v50  ;;  %v3468_v13 = vsel %vm1162_vm3, %v3465_v25, %v3467_v49  ;;  %v3466_v17 = vsel %vm1162_vm3, %v3463_v45, %v3465_v25 }
 0x2fb   : > { %v6350_v31 = vpack.i.bf16 %v2806_v23, %v2804_v29  ;;  %v9555_v29 = vpack.i.bf16 %v3468_v13, %v3466_v17 }
 0x2fc   : > { %v2412_v54 = vmax.f32 %v2376_v28, 0.0 }
 0x2fd   : > { %6351 = vrot.lane.b32.xlu1 %v6350_v31, %s7187_s24  ;;  %12362 = vst [vmem:[#allocation45_spill] sm:$0xff] %v9555_v29 }
 0x2fe   : > { %v2628_v34 = vmul.f32 %v9027_v46, %v2412_v54 }
 0x2ff   : > { %v2273_v43 = vpop.f32.mrf.mxu0  ;;  %v9553_v28 = vld [vmem:[#allocation2 + $0xa8] sm:$0xff] }
 0x300   : > { %2670 = vst.msk [vmem:[#allocation2 + $0xb0] sm:$0xff] %vm1859_vm7, %v2628_v34  ;;  %v2337_v42 = vmul.f32 %v9067_v55, %v2273_v43  ;;  %v2807_v31 = vrot.slane %v9553_v28, 1  ;;  %v3469_v17 = vrot.slane %v9553_v28, 4 }
 0x302   : > { %v2377_v51 = vadd.f32 %v9076_v26, %v2337_v42  ;;  %v2808_v25 = vsel %vm502_vm0, %v2805_v50, %v2807_v31  ;;  %v7092_v50 = vld [vmem:[%s11985_s3] ss:$0 sm:$0xff] }
 0x304   : > { %v2413_v23 = vmax.f32 %v2377_v51, 0.0 }
 0x306   : > { %v2629_v46 = vmul.f32 %v9052_v4, %v2413_v23 }
 0x307   : > { %v2275_v54 = vpop.f32.mrf.mxu0  ;;  %v9559_v32 = vld [vmem:[#allocation2 + $0xb0] sm:$0xff] }
 0x308   : > { %2671 = vst.msk [vmem:[#allocation2 + $0xb8] sm:$0xff] %vm1859_vm7, %v2629_v46  ;;  %v2338_v34 = vmul.f32 %v9067_v55, %v2275_v54  ;;  %v2809_v43 = vrot.slane %v9559_v32, 1  ;;  %v3471_v13 = vrot.slane %v9559_v32, 4  ;;  %v3470_v54 = vsel %vm1162_vm3, %v3467_v49, %v3469_v17 }
 0x30a   : > { %v2378_v45 = vadd.f32 %v9076_v26, %v2338_v34  ;;  %v2810_v42 = vsel %vm502_vm0, %v2807_v31, %v2809_v43  ;;  %v3472_v55 = vsel %vm1162_vm3, %v3469_v17, %v3471_v13 }
 0x30b   : > { %v6355_v4 = vpack.i.bf16 %v2810_v42, %v2808_v25  ;;  %v9577_v34 = vpack.i.bf16 %v3472_v55, %v3470_v54 }
 0x30c   : > { %v2414_v51 = vmax.f32 %v2378_v45, 0.0 }
 0x30d   : > { %6356 = vrot.lane.b32.xlu2 %v6355_v4, %s7187_s24  ;;  %12363 = vst [vmem:[#allocation61_spill] sm:$0xff] %v9577_v34  ;;  %v9782_v34 = vpop.permute.xlu2 %6311 }
 0x30e   : > { %v2630_v23 = vmul.f32 %v9155_v2, %v2414_v51  ;;  %v9582_v2 = vld [vmem:[#allocation2 + $0x138] sm:$0xff]  ;;  %12371 = vst [vmem:[#allocation57_spill] sm:$0xff] %v9782_v34 }
 0x30f   : > { %v2278_v46 = vpop.f32.mrf.mxu0  ;;  %v9580_v25 = vld [vmem:[#allocation2 + $0xb8] sm:$0xff]  ;;  %12365 = vst [vmem:[#allocation4_spill] sm:$0xff] %v9582_v2  ;;  %v12093_v49 = vrot.slane %v9582_v2, 4 }
 0x310   : > { %2672 = vst.msk [vmem:[#allocation2 + $0xc0] sm:$0xff] %vm1859_vm7, %v2630_v23  ;;  %v2339_v31 = vmul.f32 %v7092_v50, %v2278_v46  ;;  %v2811_v51 = vrot.slane %v9580_v25, 1  ;;  %v12092_v23 = vrot.slane %v9580_v25, 4 }
 0x311   : > { %12364 = vst [vmem:[#allocation23_spill] sm:$0xff] %v9580_v25 }
 0x312   : > { %v2379_v45 = vadd.f32 %v9076_v26, %v2339_v31  ;;  %v9595_v55 = vsel %vm1162_vm3, %v3471_v13, %v12092_v23  ;;  %v2812_v31 = vsel %vm502_vm0, %v2809_v43, %v2811_v51 }
 0x313   : > { %12366 = vst [vmem:[#allocation22_spill] sm:$0xff] %v9595_v55  ;;  %v9668_v55 = vld [vmem:[#allocation2 + $0x118] sm:$0xff] }
 0x314   : > { %v2415_v42 = vmax.f32 %v2379_v45, 0.0 }
 0x316   : > { %v2631_v4 = vmul.f32 %v9060_v20, %v2415_v42  ;;  %v7093_v20 = vld [vmem:[%s11986_s4] ss:$0 sm:$0xff] }
 0x317   : > { %v2280_v1 = vpop.f32.mrf.mxu0  ;;  %v9587_v16 = vld [vmem:[#allocation2 + $0xc0] sm:$0xff] }
 0x318   : > { %2673 = vst.msk [vmem:[#allocation2 + $0xc8] sm:$0xff] %vm1859_vm7, %v2631_v4  ;;  %v2340_v17 = vmul.f32 %v7092_v50, %v2280_v1  ;;  %v2813_v26 = vrot.slane %v9587_v16, 1  ;;  %v9607_v1 = vsel %vm1162_vm3, %v3503_v18, %v12093_v49 }
 0x319   : > { %12367 = vst [vmem:[#allocation37_spill] sm:$0xff] %v9607_v1 }
 0x31a   : > { %v2380_v46 = vadd.f32 %v7093_v20, %v2340_v17  ;;  %v2814_v54 = vsel %vm502_vm0, %v2811_v51, %v2813_v26 }
 0x31b   : > { %v6360_v45 = vpack.i.bf16 %v2814_v54, %v2812_v31 }
 0x31c   : > { %v2416_v42 = vmax.f32 %v2380_v46, 0.0 }
 0x31d   : > { %6361 = vrot.lane.b32.xlu0 %v6360_v45, %s7187_s24 }
 0x31e   : > { %v2632_v4 = vmul.f32 %v9088_v36, %v2416_v42 }
 0x31f   : > { %v2283_v17 = vpop.f32.mrf.mxu0  ;;  %v9614_v31 = vld [vmem:[#allocation2 + $0xc8] sm:$0xff] }
 0x320   : > { %2674 = vst.msk [vmem:[#allocation2 + $0xd0] sm:$0xff] %vm1859_vm7, %v2632_v4  ;;  %v2341_v43 = vmul.f32 %v7092_v50, %v2283_v17  ;;  %v2815_v18 = vrot.slane %v9614_v31, 1 }
 0x322   : > { %v2381_v51 = vadd.f32 %v7093_v20, %v2341_v43  ;;  %v2816_v4 = vsel %vm502_vm0, %v2813_v26, %v2815_v18 }
 0x324   : > { %v2417_v54 = vmax.f32 %v2381_v51, 0.0 }
 0x326   : > { %v2633_v23 = vmul.f32 %v9194_v56, %v2417_v54 }
 0x327   : > { %v2285_v46 = vpop.f32.mrf.mxu0  ;;  %v9618_v49 = vld [vmem:[#allocation2 + $0xd0] sm:$0xff] }
 0x328   : > { %2675 = vst.msk [vmem:[#allocation2 + $0xd8] sm:$0xff] %vm1859_vm7, %v2633_v23  ;;  %v2342_v45 = vmul.f32 %v7092_v50, %v2285_v46  ;;  %v2817_v36 = vrot.slane %v9618_v49, 1 }
 0x32a   : > { %v2382_v42 = vadd.f32 %v7093_v20, %v2342_v45  ;;  %v2818_v17 = vsel %vm502_vm0, %v2815_v18, %v2817_v36 }
 0x32b   : > { %v6365_v43 = vpack.i.bf16 %v2818_v17, %v2816_v4 }
 0x32c   : > { %v2418_v13 = vmax.f32 %v2382_v42, 0.0 }
 0x32d   : > { %6366 = vrot.lane.b32.xlu1 %v6365_v43, %s7187_s24 }
 0x32e   : > { %v2634_v56 = vmul.f32 %v9097_v14, %v2418_v13  ;;  %v9635_v13 = vld [vmem:[#allocation2 + $0x110] sm:$0xff] }
 0x32f   : > { %v2288_v51 = vpop.f32.mrf.mxu0  ;;  %v9627_v23 = vld [vmem:[#allocation2 + $0xd8] sm:$0xff] }
 0x330   : > { %2676 = vst.msk [vmem:[#allocation2 + $0xe0] sm:$0xff] %vm1859_vm7, %v2634_v56  ;;  %v2343_v54 = vmul.f32 %v7092_v50, %v2288_v51  ;;  %v2819_v26 = vrot.slane %v9627_v23, 1  ;;  %v9639_v56 = vld [vmem:[#allocation2 + $0x108] sm:$0xff]  ;;  %v2833_v51 = vrot.slane %v9635_v13, 1 }
 0x332   : > { %v2383_v11 = vadd.f32 %v7093_v20, %v2343_v54  ;;  %v2820_v17 = vsel %vm502_vm0, %v2817_v36, %v2819_v26  ;;  %v9643_v54 = vld [vmem:[#allocation2 + $0x100] sm:$0xff] }
 0x334   : > { %v2419_v46 = vmax.f32 %v2383_v11, 0.0 }
 0x336   : > { %v2635_v45 = vmul.f32 %v9128_v22, %v2419_v46 }
 0x337   : > { %v2290_v0 = vpop.f32.mrf.mxu0  ;;  %v9631_v18 = vld [vmem:[#allocation2 + $0xe0] sm:$0xff] }
 0x338   : > { %12368 = vst [vmem:[#allocation53_spill] sm:$0xff] %v9631_v18  ;;  %v2344_v42 = vmul.f32 %v7092_v50, %v2290_v0  ;;  %v2821_v14 = vrot.slane %v9631_v18, 1  ;;  %v2831_v50 = vrot.slane %v9639_v56, 1  ;;  %v3005_v29 = vrot.slane %v9631_v18, 2 }
 0x339   : > { %2677 = vst.msk [vmem:[#allocation2 + $0xe8] sm:$0xff] %vm1859_vm7, %v2635_v45  ;;  %v7094_v45 = vld [vmem:[#allocation2] sm:$0xff] }
 0x33a   : > { %v2384_v4 = vadd.f32 %v7093_v20, %v2344_v42  ;;  %v2822_v43 = vsel %vm502_vm0, %v2819_v26, %v2821_v14  ;;  %v2829_v20 = vrot.slane %v9643_v54, 1  ;;  %v2834_v36 = vsel %vm502_vm0, %v2831_v50, %v2833_v51  ;;  %v7095_v42 = vld [vmem:[#allocation2 + $0x8] sm:$0xff] }
 0x33b   : > { %v6370_v11 = vpack.i.bf16 %v2822_v43, %v2820_v17  ;;  %v2950_v26 = vrot.slane %v7094_v45, 2 }
 0x33c   : > { %v2420_v22 = vmax.f32 %v2384_v4, 0.0  ;;  %v2832_v46 = vsel %vm502_vm0, %v2829_v20, %v2831_v50  ;;  %v2951_v4 = vrot.slane %v7095_v42, 2 }
 0x33d   : > { %6371 = vrot.lane.b32.xlu2 %v6370_v11, %s7187_s24  ;;  %v6385_v17 = vpack.i.bf16 %v2834_v36, %v2832_v46  ;;  %v7096_v11 = vld [vmem:[#allocation2 + $0x10] sm:$0xff] }
 0x33e   : > { %v2636_v0 = vmul.f32 %v9226_v6, %v2420_v22  ;;  %v2953_v33 = vrot.slane %v7096_v11, 2  ;;  %v9654_v6 = vld [vmem:[#allocation2 + $0xf8] sm:$0xff]  ;;  %v2952_v22 = vsel %vm684_vm1, %v2950_v26, %v2951_v4 }
 0x33f   : > { %v2827_v36 = vrot.slane %v9654_v6, 1 }
 0x340   : > { %2678 = vst.msk [vmem:[#allocation2 + $0xf0] sm:$0xff] %vm1859_vm7, %v2636_v0  ;;  %v9651_v43 = vld [vmem:[#allocation2 + $0xe8] sm:$0xff]  ;;  %v2954_v0 = vsel %vm684_vm1, %v2951_v4, %v2953_v33  ;;  %v2965_v4 = vrot.slane %v9290_v52, 2 }
 0x341   : > { %v2823_v30 = vrot.slane %v9651_v43, 1  ;;  %v6395_v46 = vpack.i.bf16 %v2954_v0, %v2952_v22  ;;  %v2830_v11 = vsel %vm502_vm0, %v2827_v36, %v2829_v20  ;;  %v2837_v22 = vrot.slane %v9408_v62, 1 }
 0x342   : > { %v2963_v20 = vrot.slane %v9273_v40, 2  ;;  %v12102_v40 = vrot.slane %v9631_v18, 4 }
 0x344   : > { %v2966_v52 = vsel %vm684_vm1, %v2963_v20, %v2965_v4 }
 0x345   : > { %6386 = vrot.lane.b32.xlu2 %v6385_v17, %s7187_s24  ;;  %v2824_v17 = vsel %vm502_vm0, %v2821_v14, %v2823_v30  ;;  %v2835_v14 = vrot.slane %v9668_v55, 1 }
 0x347   : > { %v9659_v50 = vld [vmem:[#allocation2 + $0xf0] sm:$0xff]  ;;  %v2838_v0 = vsel %vm502_vm0, %v2835_v14, %v2837_v22 }
 0x348   : > { %v2825_v45 = vrot.slane %v9659_v50, 1  ;;  %v3009_v58 = vrot.slane %v9659_v50, 2 }
 0x34a   : > { %v2828_v42 = vsel %vm502_vm0, %v2825_v45, %v2827_v36  ;;  %v2826_v38 = vsel %vm502_vm0, %v2823_v30, %v2825_v45  ;;  %v12101_v30 = vrot.slane %v9659_v50, 4  ;;  %v3485_v45 = vrot.slane %v9651_v43, 4 }
 0x34b   : > { %v6380_v26 = vpack.i.bf16 %v2830_v11, %v2828_v42  ;;  %v6375_v24 = vpack.i.bf16 %v2826_v38, %v2824_v17  ;;  %v2961_v38 = vrot.slane %v9228_v3, 2  ;;  %v2977_v3 = vrot.slane %v9416_v57, 2  ;;  %v9693_v17 = vld [vmem:[#allocation2 + $0x20] sm:$0xff] }
 0x34c   : > { %v3488_v42 = vsel %vm1162_vm3, %v3485_v45, %v12101_v30 }
 0x34d   : > { %6396 = vrot.lane.b32.xlu2 %v6395_v46, %s7189_s26  ;;  %6381 = vrot.lane.b32.xlu1 %v6380_v26, %s7187_s24  ;;  %v2964_v36 = vsel %vm684_vm1, %v2961_v38, %v2963_v20  ;;  %v2957_v26 = vrot.slane %v9693_v17, 2  ;;  %v2975_v20 = vrot.slane %v9406_v41, 2 }
 0x34e   : > { %6376 = vrot.lane.b32.xlu0 %v6375_v24, %s7187_s24  ;;  %v9682_v46 = vpack.i.bf16 %v2966_v52, %v2964_v36  ;;  %v2836_v24 = vsel %vm502_vm0, %v2833_v51, %v2835_v14  ;;  %v3486_v51 = vsel %vm1162_vm3, %v12102_v40, %v3485_v45  ;;  %v2959_v14 = vrot.slane %v9212_v39, 2 }
 0x34f   : > { %v6390_v11 = vpack.i.bf16 %v2838_v0, %v2836_v24  ;;  %v9702_v52 = vpack.i.bf16 %v3488_v42, %v3486_v51  ;;  %v9704_v0 = vld [vmem:[#allocation2 + $0x18] sm:$0xff]  ;;  %v2973_v36 = vrot.slane %v9389_v44, 2  ;;  %v2978_v24 = vsel %vm684_vm1, %v2975_v20, %v2977_v3 }
 0x350   : > { %12370 = vst [vmem:[#allocation69_spill] sm:$0xff] %v9704_v0  ;;  %v2962_v30 = vsel %vm684_vm1, %v2959_v14, %v2961_v38  ;;  %v2960_v40 = vsel %vm684_vm1, %v2957_v26, %v2959_v14  ;;  %v2969_v38 = vrot.slane %v9352_v21, 2  ;;  %vm4251_vm0 = vcmask 326656  }
 0x351   : > { %12369 = vst [vmem:[#allocation41_spill] sm:$0xff] %v9702_v52  ;;  %v9715_v39 = vpack.i.bf16 %v2962_v30, %v2960_v40  ;;  %v2987_v30 = vrot.slane %v9532_v15, 2  ;;  %v2971_v40 = vrot.slane %v9383_v12, 2  ;;  %v2993_v52 = vrot.slane %v9559_v32, 2 }
 0x353   : > { %v2974_v14 = vsel %vm684_vm1, %v2971_v40, %v2973_v36 }
 0x355   : > { %6411 = vrot.lane.b32.xlu2 %v9682_v46, %s7189_s26  ;;  %2911 = vrot.lane.b32.xlu1 %v2837_v22, %s7187_s24  ;;  %v2955_v22 = vrot.slane %v9704_v0, 2 }
 0x356   : > { %6391 = vrot.lane.b32.xlu0 %v6390_v11, %s7187_s24  ;;  %v2976_v11 = vsel %vm684_vm1, %v2973_v36, %v2975_v20  ;;  %v2990_v20 = vsel %vm684_vm1, %v2987_v30, %v2989_v47  ;;  %v2981_v36 = vrot.slane %v9449_v9, 2 }
 0x357   : > { %v2958_v45 = vsel %vm684_vm1, %v2955_v22, %v2957_v26  ;;  %v9713_v35 = vpack.i.bf16 %v2978_v24, %v2976_v11  ;;  %v2956_v42 = vsel %vm684_vm1, %v2953_v33, %v2955_v22  ;;  %v2967_v33 = vrot.slane %v9335_v61, 2 }
 0x358   : > { %v9718_v51 = vpack.i.bf16 %v2958_v45, %v2956_v42  ;;  %v2985_v26 = vrot.slane %v9501_v37, 2  ;;  %v2972_v45 = vsel %vm684_vm1, %v2969_v38, %v2971_v40  ;;  %v3001_v61 = vrot.slane %v9618_v49, 2 }
 0x359   : > { %v2970_v22 = vsel %vm684_vm1, %v2967_v33, %v2969_v38  ;;  %v9739_v42 = vpack.i.bf16 %v2974_v14, %v2972_v45  ;;  %v2968_v1 = vsel %vm684_vm1, %v2965_v4, %v2967_v33  ;;  %v2999_v38 = vrot.slane %v9614_v31, 2 }
 0x35a   : > { %v2988_v24 = vsel %vm684_vm1, %v2985_v26, %v2987_v30  ;;  %v9742_v2 = vpack.i.bf16 %v2970_v22, %v2968_v1  ;;  %v2983_v30 = vrot.slane %v9486_v48, 2  ;;  %v2979_v1 = vrot.slane %v9442_v7, 2 }
 0x35b   : > { %v9737_v11 = vpack.i.bf16 %v2990_v20, %v2988_v24  ;;  %v2997_v4 = vrot.slane %v9587_v16, 2  ;;  %v3002_v40 = vsel %vm684_vm1, %v2999_v38, %v3001_v61 }
 0x35c   : > { %v2986_v33 = vsel %vm684_vm1, %v2983_v30, %v2985_v26  ;;  %v2982_v20 = vsel %vm684_vm1, %v2979_v1, %v2981_v36  ;;  %v2984_v22 = vsel %vm684_vm1, %v2981_v36, %v2983_v30  ;;  %v2980_v53 = vsel %vm684_vm1, %v2977_v3, %v2979_v1 }
 0x35d   : > { %6426 = vrot.lane.b32.xlu2 %v9713_v35, %s7189_s26  ;;  %6406 = vrot.lane.b32.xlu1 %v9715_v39, %s7189_s26  ;;  %v3000_v14 = vsel %vm684_vm1, %v2997_v4, %v2999_v38  ;;  %v6435_v45 = vpack.i.bf16 %v2986_v33, %v2984_v22  ;;  %v6430_v27 = vpack.i.bf16 %v2982_v20, %v2980_v53  ;;  %v3011_v26 = vrot.slane %v9654_v6, 2 }
 0x35e   : > { %6401 = vrot.lane.b32.xlu0 %v9718_v51, %s7189_s26  ;;  %v6455_v24 = vpack.i.bf16 %v3002_v40, %v3000_v14  ;;  %v3013_v38 = vrot.slane %v9643_v54, 2  ;;  %v2995_v36 = vrot.slane %v9580_v25, 2  ;;  %v2991_v30 = vrot.slane %v9553_v28, 2 }
 0x35f   : > { %v3012_v53 = vsel %vm684_vm1, %v3009_v58, %v3011_v26 }
 0x360   : > { %v2998_v3 = vsel %vm684_vm1, %v2995_v36, %v2997_v4  ;;  %v2994_v1 = vsel %vm684_vm1, %v2991_v30, %v2993_v52  ;;  %v3014_v40 = vsel %vm684_vm1, %v3011_v26, %v3013_v38  ;;  %v2996_v33 = vsel %vm684_vm1, %v2993_v52, %v2995_v36 }
 0x361   : > { %v6470_v20 = vpack.i.bf16 %v3014_v40, %v3012_v53  ;;  %v6450_v14 = vpack.i.bf16 %v2998_v3, %v2996_v33  ;;  %v2992_v22 = vsel %vm684_vm1, %v2989_v47, %v2991_v30  ;;  %v3007_v4 = vrot.slane %v9651_v43, 2  ;;  %v9795_v33 = vpop.permute.xlu2 %6326 }
 0x362   : > { %v6445_v19 = vpack.i.bf16 %v2994_v1, %v2992_v22  ;;  %v3003_v26 = vrot.slane %v9627_v23, 2  ;;  %v3021_v30 = vrot.slane %v9408_v62, 2  ;;  %v3017_v40 = vrot.slane %v9635_v13, 2  ;;  %12372 = vst [vmem:[#allocation36_spill] sm:$0xff] %v9795_v33 }
 0x363   : > { %v3010_v52 = vsel %vm684_vm1, %v3007_v4, %v3009_v58  ;;  %v3008_v47 = vsel %vm684_vm1, %v3005_v29, %v3007_v4  ;;  %v3019_v58 = vrot.slane %v9668_v55, 2 }
 0x364   : > { %v3006_v36 = vsel %vm684_vm1, %v3003_v26, %v3005_v29  ;;  %v6465_v53 = vpack.i.bf16 %v3010_v52, %v3008_v47  ;;  %v3004_v3 = vsel %vm684_vm1, %v3001_v61, %v3003_v26  ;;  %v3015_v29 = vrot.slane %v9639_v56, 2 }
 0x365   : > { %6441 = vrot.lane.b32.xlu2 %v9737_v11, %s7189_s26  ;;  %6421 = vrot.lane.b32.xlu1 %v9739_v42, %s7189_s26  ;;  %v6460_v1 = vpack.i.bf16 %v3006_v36, %v3004_v3  ;;  %v3022_v22 = vsel %vm684_vm1, %v3019_v58, %v3021_v30  ;;  %v3020_v61 = vsel %vm684_vm1, %v3017_v40, %v3019_v58  ;;  %v9816_v3 = vpop.permute.xlu1 %6306 }
 0x366   : > { %6416 = vrot.lane.b32.xlu0 %v9742_v2, %s7189_s26  ;;  %v3018_v4 = vsel %vm684_vm1, %v3015_v29, %v3017_v40  ;;  %v6480_v26 = vpack.i.bf16 %v3022_v22, %v3020_v61  ;;  %v3016_v52 = vsel %vm684_vm1, %v3013_v38, %v3015_v29  ;;  %12373 = vst [vmem:[#allocation52_spill] sm:$0xff] %v9816_v3  ;;  %v9848_v29 = vld [vmem:[#allocation2 + $0x30] sm:$0xff] }
 0x367   : > { %v6475_v36 = vpack.i.bf16 %v3018_v4, %v3016_v52  ;;  %v3252_v4 = vrot.slane %v9693_v17, 3 }
 0x369   : > { %v9806_v47 = vpop.permute.xlu2 %6341 }
 0x36d   : > { %6456 = vrot.lane.b32.xlu2 %v6455_v24, %s7189_s26  ;;  %6436 = vrot.lane.b32.xlu1 %v6435_v45, %s7189_s26 }
 0x36e   : > { %6431 = vrot.lane.b32.xlu0 %v6430_v27, %s7189_s26 }
 0x371   : > { %v9814_v38 = vpop.permute.xlu2 %6356 }
 0x375   : > { %6471 = vrot.lane.b32.xlu2 %v6470_v20, %s7189_s26  ;;  %6451 = vrot.lane.b32.xlu1 %v6450_v14, %s7189_s26 }
 0x376   : > { %6446 = vrot.lane.b32.xlu0 %v6445_v19, %s7189_s26 }
 0x37d   : > { %3095 = vrot.lane.b32.xlu2 %v3021_v30, %s7189_s26  ;;  %6466 = vrot.lane.b32.xlu1 %v6465_v53, %s7189_s26 }
 0x37e   : > { %6461 = vrot.lane.b32.xlu0 %v6460_v1, %s7189_s26 }
 0x385   : > { %6496 = vrot.lane.b32.xlu2 %v9682_v46, %s7191_s28  ;;  %6481 = vrot.lane.b32.xlu1 %v6480_v26, %s7189_s26  ;;  %v9829_v46 = vpop.permute.xlu1 %6321 }
 0x386   : > { %6476 = vrot.lane.b32.xlu0 %v6475_v36, %s7189_s26  ;;  %12374 = vst [vmem:[#allocation68_spill] sm:$0xff] %v9829_v46 }
 0x38d   : > { %6511 = vrot.lane.b32.xlu2 %v9713_v35, %s7191_s28  ;;  %6491 = vrot.lane.b32.xlu1 %v9715_v39, %s7191_s28 }
 0x38e   : > { %6486 = vrot.lane.b32.xlu0 %v9718_v51, %s7191_s28  ;;  %v9833_v51 = vpop.permute.xlu0 %6316 }
 0x395   : > { %6526 = vrot.lane.b32.xlu2 %v9737_v11, %s7191_s28  ;;  %6506 = vrot.lane.b32.xlu1 %v9739_v42, %s7191_s28  ;;  %v12115_v11 = vrot.slane %v9410_v63, 2  ;;  %v6337_v42 = vpop.permute.xlu1 %6336 }
 0x396   : > { %6501 = vrot.lane.b32.xlu0 %v9742_v2, %s7191_s28  ;;  %v3136_v2 = vrot.slane %v9404_v10, 2  ;;  %v9854_v10 = vld [vmem:[#allocation2 + $0x28] sm:$0xff] }
 0x397   : > { %v9824_v35 = vpop.permute.xlu2 %6371 }
 0x398   : > { %v3137_v40 = vsel %vm684_vm1, %v3021_v30, %v3136_v2 }
 0x39d   : > { %6541 = vrot.lane.b32.xlu2 %v6455_v24, %s7191_s28  ;;  %6521 = vrot.lane.b32.xlu1 %v6435_v45, %s7191_s28  ;;  %v3139_v45 = vsel %vm684_vm1, %v3136_v2, %v12115_v11  ;;  %v3434_v11 = vrot.slane %v9704_v0, 4  ;;  %vm4289_vm1 = vcmask 392192  }
 0x39e   : > { %6516 = vrot.lane.b32.xlu0 %v6430_v27, %s7191_s28  ;;  %v9842_v27 = vpop.permute.xlu0 %6331  ;;  %v6570_v58 = vpack.i.bf16 %v3139_v45, %v3137_v40  ;;  %v3251_v45 = vrot.slane %v9704_v0, 3  ;;  %v6339_v40 = vunpack.i.h.bf16 %v6337_v42 }
 0x39f   : > { %v9831_v39 = vpop.permute.xlu2 %6386 }
 0x3a0   : > { %12375 = vst [vmem:[#allocation6_spill] sm:$0xff] %v9831_v39  ;;  %v4116_v0 = vsel %vm1859_vm7, %v9406_v41, %v6339_v40  ;;  %v12382_v39 = vrot.slane %v9848_v29, 4 }
 0x3a5   : > { %6556 = vrot.lane.b32.xlu2 %v6470_v20, %s7191_s28  ;;  %6536 = vrot.lane.b32.xlu1 %v6450_v14, %s7191_s28  ;;  %v12116_v20 = vrot.slane %v9848_v29, 3  ;;  %v9857_v14 = vpop.permute.xlu1 %6351 }
 0x3a6   : > { %6531 = vrot.lane.b32.xlu0 %v6445_v19, %s7191_s28  ;;  %v3254_v19 = vrot.slane %v9854_v10, 3  ;;  %v9861_v30 = vpop.permute.xlu0 %6346 }
 0x3a7   : > { %v9840_v24 = vpop.permute.xlu2 %6396 }
 0x3a8   : > { %12376 = vst [vmem:[#allocation3_spill] sm:$0xff] %v9840_v24  ;;  %v3257_v61 = vsel %vm980_vm2, %v3254_v19, %v12116_v20  ;;  %v3266_v20 = vrot.slane %v9383_v12, 3  ;;  %v3264_v12 = vrot.slane %v9352_v21, 3 }
 0x3aa   : > { %v3267_v21 = vsel %vm980_vm2, %v3264_v12, %v3266_v20 }
 0x3ad   : > { %6571 = vrot.lane.b32.xlu2 %v6570_v58, %s7191_s28  ;;  %6551 = vrot.lane.b32.xlu1 %v6465_v53, %s7191_s28  ;;  %v3255_v53 = vsel %vm980_vm2, %v3252_v4, %v3254_v19  ;;  %v6338_v58 = vunpack.i.l.bf16 %v6337_v42  ;;  %v3253_v19 = vsel %vm980_vm2, %v3251_v45, %v3252_v4  ;;  %v9882_v42 = vrot.slane %v9854_v10, 4 }
 0x3ae   : > { %6546 = vrot.lane.b32.xlu0 %v6460_v1, %s7191_s28  ;;  %v6580_v52 = vpack.i.bf16 %v3257_v61, %v3255_v53  ;;  %v3435_v1 = vrot.slane %v9693_v17, 4  ;;  %v9877_v61 = vpop.permute.xlu1 %6366  ;;  %v12379_v4 = vrot.slane %v9389_v44, 3  ;;  %v6575_v34 = vpack.i.bf16 %v3253_v19, %v3251_v45 }
 0x3af   : > { %v9859_v22 = vpop.permute.xlu2 %6411  ;;  %12378 = vst [vmem:[#allocation12_spill] sm:$0xff] %v9882_v42 }
 0x3b0   : > { %12377 = vst [vmem:[#allocation40_spill] sm:$0xff] %v9859_v22  ;;  %v3436_v2 = vsel %vm1162_vm3, %v3434_v11, %v3435_v1  ;;  %v3269_v33 = vsel %vm980_vm2, %v3266_v20, %v12379_v4  ;;  %v4115_v22 = vsel %vm1859_vm7, %v9389_v44, %v6338_v58  ;;  %v12130_v4 = vrot.slane %v9848_v29, 6 }
 0x3b1   : > { %v6595_v3 = vpack.i.bf16 %v3269_v33, %v3267_v21  ;;  %v9905_v40 = vpack.i.bf16 %v3436_v2, %v3434_v11  ;;  %v12126_v58 = vrot.slane %v9654_v6, 3  ;;  %v6354_v33 = vunpack.i.h.bf16 %v9857_v14  ;;  %v9923_v2 = vld [vmem:[#allocation2 + $0x40] sm:$0xff] }
 0x3b2   : > { %v6353_v11 = vunpack.i.l.bf16 %v9857_v14  ;;  %v3260_v45 = vrot.slane %v9923_v2, 3  ;;  %v3278_v21 = vrot.slane %v9486_v48, 3  ;;  %v12386_v14 = vrot.slane %v9643_v54, 3 }
 0x3b4   : > { %v4121_v59 = vsel %vm1859_vm7, %v9501_v37, %v6353_v11 }
 0x3b5   : > { %6581 = vrot.lane.b32.xlu2 %v6580_v52, %s7193_s30  ;;  %6566 = vrot.lane.b32.xlu1 %v6480_v26, %s7191_s28  ;;  %v9885_v52 = vpop.permute.xlu0 %6361  ;;  %v3735_v26 = vrot.slane %v9854_v10, 5 }
 0x3b6   : > { %6561 = vrot.lane.b32.xlu0 %v6475_v36, %s7191_s28 }
 0x3b7   : > { %v6427_v53 = vpop.permute.xlu2 %6426 }
 0x3b8   : > { %v6429_v46 = vunpack.i.h.bf16 %v6427_v53  ;;  %v6428_v36 = vunpack.i.l.bf16 %v6427_v53 }
 0x3ba   : > { %v9898_v5 = vsel %vm1933_vm9, %v4116_v0, %v6429_v46  ;;  %v9901_v53 = vsel %vm1933_vm9, %v4115_v22, %v6428_v36  ;;  %v9913_v0 = vsel %vm1162_vm3, %v9882_v42, %v12382_v39  ;;  %v12384_v46 = vrot.slane %v9848_v29, 5  ;;  %v9926_v39 = vld [vmem:[#allocation2 + $0x48] sm:$0xff] }
 0x3bb   : > { %12380 = vst [vmem:[#allocation56_spill] sm:$0xff] %v9898_v5  ;;  %v12129_v22 = vrot.slane %v9854_v10, 6  ;;  %v3262_v19 = vrot.slane %v9926_v39, 3  ;;  %v12385_v36 = vrot.slane %v9410_v63, 2 }
 0x3bc   : > { %12381 = vst [vmem:[#allocation73_spill] sm:$0xff] %v9901_v53  ;;  %v3737_v20 = vsel %vm1458_vm4, %v3735_v26, %v12384_v46  ;;  %v9954_v53 = vld [vmem:[#allocation2 + $0x38] sm:$0xff] }
 0x3bd   : > { %12383 = vst [vmem:[#allocation26_spill] sm:$0xff] %v9913_v0  ;;  %6596 = vrot.lane.b32.xlu2 %v6595_v3, %s7193_s30  ;;  %6576 = vrot.lane.b32.xlu1 %v6575_v34, %s7193_s30  ;;  %v9938_v34 = vsel %vm980_vm2, %v12126_v58, %v12386_v14  ;;  %v9942_v3 = vsel %vm1162_vm3, %v3435_v1, %v9882_v42  ;;  %v3258_v14 = vrot.slane %v9954_v53, 3 }
 0x3be   : > { %3212 = vrot.lane.b32.xlu0 %v12385_v36, %s7191_s28  ;;  %12387 = vst [vmem:[#allocation42_spill] sm:$0xff] %v9942_v3  ;;  %v9949_v46 = vsel %vm1640_vm5, %v12129_v22, %v12130_v4  ;;  %v3265_v24 = vsel %vm980_vm2, %v3262_v19, %v3264_v12  ;;  %v9959_v58 = vpack.i.bf16 %v3737_v20, %v3735_v26  ;;  %v3276_v22 = vrot.slane %v9449_v9, 3  ;;  %s7196_s28 = smov 40  }
 0x3bf   : > { %12388 = vst [vmem:[#allocation58_spill] sm:$0xff] %v9949_v46  ;;  %v6442_v36 = vpop.permute.xlu2 %6441  ;;  %v9951_v48 = vpop.permute.xlu1 %6381  ;;  %v12390_v4 = vrot.slane %v9501_v37, 3  ;;  %v4122_v12 = vsel %vm1859_vm7, %v9532_v15, %v6354_v33  ;;  %v3261_v1 = vsel %vm980_vm2, %v3258_v14, %v3260_v45  ;;  %v3310_v26 = vrot.slane %v9639_v56, 3 }
 0x3c0   : > { %12389 = vst [vmem:[#allocation74_spill] sm:$0xff] %v9959_v58  ;;  %v6444_v5 = vunpack.i.h.bf16 %v6442_v36  ;;  %v6443_v42 = vunpack.i.l.bf16 %v6442_v36  ;;  %v9961_v8 = vpop.permute.xlu0 %6376  ;;  %v3279_v9 = vsel %vm980_vm2, %v3276_v22, %v3278_v21  ;;  %v12391_v33 = vrot.slane %v9848_v29, 3 }
 0x3c1   : > { %v3281_v46 = vsel %vm980_vm2, %v3278_v21, %v12390_v4  ;;  %v3263_v4 = vsel %vm980_vm2, %v3260_v45, %v3262_v19  ;;  %v12137_v56 = vrot.slane %v9587_v16, 3  ;;  %v6368_v21 = vunpack.i.l.bf16 %v9877_v61 }
 0x3c2   : > { %v9974_v20 = vsel %vm1933_vm9, %v4122_v12, %v6444_v5  ;;  %v9977_v36 = vsel %vm1933_vm9, %v4121_v59, %v6443_v42  ;;  %v6610_v58 = vpack.i.bf16 %v3281_v46, %v3279_v9  ;;  %v6590_v3 = vpack.i.bf16 %v3265_v24, %v3263_v4 }
 0x3c3   : > { %v3259_v11 = vsel %vm980_vm2, %v12391_v33, %v3258_v14  ;;  %v3314_v5 = vrot.slane %v9668_v55, 3  ;;  %v6369_v42 = vunpack.i.h.bf16 %v9877_v61  ;;  %v3272_v24 = vrot.slane %v9416_v57, 3 }
 0x3c4   : > { %v6585_v63 = vpack.i.bf16 %v3261_v1, %v3259_v11  ;;  %v3274_v45 = vrot.slane %v9442_v7, 3  ;;  %v3290_v19 = vrot.slane %v9580_v25, 3  ;;  %v3312_v46 = vrot.slane %v9635_v13, 3 }
 0x3c5   : > { %6611 = vrot.lane.b32.xlu2 %v6610_v58, %s7193_s30  ;;  %6591 = vrot.lane.b32.xlu1 %v6590_v3, %s7193_s30  ;;  %v12392_v14 = vrot.slane %v9643_v54, 3  ;;  %v3270_v7 = vrot.slane %v9406_v41, 3  ;;  %v12393_v9 = vrot.slane %v9408_v62, 3  ;;  %v3288_v11 = vrot.slane %v9559_v32, 3 }
 0x3c6   : > { %6586 = vrot.lane.b32.xlu0 %v6585_v63, %s7193_s30  ;;  %v3277_v3 = vsel %vm980_vm2, %v3274_v45, %v3276_v22  ;;  %v3284_v63 = vrot.slane %v9536_v60, 3  ;;  %v4128_v41 = vsel %vm1859_vm7, %v9614_v31, %v6369_v42  ;;  %v4127_v60 = vsel %vm1859_vm7, %v9587_v16, %v6368_v21 }
 0x3c7   : > { %v10000_v1 = vsel %vm980_vm2, %v12392_v14, %v3310_v26  ;;  %v6457_v58 = vpop.permute.xlu2 %6456  ;;  %v10003_v12 = vpop.permute.xlu1 %2911  ;;  %v10011_v13 = vsel %vm980_vm2, %v3314_v5, %v12393_v9  ;;  %v3293_v14 = vsel %vm980_vm2, %v3290_v19, %v12137_v56  ;;  %v3273_v22 = vsel %vm980_vm2, %v3270_v7, %v3272_v24 }
 0x3c8   : > { %v6459_v54 = vunpack.i.h.bf16 %v6457_v58  ;;  %v6458_v4 = vunpack.i.l.bf16 %v6457_v58  ;;  %v10013_v33 = vpop.permute.xlu0 %6391  ;;  %v3282_v9 = vrot.slane %v9532_v15, 3  ;;  %v3291_v32 = vsel %vm980_vm2, %v3288_v11, %v3290_v19 }
 0x3c9   : > { %v3275_v0 = vsel %vm980_vm2, %v3272_v24, %v3274_v45  ;;  %v6625_v61 = vpack.i.bf16 %v3293_v14, %v3291_v32  ;;  %v12395_v42 = vrot.slane %v9389_v44, 3  ;;  %v12141_v15 = vrot.slane %v9659_v50, 3 }
 0x3ca   : > { %v10026_v58 = vsel %vm1933_vm9, %v4128_v41, %v6459_v54  ;;  %v10029_v59 = vsel %vm1933_vm9, %v4127_v60, %v6458_v4  ;;  %v6605_v56 = vpack.i.bf16 %v3277_v3, %v3275_v0  ;;  %v3285_v25 = vsel %vm980_vm2, %v3282_v9, %v3284_v63  ;;  %v10056_v3 = vld [vmem:[#allocation2 + $0x50] sm:$0xff] }
 0x3cb   : > { %12394 = vst [vmem:[#allocation18_spill] sm:$0xff] %v10026_v58  ;;  %v3271_v21 = vsel %vm980_vm2, %v12395_v42, %v3270_v7  ;;  %v10039_v54 = vsel %vm980_vm2, %v3312_v46, %v3314_v5  ;;  %v10042_v4 = vsel %vm980_vm2, %v3310_v26, %v3312_v46  ;;  %v6384_v19 = vunpack.i.h.bf16 %v9951_v48  ;;  %v7108_v46 = vld [vmem:[%s7274_s22 + $0x28] sm:$0xff] }
 0x3cc   : > { %v6600_v62 = vpack.i.bf16 %v3273_v22, %v3271_v21  ;;  %v6383_v24 = vunpack.i.l.bf16 %v9951_v48  ;;  %v3286_v44 = vrot.slane %v9553_v28, 3  ;;  %v12396_v0 = vrot.slane %v9501_v37, 3 }
 0x3cd   : > { %6626 = vrot.lane.b32.xlu2 %v6625_v61, %s7193_s30  ;;  %6606 = vrot.lane.b32.xlu1 %v6605_v56, %s7193_s30  ;;  %v3302_v5 = vrot.slane %v9651_v43, 3  ;;  %v6334_v28 = vunpack.i.h.bf16 %v9842_v27  ;;  %v3300_v60 = vrot.slane %v9631_v18, 3  ;;  %v3294_v32 = vrot.slane %v9614_v31, 3  ;;  %v7107_v31 = vld [vmem:[%s7274_s22 + $0x20] sm:$0xff]  ;;  %v10092_v56 = vld [vmem:[#allocation2 + $0x58] sm:$0xff] }
 0x3ce   : > { %v3283_v45 = vsel %vm980_vm2, %v12396_v0, %v3282_v9  ;;  %6601 = vrot.lane.b32.xlu0 %v6600_v62, %s7193_s30  ;;  %v3289_v7 = vsel %vm980_vm2, %v3286_v44, %v3288_v11  ;;  %v3296_v62 = vrot.slane %v9618_v49, 3  ;;  %v4134_v9 = vsel %vm1859_vm7, %v9654_v6, %v6384_v19  ;;  %v4885_v19 = vld [vmem:[%s11990_s8] sm:$0x3] }
 0x3cf   : > { %v6615_v26 = vpack.i.bf16 %v3285_v25, %v3283_v45  ;;  %v6472_v61 = vpop.permute.xlu2 %6471  ;;  %v10061_v37 = vpop.permute.xlu1 %6406  ;;  %v3305_v22 = vsel %vm980_vm2, %v3302_v5, %v12141_v15  ;;  %v4133_v49 = vsel %vm1859_vm7, %v9659_v50, %v6383_v24  ;;  %v3287_v11 = vsel %vm980_vm2, %v3284_v63, %v3286_v44  ;;  %v7105_v24 = vld [vmem:[%s7274_s22 + $0x10] sm:$0xff]  ;;  %v7106_v63 = vld [vmem:[%s7274_s22 + $0x18] sm:$0xff] }
 0x3d0   : > { %v6474_v14 = vunpack.i.h.bf16 %v6472_v61  ;;  %v6473_v25 = vunpack.i.l.bf16 %v6472_v61  ;;  %v10065_v41 = vpop.permute.xlu0 %6401  ;;  %v6333_v42 = vunpack.i.l.bf16 %v9842_v27  ;;  %v3303_v45 = vsel %vm980_vm2, %v3300_v60, %v3302_v5 }
 0x3d1   : > { %v6640_v61 = vpack.i.bf16 %v3305_v22, %v3303_v45  ;;  %v6620_v15 = vpack.i.bf16 %v3289_v7, %v3287_v11  ;;  %v4866_v44 = vpack.c.bf16 %v7106_v63, %v7105_v24  ;;  %v4867_v27 = vpack.c.bf16 %v7108_v46, %v7107_v31  ;;  %v7110_v45 = vld [vmem:[#allocation2 + $0x120] sm:$0xff] }
 0x3d2   : > { %v10079_v21 = vsel %vm1933_vm9, %v4133_v49, %v6473_v25  ;;  %v10082_v0 = vsel %vm1933_vm9, %v4134_v9, %v6474_v14  ;;  %v4114_v14 = vsel %vm1859_vm7, %v10092_v56, %v6334_v28  ;;  %v3298_v25 = vrot.slane %v9627_v23, 3 }
 0x3d3   : > { %12397 = vst [vmem:[#allocation32_spill] sm:$0xff] %v10079_v21  ;;  %v3297_v5 = vsel %vm980_vm2, %v3294_v32, %v3296_v62  ;;  %v10099_v7 = vsel %vm1640_vm5, %v4885_v19, 0  ;;  %v4888_v22 = vshrl.u32 %v4866_v44, 16  ;;  %v4891_v9 = vshll.u32 %v4866_v44, 16 }
 0x3d4   : > { %12398 = vst [vmem:[#allocation48_spill] sm:$0xff] %v10082_v0  ;;  %v4896_v49 = vshrl.u32 %v4867_v27, 16  ;;  %v4899_v46 = vshll.u32 %v4867_v27, 16  ;;  %v6318_v11 = vunpack.i.l.bf16 %v9833_v51  ;;  %v4113_v28 = vsel %vm1859_vm7, %v10056_v3, %v6333_v42  ;;  %5121 = vmatpush.bf16.msra.mxu2 %v10099_v7 }
 0x3d5   : > { %12399 = vst [vmem:[#allocation64_spill] sm:$0xff] %v10099_v7  ;;  %6641 = vrot.lane.b32.xlu2 %v6640_v61, %s7193_s30  ;;  %6621 = vrot.lane.b32.xlu1 %v6620_v15, %s7193_s30  ;;  %v4139_v24 = vsel %vm1859_vm7, %v7110_v45, %v10003_v12  ;;  %v3301_v19 = vsel %vm980_vm2, %v3298_v25, %v3300_v60  ;;  %v4890_v63 = vrot.slane %v4888_v22, 1  ;;  %v4893_v44 = vrot.slane %v4891_v9, 2 }
 0x3d6   : > { %6616 = vrot.lane.b32.xlu0 %v6615_v26, %s7193_s30  ;;  %v4898_v31 = vrot.slane %v4896_v49, 1  ;;  %v4901_v27 = vrot.slane %v4899_v46, 2  ;;  %v6344_v12 = vunpack.i.h.bf16 %v9806_v47  ;;  %v3299_v26 = vsel %vm980_vm2, %v3296_v62, %v3298_v25 }
 0x3d7   : > { %v3096_v15 = vpop.permute.xlu2 %3095  ;;  %v6422_v61 = vpop.permute.xlu1 %6421  ;;  %v4894_v60 = vor.u32 %v4893_v44, %v4890_v63  ;;  %v6343_v22 = vunpack.i.l.bf16 %v9806_v47  ;;  %v6349_v9 = vunpack.i.h.bf16 %v9861_v30  ;;  %v6650_v47 = vpack.i.bf16 %v10042_v4, %v10000_v1 }
 0x3d8   : > { %v10112_v48 = vsel %vm1933_vm9, %v4139_v24, %v3096_v15  ;;  %v6424_v42 = vunpack.i.h.bf16 %v6422_v61  ;;  %v6423_v18 = vunpack.i.l.bf16 %v6422_v61  ;;  %v10114_v58 = vpop.permute.xlu0 %6416  ;;  %v10118_v45 = vor.u32 %v4901_v27, %v4898_v31  ;;  %v10160_v31 = vld [vmem:[#allocation2 + $0x70] sm:$0xff] }
 0x3d9   : > { %12400 = vst [vmem:[#allocation14_spill] sm:$0xff] %v10112_v48  ;;  %v6348_v24 = vunpack.i.l.bf16 %v9861_v30  ;;  %v6635_v15 = vpack.i.bf16 %v3301_v19, %v3299_v26  ;;  %v12401_v61 = vrot.slane %v9587_v16, 3  ;;  %v12402_v44 = vrot.slane %v10056_v3, 4  ;;  %v10156_v19 = vld [vmem:[#allocation2 + $0x78] sm:$0xff] }
 0x3da   : > { %v10123_v49 = vsel %vm1933_vm9, %v4114_v14, %v6424_v42  ;;  %v10126_v46 = vsel %vm1933_vm9, %v4113_v28, %v6423_v18  ;;  %v4903_v25 = vsel %vm4886_vm15, %v4894_v60, %v10118_v45  ;;  %v3443_v14 = vrot.slane %v9923_v2, 4  ;;  %12406 = vst [vmem:[#allocation28_spill] sm:$0xff] %v10156_v19  ;;  %v10174_v42 = vld [vmem:[#allocation2 + $0x80] sm:$0xff] }
 0x3db   : > { %v3295_v62 = vsel %vm980_vm2, %v12401_v61, %v3294_v32  ;;  %v12403_v18 = vrot.slane %v9926_v39, 4  ;;  %5523 = vmatmul.msk.bf16.vlgmr.msra.gmra.mxu2 %vm1822_vm6, %v4903_v25  ;;  %v12404_v16 = vunpack.i.h.bf16 %v9833_v51  ;;  %v6409_v1 = vunpack.i.h.bf16 %v10061_v37  ;;  %12410 = vst [vmem:[#allocation60_spill] sm:$0xff] %v10174_v42 }
 0x3dc   : > { %v6630_v63 = vpack.i.bf16 %v3297_v5, %v3295_v62  ;;  %v4107_v5 = vsel %vm1859_vm7, %v9693_v17, %v6318_v11  ;;  %v6408_v4 = vunpack.i.l.bf16 %v10061_v37  ;;  %v12405_v28 = vpack.i.bf16 %v10011_v13, %v10039_v54  ;;  %v10164_v11 = vld [vmem:[#allocation2 + $0x88] sm:$0xff] }
 0x3dd   : > { %v3448_v30 = vsel %vm1162_vm3, %v12403_v18, %v12402_v44  ;;  %v4108_v32 = vsel %vm1859_vm7, %v9854_v10, %v12404_v16  ;;  %6636 = vrot.lane.b32.xlu1 %v6635_v15, %s7193_s30  ;;  %v4118_v51 = vsel %vm1859_vm7, %v10156_v19, %v6344_v12  ;;  %v4117_v17 = vsel %vm1859_vm7, %v10160_v31, %v6343_v22 }
 0x3de   : > { %6656 = vrot.lane.b32.xlu2 %v12405_v28, %s7193_s30  ;;  %12407 = vst [vmem:[#allocation44_spill] sm:$0xff] %v10164_v11  ;;  %v4120_v37 = vsel %vm1859_vm7, %v10164_v11, %v6349_v9  ;;  %6631 = vrot.lane.b32.xlu0 %v6630_v63, %s7193_s30  ;;  %v12408_v13 = vrot.slane %v9654_v6, 3  ;;  %v12409_v54 = vrot.slane %v9659_v50, 3  ;;  %v4119_v12 = vsel %vm1859_vm7, %v10174_v42, %v6348_v24 }
 0x3df   : > { %v6359_v26 = vunpack.i.h.bf16 %v9814_v38  ;;  %v6358_v60 = vunpack.i.l.bf16 %v9814_v38  ;;  %v6364_v22 = vunpack.i.h.bf16 %v9885_v52  ;;  %v6497_v9 = vpop.permute.xlu2 %6496  ;;  %v6437_v15 = vpop.permute.xlu1 %6436  ;;  %v4145_v44 = vsel %vm1933_vm9, %v4108_v32, %v6409_v1  ;;  %v7115_v1 = vld [vmem:[%s7274_s22 + $0x30] sm:$0xff] }
 0x3e0   : > { %v3307_v27 = vsel %vm980_vm2, %v12409_v54, %v12408_v13  ;;  %v6499_v61 = vunpack.i.h.bf16 %v6497_v9  ;;  %v6498_v6 = vunpack.i.l.bf16 %v6497_v9  ;;  %v6439_v62 = vunpack.i.h.bf16 %v6437_v15  ;;  %v6432_v63 = vpop.permute.xlu0 %6431 }
 0x3e1   : > { %v6438_v25 = vunpack.i.l.bf16 %v6437_v15  ;;  %v4144_v18 = vsel %vm1933_vm9, %v4107_v5, %v6408_v4  ;;  %v6434_v24 = vunpack.i.h.bf16 %v6432_v63  ;;  %v6433_v16 = vunpack.i.l.bf16 %v6432_v63  ;;  %v7116_v4 = vld [vmem:[%s7274_s22 + $0x38] sm:$0xff] }
 0x3e2   : > { %v10184_v28 = vsel %vm2007_vm11, %v4144_v18, %v6498_v6  ;;  %v10187_v38 = vsel %vm2007_vm11, %v4145_v44, %v6499_v61  ;;  %v10190_v13 = vsel %vm1933_vm9, %v4120_v37, %v6439_v62  ;;  %v6363_v9 = vunpack.i.l.bf16 %v9885_v52  ;;  %v10219_v44 = vld [vmem:[#allocation2 + $0xa0] sm:$0xff] }
 0x3e3   : > { %12411 = vst [vmem:[#allocation76_spill] sm:$0xff] %v10184_v28  ;;  %v10193_v54 = vsel %vm1933_vm9, %v4119_v12, %v6438_v25  ;;  %v10197_v32 = vsel %vm1933_vm9, %v4118_v51, %v6434_v24  ;;  %v10200_v5 = vsel %vm1933_vm9, %v4117_v17, %v6433_v16  ;;  %v4868_v15 = vpack.c.bf16 %v7116_v4, %v7115_v1  ;;  %v7117_v25 = vld [vmem:[#allocation2 + $0xa8] sm:$0xff]  ;;  %v7120_v24 = vld [vmem:[#allocation2 + $0xb8] sm:$0xff]  ;;  %v7121_v16 = vld [vmem:[#allocation2 + $0xb0] sm:$0xff] }
 0x3e4   : > { %12412 = vst [vmem:[#allocation13_spill] sm:$0xff] %v10187_v38  ;;  %v6645_v61 = vpack.i.bf16 %v9938_v34, %v3307_v27  ;;  %v12413_v6 = vrot.slane %v9926_v39, 4  ;;  %v12414_v51 = vrot.slane %v9954_v53, 4  ;;  %v4124_v63 = vsel %vm1859_vm7, %v7117_v25, %v6359_v26 }
 0x3e5   : > { %6651 = vrot.lane.b32.xlu1 %v6650_v47, %s7193_s30  ;;  %v4905_v17 = vshrl.u32 %v4868_v15, 16  ;;  %v4908_v27 = vshll.u32 %v4868_v15, 16  ;;  %12415 = vst [vmem:[#allocation27_spill] sm:$0xff] %v10219_v44  ;;  %v4123_v18 = vsel %vm1859_vm7, %v10219_v44, %v6358_v60  ;;  %v4125_v1 = vsel %vm1859_vm7, %v7121_v16, %v6363_v9 }
 0x3e6   : > { %v3446_v37 = vsel %vm1162_vm3, %v3443_v14, %v12413_v6  ;;  %6666 = vrot.lane.b32.xlu2 %v9905_v40, %s7196_s28  ;;  %v3444_v34 = vsel %vm1162_vm3, %v12414_v51, %v3443_v14  ;;  %6646 = vrot.lane.b32.xlu0 %v6645_v61, %s7193_s30  ;;  %v10224_v40 = vld [vmem:[#allocation2 + $0x68] sm:$0xff]  ;;  %v4126_v14 = vsel %vm1859_vm7, %v7120_v24, %v6364_v22  ;;  %v6374_v62 = vunpack.i.h.bf16 %v9824_v35 }
 0x3e7   : > { %v10213_v52 = vpack.i.bf16 %v3448_v30, %v3446_v37  ;;  %v3453_v47 = vrot.slane %v10224_v40, 4  ;;  %v6512_v26 = vpop.permute.xlu2 %6511  ;;  %v6452_v4 = vpop.permute.xlu1 %6451  ;;  %v4907_v15 = vrot.slane %v4905_v17, 1  ;;  %v4910_v6 = vrot.slane %v4908_v27, 2 }
 0x3e8   : > { %v6514_v37 = vunpack.i.h.bf16 %v6512_v26  ;;  %v6513_v60 = vunpack.i.l.bf16 %v6512_v26  ;;  %v6454_v51 = vunpack.i.h.bf16 %v6452_v4  ;;  %v6453_v61 = vunpack.i.l.bf16 %v6452_v4  ;;  %v6447_v25 = vpop.permute.xlu0 %6446 }
 0x3e9   : > { %v6449_v12 = vunpack.i.h.bf16 %v6447_v25  ;;  %v6448_v7 = vunpack.i.l.bf16 %v6447_v25  ;;  %v10231_v30 = vor.u32 %v4910_v6, %v4907_v15  ;;  %v6373_v24 = vunpack.i.l.bf16 %v9824_v35  ;;  %v12422_v6 = vld [vmem:[#allocation11_spill] sm:$0xff] }
 0x3ea   : > { %v10235_v22 = vsel %vm2007_vm11, %v10126_v46, %v6513_v60  ;;  %v10239_v9 = vsel %vm2007_vm11, %v10123_v49, %v6514_v37  ;;  %v10242_v17 = vsel %vm1933_vm9, %v4126_v14, %v6454_v51  ;;  %v10245_v27 = vsel %vm1933_vm9, %v4125_v1, %v6453_v61  ;;  %v10262_v1 = vld [vmem:[#allocation2 + $0x60] sm:$0xff] }
 0x3eb   : > { %12416 = vst [vmem:[#allocation43_spill] sm:$0xff] %v10235_v22  ;;  %v10249_v16 = vsel %vm1933_vm9, %v4124_v63, %v6449_v12  ;;  %v10252_v26 = vsel %vm1933_vm9, %v4123_v18, %v6448_v7  ;;  %v4912_v46 = vsel %vm4886_vm15, %v10118_v45, %v10231_v30  ;;  %v12418_v49 = vrot.slane %v9954_v53, 4 }
 0x3ec   : > { %12417 = vst [vmem:[#allocation59_spill] sm:$0xff] %v10239_v9  ;;  %v12419_v14 = vrot.slane %v9848_v29, 4  ;;  %v3451_v35 = vrot.slane %v10262_v1, 4  ;;  %5524 = vmatmul.msk.bf16.gmra.mxu2 %vm1822_vm6, %v4912_v46  ;;  %v12420_v12 = vrot.slane %v9954_v53, 6  ;;  %v12421_v7 = vrot.slane %v9848_v29, 6  ;;  %v12426_v46 = vld [vmem:[#allocation39_spill] sm:$0xff] }
 0x3ed   : > { %v6379_v18 = vunpack.i.h.bf16 %v9961_v8  ;;  %v6378_v15 = vunpack.i.l.bf16 %v9961_v8  ;;  %v12423_v37 = vrot.slane %v12422_v6, 3  ;;  %v12424_v51 = vrot.slane %v9923_v2, 6 }
 0x3ee   : > { %v3442_v4 = vsel %vm1162_vm3, %v12419_v14, %v12418_v49  ;;  %v10271_v63 = vsel %vm1640_vm5, %v12421_v7, %v12420_v12  ;;  %6681 = vrot.lane.b32.xlu2 %v10213_v52, %s7196_s28  ;;  %v12425_v61 = vmov %v12420_v12  ;;  %v12427_v49 = vld [vmem:[#allocation25_spill] sm:$0xff]  ;;  %v3454_v14 = vsel %vm1162_vm3, %v3451_v35, %v3453_v47 }
 0x3ef   : > { %3394 = vrot.lane.b32.xlu1 %v12423_v37, %s7193_s30  ;;  %v10281_v60 = vpack.i.bf16 %v3444_v34, %v3442_v4  ;;  %v10288_v25 = vsel %vm1640_vm5, %v12425_v61, %v12424_v51  ;;  %v12428_v8 = vpack.i.bf16 %v12426_v46, %v12427_v49  ;;  %v12429_v12 = vrot.slane %v9416_v57, 4  ;;  %v7123_v61 = vld [vmem:[#allocation2 + $0xd0] sm:$0xff]  ;;  %v12432_v49 = vld [vmem:[#allocation6_spill] sm:$0xff]  ;;  %v6527_v57 = vpop.permute.xlu2 %6526  ;;  %v6467_v6 = vpop.permute.xlu1 %6466 }
 0x3f0   : > { %v12430_v34 = vrot.slane %v10092_v56, 4  ;;  %v12431_v4 = vrot.slane %v10056_v3, 4  ;;  %v4130_v51 = vsel %vm1859_vm7, %v9627_v23, %v6374_v62  ;;  %v4129_v46 = vsel %vm1859_vm7, %v7123_v61, %v6373_v24  ;;  %v7124_v23 = vld [vmem:[#allocation2 + $0xe0] sm:$0xff] }
 0x3f1   : > { %6661 = vrot.lane.b32.xlu0 %v12428_v8, %s7193_s30  ;;  %v3456_v7 = vsel %vm1162_vm3, %v3453_v47, %v12429_v12  ;;  %v6389_v8 = vunpack.i.h.bf16 %v12432_v49  ;;  %v6388_v45 = vunpack.i.l.bf16 %v12432_v49  ;;  %v6529_v47 = vunpack.i.h.bf16 %v6527_v57  ;;  %s7197_s30 = smov 56  }
 0x3f2   : > { %v10303_v37 = vsel %vm1162_vm3, %v12431_v4, %v12430_v34  ;;  %v6528_v12 = vunpack.i.l.bf16 %v6527_v57  ;;  %v6469_v44 = vunpack.i.h.bf16 %v6467_v6  ;;  %v6468_v11 = vunpack.i.l.bf16 %v6467_v6  ;;  %v6462_v34 = vpop.permute.xlu0 %6461 }
 0x3f3   : > { %v4132_v4 = vsel %vm1859_vm7, %v9651_v43, %v6379_v18  ;;  %v4131_v62 = vsel %vm1859_vm7, %v7124_v23, %v6378_v15  ;;  %v6464_v24 = vunpack.i.h.bf16 %v6462_v34  ;;  %v6463_v61 = vunpack.i.l.bf16 %v6462_v34  ;;  %v12435_v23 = vld [vmem:[#allocation57_spill] sm:$0xff] }
 0x3f4   : > { %v10315_v49 = vsel %vm2007_vm11, %v10193_v54, %v6528_v12  ;;  %v10319_v57 = vsel %vm2007_vm11, %v10190_v13, %v6529_v47  ;;  %v10322_v19 = vsel %vm1933_vm9, %v4131_v62, %v6468_v11  ;;  %v10325_v6 = vsel %vm1933_vm9, %v4132_v4, %v6469_v44  ;;  %v7125_v54 = vld [vmem:[%s7274_s22 + $0x40] sm:$0xff]  ;;  %v7126_v12 = vld [vmem:[%s7274_s22 + $0x48] sm:$0xff]  ;;  %v12437_v62 = vld [vmem:[#allocation52_spill] sm:$0xff] }
 0x3f5   : > { %12433 = vst [vmem:[#allocation75_spill] sm:$0xff] %v10315_v49  ;;  %v6394_v43 = vunpack.i.h.bf16 %v10013_v33  ;;  %v10329_v18 = vsel %vm1933_vm9, %v4130_v51, %v6464_v24  ;;  %v10332_v15 = vsel %vm1933_vm9, %v4129_v46, %v6463_v61  ;;  %v4869_v34 = vpack.c.bf16 %v7126_v12, %v7125_v54  ;;  %v12438_v46 = vld [vmem:[#allocation5_spill] sm:$0xff]  ;;  %v12440_v12 = vld [vmem:[#allocation26_spill] sm:$0xff] }
 0x3f6   : > { %12434 = vst [vmem:[#allocation7_spill] sm:$0xff] %v10319_v57  ;;  %v6314_v13 = vunpack.i.h.bf16 %v12435_v23  ;;  %v6313_v47 = vunpack.i.l.bf16 %v12435_v23  ;;  %v10338_v11 = vpack.i.bf16 %v3456_v7, %v3454_v14  ;;  %v12436_v44 = vrot.slane %v10092_v56, 4  ;;  %6696 = vrot.lane.b32.xlu2 %v12438_v46, %s7196_s28  ;;  %v10350_v14 = vld [vmem:[#allocation2 + $0x108] sm:$0xff]  ;;  %v12443_v57 = vld [vmem:[#allocation3_spill] sm:$0xff] }
 0x3f7   : > { %v6309_v49 = vunpack.i.h.bf16 %v12437_v62  ;;  %v6393_v51 = vunpack.i.l.bf16 %v10013_v33  ;;  %6676 = vrot.lane.b32.xlu1 %v10281_v60, %s7196_s28  ;;  %v4914_v24 = vshrl.u32 %v4869_v34, 16  ;;  %v4917_v61 = vshll.u32 %v4869_v34, 16  ;;  %12439 = vst [vmem:[#allocation21_spill] sm:$0xff] %v10350_v14  ;;  %v12441_v23 = vld [vmem:[#allocation42_spill] sm:$0xff]  ;;  %v6482_v22 = vpop.permute.xlu1 %6481 }
 0x3f8   : > { %v3452_v4 = vsel %vm1162_vm3, %v12436_v44, %v3451_v35  ;;  %v6308_v54 = vunpack.i.l.bf16 %v12437_v62  ;;  %v4136_v7 = vsel %vm1859_vm7, %v10350_v14, %v6389_v8  ;;  %v10354_v35 = vld [vmem:[#allocation2 + $0x100] sm:$0xff]  ;;  %v12442_v44 = vpack.i.bf16 %v12440_v12, %v12441_v23  ;;  %v6542_v62 = vpop.permute.xlu2 %6541 }
 0x3f9   : > { %v4135_v33 = vsel %vm1859_vm7, %v10354_v35, %v6388_v45  ;;  %v6399_v42 = vunpack.i.h.bf16 %v12443_v57  ;;  %v4138_v34 = vsel %vm1859_vm7, %v9668_v55, %v6394_v43  ;;  %v4916_v9 = vrot.slane %v4914_v24, 1  ;;  %v10365_v45 = vld [vmem:[#allocation2 + $0x110] sm:$0xff] }
 0x3fa   : > { %6671 = vrot.lane.b32.xlu0 %v12442_v44, %s7196_s28  ;;  %v4919_v46 = vrot.slane %v4917_v61, 2  ;;  %v6544_v8 = vunpack.i.h.bf16 %v6542_v62  ;;  %v6543_v28 = vunpack.i.l.bf16 %v6542_v62  ;;  %v6484_v38 = vunpack.i.h.bf16 %v6482_v22  ;;  %v6477_v14 = vpop.permute.xlu0 %6476 }
 0x3fb   : > { %v6483_v48 = vunpack.i.l.bf16 %v6482_v22  ;;  %v4137_v23 = vsel %vm1859_vm7, %v10365_v45, %v6393_v51  ;;  %v6479_v44 = vunpack.i.h.bf16 %v6477_v14  ;;  %v6478_v21 = vunpack.i.l.bf16 %v6477_v14 }
 0x3fc   : > { %v10369_v0 = vor.u32 %v4919_v46, %v4916_v9  ;;  %v10373_v55 = vsel %vm2007_vm11, %v10245_v27, %v6543_v28  ;;  %v10377_v43 = vsel %vm2007_vm11, %v10242_v17, %v6544_v8  ;;  %v10383_v24 = vsel %vm1933_vm9, %v4138_v34, %v6484_v38  ;;  %v12445_v17 = vld [vmem:[#allocation69_spill] sm:$0xff]  ;;  %v7131_v38 = vld [vmem:[#allocation2 + $0x8] sm:$0xff]  ;;  %v12449_v8 = vld [vmem:[#allocation40_spill] sm:$0xff] }
 0x3fd   : > { %12444 = vst [vmem:[#allocation35_spill] sm:$0xff] %v10373_v55  ;;  %v10380_v22 = vsel %vm1933_vm9, %v4137_v23, %v6483_v48  ;;  %v6398_v51 = vunpack.i.l.bf16 %v12443_v57  ;;  %v10387_v61 = vsel %vm1933_vm9, %v4136_v7, %v6479_v44  ;;  %v10390_v9 = vsel %vm1933_vm9, %v4135_v33, %v6478_v21  ;;  %v7130_v48 = vld [vmem:[#allocation2 + $0x10] sm:$0xff]  ;;  %v7132_v21 = vld [vmem:[#allocation2] sm:$0xff] }
 0x3fe   : > { %v4921_v28 = vsel %vm4886_vm15, %v10231_v30, %v10369_v0  ;;  %v4106_v27 = vsel %vm1859_vm7, %v12445_v17, %v6314_v13  ;;  %v4105_v46 = vsel %vm1859_vm7, %v7130_v48, %v6313_v47  ;;  %v4104_v14 = vsel %vm1859_vm7, %v7131_v38, %v6309_v49  ;;  %v12446_v13 = vld [vmem:[#allocation61_spill] sm:$0xff]  ;;  %v12447_v47 = vld [vmem:[#allocation36_spill] sm:$0xff] }
 0x3ff   : > { %v10400_v57 = vpack.i.bf16 %v3452_v4, %v10303_v37  ;;  %5525 = vmatmul.msk.bf16.gmra.mxu2 %vm1822_vm6, %v4921_v28  ;;  %v4103_v7 = vsel %vm1859_vm7, %v7132_v21, %v6308_v54  ;;  %v6404_v33 = vunpack.i.h.bf16 %v10065_v41  ;;  %v6403_v30 = vunpack.i.l.bf16 %v10065_v41  ;;  %6711 = vrot.lane.b32.xlu2 %v12446_v13, %s7196_s28  ;;  %v12448_v4 = vld [vmem:[#allocation68_spill] sm:$0xff]  ;;  %v6492_v17 = vpop.permute.xlu1 %6491 }
 0x400   : > { %6691 = vrot.lane.b32.xlu1 %v10338_v11, %s7196_s28  ;;  %v6329_v49 = vunpack.i.h.bf16 %v12447_v47  ;;  %v6328_v37 = vunpack.i.l.bf16 %v12447_v47  ;;  %v6324_v34 = vunpack.i.h.bf16 %v12448_v4  ;;  %v6323_v62 = vunpack.i.l.bf16 %v12448_v4  ;;  %v6557_v28 = vpop.permute.xlu2 %6556 }
 0x401   : > { %v4141_v54 = vsel %vm1933_vm9, %v4104_v14, %v6399_v42  ;;  %v4140_v41 = vsel %vm1933_vm9, %v4103_v7, %v6398_v51  ;;  %v6414_v23 = vunpack.i.h.bf16 %v12449_v8  ;;  %v6413_v44 = vunpack.i.l.bf16 %v12449_v8 }
 0x402   : > { %6686 = vrot.lane.b32.xlu0 %v10400_v57, %s7196_s28  ;;  %v6559_v48 = vunpack.i.h.bf16 %v6557_v28  ;;  %v6558_v38 = vunpack.i.l.bf16 %v6557_v28  ;;  %v6494_v21 = vunpack.i.h.bf16 %v6492_v17  ;;  %v6493_v47 = vunpack.i.l.bf16 %v6492_v17  ;;  %v6487_v4 = vpop.permute.xlu0 %6486 }
 0x403   : > { %v4143_v13 = vsel %vm1933_vm9, %v4106_v27, %v6404_v33  ;;  %v4142_v55 = vsel %vm1933_vm9, %v4105_v46, %v6403_v30  ;;  %v6489_v42 = vunpack.i.h.bf16 %v6487_v4  ;;  %v6488_v14 = vunpack.i.l.bf16 %v6487_v4  ;;  %v7134_v30 = vld [vmem:[%s7274_s22 + $0x58] sm:$0xff] }
 0x404   : > { %v10424_v51 = vsel %vm2007_vm11, %v10322_v19, %v6558_v38  ;;  %v10428_v7 = vsel %vm2007_vm11, %v10325_v6, %v6559_v48  ;;  %v10431_v8 = vsel %vm2007_vm11, %v4142_v55, %v6493_v47  ;;  %v10434_v28 = vsel %vm2007_vm11, %v4143_v13, %v6494_v21  ;;  %v7133_v19 = vld [vmem:[%s7274_s22 + $0x50] sm:$0xff] }
 0x405   : > { %12450 = vst [vmem:[#allocation51_spill] sm:$0xff] %v10424_v51  ;;  %v6419_v27 = vunpack.i.h.bf16 %v10114_v58  ;;  %v10438_v46 = vsel %vm2007_vm11, %v4141_v54, %v6489_v42  ;;  %v10441_v33 = vsel %vm2007_vm11, %v4140_v41, %v6488_v14  ;;  %v4870_v17 = vpack.c.bf16 %v7134_v30, %v7133_v19  ;;  %v12452_v54 = vld [vmem:[#allocation74_spill] sm:$0xff]  ;;  %v12453_v41 = vld [vmem:[#allocation45_spill] sm:$0xff] }
 0x406   : > { %12451 = vst [vmem:[#allocation67_spill] sm:$0xff] %v10428_v7  ;;  %v6740_v6 = vpack.i.bf16 %v10288_v25, %v10271_v63  ;;  %v3926_v55 = vrot.slane %v9926_v39, 6  ;;  %v4110_v13 = vsel %vm1859_vm7, %v9954_v53, %v6324_v34  ;;  %v6418_v48 = vunpack.i.l.bf16 %v10114_v58  ;;  %v12454_v34 = vld [vmem:[#allocation29_spill] sm:$0xff] }
 0x407   : > { %6726 = vrot.lane.b32.xlu2 %v12452_v54, %s7197_s30  ;;  %v4923_v38 = vshrl.u32 %v4870_v17, 16  ;;  %v4926_v21 = vshll.u32 %v4870_v17, 16  ;;  %v4112_v47 = vsel %vm1859_vm7, %v9926_v39, %v6329_v49  ;;  %v4111_v63 = vsel %vm1859_vm7, %v9923_v2, %v6328_v37  ;;  %v6507_v19 = vpop.permute.xlu1 %6506 }
 0x408   : > { %6706 = vrot.lane.b32.xlu1 %v12453_v41, %s7196_s28  ;;  %v4109_v25 = vsel %vm1859_vm7, %v9848_v29, %v6323_v62  ;;  %v4147_v58 = vsel %vm1933_vm9, %v4110_v13, %v6414_v23  ;;  %v4149_v42 = vsel %vm1933_vm9, %v4112_v47, %v6419_v27  ;;  %v6572_v14 = vpop.permute.xlu2 %6571  ;;  %v6509_v41 = vunpack.i.h.bf16 %v6507_v19 }
 0x409   : > { %v4146_v4 = vsel %vm1933_vm9, %v4109_v25, %v6413_v44  ;;  %v4925_v30 = vrot.slane %v4923_v38, 1  ;;  %v4928_v17 = vrot.slane %v4926_v21, 2  ;;  %v6574_v49 = vunpack.i.h.bf16 %v6572_v14 }
 0x40a   : > { %6701 = vrot.lane.b32.xlu0 %v12454_v34, %s7196_s28  ;;  %v6573_v54 = vunpack.i.l.bf16 %v6572_v14  ;;  %v6508_v37 = vunpack.i.l.bf16 %v6507_v19  ;;  %v6502_v7 = vpop.permute.xlu0 %6501  ;;  %v4148_v62 = vsel %vm1933_vm9, %v4111_v63, %v6418_v48  ;;  %v10481_v21 = vsel %vm2007_vm11, %v4149_v42, %v6509_v41  ;;  %v12457_v41 = vld [vmem:[#allocation58_spill] sm:$0xff] }
 0x40b   : > { %v6504_v51 = vunpack.i.h.bf16 %v6502_v7  ;;  %v6503_v23 = vunpack.i.l.bf16 %v6502_v7  ;;  %v10467_v13 = vor.u32 %v4928_v17, %v4925_v30  ;;  %v10475_v27 = vsel %vm2007_vm11, %v10383_v24, %v6574_v49  ;;  %v12455_v24 = vld [vmem:[#allocation12_spill] sm:$0xff] }
 0x40c   : > { %v10471_v44 = vsel %vm2007_vm11, %v10380_v22, %v6573_v54  ;;  %v10478_v38 = vsel %vm2007_vm11, %v4148_v62, %v6508_v37  ;;  %v3928_v47 = vrot.slane %v10056_v3, 6  ;;  %v6715_v63 = vpack.i.bf16 %v12440_v12, %v12455_v24 }
 0x40d   : > { %v10484_v48 = vsel %vm2007_vm11, %v4147_v58, %v6504_v51  ;;  %v10487_v7 = vsel %vm2007_vm11, %v4146_v4, %v6503_v23  ;;  %v4930_v22 = vsel %vm4886_vm15, %v10369_v0, %v10467_v13  ;;  %v12456_v51 = vrot.slane %v9854_v10, 6 }
 0x40e   : > { %v12458_v0 = vrot.slane %v9954_v53, 5  ;;  %v12459_v58 = vrot.slane %v9848_v29, 5  ;;  %v12460_v4 = vrot.slane %v9923_v2, 5  ;;  %v12462_v19 = vrot.slane %v9923_v2, 6 }
 0x40f   : > { %5526 = vmatmul.msk.bf16.gmra.mxu2 %vm1822_vm6, %v4930_v22  ;;  %6741 = vrot.lane.b32.xlu2 %v6740_v6, %s7198_s14  ;;  %v6735_v25 = vpack.i.bf16 %v12457_v41, %v12456_v51  ;;  %v3929_v30 = vsel %vm1640_vm5, %v3926_v55, %v3928_v47  ;;  %v3742_v17 = vrot.slane %v9926_v39, 5  ;;  %v3744_v29 = vrot.slane %v10056_v3, 5 }
 0x410   : > { %6721 = vrot.lane.b32.xlu1 %v10281_v60, %s7199_s15  ;;  %v3739_v12 = vsel %vm1458_vm4, %v12459_v58, %v12458_v0  ;;  %v12461_v6 = vmov %v12458_v0  ;;  %v6582_v14 = vpop.permute.xlu2 %6581  ;;  %v6522_v60 = vpop.permute.xlu1 %6521  ;;  %v3927_v10 = vsel %vm1640_vm5, %v12462_v19, %v3926_v55  ;;  %v3930_v24 = vrot.slane %v10092_v56, 6  ;;  %v12463_v0 = vld [vmem:[#allocation56_spill] sm:$0xff] }
 0x411   : > { %v3741_v42 = vsel %vm1458_vm4, %v12461_v6, %v12460_v4  ;;  %v6584_v49 = vunpack.i.h.bf16 %v6582_v14  ;;  %v6583_v54 = vunpack.i.l.bf16 %v6582_v14  ;;  %v6524_v37 = vunpack.i.h.bf16 %v6522_v60  ;;  %v12464_v4 = vld [vmem:[#allocation73_spill] sm:$0xff] }
 0x412   : > { %6716 = vrot.lane.b32.xlu0 %v6715_v63, %s7199_s15  ;;  %v6523_v53 = vunpack.i.l.bf16 %v6522_v60  ;;  %v6517_v62 = vpop.permute.xlu0 %6516  ;;  %v3932_v63 = vrot.slane %v10262_v1, 6  ;;  %v6755_v6 = vpack.i.bf16 %v3929_v30, %v3927_v10  ;;  %v7135_v14 = vld [vmem:[%s7274_s22 + $0x60] sm:$0xff]  ;;  %v6730_v19 = vpack.i.bf16 %v3741_v42, %v3739_v12 }
 0x413   : > { %v6519_v23 = vunpack.i.h.bf16 %v6517_v62  ;;  %v6518_v22 = vunpack.i.l.bf16 %v6517_v62  ;;  %v10523_v55 = vsel %vm2081_vm13, %v10431_v8, %v6583_v54  ;;  %v10527_v39 = vsel %vm2081_vm13, %v10434_v28, %v6584_v49  ;;  %v7136_v28 = vld [vmem:[%s7274_s22 + $0x68] sm:$0xff] }
 0x414   : > { %v10531_v51 = vsel %vm2007_vm11, %v10200_v5, %v6523_v53  ;;  %v10535_v41 = vsel %vm2007_vm11, %v10197_v32, %v6524_v37  ;;  %v4871_v60 = vpack.c.bf16 %v7136_v28, %v7135_v14  ;;  %v3745_v5 = vsel %vm1458_vm4, %v3742_v17, %v3744_v29 }
 0x415   : > { %v10539_v58 = vsel %vm2007_vm11, %v12463_v0, %v6519_v23  ;;  %v10543_v8 = vsel %vm2007_vm11, %v12464_v4, %v6518_v22  ;;  %v3931_v54 = vsel %vm1640_vm5, %v3928_v47, %v3930_v24  ;;  %v3933_v10 = vsel %vm1640_vm5, %v3930_v24, %v3932_v63 }
 0x416   : > { %v4932_v32 = vshrl.u32 %v4871_v60, 16  ;;  %v4935_v49 = vshll.u32 %v4871_v60, 16  ;;  %v12465_v12 = vrot.slane %v9923_v2, 5  ;;  %v3748_v62 = vrot.slane %v10262_v1, 5 }
 0x417   : > { %6756 = vrot.lane.b32.xlu2 %v6755_v6, %s7198_s14  ;;  %v6770_v60 = vpack.i.bf16 %v3933_v10, %v3931_v54  ;;  %v3491_v10 = vrot.slane %v10354_v35, 4  ;;  %vm4327_vm2 = vcmask 457728   ;;  %vm4431_vm9 = vsmask.f32 5376 }
 0x418   : > { %6736 = vrot.lane.b32.xlu1 %v6735_v25, %s7198_s14  ;;  %v3743_v42 = vsel %vm1458_vm4, %v12465_v12, %v3742_v17  ;;  %v6597_v30 = vpop.permute.xlu2 %6596  ;;  %v6537_v37 = vpop.permute.xlu1 %6536  ;;  %v4934_v25 = vrot.slane %v4932_v32, 1  ;;  %v4937_v23 = vrot.slane %v4935_v49, 2  ;;  %v12159_v49 = vrot.slane %v10160_v31, 6 }
 0x419   : > { %v6750_v53 = vpack.i.bf16 %v3745_v5, %v3743_v42  ;;  %v6599_v22 = vunpack.i.h.bf16 %v6597_v30  ;;  %v6598_v0 = vunpack.i.l.bf16 %v6597_v30  ;;  %v6539_v4 = vunpack.i.h.bf16 %v6537_v37 }
 0x41a   : > { %6731 = vrot.lane.b32.xlu0 %v6730_v19, %s7197_s30  ;;  %v6538_v6 = vunpack.i.l.bf16 %v6537_v37  ;;  %v6532_v47 = vpop.permute.xlu0 %6531  ;;  %v10561_v24 = vor.u32 %v4937_v23, %v4934_v25  ;;  %v12158_v12 = vrot.slane %v10160_v31, 5 }
 0x41b   : > { %v6534_v14 = vunpack.i.h.bf16 %v6532_v47  ;;  %v6533_v28 = vunpack.i.l.bf16 %v6532_v47  ;;  %v10565_v2 = vsel %vm2081_vm13, %v10478_v38, %v6598_v0  ;;  %v10569_v17 = vsel %vm2081_vm13, %v10481_v21, %v6599_v22  ;;  %v7138_v47 = vld [vmem:[%s7274_s22 + $0x78] sm:$0xff] }
 0x41c   : > { %v10573_v19 = vsel %vm2007_vm11, %v10252_v26, %v6538_v6  ;;  %v10577_v5 = vsel %vm2007_vm11, %v10249_v16, %v6539_v4  ;;  %v4939_v21 = vsel %vm4886_vm15, %v10467_v13, %v10561_v24  ;;  %v3934_v16 = vrot.slane %v10224_v40, 6 }
 0x41d   : > { %v10581_v32 = vsel %vm2007_vm11, %v9974_v20, %v6534_v14  ;;  %v10585_v38 = vsel %vm2007_vm11, %v9977_v36, %v6533_v28  ;;  %v3746_v20 = vrot.slane %v10092_v56, 5  ;;  %v3750_v22 = vrot.slane %v10224_v40, 5  ;;  %v10629_v14 = vld [vmem:[#allocation2 + $0xf8] sm:$0xff] }
 0x41e   : > { %v3937_v54 = vsel %vm1640_vm5, %v3934_v16, %v12159_v49  ;;  %v3935_v25 = vsel %vm1640_vm5, %v3932_v63, %v3934_v16  ;;  %v7137_v63 = vld [vmem:[%s7274_s22 + $0x70] sm:$0xff] }
 0x41f   : > { %5527 = vmatmul.msk.bf16.gmra.mxu2 %vm1822_vm6, %v4939_v21  ;;  %6771 = vrot.lane.b32.xlu2 %v6770_v60, %s7198_s14  ;;  %v3749_v13 = vsel %vm1458_vm4, %v3746_v20, %v3748_v62  ;;  %v3747_v23 = vsel %vm1458_vm4, %v3744_v29, %v3746_v20  ;;  %v6785_v29 = vpack.i.bf16 %v3937_v54, %v3935_v25  ;;  %v12157_v21 = vrot.slane %v10365_v45, 5 }
 0x420   : > { %6751 = vrot.lane.b32.xlu1 %v6750_v53, %s7197_s30  ;;  %v6612_v36 = vpop.permute.xlu2 %6611  ;;  %v6552_v26 = vpop.permute.xlu1 %6551  ;;  %v6765_v40 = vpack.i.bf16 %v3749_v13, %v3747_v23  ;;  %v3751_v60 = vsel %vm1458_vm4, %v3748_v62, %v3750_v22 }
 0x421   : > { %v6614_v42 = vunpack.i.h.bf16 %v6612_v36  ;;  %v6613_v30 = vunpack.i.l.bf16 %v6612_v36  ;;  %v6554_v56 = vunpack.i.h.bf16 %v6552_v26  ;;  %v6553_v37 = vunpack.i.l.bf16 %v6552_v26 }
 0x422   : > { %6746 = vrot.lane.b32.xlu0 %v10213_v52, %s7199_s15  ;;  %v6547_v53 = vpop.permute.xlu0 %6546  ;;  %v12466_v36 = vrot.slane %v9659_v50, 4 }
 0x423   : > { %v6548_v52 = vunpack.i.l.bf16 %v6547_v53  ;;  %v10613_v0 = vsel %vm2081_vm13, %v10531_v51, %v6613_v30  ;;  %v10617_v4 = vsel %vm2081_vm13, %v10535_v41, %v6614_v42  ;;  %v4203_v6 = vsel %vm2007_vm11, %v10332_v15, %v6553_v37 }
 0x424   : > { %v4204_v1 = vsel %vm2007_vm11, %v10329_v18, %v6554_v56  ;;  %v4872_v51 = vpack.c.bf16 %v7138_v47, %v7137_v63  ;;  %v3489_v41 = vrot.slane %v10629_v14, 4  ;;  %v3753_v15 = vsel %vm1458_vm4, %v3750_v22, %v12158_v12  ;;  %v12469_v47 = vld [vmem:[#allocation48_spill] sm:$0xff] }
 0x425   : > { %v10625_v3 = vsel %vm2007_vm11, %v10029_v59, %v6548_v52  ;;  %v6780_v54 = vpack.i.bf16 %v3753_v15, %v3751_v60  ;;  %v6549_v25 = vunpack.i.h.bf16 %v6547_v53  ;;  %v12472_v15 = vld [vmem:[#allocation18_spill] sm:$0xff]  ;;  %v3788_v60 = vrot.slane %v10354_v35, 5 }
 0x426   : > { %v4941_v18 = vshrl.u32 %v4872_v51, 16  ;;  %v4944_v59 = vshll.u32 %v4872_v51, 16  ;;  %v3492_v28 = vsel %vm1162_vm3, %v3489_v41, %v3491_v10  ;;  %v3490_v26 = vsel %vm1162_vm3, %v12466_v36, %v3489_v41  ;;  %v12470_v51 = vld [vmem:[#allocation32_spill] sm:$0xff] }
 0x427   : > { %6786 = vrot.lane.b32.xlu2 %v6785_v29, %s7198_s14 }
 0x428   : > { %6766 = vrot.lane.b32.xlu1 %v6765_v40, %s7197_s30  ;;  %v6627_v16 = vpop.permute.xlu2 %6626  ;;  %v6567_v20 = vpop.permute.xlu1 %6566  ;;  %v4943_v13 = vrot.slane %v4941_v18, 1  ;;  %v4946_v42 = vrot.slane %v4944_v59, 2  ;;  %v10678_v18 = vsel %vm2007_vm11, %v12472_v15, %v6549_v25 }
 0x429   : > { %v6629_v30 = vunpack.i.h.bf16 %v6627_v16  ;;  %v6628_v56 = vunpack.i.l.bf16 %v6627_v16  ;;  %v6568_v37 = vunpack.i.l.bf16 %v6567_v20 }
 0x42a   : > { %6761 = vrot.lane.b32.xlu0 %v10400_v57, %s7199_s15  ;;  %v6569_v57 = vunpack.i.h.bf16 %v6567_v20  ;;  %v6562_v52 = vpop.permute.xlu0 %6561  ;;  %v10647_v62 = vor.u32 %v4946_v42, %v4943_v13  ;;  %v12473_v13 = vld [vmem:[#allocation14_spill] sm:$0xff] }
 0x42b   : > { %v6564_v23 = vunpack.i.h.bf16 %v6562_v52  ;;  %v6563_v29 = vunpack.i.l.bf16 %v6562_v52  ;;  %v10651_v22 = vsel %vm2081_vm13, %v10573_v19, %v6628_v56  ;;  %v10655_v50 = vsel %vm2081_vm13, %v10577_v5, %v6629_v30 }
 0x42c   : > { %12467 = vst [vmem:[#allocation81_spill] sm:$0xff] %v10651_v22  ;;  %v4209_v40 = vsel %vm2007_vm11, %v10390_v9, %v6568_v37  ;;  %v4210_v63 = vsel %vm2007_vm11, %v10387_v61, %v6569_v57  ;;  %v6800_v19 = vpack.i.bf16 %v3492_v28, %v3490_v26  ;;  %v4948_v5 = vsel %vm4886_vm15, %v10561_v24, %v10647_v62  ;;  %v12471_v61 = vld [vmem:[#allocation21_spill] sm:$0xff] }
 0x42d   : > { %12468 = vst [vmem:[#allocation87_spill] sm:$0xff] %v10655_v50  ;;  %v10663_v53 = vsel %vm2007_vm11, %v12469_v47, %v6564_v23  ;;  %v10667_v41 = vsel %vm2007_vm11, %v12470_v51, %v6563_v29  ;;  %v3790_v9 = vrot.slane %v12471_v61, 5  ;;  %v3493_v30 = vrot.slane %v12471_v61, 4  ;;  %v10706_v23 = vld [vmem:[#allocation2 + $0xf0] sm:$0xff]  ;;  %v7141_v47 = vld [vmem:[%s7274_s22 + $0x80] sm:$0xff]  ;;  %v7142_v51 = vld [vmem:[%s7274_s22 + $0x88] sm:$0xff] }
 0x42e   : > { %v12154_v29 = vrot.slane %v10706_v23, 5 }
 0x42f   : > { %5528 = vmatmul.msk.bf16.gmra.mxu2 %vm1822_vm6, %v4948_v5  ;;  %6801 = vrot.lane.b32.xlu2 %v6800_v19, %s7199_s15  ;;  %v3793_v24 = vsel %vm1458_vm4, %v3790_v9, %v12157_v21  ;;  %v3786_v5 = vrot.slane %v10629_v14, 5 }
 0x430   : > { %6781 = vrot.lane.b32.xlu1 %v6780_v54, %s7197_s30  ;;  %v6642_v59 = vpop.permute.xlu2 %6641  ;;  %v6577_v28 = vpop.permute.xlu1 %6576 }
 0x431   : > { %v6644_v16 = vunpack.i.h.bf16 %v6642_v59  ;;  %v6643_v20 = vunpack.i.l.bf16 %v6642_v59  ;;  %v6579_v36 = vunpack.i.h.bf16 %v6577_v28  ;;  %v6578_v26 = vunpack.i.l.bf16 %v6577_v28 }
 0x432   : > { %6776 = vrot.lane.b32.xlu0 %v10338_v11, %s7199_s15  ;;  %v3213_v54 = vpop.permute.xlu0 %3212  ;;  %v3791_v11 = vsel %vm1458_vm4, %v3788_v60, %v3790_v9  ;;  %v3789_v15 = vsel %vm1458_vm4, %v3786_v5, %v3788_v60 }
 0x433   : > { %v10688_v42 = vsel %vm2007_vm11, %v12473_v13, %v3213_v54  ;;  %v10693_v56 = vsel %vm2081_vm13, %v4203_v6, %v6643_v20  ;;  %v10696_v57 = vsel %vm2081_vm13, %v4204_v1, %v6644_v16  ;;  %v10700_v37 = vsel %vm2081_vm13, %v10441_v33, %v6578_v26 }
 0x434   : > { %v10704_v52 = vsel %vm2081_vm13, %v10438_v46, %v6579_v36  ;;  %v6815_v25 = vpack.i.bf16 %v3793_v24, %v3791_v11  ;;  %v4873_v6 = vpack.c.bf16 %v7142_v51, %v7141_v47  ;;  %v12156_v33 = vrot.slane %v10365_v45, 4  ;;  %v12474_v46 = vld [vmem:[#allocation41_spill] sm:$0xff] }
 0x435   : > { %v3787_v24 = vsel %vm1458_vm4, %v12154_v29, %v3786_v5  ;;  %v3494_v16 = vsel %vm1162_vm3, %v3491_v10, %v3493_v30 }
 0x436   : > { %v4950_v1 = vshrl.u32 %v4873_v6, 16  ;;  %v4953_v9 = vshll.u32 %v4873_v6, 16  ;;  %v3496_v60 = vsel %vm1162_vm3, %v3493_v30, %v12156_v33  ;;  %v12478_v30 = vld [vmem:[#allocation76_spill] sm:$0xff] }
 0x437   : > { %6816 = vrot.lane.b32.xlu2 %v6815_v25, %s7197_s30 }
 0x438   : > { %6796 = vrot.lane.b32.xlu1 %v6800_v19, %s7196_s28  ;;  %v6657_v59 = vpop.permute.xlu2 %6656  ;;  %v6592_v28 = vpop.permute.xlu1 %6591  ;;  %v4952_v19 = vrot.slane %v4950_v1, 1  ;;  %v4955_v20 = vrot.slane %v4953_v9, 2  ;;  %v12477_v9 = vld [vmem:[#allocation13_spill] sm:$0xff] }
 0x439   : > { %v6659_v36 = vunpack.i.h.bf16 %v6657_v59  ;;  %v6658_v26 = vunpack.i.l.bf16 %v6657_v59  ;;  %v6594_v54 = vunpack.i.h.bf16 %v6592_v28  ;;  %v6593_v13 = vunpack.i.l.bf16 %v6592_v28 }
 0x43a   : > { %6791 = vrot.lane.b32.xlu0 %v12474_v46, %s7196_s28  ;;  %v6587_v11 = vpop.permute.xlu0 %6586  ;;  %v10727_v51 = vor.u32 %v4955_v20, %v4952_v19  ;;  %v6805_v19 = vpack.i.bf16 %v3496_v60, %v3494_v16  ;;  %v3976_v20 = vrot.slane %v10365_v45, 6 }
 0x43b   : > { %v6589_v25 = vunpack.i.h.bf16 %v6587_v11  ;;  %v6588_v47 = vunpack.i.l.bf16 %v6587_v11  ;;  %v10730_v6 = vsel %vm2081_vm13, %v4209_v40, %v6658_v26  ;;  %v10733_v10 = vsel %vm2081_vm13, %v4210_v63, %v6659_v36 }
 0x43c   : > { %12475 = vst [vmem:[#allocation93_spill] sm:$0xff] %v10730_v6  ;;  %v10737_v5 = vsel %vm2081_vm13, %v10487_v7, %v6593_v13  ;;  %v10741_v1 = vsel %vm2081_vm13, %v10484_v48, %v6594_v54  ;;  %v6810_v40 = vpack.i.bf16 %v3789_v15, %v3787_v24  ;;  %v4957_v63 = vsel %vm4886_vm15, %v10647_v62, %v10727_v51  ;;  %v12479_v48 = vld [vmem:[#allocation5_spill] sm:$0xff] }
 0x43d   : > { %12476 = vst [vmem:[#allocation17_spill] sm:$0xff] %v10733_v10  ;;  %v10745_v59 = vsel %vm2081_vm13, %v12477_v9, %v6589_v25  ;;  %v10749_v28 = vsel %vm2081_vm13, %v12478_v30, %v6588_v47  ;;  %v3972_v7 = vrot.slane %v10354_v35, 6  ;;  %v3974_v36 = vrot.slane %v12471_v61, 6  ;;  %v7143_v30 = vld [vmem:[#allocation2 + $0x118] sm:$0xff] }
 0x43e   : > { %v12155_v15 = vrot.slane %v10706_v23, 6  ;;  %v3970_v62 = vrot.slane %v10629_v14, 6 }
 0x43f   : > { %5529 = vmatmul.msk.bf16.gmra.mxu2 %vm1822_vm6, %v4957_v63  ;;  %6831 = vrot.lane.b32.xlu2 %v12479_v48, %s7199_s15  ;;  %v3977_v13 = vsel %vm1640_vm5, %v3974_v36, %v3976_v20  ;;  %v3975_v47 = vsel %vm1640_vm5, %v3972_v7, %v3974_v36  ;;  %v12480_v63 = vld [vmem:[#allocation59_spill] sm:$0xff] }
 0x440   : > { %6811 = vrot.lane.b32.xlu1 %v6810_v40, %s7197_s30  ;;  %v10764_v24 = vpop.permute.xlu2 %6666  ;;  %v6607_v35 = vpop.permute.xlu1 %6606  ;;  %v3973_v11 = vsel %vm1640_vm5, %v3970_v62, %v3972_v7  ;;  %v3971_v14 = vsel %vm1640_vm5, %v12155_v15, %v3970_v62  ;;  %v3978_v40 = vrot.slane %v7143_v30, 6  ;;  %v6825_v36 = vpack.i.bf16 %v3977_v13, %v3975_v47  ;;  %v7144_v62 = vld [vmem:[%s7274_s22 + $0x90] sm:$0xff]  ;;  %v12485_v47 = vld [vmem:[#allocation28_spill] sm:$0xff] }
 0x441   : > { %v6609_v16 = vunpack.i.h.bf16 %v6607_v35  ;;  %v6608_v26 = vunpack.i.l.bf16 %v6607_v35  ;;  %v12481_v35 = vld [vmem:[#allocation43_spill] sm:$0xff] }
 0x442   : > { %6806 = vrot.lane.b32.xlu0 %v6805_v19, %s7199_s15  ;;  %v6602_v54 = vpop.permute.xlu0 %6601  ;;  %v3979_v13 = vsel %vm1640_vm5, %v3976_v20, %v3978_v40 }
 0x443   : > { %v6604_v25 = vunpack.i.h.bf16 %v6602_v54  ;;  %v6603_v61 = vunpack.i.l.bf16 %v6602_v54  ;;  %v10774_v60 = vsel %vm2081_vm13, %v10543_v8, %v6608_v26  ;;  %v10778_v9 = vsel %vm2081_vm13, %v10539_v58, %v6609_v16  ;;  %v7145_v54 = vld [vmem:[%s7274_s22 + $0x98] sm:$0xff] }
 0x444   : > { %v4874_v29 = vpack.c.bf16 %v7145_v54, %v7144_v62  ;;  %v6820_v8 = vpack.i.bf16 %v3973_v11, %v3971_v14  ;;  %v12482_v26 = vld [vmem:[#allocation72_spill] sm:$0xff]  ;;  %v3938_v11 = vrot.slane %v12485_v47, 6  ;;  %v3754_v14 = vrot.slane %v12485_v47, 5 }
 0x445   : > { %v10782_v48 = vsel %vm2081_vm13, %v12480_v63, %v6604_v25  ;;  %v10786_v7 = vsel %vm2081_vm13, %v12481_v35, %v6603_v61  ;;  %v12483_v15 = vrot.slane %v12482_v26, 6  ;;  %v12484_v16 = vld [vmem:[#allocation60_spill] sm:$0xff]  ;;  %v3794_v54 = vrot.slane %v7143_v30, 5 }
 0x446   : > { %v3940_v33 = vrot.slane %v12484_v16, 6  ;;  %v4959_v63 = vshrl.u32 %v4874_v29, 16  ;;  %v4962_v61 = vshll.u32 %v4874_v29, 16  ;;  %v3497_v25 = vrot.slane %v7143_v30, 4 }
 0x447   : > { %v3981_v58 = vsel %vm1640_vm5, %v3978_v40, %v12483_v15  ;;  %6846 = vrot.lane.b32.xlu2 %v6805_v19, %s7196_s28  ;;  %v12486_v20 = vrot.slane %v12484_v16, 5 }
 0x448   : > { %6826 = vrot.lane.b32.xlu1 %v6825_v36, %s7198_s14  ;;  %v10801_v35 = vpop.permute.xlu2 %6681  ;;  %v6622_v15 = vpop.permute.xlu1 %6621  ;;  %v6860_v62 = vpack.i.bf16 %v3981_v58, %v3979_v13  ;;  %v4961_v19 = vrot.slane %v4959_v63, 1  ;;  %v4964_v21 = vrot.slane %v4962_v61, 2  ;;  %v3941_v29 = vsel %vm1640_vm5, %v3938_v11, %v3940_v33 }
 0x449   : > { %v6624_v36 = vunpack.i.h.bf16 %v6622_v15  ;;  %v6623_v12 = vunpack.i.l.bf16 %v6622_v15  ;;  %v3757_v40 = vsel %vm1458_vm4, %v3754_v14, %v12486_v20  ;;  %v12487_v61 = vrot.slane %v10160_v31, 6  ;;  %v12489_v15 = vld [vmem:[#allocation7_spill] sm:$0xff] }
 0x44a   : > { %6821 = vrot.lane.b32.xlu0 %v6820_v8, %s7198_s14  ;;  %v6617_v49 = vpop.permute.xlu0 %6616  ;;  %v10807_v47 = vor.u32 %v4964_v21, %v4961_v19  ;;  %v12490_v19 = vld [vmem:[#allocation75_spill] sm:$0xff] }
 0x44b   : > { %v6619_v8 = vunpack.i.h.bf16 %v6617_v49  ;;  %v6618_v50 = vunpack.i.l.bf16 %v6617_v49  ;;  %v10811_v58 = vsel %vm2081_vm13, %v10585_v38, %v6623_v12  ;;  %v10815_v63 = vsel %vm2081_vm13, %v10581_v32, %v6624_v36  ;;  %v10834_v20 = vld [vmem:[#allocation2 + $0x90] sm:$0xff] }
 0x44c   : > { %v3939_v30 = vsel %vm1640_vm5, %v12487_v61, %v3938_v11  ;;  %v12488_v49 = vrot.slane %v10160_v31, 5  ;;  %v4966_v32 = vsel %vm4886_vm15, %v10727_v51, %v10807_v47  ;;  %v12160_v31 = vrot.slane %v10834_v20, 6 }
 0x44d   : > { %v10825_v21 = vsel %vm2081_vm13, %v12489_v15, %v6619_v8  ;;  %v10829_v38 = vsel %vm2081_vm13, %v12490_v19, %v6618_v50  ;;  %v6840_v12 = vpack.i.bf16 %v3941_v29, %v3939_v30  ;;  %v12491_v11 = vrot.slane %v12482_v26, 5  ;;  %v12492_v50 = vld [vmem:[#allocation44_spill] sm:$0xff] }
 0x44e   : > { %v3755_v13 = vsel %vm1458_vm4, %v12488_v49, %v3754_v14  ;;  %v3942_v29 = vrot.slane %v12492_v50, 6  ;;  %v12493_v51 = vrot.slane %v10365_v45, 5  ;;  %v12494_v49 = vrot.slane %v10365_v45, 4 }
 0x44f   : > { %v6835_v36 = vpack.i.bf16 %v3757_v40, %v3755_v13  ;;  %v3797_v14 = vsel %vm1458_vm4, %v3794_v54, %v12491_v11  ;;  %5530 = vmatmul.msk.bf16.gmra.mxu2 %vm1822_vm6, %v4966_v32  ;;  %6861 = vrot.lane.b32.xlu2 %v6860_v62, %s7198_s14  ;;  %v12495_v15 = vrot.slane %v12482_v26, 4  ;;  %v3758_v19 = vrot.slane %v12492_v50, 5 }
 0x450   : > { %6841 = vrot.lane.b32.xlu1 %v6840_v12, %s7198_s14  ;;  %v3795_v8 = vsel %vm1458_vm4, %v12493_v51, %v3794_v54  ;;  %v6697_v40 = vpop.permute.xlu2 %6696  ;;  %v6637_v61 = vpop.permute.xlu1 %6636  ;;  %v3498_v13 = vsel %vm1162_vm3, %v12494_v49, %v3497_v25  ;;  %v3945_v54 = vsel %vm1640_vm5, %v3942_v29, %v12160_v31  ;;  %v3943_v51 = vsel %vm1640_vm5, %v3940_v33, %v3942_v29  ;;  %v12500_v49 = vld [vmem:[#allocation35_spill] sm:$0xff]  ;;  %v7147_v29 = vld [vmem:[%s7274_s22 + $0xa0] sm:$0xff] }
 0x451   : > { %v6855_v30 = vpack.i.bf16 %v3797_v14, %v3795_v8  ;;  %v3500_v62 = vsel %vm1162_vm3, %v3497_v25, %v12495_v15  ;;  %v6699_v12 = vunpack.i.h.bf16 %v6697_v40  ;;  %v6698_v32 = vunpack.i.l.bf16 %v6697_v40  ;;  %v7148_v15 = vld [vmem:[%s7274_s22 + $0xa8] sm:$0xff] }
 0x452   : > { %6836 = vrot.lane.b32.xlu0 %v6835_v36, %s7197_s30  ;;  %v6638_v36 = vunpack.i.l.bf16 %v6637_v61  ;;  %v6632_v11 = vpop.permute.xlu0 %6631  ;;  %v3760_v8 = vrot.slane %v10834_v20, 5 }
 0x453   : > { %v6634_v45 = vunpack.i.h.bf16 %v6632_v11  ;;  %v6633_v14 = vunpack.i.l.bf16 %v6632_v11  ;;  %v10861_v26 = vsel %vm4251_vm0, %v10774_v60, %v6698_v32  ;;  %v10865_v25 = vsel %vm4251_vm0, %v10778_v9, %v6699_v12 }
 0x454   : > { %12496 = vst [vmem:[#allocation31_spill] sm:$0xff] %v10861_v26  ;;  %v10869_v50 = vsel %vm2081_vm13, %v10625_v3, %v6638_v36  ;;  %v6875_v60 = vpack.i.bf16 %v3945_v54, %v3943_v51  ;;  %v4875_v32 = vpack.c.bf16 %v7148_v15, %v7147_v29  ;;  %v6850_v9 = vpack.i.bf16 %v3500_v62, %v3498_v13  ;;  %v11106_v26 = vld [vmem:[#allocation2 + $0xc8] sm:$0xff] }
 0x455   : > { %12497 = vst [vmem:[#allocation47_spill] sm:$0xff] %v10865_v25  ;;  %v10874_v40 = vsel %vm2081_vm13, %v10377_v43, %v6634_v45  ;;  %v10878_v33 = vsel %vm2081_vm13, %v12500_v49, %v6633_v14  ;;  %v12502_v11 = vrot.slane %v12484_v16, 5  ;;  %v3761_v54 = vsel %vm1458_vm4, %v3758_v19, %v3760_v8 }
 0x456   : > { %12498 = vst [vmem:[#allocation63_spill] sm:$0xff] %v10869_v50  ;;  %v4968_v3 = vshrl.u32 %v4875_v32, 16  ;;  %v4971_v12 = vshll.u32 %v4875_v32, 16 }
 0x457   : > { %12499 = vst [vmem:[#allocation78_spill] sm:$0xff] %v10874_v40  ;;  %6876 = vrot.lane.b32.xlu2 %v6875_v60, %s7198_s14  ;;  %v3759_v45 = vsel %vm1458_vm4, %v12502_v11, %v3758_v19  ;;  %v12507_v11 = vld [vmem:[#allocation27_spill] sm:$0xff] }
 0x458   : > { %12501 = vst [vmem:[#allocation84_spill] sm:$0xff] %v10878_v33  ;;  %6856 = vrot.lane.b32.xlu1 %v6855_v30, %s7197_s30  ;;  %v6652_v43 = vpop.permute.xlu1 %6651  ;;  %v4970_v14 = vrot.slane %v4968_v3, 1  ;;  %v4973_v51 = vrot.slane %v4971_v12, 2  ;;  %v6639_v30 = vunpack.i.h.bf16 %v6637_v61  ;;  %v12505_v61 = vld [vmem:[#allocation51_spill] sm:$0xff] }
 0x459   : > { %v6712_v36 = vpop.permute.xlu2 %6711  ;;  %v6654_v62 = vunpack.i.h.bf16 %v6652_v43  ;;  %v6653_v60 = vunpack.i.l.bf16 %v6652_v43  ;;  %v6870_v43 = vpack.i.bf16 %v3761_v54, %v3759_v45  ;;  %v10931_v45 = vld [vmem:[#allocation2 + $0x98] sm:$0xff] }
 0x45a   : > { %6851 = vrot.lane.b32.xlu0 %v6850_v9, %s7199_s15  ;;  %v6714_v49 = vunpack.i.h.bf16 %v6712_v36  ;;  %v6713_v13 = vunpack.i.l.bf16 %v6712_v36  ;;  %v6647_v29 = vpop.permute.xlu0 %6646  ;;  %v10889_v31 = vor.u32 %v4973_v51, %v4970_v14  ;;  %v12506_v36 = vld [vmem:[#allocation67_spill] sm:$0xff] }
 0x45b   : > { %v6649_v15 = vunpack.i.h.bf16 %v6647_v29  ;;  %v6648_v32 = vunpack.i.l.bf16 %v6647_v29  ;;  %v10901_v19 = vsel %vm2081_vm13, %v10667_v41, %v6653_v60  ;;  %v10905_v3 = vsel %vm2081_vm13, %v10663_v53, %v6654_v62  ;;  %v12508_v53 = vld [vmem:[#allocation55_spill] sm:$0xff] }
 0x45c   : > { %v10893_v50 = vsel %vm4251_vm0, %v10811_v58, %v6713_v13  ;;  %v10897_v16 = vsel %vm4251_vm0, %v10815_v63, %v6714_v49  ;;  %v4975_v63 = vsel %vm4886_vm15, %v10807_v47, %v10889_v31  ;;  %v12161_v41 = vrot.slane %v12507_v11, 5  ;;  %v12509_v14 = vld [vmem:[#allocation71_spill] sm:$0xff] }
 0x45d   : > { %12503 = vst [vmem:[#allocation90_spill] sm:$0xff] %v10893_v50  ;;  %v10909_v12 = vsel %vm2081_vm13, %v12505_v61, %v6648_v32  ;;  %v10913_v58 = vsel %vm2081_vm13, %v12506_v36, %v6649_v15  ;;  %v12510_v51 = vpack.i.bf16 %v12508_v53, %v12509_v14  ;;  %v10927_v49 = vsel %vm2081_vm13, %v10678_v18, %v6639_v30  ;;  %v10945_v15 = vld [vmem:[#allocation2 + $0x140] sm:$0xff]  ;;  %v7151_v53 = vld [vmem:[%s7274_s22 + $0xb8] sm:$0xff]  ;;  %v7154_v50 = vld [vmem:[#allocation2 + $0xa8] sm:$0xff] }
 0x45e   : > { %12504 = vst [vmem:[#allocation16_spill] sm:$0xff] %v10897_v16  ;;  %v3762_v47 = vrot.slane %v10931_v45, 5  ;;  %v10943_v29 = vpop.f32.mrf.mxu2  ;;  %v12529_v22 = vrot.slane %v10945_v15, 5  ;;  %v11028_v16 = vld [vmem:[#allocation2 + $0x148] sm:$0xff] }
 0x45f   : > { %5531 = vmatmul.msk.bf16.gmra.mxu2 %vm1822_vm6, %v4975_v63  ;;  %6891 = vrot.lane.b32.xlu2 %v12510_v51, %s7197_s30  ;;  %12511 = vst [vmem:[#allocation30_spill] sm:$0xff] %v10927_v49  ;;  %v7150_v63 = vld [vmem:[%s7274_s22 + $0xb0] sm:$0xff]  ;;  %v12162_v51 = vrot.slane %v10945_v15, 4 }
 0x460   : > { %6871 = vrot.lane.b32.xlu1 %v6870_v43, %s7197_s30  ;;  %v3765_v18 = vsel %vm1458_vm4, %v3762_v47, %v12161_v41  ;;  %12513 = vst [vmem:[#allocation62_spill] sm:$0xff] %v10943_v29  ;;  %v3763_v32 = vsel %vm1458_vm4, %v3760_v8, %v3762_v47  ;;  %v4430_v43 = vld [vmem:[%s11987_s5 + $0x20] sm:$0xf]  ;;  %v4876_v14 = vpack.c.bf16 %v7151_v53, %v7150_v63  ;;  %v12525_v49 = vld [vmem:[#allocation11_spill] sm:$0xff] }
 0x461   : > { %v10934_v54 = vpop.permute.xlu2 %6726  ;;  %v3395_v13 = vpop.permute.xlu1 %3394  ;;  %v6905_v36 = vpack.i.bf16 %v3765_v18, %v3763_v32 }
 0x462   : > { %6866 = vrot.lane.b32.xlu0 %v12454_v34, %s7199_s15  ;;  %v10938_v62 = vsel %vm2081_vm13, %v10688_v42, %v3395_v13  ;;  %v4619_v13 = vunpack.c.l.b16 %v4430_v43  ;;  %v4977_v8 = vshrl.u32 %v4876_v14, 16  ;;  %v4980_v47 = vshll.u32 %v4876_v14, 16  ;;  %v12517_v43 = vld [vmem:[#allocation4_spill] sm:$0xff] }
 0x463   : > { %12512 = vst [vmem:[#allocation46_spill] sm:$0xff] %v10938_v62  ;;  %v6662_v60 = vpop.permute.xlu0 %6661  ;;  %v3950_v62 = vrot.slane %v7154_v50, 6 }
 0x464   : > { %v6664_v34 = vunpack.i.h.bf16 %v6662_v60  ;;  %v6663_v30 = vunpack.i.l.bf16 %v6662_v60 }
 0x466   : > { %v10950_v61 = vsel %vm2081_vm13, %v10471_v44, %v6663_v30  ;;  %v10954_v42 = vsel %vm2081_vm13, %v10475_v27, %v6664_v34  ;;  %v12516_v44 = vld [vmem:[#allocation9_spill] sm:$0xff]  ;;  %v4624_v27 = vpack.c.b16 %v4619_v13, %v4619_v13  ;;  %v4979_v34 = vrot.slane %v4977_v8, 1  ;;  %v10977_v53 = vpop.f32.mrf.mxu2  ;;  %v7152_v8 = vld [vmem:[#allocation2 + $0x138] sm:$0xff] }
 0x467   : > { %12514 = vst [vmem:[#allocation77_spill] sm:$0xff] %v10950_v61  ;;  %6906 = vrot.lane.b32.xlu2 %v6905_v36, %s7197_s30  ;;  %v4982_v30 = vrot.slane %v4980_v47, 2  ;;  %v12518_v36 = vrot.slane %v12517_v43, 4  ;;  %v12520_v13 = vld [vmem:[#allocation37_spill] sm:$0xff]  ;;  %v3986_v47 = vrot.slane %v7152_v8, 6  ;;  %v3802_v40 = vrot.slane %v7152_v8, 5 }
 0x468   : > { %12515 = vst [vmem:[#allocation83_spill] sm:$0xff] %v10954_v42  ;;  %6886 = vrot.lane.b32.xlu1 %v12516_v44, %s7199_s15  ;;  %v4685_v14 = vsel %vm1162_vm3, %v4624_v27, 0  ;;  %v5548_v43 = vld [vmem:[%s11987_s5 + $0x18] sm:$0xff]  ;;  %v3946_v8 = vrot.slane %v10931_v45, 6  ;;  %v5547_v45 = vld [vmem:[%s11987_s5 + $0x10] sm:$0xff]  ;;  %v3766_v42 = vrot.slane %v7154_v50, 5 }
 0x469   : > { %v10966_v60 = vpop.permute.xlu2 %6741  ;;  %v10968_v18 = vpop.permute.xlu1 %6676  ;;  %v3621_v63 = vsel %vm1162_vm3, %v12518_v36, %v12162_v51  ;;  %12519 = vst [vmem:[#allocation89_spill] sm:$0xff] %v10977_v53  ;;  %4690 = vmatpush.bf16.msra.mxu1 %v4685_v14  ;;  %5552 = vmatpush.bf16.msrb.mxu3 %v4685_v14  ;;  %v7153_v36 = vld [vmem:[#allocation2 + $0xa0] sm:$0xff]  ;;  %v12526_v53 = vrot.slane %v12525_v49, 6  ;;  %v7155_v61 = vld [vmem:[#allocation2 + $0xb0] sm:$0xff]  ;;  %v12531_v50 = vrot.slane %v10834_v20, 6  ;;  %v12534_v20 = vrot.slane %v10945_v15, 6 }
 0x46a   : > { %6881 = vrot.lane.b32.xlu0 %v6850_v9, %s7196_s28  ;;  %v10980_v9 = vor.u32 %v4982_v30, %v4979_v34  ;;  %v6920_v41 = vpack.i.bf16 %v3621_v63, %v12520_v13  ;;  %v3948_v51 = vrot.slane %v7153_v36, 6  ;;  %v12521_v34 = vld [vmem:[#allocation45_spill] sm:$0xff]  ;;  %v12522_v30 = vld [vmem:[#allocation10_spill] sm:$0xff]  ;;  %v12523_v63 = vld [vmem:[#allocation15_spill] sm:$0xff] }
 0x46b   : > { %v12524_v14 = vpack.i.bf16 %v12522_v30, %v12523_v63  ;;  %v12528_v30 = vrot.slane %v12525_v49, 5 }
 0x46c   : > { %v10970_v32 = vpop.permute.xlu0 %6671  ;;  %v4984_v27 = vsel %vm4886_vm15, %v10889_v31, %v10980_v9  ;;  %v11005_v31 = vsel %vm1640_vm5, %v12526_v53, %v3986_v47  ;;  %v3949_v29 = vsel %vm1640_vm5, %v3946_v8, %v3948_v51 }
 0x46d   : > { %v11015_v63 = vsel %vm1458_vm4, %v12528_v30, %v3802_v40  ;;  %4691 = vmatpush.bf16.msra.mxu1 %v5548_v43  ;;  %5553 = vmatpush.bf16.msrb.mxu3 %v5548_v43 }
 0x46f   : > { %6921 = vrot.lane.b32.xlu2 %v6920_v41, %s7199_s15  ;;  %5532 = vmatmul.msk.bf16.gmra.mxu2 %vm1822_vm6, %v4984_v27  ;;  %v12527_v41 = vrot.slane %v10945_v15, 6  ;;  %v11026_v49 = vpop.f32.mrf.mxu2 }
 0x470   : > { %6901 = vrot.lane.b32.xlu1 %v12521_v34, %s7199_s15  ;;  %12530 = vst [vmem:[#allocation8_spill] sm:$0xff] %v11026_v49 }
 0x471   : > { %v11000_v36 = vpop.permute.xlu2 %6756  ;;  %v11010_v34 = vsel %vm1640_vm5, %v3986_v47, %v12527_v41  ;;  %v11024_v47 = vsel %vm1458_vm4, %v3802_v40, %v12529_v22  ;;  %v3952_v22 = vrot.slane %v7155_v61, 6  ;;  %v3768_v40 = vrot.slane %v7155_v61, 5  ;;  %4692 = vmatpush.bf16.msra.mxu1 %v5547_v45  ;;  %5554 = vmatpush.bf16.msrb.mxu3 %v5547_v45  ;;  %v7158_v45 = vld [vmem:[%s7274_s22 + $0xc8] sm:$0xff] }
 0x472   : > { %6896 = vrot.lane.b32.xlu0 %v12524_v14, %s7198_s14  ;;  %v6692_v33 = vpop.permute.xlu1 %6691 }
 0x473   : > { %v6694_v27 = vunpack.i.h.bf16 %v6692_v33  ;;  %v6693_v14 = vunpack.i.l.bf16 %v6692_v33 }
 0x474   : > { %v6687_v53 = vpop.permute.xlu0 %6686 }
 0x475   : > { %v6689_v41 = vunpack.i.h.bf16 %v6687_v53  ;;  %v6688_v30 = vunpack.i.l.bf16 %v6687_v53  ;;  %v11032_v33 = vsel %vm4251_vm0, %v10786_v7, %v6693_v14  ;;  %v11036_v43 = vsel %vm4251_vm0, %v10782_v48, %v6694_v27  ;;  %v11049_v14 = vld [vmem:[#allocation2 + $0xb8] sm:$0xff] }
 0x476   : > { %v3947_v7 = vsel %vm1640_vm5, %v12531_v50, %v3946_v8  ;;  %v12163_v48 = vrot.slane %v11049_v14, 6  ;;  %v3990_v27 = vrot.slane %v11028_v16, 6  ;;  %v12532_v8 = vld [vmem:[#allocation61_spill] sm:$0xff] }
 0x477   : > { %v11040_v49 = vsel %vm4251_vm0, %v10565_v2, %v6688_v30  ;;  %v11044_v53 = vsel %vm4251_vm0, %v10569_v17, %v6689_v41  ;;  %v5546_v2 = vld [vmem:[%s11987_s5 + $0x8] sm:$0xff]  ;;  %v6910_v61 = vpack.i.bf16 %v3949_v29, %v3947_v7  ;;  %v6930_v17 = vpack.i.bf16 %v11010_v34, %v11005_v31  ;;  %6936 = vrot.lane.b32.xlu2 %v12532_v8, %s7199_s15  ;;  %v7157_v29 = vld [vmem:[%s7274_s22 + $0xc0] sm:$0xff] }
 0x478   : > { %6916 = vrot.lane.b32.xlu1 %v12516_v44, %s7196_s28  ;;  %v6925_v41 = vpack.i.bf16 %v11024_v47, %v11015_v63  ;;  %v11066_v30 = vsel %vm1640_vm5, %v3948_v51, %v3950_v62  ;;  %v4877_v50 = vpack.c.bf16 %v7158_v45, %v7157_v29  ;;  %v11072_v31 = vsel %vm1640_vm5, %v3950_v62, %v3952_v22 }
 0x479   : > { %v12533_v34 = vrot.slane %v12507_v11, 5  ;;  %v11080_v44 = vsel %vm1458_vm4, %v3766_v42, %v3768_v40  ;;  %v3806_v63 = vrot.slane %v11028_v16, 5  ;;  %v11083_v51 = vpop.permute.xlu2 %6771  ;;  %v3622_v62 = vrot.slane %v11028_v16, 4  ;;  %4693 = vmatpush.bf16.msra.mxu1 %v5546_v2  ;;  %v5545_v11 = vld [vmem:[%s11987_s5] sm:$0xff]  ;;  %5555 = vmatpush.bf16.msrb.mxu3 %v5546_v2 }
 0x47a   : > { %6911 = vrot.lane.b32.xlu0 %v6910_v61, %s7198_s14  ;;  %v6707_v47 = vpop.permute.xlu1 %6706  ;;  %v11088_v61 = vsel %vm1640_vm5, %v3952_v22, %v12163_v48  ;;  %v4986_v8 = vshrl.u32 %v4877_v50, 16  ;;  %v11097_v10 = vsel %vm1640_vm5, %v12534_v20, %v3990_v27  ;;  %v12535_v22 = vrot.slane %v11049_v14, 5  ;;  %v11104_v48 = vpop.f32.mrf.mxu2 }
 0x47b   : > { %v11077_v7 = vsel %vm1458_vm4, %v12533_v34, %v3766_v42  ;;  %v4989_v42 = vshll.u32 %v4877_v50, 16  ;;  %v6709_v29 = vunpack.i.h.bf16 %v6707_v47  ;;  %v6708_v45 = vunpack.i.l.bf16 %v6707_v47  ;;  %12536 = vst [vmem:[#allocation24_spill] sm:$0xff] %v11104_v48 }
 0x47c   : > { %v6702_v34 = vpop.permute.xlu0 %6701  ;;  %v11102_v16 = vsel %vm1458_vm4, %v3768_v40, %v12535_v22  ;;  %v4988_v50 = vrot.slane %v4986_v8, 1  ;;  %v3774_v40 = vrot.slane %v11106_v26, 5  ;;  %v7160_v8 = vld [vmem:[#allocation2 + $0xc0] sm:$0xff] }
 0x47d   : > { %v6704_v6 = vunpack.i.h.bf16 %v6702_v34  ;;  %v6703_v25 = vunpack.i.l.bf16 %v6702_v34  ;;  %v11111_v47 = vsel %vm4251_vm0, %v10829_v38, %v6708_v45  ;;  %v11115_v27 = vsel %vm4251_vm0, %v10825_v21, %v6709_v29  ;;  %4694 = vmatpush.bf16.msra.mxu1 %v5545_v11  ;;  %5556 = vmatpush.bf16.msrb.mxu3 %v5545_v11 }
 0x47e   : > { %12537 = vst [vmem:[#allocation38_spill] sm:$0xff] %v11111_v47  ;;  %v4991_v20 = vrot.slane %v4989_v42, 2  ;;  %v3956_v2 = vrot.slane %v7160_v8, 6  ;;  %v12541_v38 = vrot.slane %v10945_v15, 5  ;;  %v12542_v21 = vrot.slane %v10945_v15, 4 }
 0x47f   : > { %12538 = vst [vmem:[#allocation54_spill] sm:$0xff] %v11115_v27  ;;  %v11120_v22 = vsel %vm4251_vm0, %v10613_v0, %v6703_v25  ;;  %v11124_v34 = vsel %vm4251_vm0, %v10617_v4, %v6704_v6  ;;  %v3772_v25 = vrot.slane %v7160_v8, 5  ;;  %v3475_v29 = vrot.slane %v7160_v8, 4  ;;  %v12543_v4 = vld [vmem:[#allocation64_spill] sm:$0xff]  ;;  %v12544_v6 = vld [vmem:[#allocation22_spill] sm:$0xff] }
 0x480   : > { %12539 = vst [vmem:[#allocation70_spill] sm:$0xff] %v11120_v22  ;;  %v11129_v45 = vsel %vm1458_vm4, %v12541_v38, %v3806_v63  ;;  %v11134_v42 = vsel %vm1162_vm3, %v12542_v21, %v3622_v62  ;;  %v11136_v0 = vor.u32 %v4991_v20, %v4988_v50  ;;  %v12545_v48 = vpack.i.bf16 %v12544_v6, %v12520_v13 }
 0x481   : > { %12540 = vst [vmem:[#allocation82_spill] sm:$0xff] %v11124_v34  ;;  %5557 = vmatpush.bf16.msra.mxu3 %v12543_v4  ;;  %6931 = vrot.lane.b32.xlu1 %v6930_v17, %s7198_s14  ;;  %v6945_v63 = vpack.i.bf16 %v11072_v31, %v11066_v30  ;;  %v6940_v15 = vpack.i.bf16 %v11080_v44, %v11077_v7  ;;  %v12546_v62 = vrot.slane %v11106_v26, 6  ;;  %v12164_v50 = vrot.slane %v11106_v26, 4  ;;  %v11160_v17 = vld [vmem:[#allocation2 + $0xd0] sm:$0xff]  ;;  %v11167_v44 = vpop.permute.xlu2 %6786 }
 0x482   : > { %6951 = vrot.lane.b32.xlu2 %v12545_v48, %s7196_s28  ;;  %6926 = vrot.lane.b32.xlu0 %v6925_v41, %s7197_s30  ;;  %v6965_v13 = vpack.i.bf16 %v11088_v61, %v11097_v10  ;;  %v4993_v48 = vsel %vm4886_vm15, %v10980_v9, %v11136_v0  ;;  %v11164_v31 = vsel %vm1458_vm4, %v3772_v25, %v3774_v40  ;;  %v6668_v7 = vunpack.i.l.bf16 %v10764_v24  ;;  %v6722_v20 = vpop.permute.xlu1 %6721  ;;  %v11192_v30 = vpop.f32.mrf.mxu2 }
 0x483   : > { %v11151_v11 = vsel %vm1640_vm5, %v3956_v2, %v12546_v62  ;;  %v12547_v41 = vrot.slane %v11049_v14, 6  ;;  %5533 = vmatmul.msk.bf16.gmra.mxu2 %vm1822_vm6, %v4993_v48  ;;  %v6669_v8 = vunpack.i.h.bf16 %v10764_v24  ;;  %v12548_v4 = vrot.slane %v11049_v14, 5  ;;  %12551 = vst [vmem:[#allocation88_spill] sm:$0xff] %v11192_v30 }
 0x484   : > { %v6717_v38 = vpop.permute.xlu0 %6716  ;;  %v11199_v48 = vsel %vm1162_vm3, %v3475_v29, %v12164_v50  ;;  %v4252_v24 = vsel %vm4251_vm0, %v10700_v37, %v6668_v7  ;;  %v6674_v21 = vunpack.i.h.bf16 %v10970_v32  ;;  %v6729_v30 = vunpack.i.h.bf16 %v10934_v54  ;;  %v7164_v7 = vld [vmem:[%s7274_s22 + $0xd8] sm:$0xff] }
 0x485   : > { %v11172_v10 = vsel %vm1640_vm5, %v12547_v41, %v3956_v2  ;;  %v11185_v62 = vsel %vm1458_vm4, %v12548_v4, %v3772_v25  ;;  %v12549_v2 = vld [vmem:[#allocation23_spill] sm:$0xff]  ;;  %v6718_v61 = vunpack.i.l.bf16 %v6717_v38  ;;  %v6673_v25 = vunpack.i.l.bf16 %v10970_v32 }
 0x486   : > { %v12550_v41 = vrot.slane %v12549_v2, 4  ;;  %v6719_v4 = vunpack.i.h.bf16 %v6717_v38  ;;  %v12552_v2 = vrot.slane %v11160_v17, 5  ;;  %v4253_v38 = vsel %vm4251_vm0, %v10704_v52, %v6669_v8  ;;  %v7163_v32 = vld [vmem:[%s7274_s22 + $0xd0] sm:$0xff] }
 0x487   : > { %v6744_v27 = vunpack.i.h.bf16 %v10966_v60  ;;  %v4290_v37 = vsel %vm4289_vm1, %v4252_v24, %v6718_v61  ;;  %v4878_v14 = vpack.c.bf16 %v7164_v7, %v7163_v32  ;;  %v6743_v50 = vunpack.i.l.bf16 %v10966_v60 }
 0x488   : > { %v11190_v9 = vsel %vm1162_vm3, %v12550_v41, %v3475_v29  ;;  %v11206_v41 = vsel %vm1458_vm4, %v3774_v40, %v12552_v2  ;;  %v11211_v29 = vld [vmem:[#allocation2 + $0xd8] sm:$0xff]  ;;  %v6728_v40 = vunpack.i.l.bf16 %v10934_v54  ;;  %v6723_v2 = vunpack.i.l.bf16 %v6722_v20 }
 0x489   : > { %6946 = vrot.lane.b32.xlu1 %v6945_v63, %s7198_s14  ;;  %v4254_v52 = vsel %vm4251_vm0, %v10523_v55, %v6673_v25  ;;  %v6724_v8 = vunpack.i.h.bf16 %v6722_v20  ;;  %v4291_v54 = vsel %vm4289_vm1, %v4253_v38, %v6719_v4  ;;  %v4255_v61 = vsel %vm4251_vm0, %v10527_v39, %v6674_v21 }
 0x48a   : > { %6966 = vrot.lane.b32.xlu2 %v6965_v13, %s7198_s14  ;;  %6941 = vrot.lane.b32.xlu0 %v6940_v15, %s7197_s30  ;;  %v11232_v13 = vpop.permute.xlu2 %6801  ;;  %v6737_v63 = vpop.permute.xlu1 %6736  ;;  %v4995_v24 = vshrl.u32 %v4878_v14, 16  ;;  %v4998_v47 = vshll.u32 %v4878_v14, 16  ;;  %v4292_v32 = vsel %vm4289_vm1, %v4254_v52, %v6723_v2  ;;  %v4328_v55 = vsel %vm4327_vm2, %v4290_v37, %v6728_v40 }
 0x48b   : > { %v6739_v60 = vunpack.i.h.bf16 %v6737_v63  ;;  %v6738_v7 = vunpack.i.l.bf16 %v6737_v63  ;;  %v11236_v25 = vpop.f32.mrf.mxu2  ;;  %v4329_v15 = vsel %vm4327_vm2, %v4291_v54, %v6729_v30  ;;  %v4293_v21 = vsel %vm4289_vm1, %v4255_v61, %v6724_v8 }
 0x48c   : > { %v6732_v20 = vpop.permute.xlu0 %6731  ;;  %v4997_v39 = vrot.slane %v4995_v24, 1  ;;  %v5000_v22 = vrot.slane %v4998_v47, 2  ;;  %v12553_v37 = vrot.slane %v11211_v29, 5  ;;  %v12554_v63 = vrot.slane %v11160_v17, 5 }
 0x48d   : > { %v6734_v4 = vunpack.i.h.bf16 %v6732_v20  ;;  %v6733_v38 = vunpack.i.l.bf16 %v6732_v20  ;;  %v4366_v34 = vsel %vm4365_vm8, %v4328_v55, %v6738_v7  ;;  %v4367_v14 = vsel %vm4365_vm8, %v4329_v15, %v6739_v60 }
 0x48e   : > { %v4403_v2 = vpack.c.bf16 %v4367_v14, %v4366_v34  ;;  %v3779_v30 = vsel %vm1458_vm4, %v12554_v63, %v12553_v37  ;;  %v6678_v54 = vunpack.i.l.bf16 %v10968_v18  ;;  %v11252_v24 = vor.u32 %v5000_v22, %v4997_v39 }
 0x48f   : > { %v4330_v52 = vsel %vm4327_vm2, %v4292_v32, %v6733_v38  ;;  %v4331_v40 = vsel %vm4327_vm2, %v4293_v21, %v6734_v4  ;;  %v6679_v47 = vunpack.i.h.bf16 %v10968_v18  ;;  %v12555_v32 = vpack.i.bf16 %v11151_v11, %v11172_v10 }
 0x490   : > { %v4368_v8 = vsel %vm4365_vm8, %v4330_v52, %v6743_v50  ;;  %v4369_v61 = vsel %vm4365_vm8, %v4331_v40, %v6744_v27  ;;  %v12556_v60 = vpack.i.bf16 %v11102_v16, %v11129_v45  ;;  %v4433_v7 = vshrl.u32 %v4403_v2, 16 }
 0x491   : > { %v4404_v34 = vpack.c.bf16 %v4369_v61, %v4368_v8  ;;  %v4436_v55 = vshll.u32 %v4403_v2, 16  ;;  %v12557_v27 = vpack.i.bf16 %v12544_v6, %v11134_v42  ;;  %v6995_v18 = vpack.i.bf16 %v3779_v30, %v11206_v41  ;;  %v7165_v8 = vld [vmem:[%s7274_s22 + $0xe0] sm:$0xff]  ;;  %v7166_v61 = vld [vmem:[%s7274_s22 + $0xe8] sm:$0xff] }
 0x492   : > { %6981 = vrot.lane.b32.xlu2 %v12555_v32, %s7198_s14  ;;  %6961 = vrot.lane.b32.xlu1 %v12556_v60, %s7197_s30  ;;  %v11270_v22 = vpack.i.bf16 %v11199_v48, %v11190_v9  ;;  %v12558_v11 = vrot.slane %v11211_v29, 4  ;;  %v12559_v50 = vrot.slane %v11160_v17, 4  ;;  %v5002_v45 = vsel %vm4886_vm15, %v11136_v0, %v11252_v24  ;;  %v6752_v10 = vpop.permute.xlu1 %6751  ;;  %v11288_v21 = vpop.permute.xlu2 %6816 }
 0x493   : > { %6956 = vrot.lane.b32.xlu0 %v12557_v27, %s7199_s15  ;;  %v4435_v20 = vrot.slane %v4433_v7, 2  ;;  %v4438_v42 = vrot.slane %v4436_v55, 3  ;;  %v4441_v6 = vshrl.u32 %v4404_v34, 16  ;;  %v4444_v15 = vshll.u32 %v4404_v34, 16  ;;  %5534 = vmatmul.msk.bf16.gmra.mxu2 %vm1822_vm6, %v5002_v45  ;;  %v11284_v39 = vpop.f32.mrf.mxu2 }
 0x494   : > { %v3482_v16 = vsel %vm1162_vm3, %v12559_v50, %v12558_v11  ;;  %v6683_v9 = vunpack.i.l.bf16 %v10801_v35  ;;  %v4256_v48 = vsel %vm4251_vm0, %v10749_v28, %v6678_v54  ;;  %v6754_v41 = vunpack.i.h.bf16 %v6752_v10  ;;  %v6747_v38 = vpop.permute.xlu0 %6746 }
 0x495   : > { %v6753_v4 = vunpack.i.l.bf16 %v6752_v10  ;;  %v4257_v0 = vsel %vm4251_vm0, %v10745_v59, %v6679_v47  ;;  %v6749_v14 = vunpack.i.h.bf16 %v6747_v38  ;;  %v6748_v2 = vunpack.i.l.bf16 %v6747_v38 }
 0x496   : > { %v4443_v52 = vrot.slane %v4441_v6, 2  ;;  %v6759_v40 = vunpack.i.h.bf16 %v11000_v36  ;;  %v6758_v37 = vunpack.i.l.bf16 %v11000_v36  ;;  %v4439_v28 = vor.u32 %v4438_v42, %v4435_v20 }
 0x497   : > { %v4446_v63 = vrot.slane %v4444_v15, 3  ;;  %v4294_v30 = vsel %vm4289_vm1, %v4256_v48, %v6748_v2  ;;  %v4295_v54 = vsel %vm4289_vm1, %v4257_v0, %v6749_v14  ;;  %v4879_v34 = vpack.c.bf16 %v7166_v61, %v7165_v8  ;;  %v12563_v61 = vld [vmem:[#allocation53_spill] sm:$0xff] }
 0x498   : > { %v4332_v59 = vsel %vm4327_vm2, %v4294_v30, %v6753_v4  ;;  %v4333_v47 = vsel %vm4327_vm2, %v4295_v54, %v6754_v41  ;;  %v12560_v7 = vpack.i.bf16 %v11164_v31, %v11185_v62  ;;  %v6684_v11 = vunpack.i.h.bf16 %v10801_v35 }
 0x499   : > { %v4447_v32 = vor.u32 %v4446_v63, %v4443_v52  ;;  %v4370_v60 = vsel %vm4365_vm8, %v4332_v59, %v6758_v37  ;;  %v4371_v36 = vsel %vm4365_vm8, %v4333_v47, %v6759_v40  ;;  %v5004_v55 = vshrl.u32 %v4879_v34, 16 }
 0x49a   : > { %6996 = vrot.lane.b32.xlu2 %v6995_v18, %s7197_s30  ;;  %6976 = vrot.lane.b32.xlu1 %v12560_v7, %s7197_s30  ;;  %v5007_v27 = vshll.u32 %v4879_v34, 16  ;;  %v4405_v45 = vpack.c.bf16 %v4371_v36, %v4370_v60  ;;  %v6767_v10 = vpop.permute.xlu1 %6766  ;;  %v12561_v18 = vrot.slane %v11160_v17, 4  ;;  %v12562_v20 = vrot.slane %v11106_v26, 4 }
 0x49b   : > { %6971 = vrot.lane.b32.xlu0 %v11270_v22, %s7199_s15  ;;  %v4448_v50 = vsel %vm4431_vm9, %v4439_v28, %v4447_v32  ;;  %v5006_v62 = vrot.slane %v5004_v55, 1  ;;  %v4258_v35 = vsel %vm4251_vm0, %v10737_v5, %v6683_v9  ;;  %v6769_v6 = vunpack.i.h.bf16 %v6767_v10  ;;  %v11317_v4 = vpop.f32.mrf.mxu2  ;;  %v11325_v5 = vpop.permute.xlu2 %6831 }
 0x49c   : > { %5505 = vmatmul.msk.bf16.vlgmr.msra.gmra.mxu1 %vm4629_vm10, %v4448_v50  ;;  %v3480_v31 = vsel %vm1162_vm3, %v12562_v20, %v12561_v18  ;;  %v5009_v42 = vrot.slane %v5007_v27, 2  ;;  %v6768_v15 = vunpack.i.l.bf16 %v6767_v10  ;;  %v6762_v48 = vpop.permute.xlu0 %6761  ;;  %v4450_v14 = vshrl.u32 %v4405_v45, 16 }
 0x49d   : > { %v6990_v41 = vpack.i.bf16 %v3482_v16, %v3480_v31  ;;  %v6764_v38 = vunpack.i.h.bf16 %v6762_v48  ;;  %v6763_v0 = vunpack.i.l.bf16 %v6762_v48  ;;  %v4453_v2 = vshll.u32 %v4405_v45, 16 }
 0x49e   : > { %v4259_v52 = vsel %vm4251_vm0, %v10741_v1, %v6684_v11  ;;  %v6774_v40 = vunpack.i.h.bf16 %v11083_v51  ;;  %v6773_v37 = vunpack.i.l.bf16 %v11083_v51  ;;  %v11323_v28 = vor.u32 %v5009_v42, %v5006_v62 }
 0x49f   : > { %v4296_v9 = vsel %vm4289_vm1, %v4258_v35, %v6763_v0  ;;  %v4297_v16 = vsel %vm4289_vm1, %v4259_v52, %v6764_v38  ;;  %v4452_v63 = vrot.slane %v4450_v14, 2  ;;  %v4455_v30 = vrot.slane %v4453_v2, 3  ;;  %v7167_v14 = vld [vmem:[#allocation2 + $0xe0] sm:$0xff] }
 0x4a0   : > { %v4334_v54 = vsel %vm4327_vm2, %v4296_v9, %v6768_v15  ;;  %v4335_v8 = vsel %vm4327_vm2, %v4297_v16, %v6769_v6  ;;  %v12564_v1 = vrot.slane %v12563_v61, 4  ;;  %v12565_v34 = vrot.slane %v11211_v29, 4  ;;  %v7169_v9 = vld [vmem:[%s7274_s22 + $0xf0] sm:$0xff]  ;;  %v7170_v16 = vld [vmem:[%s7274_s22 + $0xf8] sm:$0xff] }
 0x4a1   : > { %v5011_v59 = vsel %vm4886_vm15, %v11252_v24, %v11323_v28  ;;  %v4372_v47 = vsel %vm4365_vm8, %v4334_v54, %v6773_v37  ;;  %v4373_v60 = vsel %vm4365_vm8, %v4335_v8, %v6774_v40  ;;  %v4456_v36 = vor.u32 %v4455_v30, %v4452_v63  ;;  %v7168_v40 = vld [vmem:[#allocation2 + $0xe8] sm:$0xff] }
 0x4a2   : > { %v3484_v51 = vsel %vm1162_vm3, %v12565_v34, %v12564_v1  ;;  %6991 = vrot.lane.b32.xlu1 %v6990_v41, %s7199_s15  ;;  %v4406_v7 = vpack.c.bf16 %v4373_v60, %v4372_v47  ;;  %v6782_v55 = vpop.permute.xlu1 %6781  ;;  %v3960_v45 = vrot.slane %v11160_v17, 6  ;;  %v6789_v42 = vunpack.i.h.bf16 %v11167_v44 }
 0x4a3   : > { %3670 = vrot.lane.b32.xlu2 %v3484_v51, %s7199_s15  ;;  %6986 = vrot.lane.b32.xlu0 %v11270_v22, %s7196_s28  ;;  %v4457_v27 = vsel %vm4431_vm9, %v4447_v32, %v4456_v36  ;;  %v6784_v11 = vunpack.i.h.bf16 %v6782_v55  ;;  %v6783_v24 = vunpack.i.l.bf16 %v6782_v55  ;;  %v11348_v10 = vpop.f32.mrf.mxu2  ;;  %v6788_v22 = vunpack.i.l.bf16 %v11167_v44  ;;  %v11361_v2 = vpop.permute.xlu2 %6846 }
 0x4a4   : > { %5535 = vmatmul.msk.bf16.gmra.mxu2 %vm1822_vm6, %v5011_v59  ;;  %v6777_v50 = vpop.permute.xlu0 %6776  ;;  %v4459_v31 = vshrl.u32 %v4406_v7, 16  ;;  %v4462_v62 = vshll.u32 %v4406_v7, 16  ;;  %v12566_v38 = vrot.slane %v11106_v26, 6  ;;  %v3964_v44 = vrot.slane %v7167_v14, 6 }
 0x4a5   : > { %v6779_v18 = vunpack.i.h.bf16 %v6777_v50  ;;  %v6778_v20 = vunpack.i.l.bf16 %v6777_v50  ;;  %v3966_v37 = vrot.slane %v7168_v40, 6  ;;  %v3962_v26 = vrot.slane %v11211_v29, 6 }
 0x4a6   : > { %v4461_v6 = vrot.slane %v4459_v31, 2  ;;  %v4464_v15 = vrot.slane %v4462_v62, 3  ;;  %v3961_v0 = vsel %vm1640_vm5, %v12566_v38, %v3960_v45  ;;  %v4880_v63 = vpack.c.bf16 %v7170_v16, %v7169_v9 }
 0x4a7   : > { %v4298_v32 = vsel %vm4289_vm1, %v11040_v49, %v6778_v20  ;;  %v4299_v35 = vsel %vm4289_vm1, %v11044_v53, %v6779_v18  ;;  %v12567_v1 = vrot.slane %v10706_v23, 6  ;;  %v3965_v34 = vsel %vm1640_vm5, %v3962_v26, %v3964_v44 }
 0x4a8   : > { %v4336_v17 = vsel %vm4327_vm2, %v4298_v32, %v6783_v24  ;;  %v4337_v48 = vsel %vm4327_vm2, %v4299_v35, %v6784_v11  ;;  %v4465_v52 = vor.u32 %v4464_v15, %v4461_v6  ;;  %v3780_v59 = vrot.slane %v7167_v14, 5 }
 0x4a9   : > { %v4374_v49 = vsel %vm4365_vm8, %v4336_v17, %v6788_v22  ;;  %v4375_v53 = vsel %vm4365_vm8, %v4337_v48, %v6789_v42  ;;  %v5013_v47 = vshrl.u32 %v4880_v63, 16  ;;  %v3967_v60 = vsel %vm1640_vm5, %v3964_v44, %v3966_v37 }
 0x4aa   : > { %7001 = vrot.lane.b32.xlu1 %v6990_v41, %s7196_s28  ;;  %v4407_v30 = vpack.c.bf16 %v4375_v53, %v4374_v49  ;;  %v6797_v54 = vpop.permute.xlu1 %6796  ;;  %v4466_v8 = vsel %vm4431_vm9, %v4456_v36, %v4465_v52  ;;  %v3969_v41 = vsel %vm1640_vm5, %v3966_v37, %v12567_v1  ;;  %v3963_v7 = vsel %vm1640_vm5, %v3960_v45, %v3962_v26 }
 0x4ab   : > { %3557 = vrot.lane.b32.xlu2 %v3484_v51, %s7196_s28  ;;  %4034 = vrot.lane.b32.xlu0 %v3961_v0, %s7198_s14  ;;  %v11377_v51 = vpop.f32.mrf.mxu2  ;;  %v5016_v55 = vshll.u32 %v4880_v63, 16  ;;  %v7020_v11 = vpack.i.bf16 %v3969_v41, %v3967_v60  ;;  %v7005_v24 = vpack.i.bf16 %v3965_v34, %v3963_v7  ;;  %v5015_v36 = vrot.slane %v5013_v47, 1  ;;  %v11389_v22 = vpop.permute.xlu2 %6861 }
 0x4ac   : > { %5506 = vmatmul.msk.bf16.gmra.mxu1 %vm4629_vm10, %v4457_v27  ;;  %v6792_v61 = vpop.permute.xlu0 %6791  ;;  %v4468_v27 = vshrl.u32 %v4407_v30, 16  ;;  %v12568_v18 = vrot.slane %v11211_v29, 5  ;;  %v4471_v62 = vshll.u32 %v4407_v30, 16  ;;  %v3782_v42 = vrot.slane %v7168_v40, 5 }
 0x4ad   : > { %v5018_v50 = vrot.slane %v5016_v55, 2  ;;  %v6799_v6 = vunpack.i.h.bf16 %v6797_v54  ;;  %v6798_v15 = vunpack.i.l.bf16 %v6797_v54  ;;  %v12569_v48 = vrot.slane %v10706_v23, 5 }
 0x4ae   : > { %v3781_v20 = vsel %vm1458_vm4, %v12568_v18, %v3780_v59  ;;  %v4470_v31 = vrot.slane %v4468_v27, 2  ;;  %v4473_v35 = vrot.slane %v4471_v62, 3  ;;  %v6794_v0 = vunpack.i.h.bf16 %v6792_v61 }
 0x4af   : > { %v11387_v45 = vor.u32 %v5018_v50, %v5015_v36  ;;  %v3785_v29 = vsel %vm1458_vm4, %v3782_v42, %v12569_v48  ;;  %v6793_v14 = vunpack.i.l.bf16 %v6792_v61  ;;  %v3783_v37 = vsel %vm1458_vm4, %v3780_v59, %v3782_v42 }
 0x4b0   : > { %v11399_v49 = vor.u32 %v4473_v35, %v4470_v31  ;;  %v7015_v26 = vpack.i.bf16 %v3785_v29, %v3783_v37  ;;  %v6804_v9 = vunpack.i.h.bf16 %v11232_v13  ;;  %v6803_v16 = vunpack.i.l.bf16 %v11232_v13 }
 0x4b1   : > { %v5020_v44 = vsel %vm4886_vm15, %v11323_v28, %v11387_v45  ;;  %v4280_v28 = vsel %vm4251_vm0, %v10909_v12, %v6798_v15  ;;  %v4281_v63 = vsel %vm4251_vm0, %v10913_v58, %v6799_v6  ;;  %v4278_v30 = vsel %vm4251_vm0, %v10693_v56, %v6793_v14 }
 0x4b2   : > { %7006 = vrot.lane.b32.xlu1 %v7005_v24, %s7198_s14  ;;  %v6812_v32 = vpop.permute.xlu1 %6811  ;;  %v11405_v23 = vsel %vm4431_vm9, %v4465_v52, %v11399_v49  ;;  %v4279_v54 = vsel %vm4251_vm0, %v10696_v57, %v6794_v0  ;;  %v6819_v12 = vunpack.i.h.bf16 %v11288_v21  ;;  %v6818_v58 = vunpack.i.l.bf16 %v11288_v21 }
 0x4b3   : > { %7021 = vrot.lane.b32.xlu2 %v7020_v11, %s7198_s14  ;;  %3854 = vrot.lane.b32.xlu0 %v3781_v20, %s7197_s30  ;;  %v11394_v38 = vpop.f32.mrf.mxu2  ;;  %v6814_v52 = vunpack.i.h.bf16 %v6812_v32  ;;  %v6813_v61 = vunpack.i.l.bf16 %v6812_v32  ;;  %v4316_v57 = vsel %vm4289_vm1, %v4278_v30, %v6803_v16  ;;  %v4317_v41 = vsel %vm4289_vm1, %v4279_v54, %v6804_v9  ;;  %v11429_v7 = vpop.permute.xlu2 %6876 }
 0x4b4   : > { %v6807_v17 = vpop.permute.xlu0 %6806  ;;  %5536 = vmatmul.msk.bf16.gmra.mxu2 %vm1822_vm6, %v5020_v44  ;;  %v6834_v32 = vunpack.i.h.bf16 %v11325_v5  ;;  %v6833_v35 = vunpack.i.l.bf16 %v11325_v5 }
 0x4b5   : > { %v6809_v53 = vunpack.i.h.bf16 %v6807_v17  ;;  %v6808_v40 = vunpack.i.l.bf16 %v6807_v17  ;;  %v4355_v11 = vsel %vm4327_vm2, %v4317_v41, %v6814_v52 }
 0x4b6   : > { %v4300_v16 = vsel %vm4289_vm1, %v11032_v33, %v6833_v35  ;;  %v4301_v5 = vsel %vm4289_vm1, %v11036_v43, %v6834_v32  ;;  %v6849_v43 = vunpack.i.h.bf16 %v11361_v2 }
 0x4b7   : > { %v4318_v1 = vsel %vm4289_vm1, %v4280_v28, %v6808_v40  ;;  %v4319_v13 = vsel %vm4289_vm1, %v4281_v63, %v6809_v53 }
 0x4b8   : > { %v4357_v55 = vsel %vm4327_vm2, %v4319_v13, %v6819_v12  ;;  %v6848_v12 = vunpack.i.l.bf16 %v11361_v2  ;;  %v4283_v2 = vsel %vm4251_vm0, %v10905_v3, %v6849_v43 }
 0x4ba   : > { %7016 = vrot.lane.b32.xlu1 %v7015_v26, %s7197_s30  ;;  %v6827_v56 = vpop.permute.xlu1 %6826 }
 0x4bb   : > { %7011 = vrot.lane.b32.xlu0 %v12474_v46, %s7199_s15  ;;  %v6829_v34 = vunpack.i.h.bf16 %v6827_v56  ;;  %v6828_v59 = vunpack.i.l.bf16 %v6827_v56  ;;  %v11427_v60 = vpop.f32.mrf.mxu2  ;;  %v4356_v46 = vsel %vm4327_vm2, %v4318_v1, %v6818_v58  ;;  %v11449_v30 = vpop.permute.xlu2 %6891 }
 0x4bc   : > { %5507 = vmatmul.msk.bf16.gmra.mxu1 %vm4629_vm10, %v4466_v8  ;;  %v6822_v47 = vpop.permute.xlu0 %6821  ;;  %v4354_v8 = vsel %vm4327_vm2, %v4316_v57, %v6813_v61 }
 0x4bd   : > { %v6824_v27 = vunpack.i.h.bf16 %v6822_v47  ;;  %v6823_v21 = vunpack.i.l.bf16 %v6822_v47  ;;  %v4394_v24 = vsel %vm4365_vm8, %v4356_v46, %v6828_v59  ;;  %v4395_v36 = vsel %vm4365_vm8, %v4357_v55, %v6829_v34 }
 0x4be   : > { %v4417_v50 = vpack.c.bf16 %v4395_v36, %v4394_v24 }
 0x4bf   : > { %v4392_v18 = vsel %vm4365_vm8, %v4354_v8, %v6823_v21  ;;  %v4393_v20 = vsel %vm4365_vm8, %v4355_v11, %v6824_v27  ;;  %v4282_v8 = vsel %vm4251_vm0, %v10901_v19, %v6848_v12  ;;  %v6863_v11 = vunpack.i.l.bf16 %v11389_v22 }
 0x4c0   : > { %v4416_v31 = vpack.c.bf16 %v4393_v20, %v4392_v18  ;;  %v4558_v62 = vshrl.u32 %v4417_v50, 16  ;;  %v4561_v42 = vshll.u32 %v4417_v50, 16 }
 0x4c2   : > { %v4549_v6 = vshrl.u32 %v4416_v31, 16  ;;  %v4552_v15 = vshll.u32 %v4416_v31, 16  ;;  %v4560_v17 = vrot.slane %v4558_v62, 2  ;;  %v4563_v48 = vrot.slane %v4561_v42, 3  ;;  %v6842_v29 = vpop.permute.xlu1 %6841 }
 0x4c3   : > { %v11441_v53 = vpop.f32.mrf.mxu2  ;;  %v6844_v40 = vunpack.i.h.bf16 %v6842_v29  ;;  %v6843_v37 = vunpack.i.l.bf16 %v6842_v29  ;;  %v11474_v31 = vpop.permute.xlu2 %6906 }
 0x4c4   : > { %v4551_v0 = vrot.slane %v4549_v6, 2  ;;  %v4554_v14 = vrot.slane %v4552_v15, 3  ;;  %v6837_v44 = vpop.permute.xlu0 %6836  ;;  %v4564_v63 = vor.u32 %v4563_v48, %v4560_v17 }
 0x4c5   : > { %v6839_v26 = vunpack.i.h.bf16 %v6837_v44  ;;  %v6838_v9 = vunpack.i.l.bf16 %v6837_v44  ;;  %v6878_v44 = vunpack.i.l.bf16 %v11429_v7 }
 0x4c6   : > { %v11447_v28 = vor.u32 %v4554_v14, %v4551_v0  ;;  %v6879_v14 = vunpack.i.h.bf16 %v11429_v7 }
 0x4c7   : > { %v4338_v54 = vsel %vm4327_vm2, %v4300_v16, %v6838_v9  ;;  %v4339_v52 = vsel %vm4327_vm2, %v4301_v5, %v6839_v26  ;;  %v12571_v26 = vld [vmem:[#allocation47_spill] sm:$0xff] }
 0x4c8   : > { %v4376_v61 = vsel %vm4365_vm8, %v4338_v54, %v6843_v37  ;;  %v4377_v1 = vsel %vm4365_vm8, %v4339_v52, %v6844_v40  ;;  %v4565_v13 = vsel %vm4431_vm9, %v11447_v28, %v4564_v63  ;;  %v12570_v40 = vld [vmem:[#allocation31_spill] sm:$0xff] }
 0x4c9   : > { %v4408_v33 = vpack.c.bf16 %v4377_v1, %v4376_v61  ;;  %5518 = vmatmul.msk.bf16.vlgmr.msrb.gmra.mxu3 %vm4629_vm10, %v4565_v13 }
 0x4ca   : > { %v6857_v58 = vpop.permute.xlu1 %6856 }
 0x4cb   : > { %v4477_v56 = vshrl.u32 %v4408_v33, 16  ;;  %v4480_v57 = vshll.u32 %v4408_v33, 16  ;;  %v6859_v41 = vunpack.i.h.bf16 %v6857_v58  ;;  %v6858_v34 = vunpack.i.l.bf16 %v6857_v58  ;;  %v11462_v47 = vpop.f32.mrf.mxu2  ;;  %v11492_v33 = vpop.permute.xlu2 %6921 }
 0x4cc   : > { %5508 = vmatmul.msk.bf16.gmra.mxu1 %vm4629_vm10, %v11405_v23  ;;  %v6852_v59 = vpop.permute.xlu0 %6851  ;;  %v6864_v23 = vunpack.i.h.bf16 %v11389_v22 }
 0x4cd   : > { %v6854_v46 = vunpack.i.h.bf16 %v6852_v59  ;;  %v6853_v55 = vunpack.i.l.bf16 %v6852_v59  ;;  %v4479_v27 = vrot.slane %v4477_v56, 2  ;;  %v4482_v21 = vrot.slane %v4480_v57, 3 }
 0x4cf   : > { %v4320_v24 = vsel %vm4289_vm1, %v4282_v8, %v6853_v55  ;;  %v4321_v36 = vsel %vm4289_vm1, %v4283_v2, %v6854_v46  ;;  %v4483_v50 = vor.u32 %v4482_v21, %v4479_v27  ;;  %v12572_v21 = vld [vmem:[#allocation93_spill] sm:$0xff] }
 0x4d0   : > { %v4358_v18 = vsel %vm4327_vm2, %v4320_v24, %v6858_v34  ;;  %v4359_v20 = vsel %vm4327_vm2, %v4321_v36, %v6859_v41  ;;  %v12573_v2 = vld [vmem:[#allocation17_spill] sm:$0xff] }
 0x4d1   : > { %v4396_v19 = vsel %vm4365_vm8, %v4358_v18, %v6863_v11  ;;  %v4397_v62 = vsel %vm4365_vm8, %v4359_v20, %v6864_v23  ;;  %v4484_v3 = vsel %vm4431_vm9, %v11399_v49, %v4483_v50  ;;  %v6894_v20 = vunpack.i.h.bf16 %v11449_v30 }
 0x4d2   : > { %v4418_v42 = vpack.c.bf16 %v4397_v62, %v4396_v19  ;;  %v6872_v22 = vpop.permute.xlu1 %6871  ;;  %v6893_v19 = vunpack.i.l.bf16 %v11449_v30 }
 0x4d3   : > { %v6874_v32 = vunpack.i.h.bf16 %v6872_v22  ;;  %v6873_v35 = vunpack.i.l.bf16 %v6872_v22  ;;  %v11480_v15 = vpop.f32.mrf.mxu2 }
 0x4d4   : > { %v6867_v6 = vpop.permute.xlu0 %6866  ;;  %v4567_v29 = vshrl.u32 %v4418_v42, 16  ;;  %v4570_v0 = vshll.u32 %v4418_v42, 16  ;;  %v11513_v42 = vpop.permute.xlu2 %6936 }
 0x4d5   : > { %v6869_v17 = vunpack.i.h.bf16 %v6867_v6  ;;  %v6868_v48 = vunpack.i.l.bf16 %v6867_v6 }
 0x4d6   : > { %v4569_v9 = vrot.slane %v4567_v29, 2  ;;  %v4572_v16 = vrot.slane %v4570_v0, 3 }
 0x4d7   : > { %v4302_v37 = vsel %vm4289_vm1, %v12570_v40, %v6868_v48  ;;  %v4303_v49 = vsel %vm4289_vm1, %v12571_v26, %v6869_v17 }
 0x4d8   : > { %v4340_v5 = vsel %vm4327_vm2, %v4302_v37, %v6873_v35  ;;  %v4341_v54 = vsel %vm4327_vm2, %v4303_v49, %v6874_v32  ;;  %v4573_v1 = vor.u32 %v4572_v16, %v4569_v9  ;;  %v12575_v37 = vld [vmem:[#allocation82_spill] sm:$0xff]  ;;  %v6909_v9 = vunpack.i.h.bf16 %v11474_v31 }
 0x4d9   : > { %v4378_v52 = vsel %vm4365_vm8, %v4340_v5, %v6878_v44  ;;  %v4379_v61 = vsel %vm4365_vm8, %v4341_v54, %v6879_v14  ;;  %v12574_v44 = vld [vmem:[#allocation70_spill] sm:$0xff]  ;;  %v6908_v16 = vunpack.i.l.bf16 %v11474_v31 }
 0x4da   : > { %v4409_v13 = vpack.c.bf16 %v4379_v61, %v4378_v52  ;;  %v4574_v7 = vsel %vm4431_vm9, %v4564_v63, %v4573_v1  ;;  %v6887_v43 = vpop.permute.xlu1 %6886 }
 0x4db   : > { %5519 = vmatmul.msk.bf16.gmra.mxu3 %vm4629_vm10, %v4574_v7  ;;  %v11497_v58 = vpop.f32.mrf.mxu2  ;;  %v6889_v59 = vunpack.i.h.bf16 %v6887_v43  ;;  %v6888_v46 = vunpack.i.l.bf16 %v6887_v43 }
 0x4dc   : > { %5509 = vmatmul.msk.bf16.gmra.mxu1 %vm4629_vm10, %v4484_v3  ;;  %v6882_v12 = vpop.permute.xlu0 %6881  ;;  %v4486_v41 = vshrl.u32 %v4409_v13, 16  ;;  %v4489_v34 = vshll.u32 %v4409_v13, 16 }
 0x4dd   : > { %v6884_v56 = vunpack.i.h.bf16 %v6882_v12  ;;  %v6883_v57 = vunpack.i.l.bf16 %v6882_v12 }
 0x4de   : > { %v4488_v55 = vrot.slane %v4486_v41, 2  ;;  %v4491_v27 = vrot.slane %v4489_v34, 3 }
 0x4df   : > { %v4284_v8 = vsel %vm4251_vm0, %v12572_v21, %v6883_v57  ;;  %v4285_v63 = vsel %vm4251_vm0, %v12573_v2, %v6884_v56  ;;  %v11530_v57 = vpop.permute.xlu2 %6951 }
 0x4e0   : > { %v11503_v23 = vor.u32 %v4491_v27, %v4488_v55  ;;  %v4322_v11 = vsel %vm4289_vm1, %v4284_v8, %v6888_v46  ;;  %v4323_v24 = vsel %vm4289_vm1, %v4285_v63, %v6889_v59  ;;  %v12576_v8 = vld [vmem:[#allocation77_spill] sm:$0xff]  ;;  %v12577_v63 = vld [vmem:[#allocation83_spill] sm:$0xff] }
 0x4e1   : > { %v4360_v35 = vsel %vm4327_vm2, %v4322_v11, %v6893_v19  ;;  %v4361_v6 = vsel %vm4327_vm2, %v4323_v24, %v6894_v20 }
 0x4e2   : > { %v6902_v36 = vpop.permute.xlu1 %6901  ;;  %v4493_v18 = vsel %vm4431_vm9, %v4483_v50, %v11503_v23 }
 0x4e3   : > { %v11511_v3 = vpop.f32.mrf.mxu2  ;;  %v6904_v17 = vunpack.i.h.bf16 %v6902_v36  ;;  %v6903_v48 = vunpack.i.l.bf16 %v6902_v36  ;;  %v6924_v36 = vunpack.i.h.bf16 %v11492_v33 }
 0x4e4   : > { %v6897_v62 = vpop.permute.xlu0 %6896 }
 0x4e5   : > { %v6899_v22 = vunpack.i.h.bf16 %v6897_v62  ;;  %v6898_v32 = vunpack.i.l.bf16 %v6897_v62  ;;  %v4304_v40 = vsel %vm4289_vm1, %v12574_v44, %v6903_v48  ;;  %v4305_v26 = vsel %vm4289_vm1, %v12575_v37, %v6904_v17 }
 0x4e6   : > { %v4342_v12 = vsel %vm4327_vm2, %v4304_v40, %v6908_v16  ;;  %v4343_v56 = vsel %vm4327_vm2, %v4305_v26, %v6909_v9  ;;  %v6939_v37 = vunpack.i.h.bf16 %v11513_v42  ;;  %v6938_v26 = vunpack.i.l.bf16 %v11513_v42 }
 0x4e7   : > { %v4398_v29 = vsel %vm4365_vm8, %v4360_v35, %v6898_v32  ;;  %v4399_v50 = vsel %vm4365_vm8, %v4361_v6, %v6899_v22 }
 0x4e8   : > { %v4419_v0 = vpack.c.bf16 %v4399_v50, %v4398_v29 }
 0x4ea   : > { %v4576_v14 = vshrl.u32 %v4419_v0, 16  ;;  %v4579_v30 = vshll.u32 %v4419_v0, 16  ;;  %v6917_v49 = vpop.permute.xlu1 %6916 }
 0x4eb   : > { %v11526_v54 = vpop.f32.mrf.mxu2  ;;  %v6919_v43 = vunpack.i.h.bf16 %v6917_v49  ;;  %v6918_v41 = vunpack.i.l.bf16 %v6917_v49 }
 0x4ec   : > { %5510 = vmatmul.msk.bf16.gmra.mxu1 %vm4629_vm10, %v4493_v18  ;;  %v6912_v5 = vpop.permute.xlu0 %6911  ;;  %v4578_v13 = vrot.slane %v4576_v14, 2  ;;  %v4581_v7 = vrot.slane %v4579_v30, 3  ;;  %v6923_v18 = vunpack.i.l.bf16 %v11492_v33  ;;  %v11550_v30 = vpop.permute.xlu2 %6966 }
 0x4ed   : > { %v6914_v52 = vunpack.i.h.bf16 %v6912_v5  ;;  %v6913_v61 = vunpack.i.l.bf16 %v6912_v5  ;;  %v4286_v2 = vsel %vm4251_vm0, %v12576_v8, %v6918_v41  ;;  %v4287_v11 = vsel %vm4251_vm0, %v12577_v63, %v6919_v43 }
 0x4ee   : > { %v4582_v31 = vor.u32 %v4581_v7, %v4578_v13  ;;  %v4324_v17 = vsel %vm4289_vm1, %v4286_v2, %v6923_v18  ;;  %v4325_v48 = vsel %vm4289_vm1, %v4287_v11, %v6924_v36  ;;  %v6953_v63 = vunpack.i.l.bf16 %v11530_v57 }
 0x4ef   : > { %v4380_v34 = vsel %vm4365_vm8, %v4342_v12, %v6913_v61  ;;  %v4381_v59 = vsel %vm4365_vm8, %v4343_v56, %v6914_v52  ;;  %v12578_v56 = vld [vmem:[#allocation38_spill] sm:$0xff] }
 0x4f0   : > { %v4410_v46 = vpack.c.bf16 %v4381_v59, %v4380_v34  ;;  %v4583_v55 = vsel %vm4431_vm9, %v4573_v1, %v4582_v31  ;;  %v4306_v41 = vsel %vm4289_vm1, %v12578_v56, %v6938_v26  ;;  %v12581_v26 = vld [vmem:[#allocation90_spill] sm:$0xff] }
 0x4f1   : > { %5520 = vmatmul.msk.bf16.gmra.mxu3 %vm4629_vm10, %v4583_v55 }
 0x4f2   : > { %v4495_v27 = vshrl.u32 %v4410_v46, 16  ;;  %v4498_v21 = vshll.u32 %v4410_v46, 16 }
 0x4f3   : > { %v6932_v24 = vpop.permute.xlu1 %6931  ;;  %v11542_v6 = vpop.f32.mrf.mxu2 }
 0x4f4   : > { %v6934_v20 = vunpack.i.h.bf16 %v6932_v24  ;;  %v6933_v19 = vunpack.i.l.bf16 %v6932_v24  ;;  %v6927_v62 = vpop.permute.xlu0 %6926  ;;  %v4497_v32 = vrot.slane %v4495_v27, 2  ;;  %v4500_v35 = vrot.slane %v4498_v21, 3  ;;  %v11570_v11 = vpop.permute.xlu2 %6981 }
 0x4f5   : > { %v6929_v22 = vunpack.i.h.bf16 %v6927_v62  ;;  %v6928_v1 = vunpack.i.l.bf16 %v6927_v62  ;;  %v6983_v56 = vunpack.i.l.bf16 %v11570_v11 }
 0x4f6   : > { %v4501_v0 = vor.u32 %v4500_v35, %v4497_v32  ;;  %v12580_v32 = vld [vmem:[#allocation46_spill] sm:$0xff] }
 0x4f7   : > { %v4362_v29 = vsel %vm4327_vm2, %v4324_v17, %v6928_v1  ;;  %v4363_v50 = vsel %vm4327_vm2, %v4325_v48, %v6929_v22  ;;  %v4288_v35 = vsel %vm4251_vm0, %v12580_v32, %v6953_v63  ;;  %v6968_v17 = vunpack.i.l.bf16 %v11550_v30 }
 0x4f8   : > { %v4400_v33 = vsel %vm4365_vm8, %v4362_v29, %v6933_v19  ;;  %v4401_v14 = vsel %vm4365_vm8, %v4363_v50, %v6934_v20  ;;  %v4502_v40 = vsel %vm4431_vm9, %v11503_v23, %v4501_v0  ;;  %v12579_v23 = vld [vmem:[#allocation54_spill] sm:$0xff] }
 0x4f9   : > { %v4420_v44 = vpack.c.bf16 %v4401_v14, %v4400_v33  ;;  %v4307_v34 = vsel %vm4289_vm1, %v12579_v23, %v6939_v37 }
 0x4fb   : > { %v6947_v49 = vpop.permute.xlu1 %6946  ;;  %v4585_v9 = vshrl.u32 %v4420_v44, 16  ;;  %v4588_v16 = vshll.u32 %v4420_v44, 16  ;;  %v11561_v59 = vpop.f32.mrf.mxu2 }
 0x4fc   : > { %5511 = vmatmul.msk.bf16.gmra.mxu1 %vm4629_vm10, %v4502_v40  ;;  %v6949_v5 = vunpack.i.h.bf16 %v6947_v49  ;;  %v6948_v52 = vunpack.i.l.bf16 %v6947_v49  ;;  %v6942_v61 = vpop.permute.xlu0 %6941 }
 0x4fd   : > { %v6944_v13 = vunpack.i.h.bf16 %v6942_v61  ;;  %v6943_v7 = vunpack.i.l.bf16 %v6942_v61  ;;  %v4587_v43 = vrot.slane %v4585_v9, 2  ;;  %v4590_v12 = vrot.slane %v4588_v16, 3 }
 0x4ff   : > { %v4344_v42 = vsel %vm4327_vm2, %v4306_v41, %v6943_v7  ;;  %v4345_v46 = vsel %vm4327_vm2, %v4307_v34, %v6944_v13  ;;  %v4591_v55 = vor.u32 %v4590_v12, %v4587_v43  ;;  %v6954_v43 = vunpack.i.h.bf16 %v11530_v57  ;;  %v12582_v41 = vld [vmem:[#allocation16_spill] sm:$0xff] }
 0x500   : > { %v4382_v27 = vsel %vm4365_vm8, %v4344_v42, %v6948_v52  ;;  %v4383_v21 = vsel %vm4365_vm8, %v4345_v46, %v6949_v5  ;;  %v11587_v52 = vpop.permute.xlu2 %6996 }
 0x501   : > { %v4411_v8 = vpack.c.bf16 %v4383_v21, %v4382_v27  ;;  %v4592_v2 = vsel %vm4431_vm9, %v4582_v31, %v4591_v55  ;;  %v7171_v27 = vld [vmem:[%s7274_s22 + $0x100] sm:$0xff]  ;;  %v7172_v21 = vld [vmem:[%s7274_s22 + $0x108] sm:$0xff] }
 0x502   : > { %5521 = vmatmul.msk.bf16.gmra.mxu3 %vm4629_vm10, %v4592_v2 }
 0x503   : > { %v4504_v36 = vshrl.u32 %v4411_v8, 16  ;;  %v4507_v18 = vshll.u32 %v4411_v8, 16  ;;  %v4881_v8 = vpack.c.bf16 %v7172_v21, %v7171_v27 }
 0x504   : > { %v6962_v24 = vpop.permute.xlu1 %6961 }
 0x505   : > { %v6963_v20 = vunpack.i.l.bf16 %v6962_v24  ;;  %v6957_v19 = vpop.permute.xlu0 %6956  ;;  %v4506_v22 = vrot.slane %v4504_v36, 2  ;;  %v4509_v1 = vrot.slane %v4507_v18, 3  ;;  %v6964_v40 = vunpack.i.h.bf16 %v6962_v24  ;;  %v11605_v18 = vld [vmem:[%s11991_s9] ss:$0 sm:$0xff] }
 0x506   : > { %v6958_v62 = vunpack.i.l.bf16 %v6957_v19  ;;  %v6959_v31 = vunpack.i.h.bf16 %v6957_v19  ;;  %v11579_v33 = vpop.f32.mrf.mxu2 }
 0x507   : > { %v11576_v29 = vor.u32 %v4509_v1, %v4506_v22 }
 0x508   : > { %v4326_v48 = vsel %vm4289_vm1, %v4288_v35, %v6958_v62  ;;  %v4308_v49 = vsel %vm4289_vm1, %v12581_v26, %v6959_v31  ;;  %v5022_v31 = vshrl.u32 %v4881_v8, 16  ;;  %v12584_v26 = vld [vmem:[#allocation62_spill] sm:$0xff] }
 0x509   : > { %v4364_v50 = vsel %vm4327_vm2, %v4326_v48, %v6963_v20  ;;  %v4511_v44 = vsel %vm4431_vm9, %v4501_v0, %v11576_v29  ;;  %v6969_v0 = vunpack.i.h.bf16 %v11550_v30  ;;  %v4346_v12 = vsel %vm4327_vm2, %v4308_v49, %v6964_v40  ;;  %v12583_v20 = vld [vmem:[#allocation81_spill] sm:$0xff] }
 0x50a   : > { %v4402_v14 = vsel %vm4365_vm8, %v4364_v50, %v6968_v17  ;;  %v4272_v19 = vsel %vm4251_vm0, %v12583_v20, %v6954_v43  ;;  %v5217_v49 = vmul.f32 %v11605_v18, %v12584_v26 }
 0x50b   : > { %v4421_v37 = vpack.c.bf16 %v4402_v14, %v4402_v14  ;;  %v4384_v2 = vsel %vm4365_vm8, %v4346_v12, %v6969_v0 }
 0x50c   : > { %5512 = vmatmul.msk.bf16.gmra.mxu1 %vm4629_vm10, %v4511_v44  ;;  %v6977_v9 = vpop.permute.xlu1 %6976  ;;  %v11618_v44 = vld [vmem:[%s11988_s6] ss:$0 sm:$0xff] }
 0x50d   : > { %v6978_v16 = vunpack.i.l.bf16 %v6977_v9  ;;  %v6972_v5 = vpop.permute.xlu0 %6971  ;;  %v4594_v13 = vshrl.u32 %v4421_v37, 16  ;;  %v4597_v7 = vshll.u32 %v4421_v37, 16  ;;  %v6979_v1 = vunpack.i.h.bf16 %v6977_v9  ;;  %v11625_v9 = vld [vmem:[%s11992_s10] ss:$0 sm:$0xff] }
 0x50e   : > { %v6973_v61 = vunpack.i.l.bf16 %v6972_v5  ;;  %v6974_v63 = vunpack.i.h.bf16 %v6972_v5  ;;  %v11600_v36 = vpop.f32.mrf.mxu2  ;;  %v12585_v5 = vld [vmem:[#allocation87_spill] sm:$0xff]  ;;  %v5257_v27 = vadd.f32 %v11625_v9, %v5217_v49 }
 0x50f   : > { %v4596_v34 = vrot.slane %v4594_v13, 2  ;;  %v4599_v42 = vrot.slane %v4597_v7, 3  ;;  %v11632_v13 = vld [vmem:[%s11989_s7] ss:$0 sm:$0xff] }
 0x510   : > { %v4309_v23 = vsel %vm4289_vm1, %v12582_v41, %v6973_v61  ;;  %v4310_v48 = vsel %vm4289_vm1, %v4272_v19, %v6974_v63  ;;  %v5024_v41 = vrot.slane %v5022_v31, 1 }
 0x511   : > { %v4347_v46 = vsel %vm4327_vm2, %v4309_v23, %v6978_v16  ;;  %v4600_v30 = vor.u32 %v4599_v42, %v4596_v34  ;;  %v3671_v16 = vpop.permute.xlu2 %3670  ;;  %v4348_v0 = vsel %vm4327_vm2, %v4310_v48, %v6979_v1  ;;  %v6984_v34 = vunpack.i.h.bf16 %v11570_v11 }
 0x512   : > { %v4385_v57 = vsel %vm4365_vm8, %v4347_v46, %v6983_v56  ;;  %v6998_v42 = vunpack.i.l.bf16 %v11587_v52 }
 0x513   : > { %v4412_v24 = vpack.c.bf16 %v4385_v57, %v4384_v2  ;;  %v4601_v62 = vsel %vm4431_vm9, %v4591_v55, %v4600_v30  ;;  %v5025_v55 = vshll.u32 %v4881_v8, 16  ;;  %v4386_v57 = vsel %vm4365_vm8, %v4348_v0, %v6984_v34 }
 0x514   : > { %v11610_v22 = vpop.permute.xlu1 %6991  ;;  %5522 = vmatmul.msk.bf16.gmra.mxu3 %vm4629_vm10, %v4601_v62  ;;  %v12586_v62 = vld [vmem:[#allocation89_spill] sm:$0xff] }
 0x515   : > { %v6987_v32 = vpop.permute.xlu0 %6986  ;;  %v4513_v35 = vshrl.u32 %v4412_v24, 16  ;;  %v4516_v17 = vshll.u32 %v4412_v24, 16  ;;  %v6993_v50 = vunpack.i.l.bf16 %v11610_v22  ;;  %v5027_v23 = vrot.slane %v5025_v55, 2 }
 0x516   : > { %v6988_v14 = vunpack.i.l.bf16 %v6987_v32  ;;  %v6989_v21 = vunpack.i.h.bf16 %v6987_v32  ;;  %v11649_v30 = vpop.f32.mrf.mxu2  ;;  %v5218_v1 = vmul.f32 %v11605_v18, %v12586_v62  ;;  %v6994_v32 = vunpack.i.h.bf16 %v11610_v22 }
 0x517   : > { %v4515_v40 = vrot.slane %v4513_v35, 2  ;;  %v4518_v37 = vrot.slane %v4516_v17, 3  ;;  %v11653_v19 = vor.u32 %v5027_v23, %v5024_v41  ;;  %v12587_v17 = vld [vmem:[#allocation84_spill] sm:$0xff]  ;;  %v6999_v23 = vunpack.i.h.bf16 %v11587_v52 }
 0x518   : > { %v4273_v61 = vsel %vm4251_vm0, %v12585_v5, %v6988_v14  ;;  %v4274_v31 = vsel %vm4251_vm0, %v12587_v17, %v6989_v21  ;;  %v7174_v14 = vld [vmem:[%s7274_s22 + $0x118] sm:$0xff]  ;;  %v5258_v0 = vadd.f32 %v11625_v9, %v5218_v1 }
 0x519   : > { %v4696_v7 = vpop.f32.mrf.mxu1  ;;  %v4519_v43 = vor.u32 %v4518_v37, %v4515_v40  ;;  %v4311_v56 = vsel %vm4289_vm1, %v4273_v61, %v6993_v50  ;;  %v7173_v50 = vld [vmem:[%s7274_s22 + $0x110] sm:$0xff]  ;;  %v3558_v49 = vpop.permute.xlu2 %3557  ;;  %v5029_v5 = vsel %vm4886_vm15, %v11387_v45, %v11653_v19  ;;  %v12588_v61 = vld [vmem:[#allocation78_spill] sm:$0xff] }
 0x51a   : > { %v4790_v12 = vmul.f32 %v11618_v44, %v4696_v7  ;;  %v4349_v11 = vsel %vm4327_vm2, %v4311_v56, %v6998_v42  ;;  %v4882_v55 = vpack.c.bf16 %v7174_v14, %v7173_v50 }
 0x51b   : > { %v4520_v46 = vsel %vm4431_vm9, %v11576_v29, %v4519_v43 }
 0x51c   : > { %v4830_v8 = vadd.f32 %v11632_v13, %v4790_v12  ;;  %5513 = vmatmul.msk.bf16.gmra.mxu1 %vm4629_vm10, %v4520_v46  ;;  %v11645_v2 = vpop.permute.xlu1 %7001  ;;  %v4312_v12 = vsel %vm4289_vm1, %v4274_v31, %v6994_v32  ;;  %v5031_v46 = vshrl.u32 %v4882_v55, 16  ;;  %v12589_v32 = vld [vmem:[#allocation8_spill] sm:$0xff] }
 0x51d   : > { %v4035_v63 = vpop.permute.xlu0 %4034  ;;  %v7003_v29 = vunpack.i.l.bf16 %v11645_v2 }
 0x51e   : > { %v5293_v24 = vadd.f32 %v5257_v27, %v4830_v8  ;;  %v4387_v20 = vsel %vm4365_vm8, %v4349_v11, %v4035_v63  ;;  %v5034_v27 = vshll.u32 %v4882_v55, 16  ;;  %v11686_v1 = vpop.f32.mrf.mxu2 }
 0x51f   : > { %v4413_v35 = vpack.c.bf16 %v4387_v20, %v4386_v57  ;;  %v4275_v7 = vsel %vm4251_vm0, %v12588_v61, %v7003_v29 }
 0x520   : > { %v5329_v48 = vmax.f32 %v5293_v24, 0.0  ;;  %v4313_v63 = vsel %vm4289_vm1, %v4275_v7, %v3671_v16  ;;  %v4350_v24 = vsel %vm4327_vm2, %v4312_v12, %v6999_v23  ;;  %v5036_v50 = vrot.slane %v5034_v27, 2 }
 0x521   : > { %v4522_v40 = vshrl.u32 %v4413_v35, 16  ;;  %v4525_v37 = vshll.u32 %v4413_v35, 16  ;;  %v4698_v26 = vpop.f32.mrf.mxu1  ;;  %v5219_v35 = vmul.f32 %v11605_v18, %v12589_v32 }
 0x522   : > { %5365 = vst.msk [vmem:[%s11661_s23] sm:$0xff] %vm1859_vm7, %v5329_v48  ;;  %v4791_v22 = vmul.f32 %v11618_v44, %v4698_v26  ;;  %v5033_v48 = vrot.slane %v5031_v46, 1  ;;  %v7022_v26 = vpop.permute.xlu2 %7021 }
 0x523   : > { %v4524_v56 = vrot.slane %v4522_v40, 2  ;;  %v4527_v41 = vrot.slane %v4525_v37, 3  ;;  %v7004_v37 = vunpack.i.h.bf16 %v11645_v2 }
 0x524   : > { %v4831_v34 = vadd.f32 %v11632_v13, %v4791_v22  ;;  %v7007_v42 = vpop.permute.xlu1 %7006  ;;  %5537 = vmatmul.msk.bf16.vlgmr.msra.gmra.mxu3 %vm1822_vm6, %v5029_v5 }
 0x525   : > { %v7009_v21 = vunpack.i.h.bf16 %v7007_v42  ;;  %v7008_v45 = vunpack.i.l.bf16 %v7007_v42  ;;  %v3855_v8 = vpop.permute.xlu0 %3854  ;;  %v4528_v11 = vor.u32 %v4527_v41, %v4524_v56 }
 0x526   : > { %v5294_v57 = vadd.f32 %v5258_v0, %v4831_v34  ;;  %v4351_v29 = vsel %vm4327_vm2, %v4313_v63, %v3855_v8  ;;  %v12590_v0 = vld [vmem:[#allocation24_spill] sm:$0xff]  ;;  %v5037_v34 = vor.u32 %v5036_v50, %v5033_v48  ;;  %v7024_v8 = vunpack.i.h.bf16 %v7022_v26 }
 0x527   : > { %v4388_v52 = vsel %vm4365_vm8, %v4350_v24, %v7008_v45  ;;  %v4389_v20 = vsel %vm4365_vm8, %v4351_v29, %v7009_v21  ;;  %v4529_v62 = vsel %vm4431_vm9, %v4519_v43, %v4528_v11  ;;  %v5259_v43 = vadd.f32 %v11625_v9, %v5219_v35  ;;  %v12591_v21 = vld [vmem:[#allocation30_spill] sm:$0xff] }
 0x528   : > { %v5330_v17 = vmax.f32 %v5294_v57, 0.0  ;;  %v4414_v31 = vpack.c.bf16 %v4389_v20, %v4388_v52  ;;  %v5220_v12 = vmul.f32 %v11605_v18, %v12590_v0  ;;  %v4277_v45 = vsel %vm4251_vm0, %v12591_v21, %v3558_v49  ;;  %v12592_v57 = vld [vmem:[#allocation63_spill] sm:$0xff] }
 0x529   : > { %v4701_v16 = vpop.f32.mrf.mxu1  ;;  %v7023_v63 = vunpack.i.l.bf16 %v7022_v26  ;;  %v4276_v24 = vsel %vm4251_vm0, %v12592_v57, %v7004_v37  ;;  %v5038_v49 = vsel %vm4886_vm15, %v11653_v19, %v5037_v34 }
 0x52a   : > { %5366 = vst.msk [vmem:[%s11661_s23 + $0x8] sm:$0xff] %vm1859_vm7, %v5330_v17  ;;  %v4531_v14 = vshrl.u32 %v4414_v31, 16  ;;  %v4534_v55 = vshll.u32 %v4414_v31, 16  ;;  %v4792_v40 = vmul.f32 %v11618_v44, %v4701_v16  ;;  %v11710_v31 = vpop.f32.mrf.mxu2  ;;  %v5260_v37 = vadd.f32 %v11625_v9, %v5220_v12 }
 0x52c   : > { %v4533_v22 = vrot.slane %v4531_v14, 2  ;;  %v4536_v5 = vrot.slane %v4534_v55, 3  ;;  %v4832_v61 = vadd.f32 %v11632_v13, %v4792_v40  ;;  %5514 = vmatmul.msk.bf16.gmra.mxu1 %vm4629_vm10, %v4529_v62  ;;  %v7017_v7 = vpop.permute.xlu1 %7016  ;;  %v7175_v14 = vld [vmem:[%s7274_s22 + $0x120] sm:$0xff] }
 0x52d   : > { %v7019_v56 = vunpack.i.h.bf16 %v7017_v7  ;;  %v7018_v41 = vunpack.i.l.bf16 %v7017_v7  ;;  %v7012_v23 = vpop.permute.xlu0 %7011 }
 0x52e   : > { %v5295_v42 = vadd.f32 %v5259_v43, %v4832_v61  ;;  %v7014_v46 = vunpack.i.h.bf16 %v7012_v23  ;;  %v7013_v2 = vunpack.i.l.bf16 %v7012_v23  ;;  %v4537_v27 = vor.u32 %v4536_v5, %v4533_v22 }
 0x530   : > { %v5331_v29 = vmax.f32 %v5295_v42, 0.0  ;;  %v4314_v52 = vsel %vm4289_vm1, %v4276_v24, %v7013_v2  ;;  %v4315_v20 = vsel %vm4289_vm1, %v4277_v45, %v7014_v46  ;;  %v4538_v62 = vsel %vm4431_vm9, %v4528_v11, %v4537_v27  ;;  %v7176_v11 = vld [vmem:[%s7274_s22 + $0x128] sm:$0xff] }
 0x531   : > { %v4352_v32 = vsel %vm4327_vm2, %v4314_v52, %v7018_v41  ;;  %v4353_v35 = vsel %vm4327_vm2, %v4315_v20, %v7019_v56  ;;  %v4703_v17 = vpop.f32.mrf.mxu1  ;;  %v4883_v55 = vpack.c.bf16 %v7176_v11, %v7175_v14  ;;  %v12593_v56 = vld [vmem:[#allocation88_spill] sm:$0xff]  ;;  %v5222_v52 = vmul.f32 %v11605_v18, %v11236_v25 }
 0x532   : > { %5367 = vst.msk [vmem:[%s11661_s23 + $0x10] sm:$0xff] %vm1859_vm7, %v5331_v29  ;;  %v4390_v16 = vsel %vm4365_vm8, %v4352_v32, %v7023_v63  ;;  %v4391_v48 = vsel %vm4365_vm8, %v4353_v35, %v7024_v8  ;;  %v4793_v50 = vmul.f32 %v11618_v44, %v4703_v17  ;;  %v5221_v41 = vmul.f32 %v11605_v18, %v12593_v56  ;;  %v11729_v45 = vpop.f32.mrf.mxu2  ;;  %v7177_v17 = vld [vmem:[%s7274_s22 + $0x130] sm:$0xff] }
 0x533   : > { %v4415_v40 = vpack.c.bf16 %v4391_v48, %v4390_v16  ;;  %v5040_v5 = vshrl.u32 %v4883_v55, 16  ;;  %v5043_v61 = vshll.u32 %v4883_v55, 16  ;;  %v5262_v16 = vadd.f32 %v11625_v9, %v5222_v52 }
 0x534   : > { %v4833_v43 = vadd.f32 %v11632_v13, %v4793_v50  ;;  %5538 = vmatmul.msk.bf16.gmra.mxu3 %vm1822_vm6, %v5038_v49  ;;  %v5261_v63 = vadd.f32 %v11625_v9, %v5221_v41  ;;  %v4884_v49 = vpack.c.bf16 %v7177_v17, %v7177_v17  ;;  %v5223_v11 = vmul.f32 %v11605_v18, %v11284_v39 }
 0x535   : > { %v4540_v19 = vshrl.u32 %v4415_v40, 16  ;;  %v4543_v26 = vshll.u32 %v4415_v40, 16  ;;  %v5042_v2 = vrot.slane %v5040_v5, 1  ;;  %v5045_v21 = vrot.slane %v5043_v61, 2 }
 0x536   : > { %v5296_v22 = vadd.f32 %v5260_v37, %v4833_v43  ;;  %v5049_v25 = vshrl.u32 %v4884_v49, 16  ;;  %v5052_v14 = vshll.u32 %v4884_v49, 16  ;;  %v5224_v41 = vmul.f32 %v11605_v18, %v11317_v4 }
 0x537   : > { %v4542_v7 = vrot.slane %v4540_v19, 2  ;;  %v4545_v0 = vrot.slane %v4543_v26, 3  ;;  %v5046_v29 = vor.u32 %v5045_v21, %v5042_v2  ;;  %v5263_v26 = vadd.f32 %v11625_v9, %v5223_v11 }
 0x538   : > { %v5332_v23 = vmax.f32 %v5296_v22, 0.0  ;;  %v5051_v43 = vrot.slane %v5049_v25, 1  ;;  %v5054_v19 = vrot.slane %v5052_v14, 2  ;;  %v5226_v11 = vmul.f32 %v11605_v18, %v11377_v51 }
 0x539   : > { %v4706_v42 = vpop.f32.mrf.mxu1  ;;  %v11724_v46 = vor.u32 %v4545_v0, %v4542_v7 }
 0x53a   : > { %5368 = vst.msk [vmem:[%s11661_s23 + $0x18] sm:$0xff] %vm1859_vm7, %v5332_v23  ;;  %v4794_v12 = vmul.f32 %v11618_v44, %v4706_v42  ;;  %v5188_v48 = vpop.f32.mrf.mxu2  ;;  %v5055_v0 = vor.u32 %v5054_v19, %v5051_v43  ;;  %v5227_v19 = vmul.f32 %v11605_v18, %v11394_v38 }
 0x53b   : > { %v4547_v8 = vsel %vm4431_vm9, %v4537_v27, %v11724_v46  ;;  %v5047_v27 = vsel %vm4886_vm15, %v5037_v34, %v5046_v29  ;;  %v5243_v37 = vmul.f32 %v11605_v18, %v5188_v48  ;;  %v4556_v48 = vsel %vm4431_vm9, %v11724_v46, %v11447_v28 }
 0x53c   : > { %v4834_v57 = vadd.f32 %v11632_v13, %v4794_v12  ;;  %5515 = vmatmul.msk.bf16.gmra.mxu1 %vm4629_vm10, %v4538_v62  ;;  %v5266_v46 = vadd.f32 %v11625_v9, %v5226_v11  ;;  %v5232_v11 = vmul.f32 %v11605_v18, %v11497_v58 }
 0x53d   : > { %v5283_v7 = vadd.f32 %v11625_v9, %v5243_v37 }
 0x53e   : > { %v5297_v24 = vadd.f32 %v5261_v63, %v4834_v57  ;;  %v5264_v57 = vadd.f32 %v11625_v9, %v5224_v41 }
 0x540   : > { %v5333_v20 = vmax.f32 %v5297_v24, 0.0 }
 0x541   : > { %v4708_v32 = vpop.f32.mrf.mxu1 }
 0x542   : > { %5369 = vst.msk [vmem:[%s11661_s23 + $0x20] sm:$0xff] %vm1859_vm7, %v5333_v20  ;;  %v4795_v35 = vmul.f32 %v11618_v44, %v4708_v32  ;;  %v5190_v56 = vpop.f32.mrf.mxu2 }
 0x543   : > { %v5244_v63 = vmul.f32 %v11605_v18, %v5190_v56 }
 0x544   : > { %v4835_v62 = vadd.f32 %v11632_v13, %v4795_v35  ;;  %5539 = vmatmul.msk.bf16.gmra.mxu3 %vm1822_vm6, %v5047_v27 }
 0x545   : > { %v5284_v35 = vadd.f32 %v11625_v9, %v5244_v63 }
 0x546   : > { %v5298_v50 = vadd.f32 %v5262_v16, %v4835_v62 }
 0x548   : > { %v5334_v55 = vmax.f32 %v5298_v50, 0.0 }
 0x549   : > { %v4711_v40 = vpop.f32.mrf.mxu1 }
 0x54a   : > { %5370 = vst.msk [vmem:[%s11661_s23 + $0x28] sm:$0xff] %vm1859_vm7, %v5334_v55  ;;  %v4796_v34 = vmul.f32 %v11618_v44, %v4711_v40 }
 0x54c   : > { %v4836_v22 = vadd.f32 %v11632_v13, %v4796_v34  ;;  %5516 = vmatmul.msk.bf16.gmra.mxu1 %vm4629_vm10, %v4547_v8  ;;  %v4761_v5 = vpop.f32.mrf.mxu3  ;;  %v5056_v8 = vsel %vm4886_vm15, %v5046_v29, %v5055_v0  ;;  %v5225_v29 = vmul.f32 %v11605_v18, %v11348_v10  ;;  %v5228_v0 = vmul.f32 %v11605_v18, %v11427_v60 }
 0x54d   : > { %v4816_v39 = vmul.f32 %v11618_v44, %v4761_v5  ;;  %v5267_v5 = vadd.f32 %v11625_v9, %v5227_v19 }
 0x54e   : > { %v5299_v61 = vadd.f32 %v5263_v26, %v4836_v22  ;;  %v5265_v50 = vadd.f32 %v11625_v9, %v5225_v29 }
 0x54f   : > { %v4856_v42 = vadd.f32 %v11632_v13, %v4816_v39 }
 0x550   : > { %v5335_v23 = vmax.f32 %v5299_v61, 0.0 }
 0x551   : > { %v4713_v12 = vpop.f32.mrf.mxu1  ;;  %v5319_v2 = vadd.f32 %v5283_v7, %v4856_v42 }
 0x552   : > { %5371 = vst.msk [vmem:[%s11661_s23 + $0x30] sm:$0xff] %vm1859_vm7, %v5335_v23  ;;  %v4797_v21 = vmul.f32 %v11618_v44, %v4713_v12  ;;  %v5268_v23 = vadd.f32 %v11625_v9, %v5228_v0 }
 0x553   : > { %v5355_v24 = vmax.f32 %v5319_v2, 0.0 }
 0x554   : > { %v4837_v52 = vadd.f32 %v11632_v13, %v4797_v21  ;;  %5540 = vmatmul.msk.bf16.gmra.mxu3 %vm1822_vm6, %v5056_v8  ;;  %v4763_v4 = vpop.f32.mrf.mxu3  ;;  %v5229_v21 = vmul.f32 %v11605_v18, %v11441_v53 }
 0x555   : > { %5391 = vst.msk [vmem:[%s11661_s23 + $0xd0] sm:$0xff] %vm1859_vm7, %v5355_v24  ;;  %v4817_v32 = vmul.f32 %v11618_v44, %v4763_v4 }
 0x556   : > { %v5300_v20 = vadd.f32 %v5264_v57, %v4837_v52  ;;  %v5269_v57 = vadd.f32 %v11625_v9, %v5229_v21  ;;  %v5235_v21 = vmul.f32 %v11605_v18, %v11542_v6 }
 0x557   : > { %v4857_v17 = vadd.f32 %v11632_v13, %v4817_v32 }
 0x558   : > { %v5336_v27 = vmax.f32 %v5300_v20, 0.0  ;;  %v5230_v20 = vmul.f32 %v11605_v18, %v11462_v47 }
 0x559   : > { %v4716_v49 = vpop.f32.mrf.mxu1  ;;  %v5320_v16 = vadd.f32 %v5284_v35, %v4857_v17 }
 0x55a   : > { %5372 = vst.msk [vmem:[%s11661_s23 + $0x38] sm:$0xff] %vm1859_vm7, %v5336_v27  ;;  %v4798_v62 = vmul.f32 %v11618_v44, %v4716_v49  ;;  %v5270_v29 = vadd.f32 %v11625_v9, %v5230_v20 }
 0x55b   : > { %v5356_v25 = vmax.f32 %v5320_v16, 0.0  ;;  %v5231_v16 = vmul.f32 %v11605_v18, %v11480_v15 }
 0x55c   : > { %v4838_v14 = vadd.f32 %v11632_v13, %v4798_v62  ;;  %5517 = vmatmul.msk.bf16.gmra.mxu1 %vm4629_vm10, %v4556_v48 }
 0x55d   : > { %5392 = vst.msk [vmem:[%s11661_s23 + $0xd8] sm:$0xff] %vm1859_vm7, %v5356_v25 }
 0x55e   : > { %v5301_v10 = vadd.f32 %v5265_v50, %v4838_v14  ;;  %v11792_v34 = vpop.f32.mrf.mxu3  ;;  %v5271_v50 = vadd.f32 %v11625_v9, %v5231_v16 }
 0x560   : > { %v5337_v55 = vmax.f32 %v5301_v10, 0.0 }
 0x561   : > { %v4718_v40 = vpop.f32.mrf.mxu1 }
 0x562   : > { %5373 = vst.msk [vmem:[%s11661_s23 + $0x40] sm:$0xff] %vm1859_vm7, %v5337_v55  ;;  %v4799_v28 = vmul.f32 %v11618_v44, %v4718_v40 }
 0x564   : > { %v4839_v37 = vadd.f32 %v11632_v13, %v4799_v28  ;;  %v5272_v28 = vadd.f32 %v11625_v9, %v5232_v11 }
 0x566   : > { %v5302_v43 = vadd.f32 %v5266_v46, %v4839_v37  ;;  %v11802_v39 = vpop.f32.mrf.mxu3 }
 0x568   : > { %v5338_v26 = vmax.f32 %v5302_v43, 0.0  ;;  %v5233_v43 = vmul.f32 %v11605_v18, %v11511_v3 }
 0x569   : > { %v4721_v22 = vpop.f32.mrf.mxu1 }
 0x56a   : > { %5374 = vst.msk [vmem:[%s11661_s23 + $0x48] sm:$0xff] %vm1859_vm7, %v5338_v26  ;;  %v4800_v51 = vmul.f32 %v11618_v44, %v4721_v22 }
 0x56c   : > { %v4840_v61 = vadd.f32 %v11632_v13, %v4800_v51  ;;  %v5273_v51 = vadd.f32 %v11625_v9, %v5233_v43 }
 0x56e   : > { %v5303_v7 = vadd.f32 %v5267_v5, %v4840_v61 }
 0x570   : > { %v5339_v56 = vmax.f32 %v5303_v7, 0.0  ;;  %v5234_v7 = vmul.f32 %v11605_v18, %v11526_v54 }
 0x571   : > { %v4723_v41 = vpop.f32.mrf.mxu1 }
 0x572   : > { %5375 = vst.msk [vmem:[%s11661_s23 + $0x50] sm:$0xff] %vm1859_vm7, %v5339_v56  ;;  %v4801_v38 = vmul.f32 %v11618_v44, %v4723_v41 }
 0x574   : > { %v4841_v42 = vadd.f32 %v11632_v13, %v4801_v38  ;;  %v11811_v2 = vpop.f32.mrf.mxu3  ;;  %v5274_v38 = vadd.f32 %v11625_v9, %v5234_v7  ;;  %v5238_v7 = vmul.f32 %v11605_v18, %v11600_v36 }
 0x575   : > { %v4820_v11 = vmul.f32 %v11618_v44, %v11811_v2 }
 0x576   : > { %v5304_v12 = vadd.f32 %v5268_v23, %v4841_v42 }
 0x578   : > { %v5340_v8 = vmax.f32 %v5304_v12, 0.0  ;;  %v4818_v12 = vmul.f32 %v11618_v44, %v11792_v34  ;;  %v5275_v34 = vadd.f32 %v11625_v9, %v5235_v21 }
 0x579   : > { %v4726_v63 = vpop.f32.mrf.mxu1 }
 0x57a   : > { %5376 = vst.msk [vmem:[%s11661_s23 + $0x58] sm:$0xff] %vm1859_vm7, %v5340_v8  ;;  %v4802_v60 = vmul.f32 %v11618_v44, %v4726_v63 }
 0x57c   : > { %v4842_v24 = vadd.f32 %v11632_v13, %v4802_v60  ;;  %v11820_v4 = vpop.f32.mrf.mxu3 }
 0x57e   : > { %v5305_v52 = vadd.f32 %v5269_v57, %v4842_v24  ;;  %v4858_v24 = vadd.f32 %v11632_v13, %v4818_v12  ;;  %v5278_v12 = vadd.f32 %v11625_v9, %v5238_v7 }
 0x580   : > { %v5341_v32 = vmax.f32 %v5305_v52, 0.0 }
 0x581   : > { %v4728_v35 = vpop.f32.mrf.mxu1 }
 0x582   : > { %5377 = vst.msk [vmem:[%s11661_s23 + $0x60] sm:$0xff] %vm1859_vm7, %v5341_v32  ;;  %v4803_v53 = vmul.f32 %v11618_v44, %v4728_v35  ;;  %v4819_v35 = vmul.f32 %v11618_v44, %v11802_v39 }
 0x584   : > { %v4843_v27 = vadd.f32 %v11632_v13, %v4803_v53 }
 0x585   : > { %v11829_v49 = vpop.f32.mrf.mxu3 }
 0x586   : > { %v5306_v17 = vadd.f32 %v5270_v29, %v4843_v27  ;;  %v5236_v29 = vmul.f32 %v11605_v18, %v11561_v59 }
 0x588   : > { %v5342_v62 = vmax.f32 %v5306_v17, 0.0 }
 0x589   : > { %v4731_v48 = vpop.f32.mrf.mxu1 }
 0x58a   : > { %5378 = vst.msk [vmem:[%s11661_s23 + $0x68] sm:$0xff] %vm1859_vm7, %v5342_v62  ;;  %v4804_v47 = vmul.f32 %v11618_v44, %v4731_v48 }
 0x58c   : > { %v4844_v25 = vadd.f32 %v11632_v13, %v4804_v47  ;;  %v4859_v47 = vadd.f32 %v11632_v13, %v4819_v35 }
 0x58d   : > { %v11838_v10 = vpop.f32.mrf.mxu3 }
 0x58e   : > { %v5307_v14 = vadd.f32 %v5271_v50, %v4844_v25  ;;  %v5276_v50 = vadd.f32 %v11625_v9, %v5236_v29  ;;  %v4823_v29 = vmul.f32 %v11618_v44, %v11838_v10 }
 0x590   : > { %v5343_v55 = vmax.f32 %v5307_v14, 0.0 }
 0x591   : > { %v4733_v40 = vpop.f32.mrf.mxu1 }
 0x592   : > { %5379 = vst.msk [vmem:[%s11661_s23 + $0x70] sm:$0xff] %vm1859_vm7, %v5343_v55  ;;  %v4805_v15 = vmul.f32 %v11618_v44, %v4733_v40  ;;  %v5237_v40 = vmul.f32 %v11605_v18, %v11579_v33 }
 0x594   : > { %v4845_v46 = vadd.f32 %v11632_v13, %v4805_v15 }
 0x596   : > { %v5308_v37 = vadd.f32 %v5272_v28, %v4845_v46 }
 0x597   : > { %v11849_v26 = vpop.f32.mrf.mxu3 }
 0x598   : > { %v5344_v19 = vmax.f32 %v5308_v37, 0.0 }
 0x599   : > { %v4736_v22 = vpop.f32.mrf.mxu1 }
 0x59a   : > { %5380 = vst.msk [vmem:[%s11661_s23 + $0x78] sm:$0xff] %vm1859_vm7, %v5344_v19  ;;  %v4806_v58 = vmul.f32 %v11618_v44, %v4736_v22  ;;  %v4860_v19 = vadd.f32 %v11632_v13, %v4820_v11  ;;  %v5277_v22 = vadd.f32 %v11625_v9, %v5237_v40  ;;  %v4824_v11 = vmul.f32 %v11618_v44, %v11849_v26 }
 0x59b   : > { %v5241_v40 = vmul.f32 %v11605_v18, %v11710_v31 }
 0x59c   : > { %v4846_v5 = vadd.f32 %v11632_v13, %v4806_v58 }
 0x59e   : > { %v5309_v61 = vadd.f32 %v5273_v51, %v4846_v5  ;;  %v4821_v5 = vmul.f32 %v11618_v44, %v11820_v4 }
 0x59f   : > { %v11858_v56 = vpop.f32.mrf.mxu3 }
 0x5a0   : > { %v5345_v0 = vmax.f32 %v5309_v61, 0.0 }
 0x5a1   : > { %v4738_v3 = vpop.f32.mrf.mxu1 }
 0x5a2   : > { %5381 = vst.msk [vmem:[%s11661_s23 + $0x80] sm:$0xff] %vm1859_vm7, %v5345_v0  ;;  %v4807_v41 = vmul.f32 %v11618_v44, %v4738_v3 }
 0x5a4   : > { %v4847_v23 = vadd.f32 %v11632_v13, %v4807_v41 }
 0x5a6   : > { %v5310_v42 = vadd.f32 %v5274_v38, %v4847_v23 }
 0x5a7   : > { %v5193_v8 = vpop.f32.mrf.mxu3 }
 0x5a8   : > { %v5346_v54 = vmax.f32 %v5310_v42, 0.0  ;;  %v5245_v63 = vmul.f32 %v11605_v18, %v5193_v8  ;;  %v4861_v42 = vadd.f32 %v11632_v13, %v4821_v5  ;;  %v4822_v8 = vmul.f32 %v11618_v44, %v11829_v49 }
 0x5a9   : > { %v4741_v60 = vpop.f32.mrf.mxu1  ;;  %v5242_v5 = vmul.f32 %v11605_v18, %v11729_v45 }
 0x5aa   : > { %5382 = vst.msk [vmem:[%s11661_s23 + $0x88] sm:$0xff] %vm1859_vm7, %v5346_v54  ;;  %v4808_v57 = vmul.f32 %v11618_v44, %v4741_v60  ;;  %v5285_v52 = vadd.f32 %v11625_v9, %v5245_v63  ;;  %v5239_v60 = vmul.f32 %v11605_v18, %v11649_v30 }
 0x5ac   : > { %v4848_v20 = vadd.f32 %v11632_v13, %v4808_v57  ;;  %v5321_v6 = vadd.f32 %v5285_v52, %v4858_v24 }
 0x5ae   : > { %v5311_v32 = vadd.f32 %v5275_v34, %v4848_v20  ;;  %v5357_v53 = vmax.f32 %v5321_v6, 0.0  ;;  %v4862_v6 = vadd.f32 %v11632_v13, %v4822_v8 }
 0x5af   : > { %v5195_v17 = vpop.f32.mrf.mxu3 }
 0x5b0   : > { %v5347_v27 = vmax.f32 %v5311_v32, 0.0  ;;  %5393 = vst.msk [vmem:[%s11661_s23 + $0xe0] sm:$0xff] %vm1859_vm7, %v5357_v53  ;;  %v5246_v16 = vmul.f32 %v11605_v18, %v5195_v17  ;;  %v5279_v32 = vadd.f32 %v11625_v9, %v5239_v60  ;;  %v5240_v17 = vmul.f32 %v11605_v18, %v11686_v1 }
 0x5b1   : > { %v4743_v62 = vpop.f32.mrf.mxu1 }
 0x5b2   : > { %5383 = vst.msk [vmem:[%s11661_s23 + $0x90] sm:$0xff] %vm1859_vm7, %v5347_v27  ;;  %v4809_v48 = vmul.f32 %v11618_v44, %v4743_v62  ;;  %v5286_v39 = vadd.f32 %v11625_v9, %v5246_v16 }
 0x5b4   : > { %v4849_v59 = vadd.f32 %v11632_v13, %v4809_v48  ;;  %v5322_v25 = vadd.f32 %v5286_v39, %v4859_v47 }
 0x5b6   : > { %v5312_v14 = vadd.f32 %v5276_v50, %v4849_v59  ;;  %v5358_v55 = vmax.f32 %v5322_v25, 0.0  ;;  %v4863_v50 = vadd.f32 %v11632_v13, %v4823_v29  ;;  %v5280_v59 = vadd.f32 %v11625_v9, %v5240_v17 }
 0x5b7   : > { %v5198_v28 = vpop.f32.mrf.mxu3 }
 0x5b8   : > { %v5348_v15 = vmax.f32 %v5312_v14, 0.0  ;;  %5394 = vst.msk [vmem:[%s11661_s23 + $0xe8] sm:$0xff] %vm1859_vm7, %v5358_v55  ;;  %v5247_v46 = vmul.f32 %v11605_v18, %v5198_v28 }
 0x5b9   : > { %v4746_v37 = vpop.f32.mrf.mxu1 }
 0x5ba   : > { %5384 = vst.msk [vmem:[%s11661_s23 + $0x98] sm:$0xff] %vm1859_vm7, %v5348_v15  ;;  %v4810_v43 = vmul.f32 %v11618_v44, %v4746_v37  ;;  %v5287_v2 = vadd.f32 %v11625_v9, %v5247_v46 }
 0x5bc   : > { %v4850_v33 = vadd.f32 %v11632_v13, %v4810_v43  ;;  %v5323_v58 = vadd.f32 %v5287_v2, %v4860_v19  ;;  %v4864_v19 = vadd.f32 %v11632_v13, %v4824_v11  ;;  %v5281_v2 = vadd.f32 %v11625_v9, %v5241_v40 }
 0x5be   : > { %v5313_v51 = vadd.f32 %v5277_v22, %v4850_v33  ;;  %v5359_v61 = vmax.f32 %v5323_v58, 0.0  ;;  %v4825_v58 = vmul.f32 %v11618_v44, %v11858_v56 }
 0x5bf   : > { %v5200_v3 = vpop.f32.mrf.mxu3 }
 0x5c0   : > { %v5349_v0 = vmax.f32 %v5313_v51, 0.0  ;;  %5395 = vst.msk [vmem:[%s11661_s23 + $0xf0] sm:$0xff] %vm1859_vm7, %v5359_v61  ;;  %v5248_v41 = vmul.f32 %v11605_v18, %v5200_v3 }
 0x5c1   : > { %v4748_v38 = vpop.f32.mrf.mxu1 }
 0x5c2   : > { %5385 = vst.msk [vmem:[%s11661_s23 + $0xa0] sm:$0xff] %vm1859_vm7, %v5349_v0  ;;  %v4811_v23 = vmul.f32 %v11618_v44, %v4748_v38  ;;  %v5288_v4 = vadd.f32 %v11625_v9, %v5248_v41  ;;  %v4865_v38 = vadd.f32 %v11632_v13, %v4825_v58 }
 0x5c4   : > { %v4851_v36 = vadd.f32 %v11632_v13, %v4811_v23  ;;  %v5324_v21 = vadd.f32 %v5288_v4, %v4861_v42  ;;  %v5282_v23 = vadd.f32 %v11625_v9, %v5242_v5 }
 0x5c6   : > { %v5314_v54 = vadd.f32 %v5278_v12, %v4851_v36  ;;  %v5360_v63 = vmax.f32 %v5324_v21, 0.0 }
 0x5c7   : > { %v5203_v24 = vpop.f32.mrf.mxu3 }
 0x5c8   : > { %v5350_v57 = vmax.f32 %v5314_v54, 0.0  ;;  %5396 = vst.msk [vmem:[%s11661_s23 + $0xf8] sm:$0xff] %vm1859_vm7, %v5360_v63  ;;  %v5249_v52 = vmul.f32 %v11605_v18, %v5203_v24 }
 0x5c9   : > { %v4751_v34 = vpop.f32.mrf.mxu1 }
 0x5ca   : > { %5386 = vst.msk [vmem:[%s11661_s23 + $0xa8] sm:$0xff] %vm1859_vm7, %v5350_v57  ;;  %v4812_v20 = vmul.f32 %v11618_v44, %v4751_v34  ;;  %v5289_v49 = vadd.f32 %v11625_v9, %v5249_v52 }
 0x5cc   : > { %v4852_v30 = vadd.f32 %v11632_v13, %v4812_v20  ;;  %v5325_v35 = vadd.f32 %v5289_v49, %v4862_v6 }
 0x5ce   : > { %v5315_v53 = vadd.f32 %v5279_v32, %v4852_v30  ;;  %v5361_v27 = vmax.f32 %v5325_v35, 0.0 }
 0x5cf   : > { %v5205_v62 = vpop.f32.mrf.mxu3 }
 0x5d0   : > { %v5351_v16 = vmax.f32 %v5315_v53, 0.0  ;;  %5397 = vst.msk [vmem:[%s11661_s23 + $0x100] sm:$0xff] %vm1859_vm7, %v5361_v27  ;;  %v5250_v48 = vmul.f32 %v11605_v18, %v5205_v62 }
 0x5d1   : > { %v4753_v47 = vpop.f32.mrf.mxu1 }
 0x5d2   : > { %5387 = vst.msk [vmem:[%s11661_s23 + $0xb0] sm:$0xff] %vm1859_vm7, %v5351_v16  ;;  %v4813_v39 = vmul.f32 %v11618_v44, %v4753_v47  ;;  %v5290_v10 = vadd.f32 %v11625_v9, %v5250_v48 }
 0x5d4   : > { %v4853_v1 = vadd.f32 %v11632_v13, %v4813_v39  ;;  %v5326_v25 = vadd.f32 %v5290_v10, %v4863_v50 }
 0x5d6   : > { %v5316_v14 = vadd.f32 %v5280_v59, %v4853_v1  ;;  %v5362_v55 = vmax.f32 %v5326_v25, 0.0 }
 0x5d7   : > { %v5208_v28 = vpop.f32.mrf.mxu3 }
 0x5d8   : > { %v5352_v15 = vmax.f32 %v5316_v14, 0.0  ;;  %5398 = vst.msk [vmem:[%s11661_s23 + $0x108] sm:$0xff] %vm1859_vm7, %v5362_v55  ;;  %v5251_v46 = vmul.f32 %v11605_v18, %v5208_v28 }
 0x5d9   : > { %v4756_v37 = vpop.f32.mrf.mxu1 }
 0x5da   : > { %5388 = vst.msk [vmem:[%s11661_s23 + $0xb8] sm:$0xff] %vm1859_vm7, %v5352_v15  ;;  %v4814_v43 = vmul.f32 %v11618_v44, %v4756_v37  ;;  %v5291_v26 = vadd.f32 %v11625_v9, %v5251_v46 }
 0x5dc   : > { %v4854_v31 = vadd.f32 %v11632_v13, %v4814_v43  ;;  %v5327_v22 = vadd.f32 %v5291_v26, %v4864_v19 }
 0x5de   : > { %v5317_v33 = vadd.f32 %v5281_v2, %v4854_v31  ;;  %v5363_v51 = vmax.f32 %v5327_v22, 0.0 }
 0x5df   : > { %v5210_v7 = vpop.f32.mrf.mxu3 }
 0x5e0   : > { %v5353_v61 = vmax.f32 %v5317_v33, 0.0  ;;  %5399 = vst.msk [vmem:[%s11661_s23 + $0x110] sm:$0xff] %vm1859_vm7, %v5363_v51  ;;  %v5252_v0 = vmul.f32 %v11605_v18, %v5210_v7 }
 0x5e1   : > { %v4758_v3 = vpop.f32.mrf.mxu1 }
 0x5e2   : > { %5389 = vst.msk [vmem:[%s11661_s23 + $0xc0] sm:$0xff] %vm1859_vm7, %v5353_v61  ;;  %v4815_v41 = vmul.f32 %v11618_v44, %v4758_v3  ;;  %v5292_v56 = vadd.f32 %v11625_v9, %v5252_v0 }
 0x5e4   : > { %v4855_v45 = vadd.f32 %v11632_v13, %v4815_v41  ;;  %v5328_v42 = vadd.f32 %v5292_v56, %v4865_v38 }
 0x5e6   : > { %v5318_v4 = vadd.f32 %v5282_v23, %v4855_v45  ;;  %v5364_v12 = vmax.f32 %v5328_v42, 0.0 }
 0x5e8   : > { %v5354_v36 = vmax.f32 %v5318_v4, 0.0  ;;  %5400 = vst.msk [vmem:[%s11661_s23 + $0x118] sm:$0xff] %vm1859_vm7, %v5364_v12 }
 0x5ea   : > { %5390 = vst.msk [vmem:[%s11661_s23 + $0xc8] sm:$0xff] %vm1859_vm7, %v5354_v36 }
 0x5eb PF: > { %s21_s17 = sadd.s32 1, %s7184_s17  }
 0x5ec   : > { %p18_p4 = scmp.ge.s32.totalorder %s21_s17, 4  }
 0x5ee   :  { %20 = sbr.rel (!%p18_p4) target bundleno = 1 (0x1), region = 94 }

</bundles_post_ra>
